<compile_context>
chip_gen: v7x
topology: tpu7x:2x2x1
jax: 0.10.0
libtpu: 0.0.40
codegen_flags: <defaults>
</compile_context>

<pallas_src>
import jax
import jax.numpy as jnp
from jax.experimental import pallas as pl
from jax.experimental.pallas import tpu as pltpu

D_IN = 1024
D_HID = 2048
LN_EPS = 1e-5  # torch.nn.LayerNorm default


def _round_up(x, m):
    return ((x + m - 1) // m) * m


def critic_kernel(x_ref, g_ref, b_ref,
                  w1_ref, b1_ref, w2_ref, b2_ref, w3_ref, b3_ref,
                  out_ref,
                  xn_ref, acc_ref):
    k = pl.program_id(1)

    # --- LayerNorm(1024), once per batch tile (hoisted out of the k loop) ---
    @pl.when(k == 0)
    def _():
        x = x_ref[...]                                     # (TB, 1024) f32
        mean = jnp.mean(x, axis=-1, keepdims=True)
        var = jnp.mean((x - mean) * (x - mean), axis=-1, keepdims=True)
        xn = (x - mean) * jax.lax.rsqrt(var + LN_EPS)
        xn = xn * g_ref[...] + b_ref[...]                  # gamma/beta (1, 1024)
        xn_ref[...] = xn.astype(jnp.bfloat16)
        acc_ref[...] = jnp.zeros_like(acc_ref)

    # --- streamed hidden chunk: relu(xn @ w1[:, k]) @ w2[k, :] ---
    h1 = jnp.dot(xn_ref[...], w1_ref[...],
                 preferred_element_type=jnp.float32) + b1_ref[...]   # (TB, TN)
    h1 = jnp.maximum(h1, 0.0)
    acc_ref[...] += jnp.dot(h1.astype(jnp.bfloat16), w2_ref[...],
                            preferred_element_type=jnp.float32)      # (TB, 1024)

    # --- finalize: bias + ReLU, then 1024->1 as a VPU mul + lane reduction ---
    @pl.when(k == pl.num_programs(1) - 1)
    def _():
        h2 = jnp.maximum(acc_ref[...] + b2_ref[...], 0.0)            # (TB, 1024)
        v = jnp.sum(h2 * w3_ref[...], axis=-1, keepdims=True) + b3_ref[...]
        out_ref[...] = v.astype(out_ref.dtype)                       # (TB, 1)


def critic_forward(x, params, *, tb=128, tn=512):
    """x: (B, 1024) f32 -> (B, 1) f32."""
    B = x.shape[0]
    tb = min(tb, _round_up(B, 8))          # batch tile (multiple of 8 sublanes)
    Bp = _round_up(B, tb)
    if Bp != B:
        x = jnp.pad(x, ((0, Bp - B), (0, 0)))

    assert D_HID % tn == 0
    grid = (Bp // tb, D_HID // tn)         # (batch tiles, hidden chunks)

    # bf16 MXU inputs for the two large weights; everything else stays f32.
    w1 = params["w1"].astype(jnp.bfloat16)           # (1024, 2048)
    w2 = params["w2"].astype(jnp.bfloat16)           # (2048, 1024)
    w3_row = params["w3"].reshape(1, D_IN)           # (1, 1024) f32

    out = pl.pallas_call(
        critic_kernel,
        out_shape=jax.ShapeDtypeStruct((Bp, 1), jnp.float32),
        grid_spec=pltpu.PrefetchScalarGridSpec(
            num_scalar_prefetch=0,
            grid=grid,
            in_specs=[
                pl.BlockSpec((tb, D_IN), lambda i, k: (i, 0)),     # x
                pl.BlockSpec((1, D_IN), lambda i, k: (0, 0)),      # ln gamma
                pl.BlockSpec((1, D_IN), lambda i, k: (0, 0)),      # ln beta
                pl.BlockSpec((D_IN, tn), lambda i, k: (0, k)),     # w1 chunk
                pl.BlockSpec((1, tn), lambda i, k: (0, k)),        # b1 chunk
                pl.BlockSpec((tn, D_IN), lambda i, k: (k, 0)),     # w2 chunk
                pl.BlockSpec((1, D_IN), lambda i, k: (0, 0)),      # b2
                pl.BlockSpec((1, D_IN), lambda i, k: (0, 0)),      # w3 row
                pl.BlockSpec((1, 1), lambda i, k: (0, 0)),         # b3
            ],
            out_specs=pl.BlockSpec((tb, 1), lambda i, k: (i, 0)),
            scratch_shapes=[
                pltpu.VMEM((tb, D_IN), jnp.bfloat16),   # xn (post-LayerNorm)
                pltpu.VMEM((tb, D_IN), jnp.float32),    # f32 accumulator
            ],
        ),
        compiler_params=pltpu.CompilerParams(
            dimension_semantics=("parallel", "arbitrary")),
    )(
        x,
        params["ln_g"], params["ln_b"],
        w1, params["b1"],
        w2, params["b2"],
        w3_row, params["b3"],
    )
    return out[:B]


def init_params(key):
    """Deterministic synthetic parameters matching the torch module's shapes.
    Linear biases are zero and LayerNorm is (weight=1, bias=0), exactly as the
    module's _init_weights does; Linear weights use a small scaled normal."""
    k1, k2, k3 = jax.random.split(key, 3)

    def lin_w(k, fan_in, fan_out):
        return (jax.random.normal(k, (fan_in, fan_out), jnp.float32)
                * (1.0 / jnp.sqrt(fan_in)))

    return {
        "ln_g": jnp.ones((1, D_IN), jnp.float32),
        "ln_b": jnp.zeros((1, D_IN), jnp.float32),
        "w1": lin_w(k1, D_IN, D_HID),
        "b1": jnp.zeros((1, D_HID), jnp.float32),
        "w2": lin_w(k2, D_HID, D_IN),
        "b2": jnp.zeros((1, D_IN), jnp.float32),
        "w3": lin_w(k3, D_IN, 1),
        "b3": jnp.zeros((1, 1), jnp.float32),
    }


def critic_reference_f32(x, p):
    mean = jnp.mean(x, axis=-1, keepdims=True)
    var = jnp.mean((x - mean) ** 2, axis=-1, keepdims=True)
    xn = (x - mean) * jax.lax.rsqrt(var + LN_EPS) * p["ln_g"] + p["ln_b"]
    h1 = jnp.maximum(xn @ p["w1"] + p["b1"], 0.0)
    h2 = jnp.maximum(h1 @ p["w2"] + p["b2"], 0.0)
    return h2 @ p["w3"] + p["b3"]


def critic_reference_bf16(x, p):
    """Same bf16-input / f32-accumulate recipe the kernel uses."""
    mean = jnp.mean(x, axis=-1, keepdims=True)
    var = jnp.mean((x - mean) ** 2, axis=-1, keepdims=True)
    xn = (x - mean) * jax.lax.rsqrt(var + LN_EPS) * p["ln_g"] + p["ln_b"]
    xn = xn.astype(jnp.bfloat16)
    w1 = p["w1"].astype(jnp.bfloat16)
    w2 = p["w2"].astype(jnp.bfloat16)
    h1 = jnp.maximum(
        jnp.dot(xn, w1, preferred_element_type=jnp.float32) + p["b1"], 0.0)
    h1 = h1.astype(jnp.bfloat16)
    h2 = jnp.maximum(
        jnp.dot(h1, w2, preferred_element_type=jnp.float32) + p["b2"], 0.0)
    return jnp.sum(h2 * p["w3"].reshape(1, D_IN), axis=-1, keepdims=True) + p["b3"]


if __name__ == "__main__":
    key = jax.random.PRNGKey(0)
    kx, kp = jax.random.split(key)

    # Batch of "outer_tokens" vectors, each 1024-d (feature dims are fixed by
    # the module). 256 rows -> two 128-row batch tiles across the parallel axis.
    B = 256
    x = jax.random.normal(kx, (B, D_IN), jnp.float32)
    params = init_params(kp)

    value = critic_forward(x, params)
    value = jax.block_until_ready(value)
    assert value.shape == (B, 1), value.shape

    # Bit-recipe-matched reference (bf16 MXU inputs, f32 accumulation).
    ref_bf16 = critic_reference_bf16(x, params)
    assert jnp.allclose(value, ref_bf16, atol=2e-2, rtol=2e-2), (
        "mismatch vs bf16-matched reference; max abs diff = "
        f"{float(jnp.max(jnp.abs(value - ref_bf16)))}")

    # Sanity check vs full-f32 reference (loose tolerance for bf16 weights).
    ref_f32 = critic_reference_f32(x, params)
    assert jnp.allclose(value, ref_f32, atol=1e-1, rtol=1e-1), (
        "mismatch vs f32 reference; max abs diff = "
        f"{float(jnp.max(jnp.abs(value - ref_f32)))}")

    print("KERNEL_OK")
</pallas_src>

<mosaic_0001>
module attributes {stable_mosaic.version = 11 : i64} {
  func.func @critic_kernel(%arg0: i32, %arg1: i32, %arg2: memref<128x1024xf32, #tpu.memory_space<vmem>>, %arg3: memref<1x1024xf32, #tpu.memory_space<vmem>>, %arg4: memref<1x1024xf32, #tpu.memory_space<vmem>>, %arg5: memref<1024x512xbf16, #tpu.memory_space<vmem>>, %arg6: memref<1x512xf32, #tpu.memory_space<vmem>>, %arg7: memref<512x1024xbf16, #tpu.memory_space<vmem>>, %arg8: memref<1x1024xf32, #tpu.memory_space<vmem>>, %arg9: memref<1x1024xf32, #tpu.memory_space<vmem>>, %arg10: memref<1x1xf32, #tpu.memory_space<vmem>>, %arg11: memref<128x1xf32, #tpu.memory_space<vmem>>, %arg12: memref<128x1024xbf16, #tpu.memory_space<vmem>>, %arg13: memref<128x1024xf32, #tpu.memory_space<vmem>>) attributes {dimension_semantics = [#tpu.dimension_semantics<parallel>, #tpu.dimension_semantics<arbitrary>], iteration_bounds = array<i64: 2, 4>, scalar_prefetch = 0 : i64, scratch_operands = 2 : i64, tpu.core_type = #tpu.core_type<tc>, window_params = [{transform_indices = @transform_0, window_bounds = array<i64: 128, 1024>}, {pipeline_mode = #tpu.pipeline_mode<synchronous>, transform_indices = @transform_1, window_bounds = array<i64: 1, 1024>}, {pipeline_mode = #tpu.pipeline_mode<synchronous>, transform_indices = @transform_2, window_bounds = array<i64: 1, 1024>}, {transform_indices = @transform_3, window_bounds = array<i64: 1024, 512>}, {transform_indices = @transform_4, window_bounds = array<i64: 1, 512>}, {transform_indices = @transform_5, window_bounds = array<i64: 512, 1024>}, {pipeline_mode = #tpu.pipeline_mode<synchronous>, transform_indices = @transform_6, window_bounds = array<i64: 1, 1024>}, {pipeline_mode = #tpu.pipeline_mode<synchronous>, transform_indices = @transform_7, window_bounds = array<i64: 1, 1024>}, {pipeline_mode = #tpu.pipeline_mode<synchronous>, transform_indices = @transform_8, window_bounds = array<i64: 1, 1>}, {transform_indices = @transform_9, window_bounds = array<i64: 128, 1>}]} {
    %c0_i32 = arith.constant 0 : i32
    %0 = arith.cmpi eq, %arg1, %c0_i32 : i32
    %1 = arith.extui %0 : i1 to i32
    %c0_i32_0 = arith.constant 0 : i32
    %2 = arith.cmpi ne, %1, %c0_i32_0 : i32
    scf.if %2 {
      %c0_15 = arith.constant 0 : index
      %c0_16 = arith.constant 0 : index
      %20 = vector.load %arg2[%c0_15, %c0_16] : memref<128x1024xf32, #tpu.memory_space<vmem>>, vector<128x1024xf32>
      %cst_17 = arith.constant dense<0.000000e+00> : vector<128xf32>
      %21 = vector.multi_reduction <add>, %20, %cst_17 [1] : vector<128x1024xf32> to vector<128xf32>
      %22 = vector.shape_cast %21 : vector<128xf32> to vector<128x1xf32>
      %cst_18 = arith.constant 1.024000e+03 : f32
      %23 = vector.broadcast %cst_18 : f32 to vector<128x1xf32>
      %24 = arith.divf %22, %23 : vector<128x1xf32>
      %25 = vector.broadcast %24 : vector<128x1xf32> to vector<128x1024xf32>
      %26 = arith.subf %20, %25 : vector<128x1024xf32>
      %27 = vector.broadcast %24 : vector<128x1xf32> to vector<128x1024xf32>
      %28 = arith.subf %20, %27 : vector<128x1024xf32>
      %29 = arith.mulf %26, %28 : vector<128x1024xf32>
      %cst_19 = arith.constant dense<0.000000e+00> : vector<128xf32>
      %30 = vector.multi_reduction <add>, %29, %cst_19 [1] : vector<128x1024xf32> to vector<128xf32>
      %31 = vector.shape_cast %30 : vector<128xf32> to vector<128x1xf32>
      %cst_20 = arith.constant 1.024000e+03 : f32
      %32 = vector.broadcast %cst_20 : f32 to vector<128x1xf32>
      %33 = arith.divf %31, %32 : vector<128x1xf32>
      %34 = vector.broadcast %24 : vector<128x1xf32> to vector<128x1024xf32>
      %35 = arith.subf %20, %34 : vector<128x1024xf32>
      %cst_21 = arith.constant 9.99999974E-6 : f32
      %36 = vector.broadcast %cst_21 : f32 to vector<128x1xf32>
      %37 = arith.addf %33, %36 : vector<128x1xf32>
      %38 = math.rsqrt %37 : vector<128x1xf32>
      %39 = vector.broadcast %38 : vector<128x1xf32> to vector<128x1024xf32>
      %40 = arith.mulf %35, %39 : vector<128x1024xf32>
      %c0_22 = arith.constant 0 : index
      %c0_23 = arith.constant 0 : index
      %41 = vector.load %arg3[%c0_22, %c0_23] : memref<1x1024xf32, #tpu.memory_space<vmem>>, vector<1x1024xf32>
      %42 = vector.broadcast %41 : vector<1x1024xf32> to vector<128x1024xf32>
      %43 = arith.mulf %40, %42 : vector<128x1024xf32>
      %c0_24 = arith.constant 0 : index
      %c0_25 = arith.constant 0 : index
      %44 = vector.load %arg4[%c0_24, %c0_25] : memref<1x1024xf32, #tpu.memory_space<vmem>>, vector<1x1024xf32>
      %45 = vector.broadcast %44 : vector<1x1024xf32> to vector<128x1024xf32>
      %46 = arith.addf %43, %45 : vector<128x1024xf32>
      %47 = arith.truncf %46 : vector<128x1024xf32> to vector<128x1024xbf16>
      %c0_26 = arith.constant 0 : index
      %c0_27 = arith.constant 0 : index
      %48 = vector.load %arg12[%c0_26, %c0_27] : memref<128x1024xbf16, #tpu.memory_space<vmem>>, vector<128x1024xbf16>
      tpu.vector_store %arg12[%c0_26, %c0_27], %47 {strides = array<i32>} : memref<128x1024xbf16, #tpu.memory_space<vmem>>, vector<128x1024xbf16>,
      %cst_28 = arith.constant 0.000000e+00 : f32
      %49 = vector.broadcast %cst_28 : f32 to vector<128x1024xf32>
      %c0_29 = arith.constant 0 : index
      %c0_30 = arith.constant 0 : index
      %50 = vector.load %arg13[%c0_29, %c0_30] : memref<128x1024xf32, #tpu.memory_space<vmem>>, vector<128x1024xf32>
      tpu.vector_store %arg13[%c0_29, %c0_30], %49 {strides = array<i32>} : memref<128x1024xf32, #tpu.memory_space<vmem>>, vector<128x1024xf32>,
    } else {
    }
    %c0 = arith.constant 0 : index
    %c0_1 = arith.constant 0 : index
    %3 = vector.load %arg12[%c0, %c0_1] : memref<128x1024xbf16, #tpu.memory_space<vmem>>, vector<128x1024xbf16>
    %c0_2 = arith.constant 0 : index
    %c0_3 = arith.constant 0 : index
    %4 = vector.load %arg5[%c0_2, %c0_3] : memref<1024x512xbf16, #tpu.memory_space<vmem>>, vector<1024x512xbf16>
    %cst = arith.constant dense<0.000000e+00> : vector<128x512xf32>
    %5 = tpu.matmul %3, %4, %cst {dimension_numbers = #tpu.dot_dimension_numbers<[1], [0], [0], [1], [0, 0, 1, 1], [], []>} : vector<128x1024xbf16>, vector<1024x512xbf16>, vector<128x512xf32> -> vector<128x512xf32>
    %c0_4 = arith.constant 0 : index
    %c0_5 = arith.constant 0 : index
    %6 = vector.load %arg6[%c0_4, %c0_5] : memref<1x512xf32, #tpu.memory_space<vmem>>, vector<1x512xf32>
    %7 = vector.broadcast %6 : vector<1x512xf32> to vector<128x512xf32>
    %8 = arith.addf %5, %7 : vector<128x512xf32>
    %cst_6 = arith.constant 0.000000e+00 : f32
    %9 = vector.broadcast %cst_6 : f32 to vector<128x512xf32>
    %10 = arith.maximumf %8, %9 : vector<128x512xf32>
    %c0_7 = arith.constant 0 : index
    %c0_8 = arith.constant 0 : index
    %11 = vector.load %arg13[%c0_7, %c0_8] : memref<128x1024xf32, #tpu.memory_space<vmem>>, vector<128x1024xf32>
    %12 = arith.truncf %10 : vector<128x512xf32> to vector<128x512xbf16>
    %c0_9 = arith.constant 0 : index
    %c0_10 = arith.constant 0 : index
    %13 = vector.load %arg7[%c0_9, %c0_10] : memref<512x1024xbf16, #tpu.memory_space<vmem>>, vector<512x1024xbf16>
    %cst_11 = arith.constant dense<0.000000e+00> : vector<128x1024xf32>
    %14 = tpu.matmul %12, %13, %cst_11 {dimension_numbers = #tpu.dot_dimension_numbers<[1], [0], [0], [1], [0, 0, 1, 1], [], []>} : vector<128x512xbf16>, vector<512x1024xbf16>, vector<128x1024xf32> -> vector<128x1024xf32>
    %15 = arith.addf %11, %14 : vector<128x1024xf32>
    %c0_12 = arith.constant 0 : index
    %c0_13 = arith.constant 0 : index
    %16 = vector.load %arg13[%c0_12, %c0_13] : memref<128x1024xf32, #tpu.memory_space<vmem>>, vector<128x1024xf32>
    tpu.vector_store %arg13[%c0_12, %c0_13], %15 {strides = array<i32>} : memref<128x1024xf32, #tpu.memory_space<vmem>>, vector<128x1024xf32>,
    %c3_i32 = arith.constant 3 : i32
    %17 = arith.cmpi eq, %arg1, %c3_i32 : i32
    %18 = arith.extui %17 : i1 to i32
    %c0_i32_14 = arith.constant 0 : i32
    %19 = arith.cmpi ne, %18, %c0_i32_14 : i32
    scf.if %19 {
      %c0_15 = arith.constant 0 : index
      %c0_16 = arith.constant 0 : index
      %20 = vector.load %arg13[%c0_15, %c0_16] : memref<128x1024xf32, #tpu.memory_space<vmem>>, vector<128x1024xf32>
      %c0_17 = arith.constant 0 : index
      %c0_18 = arith.constant 0 : index
      %21 = vector.load %arg8[%c0_17, %c0_18] : memref<1x1024xf32, #tpu.memory_space<vmem>>, vector<1x1024xf32>
      %22 = vector.broadcast %21 : vector<1x1024xf32> to vector<128x1024xf32>
      %23 = arith.addf %20, %22 : vector<128x1024xf32>
      %cst_19 = arith.constant 0.000000e+00 : f32
      %24 = vector.broadcast %cst_19 : f32 to vector<128x1024xf32>
      %25 = arith.maximumf %23, %24 : vector<128x1024xf32>
      %c0_20 = arith.constant 0 : index
      %c0_21 = arith.constant 0 : index
      %26 = vector.load %arg9[%c0_20, %c0_21] : memref<1x1024xf32, #tpu.memory_space<vmem>>, vector<1x1024xf32>
      %27 = vector.broadcast %26 : vector<1x1024xf32> to vector<128x1024xf32>
      %28 = arith.mulf %25, %27 : vector<128x1024xf32>
      %cst_22 = arith.constant dense<0.000000e+00> : vector<128xf32>
      %29 = vector.multi_reduction <add>, %28, %cst_22 [1] : vector<128x1024xf32> to vector<128xf32>
      %30 = vector.shape_cast %29 : vector<128xf32> to vector<128x1xf32>
      %c0_23 = arith.constant 0 : index
      %c0_24 = arith.constant 0 : index
      %31 = vector.load %arg10[%c0_23, %c0_24] : memref<1x1xf32, #tpu.memory_space<vmem>>, vector<1x1xf32>
      %32 = vector.broadcast %31 : vector<1x1xf32> to vector<128x1xf32>
      %33 = arith.addf %30, %32 : vector<128x1xf32>
      %c0_25 = arith.constant 0 : index
      %c0_26 = arith.constant 0 : index
      %34 = vector.load %arg11[%c0_25, %c0_26] : memref<128x1xf32, #tpu.memory_space<vmem>>, vector<128x1xf32>
      tpu.vector_store %arg11[%c0_25, %c0_26], %33 {strides = array<i32>} : memref<128x1xf32, #tpu.memory_space<vmem>>, vector<128x1xf32>,
    } else {
    }
    return
  }
  func.func @transform_0(%arg0: i32, %arg1: i32) -> (i32, i32) {
    %c0_i32 = arith.constant 0 : i32
    %c0_i32_0 = arith.constant 0 : i32
    return %arg0, %c0_i32 : i32, i32
  }
  func.func @transform_1(%arg0: i32, %arg1: i32) -> (i32, i32) {
    %c0_i32 = arith.constant 0 : i32
    %c0_i32_0 = arith.constant 0 : i32
    %c0_i32_1 = arith.constant 0 : i32
    return %c0_i32, %c0_i32_0 : i32, i32
  }
  func.func @transform_2(%arg0: i32, %arg1: i32) -> (i32, i32) {
    %c0_i32 = arith.constant 0 : i32
    %c0_i32_0 = arith.constant 0 : i32
    %c0_i32_1 = arith.constant 0 : i32
    return %c0_i32, %c0_i32_0 : i32, i32
  }
  func.func @transform_3(%arg0: i32, %arg1: i32) -> (i32, i32) {
    %c0_i32 = arith.constant 0 : i32
    %c0_i32_0 = arith.constant 0 : i32
    return %c0_i32, %arg1 : i32, i32
  }
  func.func @transform_4(%arg0: i32, %arg1: i32) -> (i32, i32) {
    %c0_i32 = arith.constant 0 : i32
    %c0_i32_0 = arith.constant 0 : i32
    return %c0_i32, %arg1 : i32, i32
  }
  func.func @transform_5(%arg0: i32, %arg1: i32) -> (i32, i32) {
    %c0_i32 = arith.constant 0 : i32
    %c0_i32_0 = arith.constant 0 : i32
    return %arg1, %c0_i32 : i32, i32
  }
  func.func @transform_6(%arg0: i32, %arg1: i32) -> (i32, i32) {
    %c0_i32 = arith.constant 0 : i32
    %c0_i32_0 = arith.constant 0 : i32
    %c0_i32_1 = arith.constant 0 : i32
    return %c0_i32, %c0_i32_0 : i32, i32
  }
  func.func @transform_7(%arg0: i32, %arg1: i32) -> (i32, i32) {
    %c0_i32 = arith.constant 0 : i32
    %c0_i32_0 = arith.constant 0 : i32
    %c0_i32_1 = arith.constant 0 : i32
    return %c0_i32, %c0_i32_0 : i32, i32
  }
  func.func @transform_8(%arg0: i32, %arg1: i32) -> (i32, i32) {
    %c0_i32 = arith.constant 0 : i32
    %c0_i32_0 = arith.constant 0 : i32
    %c0_i32_1 = arith.constant 0 : i32
    return %c0_i32, %c0_i32_0 : i32, i32
  }
  func.func @transform_9(%arg0: i32, %arg1: i32) -> (i32, i32) {
    %c0_i32 = arith.constant 0 : i32
    %c0_i32_0 = arith.constant 0 : i32
    return %arg0, %c0_i32 : i32, i32
  }
}

</mosaic_0001>

<bundles_post_ra>
// kernel: tpu_custom_call.1
= control target key start
LH: loop header
LB: loop body
LE: loop exit
PB: predicated region body
PF: predicated region fallthrough
CT: control target
= control target key end

     0   :  { %s14119_s0 = inlined_call_operand.hbm [shape: f32[256,1024], index: 0, kind: input, shape index: {}]   ;;  %s14120_s1 = inlined_call_operand.hbm [shape: f32[1,1024], index: 1, kind: input, shape index: {}]   ;;  %s14121_s2 = inlined_call_operand.hbm [shape: f32[1,1024], index: 2, kind: input, shape index: {}]   ;;  %s14122_s3 = inlined_call_operand.hbm [shape: bf16[1024,2048], index: 3, kind: input, shape index: {}]   ;;  %s14123_s4 = inlined_call_operand.hbm [shape: f32[1,2048], index: 4, kind: input, shape index: {}]   ;;  %s14124_s5 = inlined_call_operand.hbm [shape: bf16[2048,1024], index: 5, kind: input, shape index: {}]   ;;  %s14125_s6 = inlined_call_operand.hbm [shape: f32[1,1024], index: 6, kind: input, shape index: {}]   ;;  %s14126_s7 = inlined_call_operand.hbm [shape: f32[1,1024], index: 7, kind: input, shape index: {}]   ;;  %s14127_s8 = inlined_call_operand.<no memory space> [shape: f32[1,1], index: 8, kind: input, shape index: {}]   ;;  %s14128_s9 = inlined_call_operand.vmem [shape: f32[256,1], index: 9, kind: output, shape index: {}]  }
   0x1   :  { %14339 = sst [smem:[#allocation135_spill]] %s14119_s0  ;;  %v14_v0 = vstv %s14127_s8 }
   0x2   :  { %14340 = sst [smem:[#allocation136_spill]] %s14120_s1  ;;  %15 = vst [vmem:[#allocation4] sm:$0x1] %v14_v0 }
   0x3   :  { %14341 = sst [smem:[#allocation137_spill]] %s14122_s3 }
   0x4   :  { %14342 = sst [smem:[#allocation138_spill]] %s14123_s4 }
   0x5   :  { %14343 = sst [smem:[#allocation139_spill]] %s14124_s5 }
   0x6   :  { %14344 = sst [smem:[#allocation140_spill]] %s14125_s6 }
   0x7   :  { %14345 = sst [smem:[#allocation141_spill]] %s14128_s9 }
   0x8   :  { %16 = vsyncpa [#allocation6], 0 }
   0x9   :  { %18 = vsyncpa [#allocation6 + $0x1], 0 }
   0xa   :  { %19 = vsyncpa [#allocation8], 0 }
   0xb   :  { %20 = vsyncpa [#allocation11], 0 }
   0xc   :  { %22 = vsyncpa [#allocation11 + $0x1], 0 }
   0xd   :  { %23 = vsyncpa [#allocation14], 0 }
   0xe   :  { %25 = vsyncpa [#allocation14 + $0x1], 0 }
   0xf   :  { %26 = vsyncpa [#allocation17], 0  ;;  %s10343_s11 = smov 0   ;;  %s10345_s12 = smov 0  }
  0x10   :  { %s10347_s13 = smov 0   ;;  %s10349_s14 = smov 0  }
  0x11   :  { %s10351_s15 = smov 0   ;;  %s10353_s8 = smov 0  }
  0x12   :  { %s10355_s16 = smov 0   ;;  %s10357_s17 = smov 0  }
  0x13   :  { %s10359_s18 = smov 0   ;;  %s10361_s19 = smov 0  }
  0x14   :  { %s10363_s20 = smov 0  }
  0x15 LB: > { %14346 = sst [smem:[#allocation24_spill]] %s10237_s12  ;;  %s14129_s21 = sadd.s32 4294967295, %s10273_s20   ;;  %s10273_s20 = sphi %s10363_s20, %s32_s20   ;;  %s10269_s19 = sphi %s10361_s19, %s14763_s19   ;;  %s10265_s18 = sphi %s10359_s18, %s14762_s18   ;;  %s10261_s17 = sphi %s10357_s17, %s14761_s17   ;;  %s10257_s16 = sphi %s10355_s16, %s14760_s16   ;;  %s10253_s8 = sphi %s10353_s8, %s14759_s8   ;;  %s10249_s15 = sphi %s10351_s15, %s14758_s15   ;;  %s10245_s14 = sphi %s10349_s14, %s14757_s14   ;;  %s10241_s13 = sphi %s10347_s13, %s14756_s13   ;;  %s10237_s12 = sphi %s10345_s12, %s14755_s12   ;;  %s10233_s11 = sphi %s10343_s11, %s14754_s11  }
  0x16   : > { %14347 = sst [smem:[#allocation25_spill]] %s10257_s16  ;;  %p132_p0 = scmp.ne.s32.totalorder %s10237_s12, %s10233_s11 }
  0x17   : > { %14348 = sst [smem:[#allocation26_spill]] %s10261_s17  ;;  %p10400_p1 = scmp.eq.s32.totalorder %s14129_s21, 0 }
  0x18   : > { %p8419_p2 = scmp.ge.s32.totalorder %s10273_s20, 1  ;;  %p284_p3 = scmp.lt.s32.totalorder %s10273_s20, 9 }
  0x19   : > { %s14349_s22 = scalar_select %p10400_p1, 1, 0 }
  0x1a   : > { %p10408_p4 = por %p132_p0, %p10400_p1  ;;  %p10412_p5 = pnand %p8419_p2, %p284_p3 }
  0x1b   : > { %s10275_s25 = smov [#allocation7]   ;;  %s10276_s27 = smov [#allocation15]  }
  0x1c   : > { %s14350_s23 = scalar_select %p10408_p4, 1, 0 }
  0x1d   : > { %s14352_s24 = scalar_select %p10412_p5, 1, 0 }
  0x1e   : > { %14351 = sst [smem:[#allocation27_spill]] %s14350_s23  ;;  %s297_s26 = sshll.u32 %s10275_s25, 4  ;;  %s298_s26 = int_to_ptr.vmem [resolvable:$true] %s297_s26 }
  0x1f   : > { %14353 = sst [smem:[#allocation28_spill]] %s14352_s24  ;;  %p9381_p6 = pneg %p10412_p5 }
  0x20   : > { %s319_s28 = sshll.u32 %s10276_s27, 4  ;;  %s14355_s1 = sld [smem:[#allocation136_spill]]  ;;  %s10424_s28 = int_to_ptr.vmem [resolvable:$true] %s319_s28 }
  0x21   : > { %p10420_p7 = pnand %p9381_p6, %p10400_p1 }
  0x23   : > { %s14354_s29 = scalar_select %p10420_p7, 1, 0 }
  0x24   : > { %p10434_p9 = pneg %p10420_p7 }
  0x26   : > { %s9931_s11 = scalar_lea.hbm %s14355_s1, 128 }
  0x27   : > { %p9932_p8 = scmp.ne.s32.totalorder %s14355_s1, %s9931_s11  ;;  %p9938_p12 = scmp.lt.u32.totalorder %s9931_s11, %s14355_s1 }
  0x28   : > { %s14356_s25 = scalar_select %p10434_p9, 1, 0 }
  0x29   : > { %p9934_p10 = pnand %p10434_p9, %p9932_p8 }
  0x2b   : > { %p9935_p11 = pneg %p9934_p10 }
  0x2d   : > { %p9940_p13 = pnand %p9938_p12, %p9935_p11 }
  0x2f   : > { %9943 = shalt.err (!%p9940_p13)
}
  0x30   : > { %s9944_s30 = scalar_lea.vmem %s298_s26, 128  ;;  %p9952_p6 = scmp.lt.s32.totalorder %s298_s26, %s298_s26 }
  0x31   : > { %p9945_p0 = scmp.ne.s32.totalorder %s298_s26, %s9944_s30  ;;  %p9953_p4 = scmp.lt.s32.totalorder %s9944_s30, %s9944_s30 }
  0x33   : > { %p9947_p2 = pnand %p9945_p0, %p10434_p9  ;;  %p9954_p5 = por %p9953_p4, %p9952_p6 }
  0x35   : > { %p9948_p3 = pneg %p9947_p2 }
  0x37   : > { %p9955_p1 = pnand %p9954_p5, %p9948_p3 }
  0x39   : > { %9958 = shalt.err (!%p9955_p1)
}
  0x3a   : > { %9384 = dma.hbm_to_vmem [thread:$0]  (!%p10420_p7), %s14355_s1, 128, %s298_s26, [#allocation8]  }
  0x3b   : > { %s14357_s6 = sld [smem:[#allocation140_spill]] }
  0x41   : > { %s9959_s11 = scalar_lea.hbm %s14357_s6, 128 }
  0x42   : > { %p9960_p8 = scmp.ne.s32.totalorder %s14357_s6, %s9959_s11  ;;  %p9966_p1 = scmp.lt.u32.totalorder %s9959_s11, %s14357_s6 }
  0x44   : > { %p9962_p10 = pnand %p9960_p8, %p10434_p9 }
  0x46   : > { %p9963_p4 = pneg %p9962_p10 }
  0x48   : > { %p9968_p5 = pnand %p9966_p1, %p9963_p4 }
  0x4a   : > { %9971 = shalt.err (!%p9968_p5)
}
  0x4b   : > { %s9972_s26 = scalar_lea.vmem %s10424_s28, 128  ;;  %p9980_p0 = scmp.lt.s32.totalorder %s10424_s28, %s10424_s28 }
  0x4c   : > { %p9973_p11 = scmp.ne.s32.totalorder %s10424_s28, %s9972_s26  ;;  %p9981_p2 = scmp.lt.s32.totalorder %s9972_s26, %s9972_s26 }
  0x4e   : > { %p9975_p12 = pnand %p9973_p11, %p10434_p9  ;;  %p9982_p3 = por %p9981_p2, %p9980_p0 }
  0x50   : > { %p9976_p13 = pneg %p9975_p12 }
  0x52   : > { %p9983_p6 = pnand %p9982_p3, %p9976_p13 }
  0x54   : > { %9986 = shalt.err (!%p9983_p6)
}
  0x55   : > { %9390 = dma.hbm_to_vmem [thread:$0]  (!%p10420_p7), %s14357_s6, 128, %s10424_s28, [#allocation14]  }
  0x56   : > { %p14139_p8 = scmp.eq.s32.totalorder %s10273_s20, 0  ;;  %p126_p10 = scmp.ne.s32.totalorder %s10241_s13, %s10237_s12 }
  0x57   : > { %p14137_p4 = scmp.lt.s32.totalorder %s10273_s20, 8  ;;  %s14138_s21 = sand.u32 1, %s10273_s20  }
  0x58   : > { %p128_p1 = por %p126_p10, %p14139_p8  ;;  %s14136_s9 = sand.u32 1, %s10241_s13  }
  0x59   : > { %s8969_s10 = sshll.u32 %s10265_s18, 8  ;;  %s10485_s11 = sshll.u32 %s14136_s9, 11 }
  0x5a   : > { %14358 = sst [smem:[#allocation29_spill]] %s10485_s11  ;;  %s14359_s3 = sld [smem:[#allocation137_spill]] }
  0x5b   : > { %p10494_p5 = pnand %p14137_p4, %p128_p1  ;;  %s370_s17 = scalar_lea.vmem [#allocation10], %s10485_s11 }
  0x5c   : > { %s377_s23 = sshll.u32 %s370_s17, 4  ;;  %s10503_s9 = scalar_lea.sflag [#allocation11], %s14138_s21  ;;  %s10499_s23 = int_to_ptr.vmem [resolvable:$true] %s377_s23 }
  0x5d   : > { %s14360_s28 = scalar_select %p10494_p5, 1, 0 }
  0x5e   : > { %p10509_p12 = pneg %p10494_p5 }
  0x5f   : > { %14361 = sst [smem:[#allocation30_spill]] %s14360_s28 }
  0x60   : > { %s10490_s26 = scalar_lea.hbm %s14359_s3, %s8969_s10  ;;  %s9992_s17 = scalar_lea.hbm %s14359_s3, 131072 }
  0x61   : > { %s9987_s27 = scalar_lea.hbm %s10490_s26, 32768  ;;  %p9993_p2 = scmp.lt.u32.totalorder %s10490_s26, %s14359_s3 }
  0x62   : > { %p9988_p11 = scmp.ne.s32.totalorder %s10490_s26, %s9987_s27  ;;  %p9994_p3 = scmp.lt.u32.totalorder %s9992_s17, %s9987_s27 }
  0x63   : > { %s14362_s10 = scalar_select %p10509_p12, 1, 0 }
  0x64   : > { %p9990_p13 = pnand %p10509_p12, %p9988_p11  ;;  %p9995_p6 = por %p9994_p3, %p9993_p2 }
  0x65   : > { %p9996_p10 = scmp.lt.u32.totalorder %s9987_s27, %s10490_s26 }
  0x66   : > { %p9991_p0 = pneg %p9990_p13 }
  0x67   : > { %p9997_p1 = por %p9996_p10, %p9995_p6 }
  0x69   : > { %p9998_p4 = pnand %p9997_p1, %p9991_p0 }
  0x6b   : > { %10001 = shalt.err (!%p9998_p4)
}
  0x6c   : > { %s10002_s21 = scalar_lea.vmem %s10499_s23, 32768  ;;  %s10277_s16 = smov [#allocation10]  }
  0x6d   : > { %p10003_p11 = scmp.ne.s32.totalorder %s10499_s23, %s10002_s21  ;;  %s10007_s30 = sshll.u32 %s10277_s16, 4  ;;  %s10008_s30 = int_to_ptr.vmem [resolvable:$false] %s10007_s30 }
  0x6e   : > { %s10009_s1 = scalar_lea.vmem %s10008_s30, 65536  ;;  %p10010_p7 = scmp.lt.s32.totalorder %s10499_s23, %s10008_s30 }
  0x6f   : > { %p10005_p13 = pnand %p10003_p11, %p10509_p12  ;;  %p10011_p9 = scmp.lt.s32.totalorder %s10009_s1, %s10002_s21 }
  0x71   : > { %p10006_p8 = pneg %p10005_p13  ;;  %p10012_p2 = por %p10011_p9, %p10010_p7 }
  0x73   : > { %p10013_p3 = pnand %p10012_p2, %p10006_p8 }
  0x75   : > { %10016 = shalt.err (!%p10013_p3)
}
  0x76   : > { %s10278_s6 = smov 1024   ;;  %s10279_s27 = smov 256  }
  0x77   : > { %s10280_s17 = smov 16   ;;  %s10281_s3 = smov [#allocation9]  }
  0x78   : > { %9400 = dma.hbm_to_vmem [thread:$0]  (!%p10494_p5), %s10490_s26, 32768, %s10499_s23, %s10503_s9, %s10278_s6, %s10279_s27, %s10280_s17  }
  0x79   : > { %s308_s16 = sshll.u32 %s10281_s3, 4  ;;  %s10282_s12 = smov [#allocation16]   ;;  %s309_s16 = int_to_ptr.vmem [resolvable:$true] %s308_s16 }
  0x7a   : > { %s330_s30 = sshll.u32 %s10282_s12, 4  ;;  %s10017_s24 = scalar_lea.hbm %s14121_s2, 128  ;;  %s331_s30 = int_to_ptr.vmem [resolvable:$true] %s330_s30 }
  0x7b   : > { %p10018_p7 = scmp.ne.s32.totalorder %s14121_s2, %s10017_s24  ;;  %p14363_p9 = scmp.ne.s32.totalorder %s14356_s25, 0 }
  0x7c   : > { %p10024_p0 = scmp.lt.u32.totalorder %s10017_s24, %s14121_s2 }
  0x7d   : > { %p10020_p8 = pnand %p10018_p7, %p14363_p9 }
  0x7f   : > { %p10021_p4 = pneg %p10020_p8 }
  0x81   : > { %p10026_p6 = pnand %p10024_p0, %p10021_p4 }
  0x83   : > { %10029 = shalt.err (!%p10026_p6)
}
  0x84   : > { %s10030_s3 = scalar_lea.vmem %s309_s16, 128  ;;  %p10038_p13 = scmp.lt.s32.totalorder %s309_s16, %s309_s16 }
  0x85   : > { %p10031_p10 = scmp.ne.s32.totalorder %s309_s16, %s10030_s3  ;;  %p10039_p2 = scmp.lt.s32.totalorder %s10030_s3, %s10030_s3 }
  0x87   : > { %p10033_p1 = pnand %p10031_p10, %p14363_p9  ;;  %p10040_p3 = por %p10039_p2, %p10038_p13 }
  0x89   : > { %p10034_p11 = pneg %p10033_p1 }
  0x8b   : > { %p10041_p5 = pnand %p10040_p3, %p10034_p11 }
  0x8d   : > { %10044 = shalt.err (!%p10041_p5)
}
  0x8e   : > { %p14364_p7 = scmp.ne.s32.totalorder %s14354_s29, 0  ;;  %s10045_s11 = scalar_lea.hbm %s14126_s7, 128 }
  0x8f   : > { %p10046_p8 = scmp.ne.s32.totalorder %s14126_s7, %s10045_s11  ;;  %p10052_p5 = scmp.lt.u32.totalorder %s10045_s11, %s14126_s7 }
  0x90   : > { %9387 = dma.hbm_to_vmem [thread:$0]  (!%p14364_p7), %s14121_s2, 128, %s309_s16, [#allocation8]  }
  0x91   : > { %p10048_p4 = pnand %p10046_p8, %p14363_p9 }
  0x93   : > { %p10049_p0 = pneg %p10048_p4 }
  0x95   : > { %p10054_p6 = pnand %p10052_p5, %p10049_p0 }
  0x97   : > { %10057 = shalt.err (!%p10054_p6)
}
  0x98   : > { %s10058_s17 = scalar_lea.vmem %s331_s30, 128  ;;  %p10066_p13 = scmp.lt.s32.totalorder %s331_s30, %s331_s30 }
  0x99   : > { %p10059_p10 = scmp.ne.s32.totalorder %s331_s30, %s10058_s17  ;;  %p10067_p2 = scmp.lt.s32.totalorder %s10058_s17, %s10058_s17 }
  0x9b   : > { %p10061_p1 = pnand %p10059_p10, %p14363_p9  ;;  %p10068_p3 = por %p10067_p2, %p10066_p13 }
  0x9d   : > { %p10062_p11 = pneg %p10061_p1 }
  0x9f   : > { %p10069_p12 = pnand %p10068_p3, %p10062_p11 }
  0xa1   : > { %10072 = shalt.err (!%p10069_p12)
}
  0xa2   : > { %9393 = dma.hbm_to_vmem [thread:$0]  (!%p14364_p7), %s14126_s7, 128, %s331_s30, [#allocation17]  }
  0xa3   : > { %s41_s25 = sadd.s32 1, %s10265_s18  ;;  %s44_s29 = sadd.s32 1, %s10269_s19 }
  0xa4   : > { %p42_p12 = scmp.ge.s32.totalorder %s41_s25, 4  ;;  %s51_s1 = sadd.s32 1, %s10253_s8 }
  0xa5   : > { %p58_p9 = scmp.ne.s32.totalorder %s10253_s8, %s10249_s15  ;;  %p14365_p8 = scmp.eq.s32.totalorder %s10273_s20, 0 }
  0xa6   : > { %s14765_s25 = smov (%p42_p12, %s41_s25), 0  ;;  %s14767_s29 = smov (!%p42_p12, %s44_s29), %s10269_s19 }
  0xa7   : > { %p10580_p4 = por %p14365_p8, %p58_p9  ;;  %p64_p0 = scmp.ne.s32.totalorder %s10249_s15, %s10245_s14 }
  0xa8   : > { %p46_p7 = scmp.ge.s32.totalorder %s14767_s29, 2  ;;  %s116_s30 = ssub.s32 %s10265_s18, %s14765_s25 }
  0xa9   : > { %p14367_p5 = scmp.ne.s32.totalorder %s14349_s22, 0  ;;  %p117_p10 = scmp.eq.s32.totalorder %s116_s30, 0 }
  0xaa   : > { %s14769_s29 = smov (%p46_p7, %s14767_s29), 0  ;;  %s14369_s12 = sadd.s32 1, %s10241_s13 }
  0xab   : > { %p10590_p6 = por %p14367_p5, %p64_p0  ;;  %s48_s24 = ssub.s32 %s10269_s19, %s14769_s29 }
  0xac   : > { %s10599_s4 = scalar_select %p117_p10, %s10241_s13, %s14369_s12  }
  0xad   : > { %s14368_s5 = scalar_select %p10590_p6, 1, 0 }
  0xae   : > { %s344_s11 = sand.u32 1, %s10253_s8   ;;  %p49_p1 = scmp.eq.s32.totalorder %s48_s24, 0 }
  0xaf   : > { %s8425_s14 = sshll.u32 %s344_s11, 10  ;;  %s8968_s26 = sshll.u32 %s10269_s19, 14 }
  0xb0   : > { %s10606_s28 = scalar_select %p49_p1, %s10253_s8, %s51_s1  }
  0xb1   : > { %s14370_s0 = sld [smem:[#allocation135_spill]]  ;;  %s348_s16 = scalar_lea.vmem [#allocation5], %s8425_s14 }
  0xb2   : > { %s356_s21 = sshll.u32 %s348_s16, 4  ;;  %p14371_p11 = scmp.lt.s32.totalorder %s10273_s20, 8  ;;  %s10621_s21 = int_to_ptr.vmem [resolvable:$true] %s356_s21 }
  0xb3   : > { %s14373_s1 = sand.u32 1, %s10241_s13   ;;  %s10627_s24 = scalar_lea.sflag [#allocation6], %s344_s11 }
  0xb4   : > { %p10617_p13 = pnand %p14371_p11, %p10580_p4  ;;  %s10625_s12 = sshll.u32 %s14373_s1, 2 }
  0xb6   : > { %p10075_p3 = pneg %p10617_p13 }
  0xb7   : > { %s10611_s17 = scalar_lea.hbm %s14370_s0, %s8968_s26  ;;  %s10078_s23 = scalar_lea.hbm %s14370_s0, 32768 }
  0xb8   : > { %s10073_s26 = scalar_lea.hbm %s10611_s17, 16384  ;;  %p10079_p8 = scmp.lt.u32.totalorder %s10611_s17, %s14370_s0 }
  0xb9   : > { %p10074_p2 = scmp.ne.s32.totalorder %s10611_s17, %s10073_s26  ;;  %p10080_p4 = scmp.lt.u32.totalorder %s10078_s23, %s10073_s26 }
  0xba   : > { %p10082_p7 = scmp.lt.u32.totalorder %s10073_s26, %s10611_s17 }
  0xbb   : > { %p10076_p12 = pnand %p10075_p3, %p10074_p2  ;;  %p10081_p0 = por %p10080_p4, %p10079_p8 }
  0xbd   : > { %p10077_p9 = pneg %p10076_p12  ;;  %p10083_p5 = por %p10082_p7, %p10081_p0 }
  0xbf   : > { %p10084_p10 = pnand %p10083_p5, %p10077_p9 }
  0xc1   : > { %10087 = shalt.err (!%p10084_p10)
}
  0xc2   : > { %s10088_s11 = scalar_lea.vmem %s10621_s21, 16384  ;;  %s10283_s1 = smov [#allocation5]  }
  0xc3   : > { %p10089_p1 = scmp.ne.s32.totalorder %s10621_s21, %s10088_s11  ;;  %s10093_s3 = sshll.u32 %s10283_s1, 4  ;;  %s10094_s3 = int_to_ptr.vmem [resolvable:$false] %s10093_s3 }
  0xc4   : > { %s10095_s14 = scalar_lea.vmem %s10094_s3, 32768  ;;  %p10096_p12 = scmp.lt.s32.totalorder %s10621_s21, %s10094_s3 }
  0xc5   : > { %p10091_p11 = pnand %p10089_p1, %p10075_p3  ;;  %p10097_p8 = scmp.lt.s32.totalorder %s10095_s14, %s10088_s11 }
  0xc7   : > { %p10092_p2 = pneg %p10091_p11  ;;  %p10098_p4 = por %p10097_p8, %p10096_p12 }
  0xc9   : > { %p10099_p0 = pnand %p10098_p4, %p10092_p2 }
  0xcb   : > { %10102 = shalt.err (!%p10099_p0)
}
  0xcc   : > { %s10284_s26 = smov 64   ;;  %s8970_s23 = sshll.u32 %s10265_s18, 6 }
  0xcd   : > { %9397 = dma.hbm_to_vmem [thread:$0]  (!%p10617_p13), %s10611_s17, 16384, %s10621_s21, %s10627_s24, %s10278_s6, %s10278_s6, %s10284_s26  }
  0xce   : > { %s14374_s1 = sld [smem:[#allocation138_spill]]  ;;  %s391_s30 = scalar_lea.vmem [#allocation12], %s10625_s12 }
  0xcf   : > { %s399_s3 = sshll.u32 %s391_s30, 4  ;;  %p14375_p9 = scmp.ne.s32.totalorder %s14362_s10, 0  ;;  %s400_s3 = int_to_ptr.vmem [resolvable:$true] %s399_s3 }
  0xd4   : > { %s10661_s11 = scalar_lea.hbm %s14374_s1, %s8970_s23  ;;  %s10108_s17 = scalar_lea.hbm %s14374_s1, 256 }
  0xd5   : > { %s10103_s14 = scalar_lea.hbm %s10661_s11, 64  ;;  %p10109_p13 = scmp.lt.u32.totalorder %s10661_s11, %s14374_s1 }
  0xd6   : > { %p10104_p3 = scmp.ne.s32.totalorder %s10661_s11, %s10103_s14  ;;  %p10110_p10 = scmp.lt.u32.totalorder %s10108_s17, %s10103_s14 }
  0xd7   : > { %p10112_p11 = scmp.lt.u32.totalorder %s10103_s14, %s10661_s11 }
  0xd8   : > { %p10106_p7 = pnand %p10104_p3, %p14375_p9  ;;  %p10111_p1 = por %p10110_p10, %p10109_p13 }
  0xda   : > { %p10107_p5 = pneg %p10106_p7  ;;  %p10113_p2 = por %p10112_p11, %p10111_p1 }
  0xdc   : > { %p10114_p12 = pnand %p10113_p2, %p10107_p5 }
  0xde   : > { %10117 = shalt.err (!%p10114_p12)
}
  0xdf   : > { %s10118_s12 = scalar_lea.vmem %s400_s3, 64  ;;  %s10285_s26 = smov [#allocation12]  }
  0xe0   : > { %p10119_p8 = scmp.ne.s32.totalorder %s400_s3, %s10118_s12  ;;  %s10123_s23 = sshll.u32 %s10285_s26, 4  ;;  %s10124_s23 = int_to_ptr.vmem [resolvable:$false] %s10123_s23 }
  0xe1   : > { %s10125_s0 = scalar_lea.vmem %s10124_s23, 128  ;;  %p10126_p3 = scmp.lt.s32.totalorder %s400_s3, %s10124_s23 }
  0xe2   : > { %p10121_p4 = pnand %p10119_p8, %p14375_p9  ;;  %p10127_p7 = scmp.lt.s32.totalorder %s10125_s0, %s10118_s12 }
  0xe4   : > { %p10122_p0 = pneg %p10121_p4  ;;  %p10128_p6 = por %p10127_p7, %p10126_p3 }
  0xe6   : > { %p10129_p10 = pnand %p10128_p6, %p10122_p0 }
  0xe8   : > { %10132 = shalt.err (!%p10129_p10)
}
  0xe9   : > { %s14376_s27 = sld [smem:[#allocation30_spill]]  ;;  %s14378_s16 = sld [smem:[#allocation29_spill]] }
  0xea   : > { %s8972_s30 = sshll.u32 %s10265_s18, 15  ;;  %s14379_s17 = sld [smem:[#allocation139_spill]] }
  0xeb   : > { %s14381_s23 = sand.u32 1, %s10273_s20  }
  0xec   : > { %s10693_s0 = scalar_lea.sflag [#allocation14], %s14381_s23 }
  0xef   : > { %p14377_p13 = scmp.ne.s32.totalorder %s14376_s27, 0  ;;  %s410_s12 = scalar_lea.vmem [#allocation13], %s14378_s16 }
  0xf0   : > { %s14380_s21 = smov %s14379_s17  ;;  %s10686_s24 = scalar_lea.hbm %s14379_s17, %s8972_s30 }
  0xf1   : > { %9403 = dma.hbm_to_vmem [thread:$0]  (!%p14377_p13), %s10661_s11, 64, %s400_s3, %s10503_s9  }
  0xf2   : > { %s418_s26 = sshll.u32 %s410_s12, 4  ;;  %s10133_s1 = scalar_lea.hbm %s10686_s24, 32768  ;;  %s10689_s26 = int_to_ptr.vmem [resolvable:$true] %s418_s26 }
  0xf3   : > { %p10134_p6 = scmp.ne.s32.totalorder %s10686_s24, %s10133_s1  ;;  %s10138_s3 = scalar_lea.hbm %s14380_s21, 131072 }
  0xf4   : > { %p10139_p11 = scmp.lt.u32.totalorder %s10686_s24, %s14380_s21  ;;  %p10140_p2 = scmp.lt.u32.totalorder %s10138_s3, %s10133_s1 }
  0xf5   : > { %p10136_p5 = pnand %p10134_p6, %p14375_p9  ;;  %p10142_p8 = scmp.lt.u32.totalorder %s10133_s1, %s10686_s24 }
  0xf6   : > { %p10141_p12 = por %p10140_p2, %p10139_p11 }
  0xf7   : > { %p10137_p1 = pneg %p10136_p5 }
  0xf8   : > { %p10143_p4 = por %p10142_p8, %p10141_p12 }
  0xfa   : > { %p10144_p0 = pnand %p10143_p4, %p10137_p1 }
  0xfc   : > { %10147 = shalt.err (!%p10144_p0)
}
  0xfd   : > { %s10148_s16 = scalar_lea.vmem %s10689_s26, 32768  ;;  %s10286_s6 = smov [#allocation13]  }
  0xfe   : > { %p10149_p3 = scmp.ne.s32.totalorder %s10689_s26, %s10148_s16  ;;  %s10153_s17 = sshll.u32 %s10286_s6, 4  ;;  %s10154_s17 = int_to_ptr.vmem [resolvable:$false] %s10153_s17 }
  0xff   : > { %s10155_s12 = scalar_lea.vmem %s10154_s17, 65536  ;;  %p10156_p6 = scmp.lt.s32.totalorder %s10689_s26, %s10154_s17 }
 0x100   : > { %p10151_p7 = pnand %p10149_p3, %p14375_p9  ;;  %p10157_p5 = scmp.lt.s32.totalorder %s10155_s12, %s10148_s16 }
 0x102   : > { %p10152_p10 = pneg %p10151_p7  ;;  %p10158_p11 = por %p10157_p5, %p10156_p6 }
 0x104   : > { %p10159_p2 = pnand %p10158_p11, %p10152_p10 }
 0x106   : > { %10162 = shalt.err (!%p10159_p2)
}
 0x107   : > { %s10287_s1 = smov 512   ;;  %s10288_s23 = smov 32  }
 0x108   : > { %9406 = dma.hbm_to_vmem [thread:$0]  (!%p14377_p13), %s10686_s24, 32768, %s10689_s26, %s10693_s0, %s10287_s1, %s10287_s1, %s10288_s23  }
 0x109   : > { %s14382_s10 = sld [smem:[#allocation28_spill]] }
 0x10f   : > { %p14383_p9 = scmp.ne.s32.totalorder %s14382_s10, 0 }
 0x111   : > { %430 = sbr.rel (%p14383_p9) target bundleno = 2058 (0x80a), region = 56 }
 0x118   : > { %s432_s9 = sand.u32 1, %s10249_s15   ;;  %p14384_p1 = scmp.ne.s32.totalorder %s14368_s5, 0 }
 0x119   : > { %s8440_s11 = sshll.u32 %s432_s9, 10  ;;  %s433_s3 = scalar_lea.sflag [#allocation6], %s432_s9 }
 0x11a   : > { %s10720_s30 = scalar_lea.vmem [#allocation5], %s8440_s11 }
 0x11b   : > { %10208 = dma.done.wait (%p14384_p1), %s433_s3, 16384  }
 0x11c   : > { %10210 = vsyncadd (%p14384_p1), %s433_s3, 4294950912  ;;  %p14385_p12 = scmp.ne.s32.totalorder %s14349_s22, 0 }
 0x11e   : > { %10212 = dma.done.wait (%p14385_p12), [#allocation8], 256  }
 0x11f   : > { %10214 = vsyncadd (%p14385_p12), [#allocation8], 4294967040  ;;  %s14386_s27 = sadd.s32 4294967295, %s10273_s20   ;;  %s14387_s24 = sld [smem:[#allocation24_spill]] }
 0x120   : > { %s14388_s26 = sld [smem:[#allocation27_spill]]  ;;  %s449_s0 = sand.u32 1, %s14386_s27  }
 0x121   : > { %s450_s6 = scalar_lea.sflag [#allocation11], %s449_s0 }
 0x125   : > { %s451_s14 = sand.u32 1, %s14387_s24  }
 0x126   : > { %s8443_s16 = sshll.u32 %s451_s14, 11  ;;  %p14389_p13 = scmp.ne.s32.totalorder %s14388_s26, 0 }
 0x127   : > { %s10733_s17 = scalar_lea.vmem [#allocation10], %s8443_s16 }
 0x128   : > { %10216 = dma.done.wait (%p14389_p13), %s450_s6, 32832  }
 0x129   : > { %10218 = vsyncadd (%p14389_p13), %s450_s6, 4294934464  ;;  %s10739_s5 = sshll.u32 %s451_s14, 2  ;;  %s468_s1 = scalar_lea.sflag [#allocation14], %s449_s0 }
 0x12a   : > { %s462_s12 = scalar_lea.vmem [#allocation12], %s10739_s5  ;;  %s10742_s23 = scalar_lea.vmem [#allocation13], %s8443_s16 }
 0x12b   : > { %10220 = dma.done.wait (%p14389_p13), %s468_s1, 32768  }
 0x12c   : > { %10222 = vsyncadd (%p14389_p13), %s468_s1, 4294934528 }
 0x12d   : > { %10224 = dma.done.wait (%p14385_p12), [#allocation14], 128  }
 0x12e   : > { %10226 = vsyncadd (%p14385_p12), [#allocation14], 4294967168 }
 0x12f   : > { %10228 = dma.done.wait (%p14385_p12), [#allocation17], 128  }
 0x130   : > { %10230 = vsyncadd (%p14385_p12), [#allocation17], 4294967168  ;;  %s14390_s10 = sld [smem:[#allocation26_spill]]  ;;  %s14391_s24 = sld [smem:[#allocation141_spill]] }
 0x131   : > { %s14392_s0 = sld [smem:[#allocation25_spill]] }
 0x136   : > { %s8448_s9 = sshll.u32 %s14390_s10, 4 }
 0x137   : > { %p534_p8 = scmp.lt.s32.totalorder %s8448_s9, 31  ;;  %p8450_p4 = scmp.ne.s32.totalorder %s14392_s0, 0 }
 0x139   : > { %s14771_s9 = smov (!%p534_p8, %s8448_s9), 31  ;;  %542 = sbr.rel (%p8450_p4) target bundleno = 837 (0x345), region = 92 }
 0x13a   : > { %s8449_s11 = sshll.u32 %s14771_s9, 3 }
 0x13b   : > { %s10760_s26 = scalar_lea.vmem %s14391_s24, %s8449_s11 }
 0x140   : > { %v10764_v1 = vld [vmem:[%s10720_s30 + $0x80] sm:$0xff]  ;;  %v10767_v2 = vld [vmem:[%s10720_s30 + $0x88] sm:$0xff]  ;;  %v10770_v3 = vld [vmem:[%s10720_s30 + $0x90] sm:$0xff] }
 0x141   : > { %v689_v4 = vadd.f32 %v10767_v2, %v10764_v1  ;;  %v10775_v5 = vld [vmem:[%s10720_s30 + $0x98] sm:$0xff]  ;;  %v10778_v6 = vld [vmem:[%s10720_s30] sm:$0xff]  ;;  %v10782_v8 = vld [vmem:[%s10720_s30 + $0x8] sm:$0xff] }
 0x142   : > { %v10785_v9 = vld [vmem:[%s10720_s30 + $0x10] sm:$0xff]  ;;  %v10788_v10 = vld [vmem:[%s10720_s30 + $0xa0] sm:$0xff]  ;;  %v671_v11 = vadd.f32 %v10782_v8, %v10778_v6  ;;  %v10794_v13 = vld [vmem:[%s10720_s30 + $0x18] sm:$0xff] }
 0x143   : > { %v690_v7 = vadd.f32 %v689_v4, %v10770_v3  ;;  %v10797_v14 = vld [vmem:[%s10720_s30 + $0xc0] sm:$0xff]  ;;  %v10800_v15 = vld [vmem:[%s10720_s30 + $0xc8] sm:$0xff]  ;;  %v10807_v18 = vld [vmem:[%s10720_s30 + $0xd0] sm:$0xff] }
 0x144   : > { %v10803_v16 = vld [vmem:[%s10720_s30 + $0xa8] sm:$0xff]  ;;  %v672_v17 = vadd.f32 %v671_v11, %v10785_v9  ;;  %v698_v19 = vadd.f32 %v10800_v15, %v10797_v14  ;;  %v10812_v20 = vld [vmem:[%s10720_s30 + $0xb0] sm:$0xff]  ;;  %v10816_v22 = vld [vmem:[%s10720_s30 + $0x20] sm:$0xff] }
 0x145   : > { %v691_v12 = vadd.f32 %v690_v7, %v10775_v5  ;;  %v10819_v23 = vld [vmem:[%s10720_s30 + $0xd8] sm:$0xff]  ;;  %v10824_v26 = vld [vmem:[%s10720_s30 + $0x40] sm:$0xff]  ;;  %v10827_v27 = vld [vmem:[%s10720_s30 + $0x48] sm:$0xff] }
 0x146   : > { %v673_v24 = vadd.f32 %v672_v17, %v10794_v13  ;;  %v699_v25 = vadd.f32 %v698_v19, %v10807_v18  ;;  %v10830_v28 = vld [vmem:[%s10720_s30 + $0x50] sm:$0xff]  ;;  %v10833_v29 = vld [vmem:[%s10720_s30 + $0xb8] sm:$0xff]  ;;  %v10837_v31 = vld [vmem:[%s10720_s30 + $0x28] sm:$0xff]  ;;  %v680_v33 = vadd.f32 %v10827_v27, %v10824_v26 }
 0x147   : > { %v692_v21 = vadd.f32 %v691_v12, %v10788_v10  ;;  %v10840_v32 = vld [vmem:[%s10720_s30 + $0xe0] sm:$0xff]  ;;  %v10845_v34 = vld [vmem:[%s10720_s30 + $0x30] sm:$0xff]  ;;  %v10850_v37 = vld [vmem:[%s10720_s30 + $0x58] sm:$0xff] }
 0x148   : > { %v674_v35 = vadd.f32 %v673_v24, %v10816_v22  ;;  %v700_v36 = vadd.f32 %v699_v25, %v10819_v23  ;;  %v10853_v38 = vld [vmem:[%s10720_s30 + $0x140] sm:$0xff]  ;;  %v10857_v40 = vld [vmem:[%s10720_s30 + $0xe8] sm:$0xff]  ;;  %v681_v41 = vadd.f32 %v680_v33, %v10830_v28  ;;  %v10864_v43 = vld [vmem:[%s10720_s30 + $0x150] sm:$0xff] }
 0x149   : > { %v693_v30 = vadd.f32 %v692_v21, %v10803_v16  ;;  %v10861_v42 = vld [vmem:[%s10720_s30 + $0x148] sm:$0xff]  ;;  %14393 = vst [vmem:[#allocation31_spill] sm:$0xff] %v10864_v43  ;;  %v10867_v44 = vld [vmem:[%s10720_s30 + $0x38] sm:$0xff]  ;;  %v10871_v46 = vld [vmem:[%s10720_s30 + $0xf0] sm:$0xff] }
 0x14a   : > { %v675_v45 = vadd.f32 %v674_v35, %v10837_v31  ;;  %v701_v47 = vadd.f32 %v700_v36, %v10840_v32  ;;  %v10875_v48 = vld [vmem:[%s10720_s30 + $0x60] sm:$0xff]  ;;  %v716_v49 = vadd.f32 %v10861_v42, %v10853_v38  ;;  %v682_v51 = vadd.f32 %v681_v41, %v10850_v37  ;;  %v10882_v52 = vld [vmem:[%s10720_s30 + $0x158] sm:$0xff]  ;;  %v10888_v54 = vld [vmem:[%s10720_s30 + $0x108] sm:$0xff] }
 0x14b   : > { %v694_v39 = vadd.f32 %v693_v30, %v10812_v20  ;;  %14394 = vst [vmem:[#allocation32_spill] sm:$0xff] %v10882_v52  ;;  %v10885_v53 = vld [vmem:[%s10720_s30 + $0x100] sm:$0xff]  ;;  %v10892_v56 = vld [vmem:[%s10720_s30 + $0xf8] sm:$0xff]  ;;  %v10896_v58 = vld [vmem:[%s10720_s30 + $0x68] sm:$0xff] }
 0x14c   : > { %v676_v55 = vadd.f32 %v675_v45, %v10845_v34  ;;  %v702_v57 = vadd.f32 %v701_v47, %v10857_v40  ;;  %v717_v59 = vadd.f32 %v716_v49, %v10864_v43  ;;  %v10900_v60 = vld [vmem:[%s10720_s30 + $0x110] sm:$0xff]  ;;  %v707_v61 = vadd.f32 %v10888_v54, %v10885_v53  ;;  %v10909_v0 = vld [vmem:[%s10720_s30 + $0x160] sm:$0xff]  ;;  %v10912_v4 = vld [vmem:[%s10720_s30 + $0x118] sm:$0xff] }
 0x14d   : > { %v695_v50 = vadd.f32 %v694_v39, %v10833_v29  ;;  %v10905_v62 = vld [vmem:[%s10720_s30 + $0x70] sm:$0xff]  ;;  %v683_v63 = vadd.f32 %v682_v51, %v10875_v48  ;;  %14395 = vst [vmem:[#allocation33_spill] sm:$0xff] %v10909_v0  ;;  %v10919_v19 = vld [vmem:[%s10720_s30 + $0x1c0] sm:$0xff]  ;;  %v10922_v21 = vld [vmem:[%s10720_s30 + $0x1c8] sm:$0xff] }
 0x14e   : > { %v677_v7 = vadd.f32 %v676_v55, %v10867_v44  ;;  %v703_v11 = vadd.f32 %v702_v57, %v10871_v46  ;;  %v718_v12 = vadd.f32 %v717_v59, %v10882_v52  ;;  %v708_v17 = vadd.f32 %v707_v61, %v10900_v60  ;;  %14396 = vst [vmem:[#allocation34_spill] sm:$0xff] %v10919_v19  ;;  %v10925_v24 = vld [vmem:[%s10720_s30 + $0x1d0] sm:$0xff]  ;;  %v10928_v25 = vld [vmem:[%s10720_s30 + $0x78] sm:$0xff]  ;;  %v10932_v33 = vld [vmem:[%s10720_s30 + $0x168] sm:$0xff] }
 0x14f   : > { %696 = vadd.xlane.f32.xlu1 %v695_v50  ;;  %14397 = vst [vmem:[#allocation35_spill] sm:$0xff] %v10922_v21  ;;  %14398 = vst [vmem:[#allocation36_spill] sm:$0xff] %v10925_v24  ;;  %v684_v30 = vadd.f32 %v683_v63, %v10896_v58  ;;  %v10935_v35 = vld [vmem:[%s10720_s30 + $0x120] sm:$0xff]  ;;  %v734_v36 = vadd.f32 %v10922_v21, %v10919_v19  ;;  %v10941_v41 = vld [vmem:[%s10720_s30 + $0x170] sm:$0xff] }
 0x150   : > { %14399 = vst [vmem:[#allocation37_spill] sm:$0xff] %v10932_v33  ;;  %678 = vadd.xlane.f32.xlu0 %v677_v7  ;;  %v704_v39 = vadd.f32 %v703_v11, %v10892_v56  ;;  %14400 = vst [vmem:[#allocation38_spill] sm:$0xff] %v10941_v41  ;;  %v719_v45 = vadd.f32 %v718_v12, %v10909_v0  ;;  %v709_v47 = vadd.f32 %v708_v17, %v10912_v4  ;;  %v10946_v49 = vld [vmem:[%s10720_s30 + $0x1d8] sm:$0xff]  ;;  %v10949_v50 = vld [vmem:[%s10720_s30 + $0x180] sm:$0xff] }
 0x151   : > { %14401 = vst [vmem:[#allocation39_spill] sm:$0xff] %v10946_v49  ;;  %14402 = vst [vmem:[#allocation40_spill] sm:$0xff] %v10949_v50  ;;  %v685_v51 = vadd.f32 %v684_v30, %v10905_v62  ;;  %v10953_v55 = vld [vmem:[%s10720_s30 + $0x128] sm:$0xff]  ;;  %v735_v57 = vadd.f32 %v734_v36, %v10925_v24  ;;  %v10960_v61 = vld [vmem:[%s10720_s30 + $0x190] sm:$0xff] }
 0x152   : > { %v10957_v59 = vld [vmem:[%s10720_s30 + $0x188] sm:$0xff]  ;;  %14404 = vst [vmem:[#allocation42_spill] sm:$0xff] %v10960_v61  ;;  %v10963_v63 = vld [vmem:[%s10720_s30 + $0x178] sm:$0xff]  ;;  %v720_v7 = vadd.f32 %v719_v45, %v10932_v33  ;;  %v10967_v11 = vld [vmem:[%s10720_s30 + $0x130] sm:$0xff]  ;;  %v710_v12 = vadd.f32 %v709_v47, %v10935_v35 }
 0x153   : > { %14403 = vst [vmem:[#allocation41_spill] sm:$0xff] %v10957_v59  ;;  %705 = vadd.xlane.f32.xlu1 %v704_v39  ;;  %14405 = vst [vmem:[#allocation43_spill] sm:$0xff] %v10963_v63  ;;  %v10971_v17 = vld [vmem:[%s10720_s30 + $0x1e0] sm:$0xff]  ;;  %v725_v30 = vadd.f32 %v10957_v59, %v10949_v50  ;;  %v686_v36 = vadd.f32 %v685_v51, %v10928_v25  ;;  %v736_v39 = vadd.f32 %v735_v57, %v10946_v49  ;;  %v10978_v24 = vld [vmem:[%s10720_s30 + $0x198] sm:$0xff] }
 0x154   : > { %14406 = vst [vmem:[#allocation44_spill] sm:$0xff] %v10971_v17  ;;  %14407 = vst [vmem:[#allocation45_spill] sm:$0xff] %v10978_v24  ;;  %v10981_v21 = vld [vmem:[%s10720_s30 + $0x240] sm:$0xff]  ;;  %v10984_v45 = vld [vmem:[%s10720_s30 + $0x248] sm:$0xff]  ;;  %v721_v47 = vadd.f32 %v720_v7, %v10941_v41  ;;  %v711_v59 = vadd.f32 %v710_v12, %v10953_v55 }
 0x155   : > { %14408 = vst [vmem:[#allocation46_spill] sm:$0xff] %v10981_v21  ;;  %14409 = vst [vmem:[#allocation47_spill] sm:$0xff] %v10984_v45  ;;  %v10988_v19 = vld [vmem:[%s10720_s30 + $0x138] sm:$0xff]  ;;  %v10992_v50 = vld [vmem:[%s10720_s30 + $0x1e8] sm:$0xff]  ;;  %v726_v51 = vadd.f32 %v725_v30, %v10960_v61  ;;  %v752_v49 = vadd.f32 %v10984_v45, %v10981_v21  ;;  %687 = vadd.xlane.f32.xlu0 %v686_v36  ;;  %v737_v41 = vadd.f32 %v736_v39, %v10971_v17 }
 0x156   : > { %14410 = vst [vmem:[#allocation48_spill] sm:$0xff] %v10988_v19  ;;  %14411 = vst [vmem:[#allocation49_spill] sm:$0xff] %v10992_v50  ;;  %v10996_v57 = vld [vmem:[%s10720_s30 + $0x250] sm:$0xff]  ;;  %v11005_v33 = vld [vmem:[%s10720_s30 + $0x1a0] sm:$0xff]  ;;  %v722_v0 = vadd.f32 %v721_v47, %v10963_v63  ;;  %v712_v30 = vadd.f32 %v711_v59, %v10967_v11 }
 0x157   : > { %14412 = vst [vmem:[#allocation50_spill] sm:$0xff] %v10996_v57  ;;  %v11001_v7 = vld [vmem:[%s10720_s30 + $0x1f0] sm:$0xff]  ;;  %14414 = vst [vmem:[#allocation52_spill] sm:$0xff] %v11005_v33  ;;  %v11008_v12 = vld [vmem:[%s10720_s30 + $0x258] sm:$0xff]  ;;  %v727_v61 = vadd.f32 %v726_v51, %v10978_v24  ;;  %v753_v45 = vadd.f32 %v752_v49, %v10996_v57  ;;  %v738_v47 = vadd.f32 %v737_v41, %v10992_v50 }
 0x158   : > { %14413 = vst [vmem:[#allocation51_spill] sm:$0xff] %v11001_v7  ;;  %14415 = vst [vmem:[#allocation53_spill] sm:$0xff] %v11008_v12  ;;  %v11015_v36 = vld [vmem:[%s10720_s30 + $0x200] sm:$0xff]  ;;  %v11018_v21 = vld [vmem:[%s10720_s30 + $0x208] sm:$0xff]  ;;  %723 = vadd.xlane.f32.xlu1 %v722_v0  ;;  %v713_v57 = vadd.f32 %v712_v30, %v10988_v19 }
 0x159   : > { %14416 = vst [vmem:[#allocation54_spill] sm:$0xff] %v11015_v36  ;;  %14417 = vst [vmem:[#allocation55_spill] sm:$0xff] %v11018_v21  ;;  %v11021_v39 = vld [vmem:[%s10720_s30 + $0x210] sm:$0xff]  ;;  %v11024_v17 = vld [vmem:[%s10720_s30 + $0x1f8] sm:$0xff]  ;;  %v743_v49 = vadd.f32 %v11018_v21, %v11015_v36  ;;  %v728_v24 = vadd.f32 %v727_v61, %v11005_v33  ;;  %v754_v52 = vadd.f32 %v753_v45, %v11008_v12 }
 0x15a   : > { %14418 = vst [vmem:[#allocation56_spill] sm:$0xff] %v11021_v39  ;;  %14419 = vst [vmem:[#allocation57_spill] sm:$0xff] %v11024_v17  ;;  %v11028_v59 = vld [vmem:[%s10720_s30 + $0x1a8] sm:$0xff]  ;;  %v11031_v51 = vld [vmem:[%s10720_s30 + $0x260] sm:$0xff]  ;;  %v739_v43 = vadd.f32 %v738_v47, %v11001_v7  ;;  %714 = vadd.xlane.f32.xlu0 %v713_v57 }
 0x15b   : > { %14420 = vst [vmem:[#allocation58_spill] sm:$0xff] %v11028_v59  ;;  %14421 = vst [vmem:[#allocation59_spill] sm:$0xff] %v11031_v51  ;;  %v11037_v63 = vld [vmem:[%s10720_s30 + $0x1b0] sm:$0xff]  ;;  %v11042_v41 = vld [vmem:[%s10720_s30 + $0x218] sm:$0xff]  ;;  %v744_v0 = vadd.f32 %v743_v49, %v11021_v39  ;;  %v729_v45 = vadd.f32 %v728_v24, %v11028_v59  ;;  %v755_v47 = vadd.f32 %v754_v52, %v11031_v51 }
 0x15c   : > { %14422 = vst [vmem:[#allocation60_spill] sm:$0xff] %v11037_v63  ;;  %14423 = vst [vmem:[#allocation61_spill] sm:$0xff] %v11042_v41  ;;  %v11045_v50 = vld [vmem:[%s10720_s30 + $0x2c0] sm:$0xff]  ;;  %v11049_v21 = vld [vmem:[%s10720_s30 + $0x268] sm:$0xff]  ;;  %v740_v39 = vadd.f32 %v739_v43, %v11024_v17 }
 0x15d   : > { %14424 = vst [vmem:[#allocation62_spill] sm:$0xff] %v11045_v50  ;;  %14425 = vst [vmem:[#allocation63_spill] sm:$0xff] %v11049_v21  ;;  %v11053_v30 = vld [vmem:[%s10720_s30 + $0x2c8] sm:$0xff]  ;;  %v11056_v36 = vld [vmem:[%s10720_s30 + $0x2d0] sm:$0xff]  ;;  %v745_v57 = vadd.f32 %v744_v0, %v11042_v41  ;;  %v730_v52 = vadd.f32 %v729_v45, %v11037_v63 }
 0x15e   : > { %14426 = vst [vmem:[#allocation64_spill] sm:$0xff] %v11053_v30  ;;  %14427 = vst [vmem:[#allocation65_spill] sm:$0xff] %v11056_v36  ;;  %v11059_v61 = vld [vmem:[%s10720_s30 + $0x1b8] sm:$0xff]  ;;  %v11063_v12 = vld [vmem:[%s10720_s30 + $0x270] sm:$0xff]  ;;  %v770_v49 = vadd.f32 %v11053_v30, %v11045_v50  ;;  %v756_v30 = vadd.f32 %v755_v47, %v11049_v21  ;;  %741 = vadd.xlane.f32.xlu1 %v740_v39 }
 0x15f   : > { %14428 = vst [vmem:[#allocation66_spill] sm:$0xff] %v11059_v61  ;;  %14429 = vst [vmem:[#allocation67_spill] sm:$0xff] %v11063_v12  ;;  %v11067_v7 = vld [vmem:[%s10720_s30 + $0x220] sm:$0xff]  ;;  %v11074_v33 = vld [vmem:[%s10720_s30 + $0x2d8] sm:$0xff]  ;;  %v731_v21 = vadd.f32 %v730_v52, %v11059_v61 }
 0x160   : > { %14430 = vst [vmem:[#allocation68_spill] sm:$0xff] %v11067_v7  ;;  %14431 = vst [vmem:[#allocation69_spill] sm:$0xff] %v11074_v33  ;;  %v11077_v19 = vld [vmem:[%s10720_s30 + $0x280] sm:$0xff]  ;;  %v11080_v24 = vld [vmem:[%s10720_s30 + $0x288] sm:$0xff]  ;;  %v771_v43 = vadd.f32 %v770_v49, %v11056_v36  ;;  %v746_v41 = vadd.f32 %v745_v57, %v11067_v7  ;;  %v757_v49 = vadd.f32 %v756_v30, %v11063_v12 }
 0x161   : > { %14432 = vst [vmem:[#allocation70_spill] sm:$0xff] %v11077_v19  ;;  %14433 = vst [vmem:[#allocation71_spill] sm:$0xff] %v11080_v24  ;;  %v11084_v51 = vld [vmem:[%s10720_s30 + $0x278] sm:$0xff]  ;;  %v11088_v50 = vld [vmem:[%s10720_s30 + $0x228] sm:$0xff]  ;;  %v761_v17 = vadd.f32 %v11080_v24, %v11077_v19  ;;  %732 = vadd.xlane.f32.xlu0 %v731_v21 }
 0x162   : > { %14434 = vst [vmem:[#allocation72_spill] sm:$0xff] %v11084_v51  ;;  %14435 = vst [vmem:[#allocation73_spill] sm:$0xff] %v11088_v50  ;;  %v11092_v0 = vld [vmem:[%s10720_s30 + $0x290] sm:$0xff]  ;;  %v11101_v63 = vld [vmem:[%s10720_s30 + $0x2e0] sm:$0xff]  ;;  %v772_v36 = vadd.f32 %v771_v43, %v11074_v33  ;;  %v747_v52 = vadd.f32 %v746_v41, %v11088_v50  ;;  %v758_v33 = vadd.f32 %v757_v49, %v11084_v51 }
 0x163   : > { %14436 = vst [vmem:[#allocation74_spill] sm:$0xff] %v11092_v0  ;;  %v11097_v45 = vld [vmem:[%s10720_s30 + $0x230] sm:$0xff]  ;;  %14438 = vst [vmem:[#allocation76_spill] sm:$0xff] %v11101_v63  ;;  %v11104_v47 = vld [vmem:[%s10720_s30 + $0x298] sm:$0xff]  ;;  %v762_v24 = vadd.f32 %v761_v17, %v11092_v0 }
 0x164   : > { %14437 = vst [vmem:[#allocation75_spill] sm:$0xff] %v11097_v45  ;;  %14439 = vst [vmem:[#allocation77_spill] sm:$0xff] %v11104_v47  ;;  %v11111_v39 = vld [vmem:[%s10720_s30 + $0x340] sm:$0xff]  ;;  %v11114_v19 = vld [vmem:[%s10720_s30 + $0x348] sm:$0xff]  ;;  %v773_v12 = vadd.f32 %v772_v36, %v11101_v63  ;;  %v748_v59 = vadd.f32 %v747_v52, %v11097_v45  ;;  %759 = vadd.xlane.f32.xlu1 %v758_v33 }
 0x165   : > { %14440 = vst [vmem:[#allocation78_spill] sm:$0xff] %v11111_v39  ;;  %14441 = vst [vmem:[#allocation79_spill] sm:$0xff] %v11114_v19  ;;  %v11117_v57 = vld [vmem:[%s10720_s30 + $0x350] sm:$0xff]  ;;  %v11120_v7 = vld [vmem:[%s10720_s30 + $0x238] sm:$0xff]  ;;  %v788_v17 = vadd.f32 %v11114_v19, %v11111_v39  ;;  %v763_v61 = vadd.f32 %v762_v24, %v11104_v47 }
 0x166   : > { %14442 = vst [vmem:[#allocation80_spill] sm:$0xff] %v11117_v57  ;;  %14443 = vst [vmem:[#allocation81_spill] sm:$0xff] %v11120_v7  ;;  %v11124_v30 = vld [vmem:[%s10720_s30 + $0x2e8] sm:$0xff]  ;;  %v11127_v43 = vld [vmem:[%s10720_s30 + $0x2a0] sm:$0xff] }
 0x167   : > { %14444 = vst [vmem:[#allocation82_spill] sm:$0xff] %v11124_v30  ;;  %14445 = vst [vmem:[#allocation83_spill] sm:$0xff] %v11127_v43  ;;  %v11133_v0 = vld [vmem:[%s10720_s30 + $0x2f0] sm:$0xff]  ;;  %v11138_v41 = vld [vmem:[%s10720_s30 + $0x358] sm:$0xff]  ;;  %v789_v21 = vadd.f32 %v788_v17, %v11117_v57  ;;  %v774_v24 = vadd.f32 %v773_v12, %v11124_v30  ;;  %v764_v52 = vadd.f32 %v763_v61, %v11127_v43 }
 0x168   : > { %14446 = vst [vmem:[#allocation84_spill] sm:$0xff] %v11133_v0  ;;  %14447 = vst [vmem:[#allocation85_spill] sm:$0xff] %v11138_v41  ;;  %v11141_v50 = vld [vmem:[%s10720_s30 + $0x300] sm:$0xff]  ;;  %v11145_v19 = vld [vmem:[%s10720_s30 + $0x2a8] sm:$0xff]  ;;  %v749_v57 = vadd.f32 %v748_v59, %v11120_v7 }
 0x169   : > { %14448 = vst [vmem:[#allocation86_spill] sm:$0xff] %v11141_v50  ;;  %14449 = vst [vmem:[#allocation87_spill] sm:$0xff] %v11145_v19  ;;  %v11149_v49 = vld [vmem:[%s10720_s30 + $0x308] sm:$0xff]  ;;  %v11152_v39 = vld [vmem:[%s10720_s30 + $0x310] sm:$0xff]  ;;  %v790_v33 = vadd.f32 %v789_v21, %v11138_v41  ;;  %v775_v61 = vadd.f32 %v774_v24, %v11133_v0 }
 0x16a   : > { %14450 = vst [vmem:[#allocation88_spill] sm:$0xff] %v11149_v49  ;;  %14451 = vst [vmem:[#allocation89_spill] sm:$0xff] %v11152_v39  ;;  %v11155_v36 = vld [vmem:[%s10720_s30 + $0x2f8] sm:$0xff]  ;;  %v11159_v63 = vld [vmem:[%s10720_s30 + $0x2b0] sm:$0xff]  ;;  %v779_v17 = vadd.f32 %v11149_v49, %v11141_v50  ;;  %v765_v49 = vadd.f32 %v764_v52, %v11145_v19  ;;  %750 = vadd.xlane.f32.xlu0 %v749_v57 }
 0x16b   : > { %14452 = vst [vmem:[#allocation90_spill] sm:$0xff] %v11155_v36  ;;  %v11163_v51 = vld [vmem:[%s10720_s30 + $0x360] sm:$0xff]  ;;  %v11170_v47 = vld [vmem:[%s10720_s30 + $0x318] sm:$0xff]  ;;  %v11176_v12 = vld [vmem:[%s10720_s30 + $0x3c8] sm:$0xff]  ;;  %v776_v19 = vadd.f32 %v775_v61, %v11155_v36 }
 0x16c   : > { %14453 = vst [vmem:[#allocation91_spill] sm:$0xff] %v11163_v51  ;;  %14454 = vst [vmem:[#allocation92_spill] sm:$0xff] %v11170_v47  ;;  %v11173_v45 = vld [vmem:[%s10720_s30 + $0x3c0] sm:$0xff]  ;;  %v11180_v30 = vld [vmem:[%s10720_s30 + $0x2b8] sm:$0xff]  ;;  %v780_v59 = vadd.f32 %v779_v17, %v11152_v39  ;;  %v791_v0 = vadd.f32 %v790_v33, %v11163_v51  ;;  %v766_v17 = vadd.f32 %v765_v49, %v11159_v63 }
 0x16d   : > { %14455 = vst [vmem:[#allocation93_spill] sm:$0xff] %v11173_v45  ;;  %14456 = vst [vmem:[#allocation94_spill] sm:$0xff] %v11176_v12  ;;  %v11184_v50 = vld [vmem:[%s10720_s30 + $0x368] sm:$0xff]  ;;  %v11188_v21 = vld [vmem:[%s10720_s30 + $0x3d0] sm:$0xff]  ;;  %v806_v41 = vadd.f32 %v11176_v12, %v11173_v45  ;;  %777 = vadd.xlane.f32.xlu1 %v776_v19 }
 0x16e   : > { %14457 = vst [vmem:[#allocation95_spill] sm:$0xff] %v11184_v50  ;;  %14458 = vst [vmem:[#allocation96_spill] sm:$0xff] %v11188_v21  ;;  %v11193_v24 = vld [vmem:[%s10720_s30 + $0x370] sm:$0xff]  ;;  %v11197_v43 = vld [vmem:[%s10720_s30 + $0x320] sm:$0xff]  ;;  %v781_v39 = vadd.f32 %v780_v59, %v11170_v47  ;;  %v792_v51 = vadd.f32 %v791_v0, %v11184_v50 }
 0x16f   : > { %14459 = vst [vmem:[#allocation97_spill] sm:$0xff] %v11193_v24  ;;  %14460 = vst [vmem:[#allocation98_spill] sm:$0xff] %v11197_v43  ;;  %v11200_v52 = vld [vmem:[%s10720_s30 + $0x3d8] sm:$0xff]  ;;  %v807_v12 = vadd.f32 %v806_v41, %v11188_v21  ;;  %v11207_v57 = vld [vmem:[%s10720_s30 + $0x380] sm:$0xff]  ;;  %v767_v41 = vadd.f32 %v766_v17, %v11180_v30 }
 0x170   : > { %14461 = vst [vmem:[#allocation99_spill] sm:$0xff] %v11200_v52  ;;  %14462 = vst [vmem:[#allocation100_spill] sm:$0xff] %v11207_v57  ;;  %v11210_v45 = vld [vmem:[%s10720_s30 + $0x388] sm:$0xff]  ;;  %v11213_v33 = vld [vmem:[%s10720_s30 + $0x390] sm:$0xff]  ;;  %v782_v21 = vadd.f32 %v781_v39, %v11197_v43  ;;  %v793_v50 = vadd.f32 %v792_v51, %v11193_v24 }
 0x171   : > { %14463 = vst [vmem:[#allocation101_spill] sm:$0xff] %v11210_v45  ;;  %14464 = vst [vmem:[#allocation102_spill] sm:$0xff] %v11213_v33  ;;  %v11217_v7 = vld [vmem:[%s10720_s30 + $0x328] sm:$0xff]  ;;  %v11220_v61 = vld [vmem:[%s10720_s30 + $0x3e0] sm:$0xff]  ;;  %v797_v49 = vadd.f32 %v11210_v45, %v11207_v57  ;;  %v808_v36 = vadd.f32 %v807_v12, %v11200_v52  ;;  %768 = vadd.xlane.f32.xlu0 %v767_v41 }
 0x172   : > { %14465 = vst [vmem:[#allocation103_spill] sm:$0xff] %v11220_v61  ;;  %v11226_v59 = vld [vmem:[%s10720_s30 + $0x378] sm:$0xff]  ;;  %v11235_v47 = vld [vmem:[%s10720_s30 + $0x330] sm:$0xff]  ;;  %v11238_v45 = vld [vmem:[%s10720_s30 + $0x3e8] sm:$0xff]  ;;  %v783_v17 = vadd.f32 %v782_v21, %v11217_v7 }
 0x173   : > { %14466 = vst [vmem:[#allocation104_spill] sm:$0xff] %v11226_v59  ;;  %v11231_v0 = vld [vmem:[%s10720_s30 + $0x398] sm:$0xff]  ;;  %14467 = vst [vmem:[#allocation105_spill] sm:$0xff] %v11238_v45  ;;  %v798_v19 = vadd.f32 %v797_v49, %v11213_v33  ;;  %v809_v39 = vadd.f32 %v808_v36, %v11220_v61  ;;  %v11244_v57 = vld [vmem:[%s10720_s30 + $0x3a0] sm:$0xff]  ;;  %v794_v12 = vadd.f32 %v793_v50, %v11226_v59 }
 0x174   : > { %14468 = vst [vmem:[#allocation106_spill] sm:$0xff] %v11244_v57  ;;  %v11248_v52 = vld [vmem:[%s10720_s30 + $0x338] sm:$0xff]  ;;  %v11251_v51 = vld [vmem:[%s10720_s30 + $0x3f0] sm:$0xff]  ;;  %v784_v43 = vadd.f32 %v783_v17, %v11235_v47  ;;  %v11257_v41 = vld [vmem:[%s10720_s30 + $0x3a8] sm:$0xff] }
 0x175   : > { %v799_v24 = vadd.f32 %v798_v19, %v11231_v0  ;;  %v810_v49 = vadd.f32 %v809_v39, %v11238_v45  ;;  %795 = vadd.xlane.f32.xlu1 %v794_v12  ;;  %v11260_v21 = vld [vmem:[%s10720_s30 + $0x3f8] sm:$0xff]  ;;  %v11266_v59 = vld [vmem:[%s10720_s30 + $0x3b0] sm:$0xff] }
 0x176   : > { %v785_v50 = vadd.f32 %v784_v43, %v11248_v52  ;;  %v11271_v17 = vld [vmem:[%s10720_s30 + $0x3b8] sm:$0xff] }
 0x177   : > { %v800_v36 = vadd.f32 %v799_v24, %v11244_v57  ;;  %v811_v61 = vadd.f32 %v810_v49, %v11251_v51 }
 0x178   : > { %786 = vadd.xlane.f32.xlu0 %v785_v50 }
 0x179   : > { %v801_v33 = vadd.f32 %v800_v36, %v11257_v41  ;;  %v812_v19 = vadd.f32 %v811_v61, %v11260_v21 }
 0x17b   : > { %v802_v39 = vadd.f32 %v801_v33, %v11266_v59  ;;  %813 = vadd.xlane.f32.xlu1 %v812_v19 }
 0x17d   : > { %v803_v12 = vadd.f32 %v802_v39, %v11271_v17 }
 0x17f   : > { %804 = vadd.xlane.f32.xlu0 %v803_v12 }
 0x1dc   : > { %v697_v24 = vpop.xlane.xlu1 %696 }
 0x1dd   : > { %v818_v45 = vmul.f32 0.0009765625, %v697_v24  ;;  %v679_v43 = vpop.xlane.xlu0 %678 }
 0x1de   : > { %v816_v57 = vmul.f32 0.0009765625, %v679_v43 }
 0x1df   : > { %v11276_v49 = vsub.f32 %v10764_v1, %v818_v45  ;;  %v11279_v36 = vsub.f32 %v10767_v2, %v818_v45  ;;  %v11291_v39 = vsub.f32 %v10770_v3, %v818_v45  ;;  %v11297_v1 = vsub.f32 %v10775_v5, %v818_v45 }
 0x1e0   : > { %v706_v50 = vpop.xlane.xlu1 %705  ;;  %v11282_v61 = vsub.f32 %v10778_v6, %v816_v57  ;;  %v11285_v33 = vsub.f32 %v10782_v8, %v816_v57  ;;  %v11288_v19 = vsub.f32 %v10785_v9, %v816_v57  ;;  %v11294_v12 = vsub.f32 %v10794_v13, %v816_v57 }
 0x1e1   : > { %14469 = vst [vmem:[#allocation107_spill] sm:$0xff] %v11276_v49  ;;  %14470 = vst [vmem:[#allocation108_spill] sm:$0xff] %v11279_v36  ;;  %v11300_v2 = vsub.f32 %v10788_v10, %v818_v45  ;;  %v11303_v6 = vsub.f32 %v10803_v16, %v818_v45  ;;  %v976_v13 = vmul.f32 %v11276_v49, %v11276_v49 }
 0x1e2   : > { %14471 = vst [vmem:[#allocation109_spill] sm:$0xff] %v11282_v61  ;;  %14472 = vst [vmem:[#allocation110_spill] sm:$0xff] %v11285_v33  ;;  %v688_v8 = vpop.xlane.xlu0 %687  ;;  %v960_v9 = vmul.f32 %v11282_v61, %v11282_v61  ;;  %v961_v3 = vmul.f32 %v11285_v33, %v11285_v33  ;;  %v977_v5 = vmul.f32 %v11279_v36, %v11279_v36 }
 0x1e3   : > { %14473 = vst [vmem:[#allocation111_spill] sm:$0xff] %v11288_v19  ;;  %14474 = vst [vmem:[#allocation112_spill] sm:$0xff] %v11291_v39  ;;  %v817_v24 = vmul.f32 0.0009765625, %v688_v8  ;;  %v11314_v10 = vsub.f32 %v10816_v22, %v816_v57  ;;  %v11317_v16 = vsub.f32 %v10837_v31, %v816_v57  ;;  %v11320_v43 = vsub.f32 %v10845_v34, %v816_v57 }
 0x1e4   : > { %14475 = vst [vmem:[#allocation113_spill] sm:$0xff] %v11297_v1  ;;  %14476 = vst [vmem:[#allocation114_spill] sm:$0xff] %v11300_v2  ;;  %v11323_v61 = vsub.f32 %v10867_v44, %v816_v57  ;;  %v962_v33 = vmul.f32 %v11288_v19, %v11288_v19  ;;  %v1088_v49 = vadd.f32 %v961_v3, %v960_v9  ;;  %v11329_v8 = vmul.f32 0.0009765625, %v706_v50 }
 0x1e5   : > { %14477 = vst [vmem:[#allocation115_spill] sm:$0xff] %v11303_v6  ;;  %14478 = vst [vmem:[#allocation116_spill] sm:$0xff] %v11317_v16  ;;  %v978_v36 = vmul.f32 %v11291_v39, %v11291_v39  ;;  %v963_v22 = vmul.f32 %v11294_v12, %v11294_v12  ;;  %v11334_v31 = vsub.f32 %v10812_v20, %v818_v45  ;;  %v724_v44 = vpop.xlane.xlu1 %723 }
 0x1e6   : > { %14479 = vst [vmem:[#allocation117_spill] sm:$0xff] %v11320_v43  ;;  %v11337_v34 = vsub.f32 %v10833_v29, %v818_v45  ;;  %v1089_v57 = vadd.f32 %v1088_v49, %v962_v33  ;;  %v979_v19 = vmul.f32 %v11297_v1, %v11297_v1  ;;  %v1106_v9 = vadd.f32 %v977_v5, %v976_v13 }
 0x1e7   : > { %14480 = vst [vmem:[#allocation118_spill] sm:$0xff] %v11334_v31  ;;  %v11342_v3 = vsub.f32 %v10824_v26, %v817_v24  ;;  %v715_v50 = vpop.xlane.xlu0 %714  ;;  %v964_v39 = vmul.f32 %v11314_v10, %v11314_v10  ;;  %v965_v20 = vmul.f32 %v11317_v16, %v11317_v16  ;;  %v966_v29 = vmul.f32 %v11320_v43, %v11320_v43 }
 0x1e8   : > { %v11351_v45 = vsub.f32 %v10827_v27, %v817_v24  ;;  %v967_v49 = vmul.f32 %v11323_v61, %v11323_v61  ;;  %v1090_v33 = vadd.f32 %v1089_v57, %v963_v22  ;;  %v1107_v13 = vadd.f32 %v1106_v9, %v978_v36 }
 0x1e9   : > { %v11356_v26 = vsub.f32 %v10830_v28, %v817_v24  ;;  %v980_v5 = vmul.f32 %v11300_v2, %v11300_v2  ;;  %v981_v1 = vmul.f32 %v11303_v6, %v11303_v6  ;;  %v968_v43 = vmul.f32 %v11342_v3, %v11342_v3 }
 0x1ea   : > { %14481 = vst [vmem:[#allocation119_spill] sm:$0xff] %v11351_v45  ;;  %v969_v27 = vmul.f32 %v11351_v45, %v11351_v45  ;;  %v1091_v16 = vadd.f32 %v1090_v33, %v964_v39  ;;  %v982_v22 = vmul.f32 %v11334_v31, %v11334_v31  ;;  %v1108_v36 = vadd.f32 %v1107_v13, %v979_v19 }
 0x1eb   : > { %v11369_v28 = vsub.f32 %v10850_v37, %v817_v24  ;;  %v983_v57 = vmul.f32 %v11337_v34, %v11337_v34  ;;  %v11374_v9 = vsub.f32 %v10875_v48, %v817_v24  ;;  %v11377_v6 = vsub.f32 %v10896_v58, %v817_v24  ;;  %v742_v39 = vpop.xlane.xlu1 %741 }
 0x1ec   : > { %v11380_v2 = vsub.f32 %v10905_v62, %v817_v24  ;;  %v1092_v33 = vadd.f32 %v1091_v16, %v965_v20  ;;  %v1109_v45 = vadd.f32 %v1108_v36, %v980_v5  ;;  %v970_v19 = vmul.f32 %v11356_v26, %v11356_v26 }
 0x1ed   : > { %v1097_v37 = vadd.f32 %v969_v27, %v968_v43  ;;  %v11385_v31 = vsub.f32 %v10928_v25, %v817_v24  ;;  %v11389_v48 = vsub.f32 %v10797_v14, %v11329_v8  ;;  %v11393_v58 = vsub.f32 %v10800_v15, %v11329_v8 }
 0x1ee   : > { %v733_v13 = vpop.xlane.xlu0 %732  ;;  %v11397_v62 = vsub.f32 %v10807_v18, %v11329_v8  ;;  %v1093_v16 = vadd.f32 %v1092_v33, %v966_v29  ;;  %v1110_v20 = vadd.f32 %v1109_v45, %v981_v1  ;;  %v971_v43 = vmul.f32 %v11369_v28, %v11369_v28 }
 0x1ef   : > { %v1098_v5 = vadd.f32 %v1097_v37, %v970_v19  ;;  %v11401_v25 = vmul.f32 0.0009765625, %v724_v44  ;;  %v820_v24 = vmul.f32 0.0009765625, %v715_v50  ;;  %v11403_v27 = vmul.f32 0.0009765625, %v742_v39 }
 0x1f0   : > { %v11407_v14 = vsub.f32 %v10819_v23, %v11329_v8  ;;  %v1094_v15 = vadd.f32 %v1093_v16, %v967_v49  ;;  %v1111_v36 = vadd.f32 %v1110_v20, %v982_v22  ;;  %v972_v18 = vmul.f32 %v11374_v9, %v11374_v9 }
 0x1f1   : > { %v1099_v29 = vadd.f32 %v1098_v5, %v971_v43  ;;  %v973_v1 = vmul.f32 %v11377_v6, %v11377_v6  ;;  %v984_v44 = vmul.f32 %v11389_v48, %v11389_v48  ;;  %v985_v50 = vmul.f32 %v11393_v58, %v11393_v58  ;;  %v760_v33 = vpop.xlane.xlu1 %759 }
 0x1f2   : > { %v986_v45 = vmul.f32 %v11397_v62, %v11397_v62  ;;  %1095 = vadd.xlane.f32.xlu0 %v1094_v15  ;;  %v974_v23 = vmul.f32 %v11380_v2, %v11380_v2  ;;  %v975_v49 = vmul.f32 %v11385_v31, %v11385_v31  ;;  %v11425_v39 = vsub.f32 %v10840_v32, %v11329_v8 }
 0x1f3   : > { %v1100_v22 = vadd.f32 %v1099_v29, %v972_v18  ;;  %v1112_v37 = vadd.f32 %v1111_v36, %v983_v57  ;;  %v11429_v16 = vsub.f32 %v10857_v40, %v11329_v8  ;;  %v987_v20 = vmul.f32 %v11407_v14, %v11407_v14 }
 0x1f4   : > { %v1115_v43 = vadd.f32 %v985_v50, %v984_v44  ;;  %v11434_v15 = vsub.f32 %v10885_v53, %v820_v24  ;;  %v11437_v18 = vsub.f32 %v10888_v54, %v820_v24  ;;  %v11440_v32 = vsub.f32 %v10900_v60, %v820_v24 }
 0x1f5   : > { %v1101_v5 = vadd.f32 %v1100_v22, %v973_v1  ;;  %v11442_v29 = vmul.f32 0.0009765625, %v733_v13  ;;  %v11446_v40 = vsub.f32 %v10871_v46, %v11329_v8  ;;  %v11449_v36 = vsub.f32 %v10912_v4, %v820_v24 }
 0x1f6   : > { %14482 = vst [vmem:[#allocation120_spill] sm:$0xff] %v11437_v18  ;;  %14483 = vst [vmem:[#allocation121_spill] sm:$0xff] %v11440_v32  ;;  %v1116_v57 = vadd.f32 %v1115_v43, %v986_v45  ;;  %v11451_v1 = vmul.f32 0.0009765625, %v760_v33  ;;  %1113 = vadd.xlane.f32.xlu0 %v1112_v37  ;;  %v11455_v54 = vsub.f32 %v10892_v56, %v11329_v8 }
 0x1f7   : > { %v751_v19 = vpop.xlane.xlu0 %750  ;;  %14484 = vst [vmem:[#allocation122_spill] sm:$0xff] %v11449_v36  ;;  %v1102_v53 = vadd.f32 %v1101_v5, %v974_v23  ;;  %v988_v60 = vmul.f32 %v11425_v39, %v11425_v39  ;;  %v989_v13 = vmul.f32 %v11429_v16, %v11429_v16  ;;  %v992_v44 = vmul.f32 %v11434_v15, %v11434_v15  ;;  %v14490_v5 = vld [vmem:[#allocation31_spill] sm:$0xff] }
 0x1f8   : > { %v1117_v46 = vadd.f32 %v1116_v57, %v987_v20  ;;  %v993_v4 = vmul.f32 %v11437_v18, %v11437_v18  ;;  %v11465_v50 = vmul.f32 0.0009765625, %v751_v19  ;;  %v11468_v23 = vsub.f32 %v10935_v35, %v820_v24 }
 0x1f9   : > { %v1103_v45 = vadd.f32 %v1102_v53, %v975_v49  ;;  %v994_v56 = vmul.f32 %v11440_v32, %v11440_v32  ;;  %v11473_v37 = vsub.f32 %v10953_v55, %v820_v24  ;;  %v11476_v20 = vsub.f32 %v10967_v11, %v820_v24 }
 0x1fa   : > { %14485 = vst [vmem:[#allocation123_spill] sm:$0xff] %v11468_v23  ;;  %v778_v8 = vpop.xlane.xlu1 %777  ;;  %v1118_v33 = vadd.f32 %v1117_v46, %v988_v60  ;;  %v995_v19 = vmul.f32 %v11449_v36, %v11449_v36  ;;  %v1124_v49 = vadd.f32 %v993_v4, %v992_v44  ;;  %v11482_v35 = vsub.f32 %v10853_v38, %v11401_v25  ;;  %v14492_v60 = vld [vmem:[#allocation48_spill] sm:$0xff] }
 0x1fb   : > { %14486 = vst [vmem:[#allocation124_spill] sm:$0xff] %v11473_v37  ;;  %14487 = vst [vmem:[#allocation125_spill] sm:$0xff] %v11476_v20  ;;  %1104 = vadd.xlane.f32.xlu1 %v1103_v45  ;;  %v11486_v43 = vsub.f32 %v10861_v42, %v11401_v25  ;;  %v11490_v55 = vsub.f32 %v14490_v5, %v11401_v25  ;;  %v990_v11 = vmul.f32 %v11446_v40, %v11446_v40  ;;  %v14494_v4 = vld [vmem:[#allocation32_spill] sm:$0xff] }
 0x1fc   : > { %14488 = vst [vmem:[#allocation126_spill] sm:$0xff] %v11482_v35  ;;  %v991_v57 = vmul.f32 %v11455_v54, %v11455_v54  ;;  %v1119_v53 = vadd.f32 %v1118_v33, %v989_v13  ;;  %v11497_v46 = vsub.f32 %v14492_v60, %v820_v24  ;;  %v11499_v38 = vmul.f32 0.0009765625, %v778_v8 }
 0x1fd   : > { %14489 = vst [vmem:[#allocation127_spill] sm:$0xff] %v11486_v43  ;;  %14491 = vst [vmem:[#allocation31_spill] sm:$0xff] %v11490_v55  ;;  %v1125_v42 = vadd.f32 %v1124_v49, %v994_v56  ;;  %v11505_v45 = vsub.f32 %v14494_v4, %v11401_v25  ;;  %v996_v36 = vmul.f32 %v11468_v23, %v11468_v23  ;;  %v14498_v4 = vld [vmem:[#allocation37_spill] sm:$0xff] }
 0x1fe   : > { %v769_v22 = vpop.xlane.xlu0 %768  ;;  %14493 = vst [vmem:[#allocation48_spill] sm:$0xff] %v11497_v46  ;;  %v1120_v5 = vadd.f32 %v1119_v53, %v990_v11  ;;  %v1000_v32 = vmul.f32 %v11482_v35, %v11482_v35  ;;  %v1001_v24 = vmul.f32 %v11486_v43, %v11486_v43  ;;  %v997_v13 = vmul.f32 %v11473_v37, %v11473_v37  ;;  %v14496_v53 = vld [vmem:[#allocation33_spill] sm:$0xff] }
 0x1ff   : > { %v11501_v44 = vmul.f32 0.0009765625, %v769_v22  ;;  %14495 = vst [vmem:[#allocation32_spill] sm:$0xff] %v11505_v45  ;;  %v998_v56 = vmul.f32 %v11476_v20, %v11476_v20  ;;  %v1126_v8 = vadd.f32 %v1125_v42, %v995_v19  ;;  %v1002_v22 = vmul.f32 %v11490_v55, %v11490_v55  ;;  %v14500_v55 = vld [vmem:[#allocation40_spill] sm:$0xff] }
 0x200   : > { %v1121_v49 = vadd.f32 %v1120_v5, %v991_v57  ;;  %v999_v11 = vmul.f32 %v11497_v46, %v11497_v46  ;;  %v11523_v60 = vsub.f32 %v14496_v53, %v11401_v25  ;;  %v11527_v43 = vsub.f32 %v14498_v4, %v11401_v25  ;;  %v14502_v5 = vld [vmem:[#allocation38_spill] sm:$0xff]  ;;  %v14504_v53 = vld [vmem:[#allocation41_spill] sm:$0xff] }
 0x201   : > { %v1127_v37 = vadd.f32 %v1126_v8, %v996_v36  ;;  %v1003_v19 = vmul.f32 %v11505_v45, %v11505_v45  ;;  %v1133_v42 = vadd.f32 %v1001_v24, %v1000_v32  ;;  %v11533_v57 = vsub.f32 %v14500_v55, %v11442_v29  ;;  %v14506_v4 = vld [vmem:[#allocation42_spill] sm:$0xff]  ;;  %v14508_v8 = vld [vmem:[#allocation45_spill] sm:$0xff] }
 0x202   : > { %v796_v33 = vpop.xlane.xlu1 %795  ;;  %14497 = vst [vmem:[#allocation33_spill] sm:$0xff] %v11523_v60  ;;  %14499 = vst [vmem:[#allocation37_spill] sm:$0xff] %v11527_v43  ;;  %1122 = vadd.xlane.f32.xlu1 %v1121_v49  ;;  %v11537_v46 = vsub.f32 %v14502_v5, %v11401_v25  ;;  %v11541_v20 = vsub.f32 %v14504_v53, %v11442_v29  ;;  %v11545_v36 = vsub.f32 %v14506_v4, %v11442_v29  ;;  %v14510_v49 = vld [vmem:[#allocation43_spill] sm:$0xff] }
 0x203   : > { %14501 = vst [vmem:[#allocation40_spill] sm:$0xff] %v11533_v57  ;;  %v11549_v32 = vsub.f32 %v14508_v8, %v11442_v29  ;;  %v11551_v24 = vmul.f32 0.0009765625, %v796_v33  ;;  %v1128_v55 = vadd.f32 %v1127_v37, %v997_v13  ;;  %v11555_v45 = vsub.f32 %v14510_v49, %v11401_v25 }
 0x204   : > { %14503 = vst [vmem:[#allocation38_spill] sm:$0xff] %v11537_v46  ;;  %14505 = vst [vmem:[#allocation41_spill] sm:$0xff] %v11541_v20  ;;  %v1134_v5 = vadd.f32 %v1133_v42, %v1002_v22  ;;  %v1004_v53 = vmul.f32 %v11523_v60, %v11523_v60  ;;  %v1008_v4 = vmul.f32 %v11533_v57, %v11533_v57  ;;  %v14512_v22 = vld [vmem:[#allocation52_spill] sm:$0xff]  ;;  %v14514_v42 = vld [vmem:[#allocation58_spill] sm:$0xff] }
 0x205   : > { %v787_v35 = vpop.xlane.xlu0 %786  ;;  %14507 = vst [vmem:[#allocation42_spill] sm:$0xff] %v11545_v36  ;;  %14509 = vst [vmem:[#allocation45_spill] sm:$0xff] %v11549_v32  ;;  %v1009_v8 = vmul.f32 %v11541_v20, %v11541_v20  ;;  %v1129_v18 = vadd.f32 %v1128_v55, %v998_v56  ;;  %v1005_v37 = vmul.f32 %v11527_v43, %v11527_v43 }
 0x206   : > { %14511 = vst [vmem:[#allocation43_spill] sm:$0xff] %v11555_v45  ;;  %v11557_v23 = vmul.f32 0.0009765625, %v787_v35  ;;  %v1135_v13 = vadd.f32 %v1134_v5, %v1003_v19  ;;  %v1010_v25 = vmul.f32 %v11545_v36, %v11545_v36  ;;  %v1006_v35 = vmul.f32 %v11537_v46, %v11537_v46  ;;  %v14516_v5 = vld [vmem:[#allocation34_spill] sm:$0xff] }
 0x207   : > { %v11573_v33 = vsub.f32 %v14512_v22, %v11442_v29  ;;  %v11577_v49 = vsub.f32 %v14514_v42, %v11442_v29  ;;  %v1011_v56 = vmul.f32 %v11549_v32, %v11549_v32  ;;  %v1130_v55 = vadd.f32 %v1129_v18, %v999_v11  ;;  %v14518_v22 = vld [vmem:[#allocation35_spill] sm:$0xff]  ;;  %v14520_v42 = vld [vmem:[#allocation36_spill] sm:$0xff] }
 0x208   : > { %v1136_v20 = vadd.f32 %v1135_v13, %v1004_v53  ;;  %v1142_v19 = vadd.f32 %v1009_v8, %v1008_v4  ;;  %v11583_v36 = vsub.f32 %v14516_v5, %v11403_v27  ;;  %v1007_v57 = vmul.f32 %v11555_v45, %v11555_v45  ;;  %v14522_v32 = vld [vmem:[#allocation39_spill] sm:$0xff]  ;;  %v14524_v53 = vld [vmem:[#allocation60_spill] sm:$0xff]  ;;  %v14525_v8 = vld [vmem:[#allocation66_spill] sm:$0xff] }
 0x209   : > { %14513 = vst [vmem:[#allocation52_spill] sm:$0xff] %v11573_v33  ;;  %14515 = vst [vmem:[#allocation58_spill] sm:$0xff] %v11577_v49  ;;  %v11589_v46 = vsub.f32 %v14518_v22, %v11403_v27  ;;  %v11593_v43 = vsub.f32 %v14520_v42, %v11403_v27  ;;  %v11597_v18 = vsub.f32 %v14522_v32, %v11403_v27  ;;  %1131 = vadd.xlane.f32.xlu0 %v1130_v55 }
 0x20a   : > { %14517 = vst [vmem:[#allocation34_spill] sm:$0xff] %v11583_v36  ;;  %v1137_v11 = vadd.f32 %v1136_v20, %v1005_v37  ;;  %v11601_v4 = vsub.f32 %v14524_v53, %v11442_v29  ;;  %v11605_v13 = vsub.f32 %v14525_v8, %v11442_v29  ;;  %v1143_v5 = vadd.f32 %v1142_v19, %v1010_v25  ;;  %v14526_v29 = vld [vmem:[#allocation44_spill] sm:$0xff]  ;;  %v14528_v19 = vld [vmem:[#allocation49_spill] sm:$0xff] }
 0x20b   : > { %14519 = vst [vmem:[#allocation35_spill] sm:$0xff] %v11589_v46  ;;  %14521 = vst [vmem:[#allocation36_spill] sm:$0xff] %v11593_v43  ;;  %v1012_v22 = vmul.f32 %v11573_v33, %v11573_v33  ;;  %v1016_v42 = vmul.f32 %v11583_v36, %v11583_v36  ;;  %v1017_v32 = vmul.f32 %v11589_v46, %v11589_v46  ;;  %v14530_v36 = vld [vmem:[#allocation51_spill] sm:$0xff] }
 0x20c   : > { %14523 = vst [vmem:[#allocation39_spill] sm:$0xff] %v11597_v18  ;;  %v1018_v20 = vmul.f32 %v11593_v43, %v11593_v43  ;;  %v1138_v37 = vadd.f32 %v1137_v11, %v1006_v35  ;;  %v1013_v55 = vmul.f32 %v11577_v49, %v11577_v49  ;;  %v1144_v53 = vadd.f32 %v1143_v5, %v1011_v56  ;;  %v14532_v56 = vld [vmem:[#allocation54_spill] sm:$0xff] }
 0x20d   : > { %v11619_v25 = vsub.f32 %v14526_v29, %v11403_v27  ;;  %v11623_v8 = vsub.f32 %v14528_v19, %v11403_v27  ;;  %v11627_v33 = vsub.f32 %v14530_v36, %v11403_v27  ;;  %v1019_v43 = vmul.f32 %v11597_v18, %v11597_v18  ;;  %v14534_v29 = vld [vmem:[#allocation55_spill] sm:$0xff]  ;;  %v14536_v36 = vld [vmem:[#allocation56_spill] sm:$0xff] }
 0x20e   : > { %v1151_v35 = vadd.f32 %v1017_v32, %v1016_v42  ;;  %v1139_v11 = vadd.f32 %v1138_v37, %v1007_v57  ;;  %v1145_v46 = vadd.f32 %v1144_v53, %v1012_v22  ;;  %v11633_v5 = vsub.f32 %v14532_v56, %v11465_v50  ;;  %v14538_v42 = vld [vmem:[#allocation61_spill] sm:$0xff] }
 0x20f   : > { %14527 = vst [vmem:[#allocation60_spill] sm:$0xff] %v11619_v25  ;;  %14529 = vst [vmem:[#allocation66_spill] sm:$0xff] %v11623_v8  ;;  %v11637_v49 = vsub.f32 %v14534_v29, %v11465_v50  ;;  %v1014_v19 = vmul.f32 %v11601_v4, %v11601_v4  ;;  %v11643_v60 = vsub.f32 %v14536_v36, %v11465_v50  ;;  %v14540_v37 = vld [vmem:[#allocation57_spill] sm:$0xff] }
 0x210   : > { %14531 = vst [vmem:[#allocation44_spill] sm:$0xff] %v11627_v33  ;;  %14533 = vst [vmem:[#allocation49_spill] sm:$0xff] %v11633_v5  ;;  %v1152_v45 = vadd.f32 %v1151_v35, %v1018_v20  ;;  %v11647_v57 = vsub.f32 %v14538_v42, %v11465_v50  ;;  %1140 = vadd.xlane.f32.xlu1 %v1139_v11  ;;  %v1015_v22 = vmul.f32 %v11605_v13, %v11605_v13 }
 0x211   : > { %14535 = vst [vmem:[#allocation51_spill] sm:$0xff] %v11637_v49  ;;  %14537 = vst [vmem:[#allocation54_spill] sm:$0xff] %v11643_v60  ;;  %v1146_v32 = vadd.f32 %v1145_v46, %v1013_v55  ;;  %v11653_v53 = vsub.f32 %v14540_v37, %v11403_v27  ;;  %v1020_v20 = vmul.f32 %v11619_v25, %v11619_v25  ;;  %v14542_v55 = vld [vmem:[#allocation68_spill] sm:$0xff] }
 0x212   : > { %14539 = vst [vmem:[#allocation55_spill] sm:$0xff] %v11647_v57  ;;  %v1153_v35 = vadd.f32 %v1152_v45, %v1019_v43  ;;  %v1024_v56 = vmul.f32 %v11633_v5, %v11633_v5  ;;  %v1025_v29 = vmul.f32 %v11637_v49, %v11637_v49  ;;  %v1026_v11 = vmul.f32 %v11643_v60, %v11643_v60  ;;  %v14544_v45 = vld [vmem:[#allocation73_spill] sm:$0xff] }
 0x213   : > { %14541 = vst [vmem:[#allocation56_spill] sm:$0xff] %v11653_v53  ;;  %v1147_v36 = vadd.f32 %v1146_v32, %v1014_v19  ;;  %v1021_v46 = vmul.f32 %v11623_v8, %v11623_v8  ;;  %v1022_v27 = vmul.f32 %v11627_v33, %v11627_v33  ;;  %v11669_v42 = vsub.f32 %v14542_v55, %v11465_v50  ;;  %v14546_v32 = vld [vmem:[#allocation46_spill] sm:$0xff]  ;;  %v14548_v33 = vld [vmem:[#allocation47_spill] sm:$0xff] }
 0x214   : > { %v1154_v43 = vadd.f32 %v1153_v35, %v1020_v20  ;;  %v11673_v37 = vsub.f32 %v14544_v45, %v11465_v50  ;;  %v1027_v49 = vmul.f32 %v11647_v57, %v11647_v57  ;;  %v1160_v60 = vadd.f32 %v1025_v29, %v1024_v56  ;;  %v14550_v55 = vld [vmem:[#allocation50_spill] sm:$0xff]  ;;  %v14552_v56 = vld [vmem:[#allocation53_spill] sm:$0xff]  ;;  %v14554_v29 = vld [vmem:[#allocation75_spill] sm:$0xff] }
 0x215   : > { %14543 = vst [vmem:[#allocation61_spill] sm:$0xff] %v11669_v42  ;;  %v1148_v19 = vadd.f32 %v1147_v36, %v1015_v22  ;;  %v11679_v5 = vsub.f32 %v14546_v32, %v11451_v1  ;;  %v11683_v8 = vsub.f32 %v14548_v33, %v11451_v1  ;;  %v11687_v20 = vsub.f32 %v14550_v55, %v11451_v1  ;;  %v14555_v33 = vld [vmem:[#allocation81_spill] sm:$0xff] }
 0x216   : > { %14545 = vst [vmem:[#allocation57_spill] sm:$0xff] %v11673_v37  ;;  %v1023_v35 = vmul.f32 %v11653_v53, %v11653_v53  ;;  %v1155_v45 = vadd.f32 %v1154_v43, %v1021_v46  ;;  %v1161_v25 = vadd.f32 %v1160_v60, %v1026_v11  ;;  %v11693_v22 = vsub.f32 %v14552_v56, %v11451_v1  ;;  %v805_v56 = vpop.xlane.xlu0 %804 }
 0x217   : > { %14547 = vst [vmem:[#allocation68_spill] sm:$0xff] %v11679_v5  ;;  %14549 = vst [vmem:[#allocation73_spill] sm:$0xff] %v11683_v8  ;;  %1149 = vadd.xlane.f32.xlu0 %v1148_v19  ;;  %v11697_v36 = vsub.f32 %v14554_v29, %v11465_v50  ;;  %v11701_v32 = vsub.f32 %v14555_v33, %v11465_v50  ;;  %v1028_v55 = vmul.f32 %v11669_v42, %v11669_v42  ;;  %v14556_v50 = vld [vmem:[#allocation59_spill] sm:$0xff] }
 0x218   : > { %14551 = vst [vmem:[#allocation46_spill] sm:$0xff] %v11687_v20  ;;  %14553 = vst [vmem:[#allocation47_spill] sm:$0xff] %v11693_v22  ;;  %v1032_v46 = vmul.f32 %v11679_v5, %v11679_v5  ;;  %v1156_v60 = vadd.f32 %v1155_v45, %v1022_v27  ;;  %v1162_v11 = vadd.f32 %v1161_v25, %v1027_v49  ;;  %v14558_v42 = vld [vmem:[#allocation63_spill] sm:$0xff]  ;;  %v14562_v5 = vld [vmem:[#allocation70_spill] sm:$0xff] }
 0x219   : > { %v1033_v43 = vmul.f32 %v11683_v8, %v11683_v8  ;;  %v1034_v19 = vmul.f32 %v11687_v20, %v11687_v20  ;;  %v1029_v29 = vmul.f32 %v11673_v37, %v11673_v37  ;;  %v11715_v33 = vsub.f32 %v14556_v50, %v11451_v1  ;;  %v14560_v49 = vld [vmem:[#allocation67_spill] sm:$0xff] }
 0x21a   : > { %v11719_v57 = vsub.f32 %v14558_v42, %v11451_v1  ;;  %v11723_v25 = vsub.f32 %v14560_v49, %v11451_v1  ;;  %v1157_v27 = vadd.f32 %v1156_v60, %v1023_v35  ;;  %v1163_v45 = vadd.f32 %v1162_v11, %v1028_v55  ;;  %v14564_v50 = vld [vmem:[#allocation71_spill] sm:$0xff]  ;;  %v14566_v42 = vld [vmem:[#allocation74_spill] sm:$0xff]  ;;  %v14568_v49 = vld [vmem:[#allocation77_spill] sm:$0xff] }
 0x21b   : > { %14557 = vst [vmem:[#allocation50_spill] sm:$0xff] %v11715_v33  ;;  %v1035_v20 = vmul.f32 %v11693_v22, %v11693_v22  ;;  %v1169_v8 = vadd.f32 %v1033_v43, %v1032_v46  ;;  %v11729_v37 = vsub.f32 %v14562_v5, %v11501_v44  ;;  %v11733_v53 = vsub.f32 %v14564_v50, %v11501_v44  ;;  %v14569_v43 = vld [vmem:[#allocation72_spill] sm:$0xff] }
 0x21c   : > { %14559 = vst [vmem:[#allocation53_spill] sm:$0xff] %v11719_v57  ;;  %14561 = vst [vmem:[#allocation75_spill] sm:$0xff] %v11723_v25  ;;  %v11737_v18 = vsub.f32 %v14566_v42, %v11501_v44  ;;  %v11741_v35 = vsub.f32 %v14568_v49, %v11501_v44  ;;  %v11743_v55 = vmul.f32 0.0009765625, %v805_v56  ;;  %1158 = vadd.xlane.f32.xlu1 %v1157_v27 }
 0x21d   : > { %14563 = vst [vmem:[#allocation81_spill] sm:$0xff] %v11729_v37  ;;  %14565 = vst [vmem:[#allocation59_spill] sm:$0xff] %v11733_v53  ;;  %v1030_v46 = vmul.f32 %v11697_v36, %v11697_v36  ;;  %v1164_v5 = vadd.f32 %v1163_v45, %v1029_v29  ;;  %v1170_v60 = vadd.f32 %v1169_v8, %v1034_v19  ;;  %v14570_v29 = vld [vmem:[#allocation83_spill] sm:$0xff] }
 0x21e   : > { %14567 = vst [vmem:[#allocation63_spill] sm:$0xff] %v11737_v18  ;;  %v1031_v11 = vmul.f32 %v11701_v32, %v11701_v32  ;;  %v11751_v50 = vsub.f32 %v14569_v43, %v11451_v1  ;;  %v1040_v42 = vmul.f32 %v11729_v37, %v11729_v37  ;;  %v1041_v56 = vmul.f32 %v11733_v53, %v11733_v53 }
 0x21f   : > { %v1165_v49 = vadd.f32 %v1164_v5, %v1030_v46  ;;  %v1036_v27 = vmul.f32 %v11715_v33, %v11715_v33  ;;  %v1171_v22 = vadd.f32 %v1170_v60, %v1035_v20  ;;  %v1042_v8 = vmul.f32 %v11737_v18, %v11737_v18  ;;  %v14572_v20 = vld [vmem:[#allocation62_spill] sm:$0xff]  ;;  %v14574_v18 = vld [vmem:[#allocation87_spill] sm:$0xff] }
 0x220   : > { %v1037_v19 = vmul.f32 %v11719_v57, %v11719_v57  ;;  %v1038_v1 = vmul.f32 %v11723_v25, %v11723_v25  ;;  %v11767_v45 = vsub.f32 %v14570_v29, %v11501_v44  ;;  %v1043_v46 = vmul.f32 %v11741_v35, %v11741_v35  ;;  %v14576_v25 = vld [vmem:[#allocation64_spill] sm:$0xff]  ;;  %v14578_v29 = vld [vmem:[#allocation65_spill] sm:$0xff] }
 0x221   : > { %v1166_v5 = vadd.f32 %v1165_v49, %v1031_v11  ;;  %v1172_v43 = vadd.f32 %v1171_v22, %v1036_v27  ;;  %v1178_v53 = vadd.f32 %v1041_v56, %v1040_v42  ;;  %v11773_v60 = vsub.f32 %v14572_v20, %v11499_v38  ;;  %v14580_v11 = vld [vmem:[#allocation69_spill] sm:$0xff] }
 0x222   : > { %14571 = vst [vmem:[#allocation67_spill] sm:$0xff] %v11767_v45  ;;  %v11777_v37 = vsub.f32 %v14574_v18, %v11501_v44  ;;  %v11781_v57 = vsub.f32 %v14576_v25, %v11499_v38  ;;  %v11785_v33 = vsub.f32 %v14578_v29, %v11499_v38  ;;  %v11789_v22 = vsub.f32 %v14580_v11, %v11499_v38 }
 0x223   : > { %14573 = vst [vmem:[#allocation70_spill] sm:$0xff] %v11773_v60  ;;  %1167 = vadd.xlane.f32.xlu0 %v1166_v5  ;;  %v1039_v42 = vmul.f32 %v11751_v50, %v11751_v50  ;;  %v1173_v56 = vadd.f32 %v1172_v43, %v1037_v19  ;;  %v11795_v18 = vsub.f32 %v11159_v63, %v11501_v44 }
 0x224   : > { %14575 = vst [vmem:[#allocation71_spill] sm:$0xff] %v11777_v37  ;;  %14577 = vst [vmem:[#allocation74_spill] sm:$0xff] %v11781_v57  ;;  %v1179_v49 = vadd.f32 %v1178_v53, %v1042_v8  ;;  %v11799_v25 = vsub.f32 %v11180_v30, %v11501_v44  ;;  %v1048_v27 = vmul.f32 %v11773_v60, %v11773_v60  ;;  %v14584_v53 = vld [vmem:[#allocation76_spill] sm:$0xff]  ;;  %v14586_v44 = vld [vmem:[#allocation82_spill] sm:$0xff] }
 0x225   : > { %14579 = vst [vmem:[#allocation77_spill] sm:$0xff] %v11785_v33  ;;  %14581 = vst [vmem:[#allocation72_spill] sm:$0xff] %v11789_v22  ;;  %v1049_v20 = vmul.f32 %v11781_v57, %v11781_v57  ;;  %v1050_v5 = vmul.f32 %v11785_v33, %v11785_v33  ;;  %v1174_v29 = vadd.f32 %v1173_v56, %v1038_v1  ;;  %v14588_v57 = vld [vmem:[#allocation86_spill] sm:$0xff] }
 0x226   : > { %14582 = vst [vmem:[#allocation83_spill] sm:$0xff] %v11795_v18  ;;  %14583 = vst [vmem:[#allocation62_spill] sm:$0xff] %v11799_v25  ;;  %v1044_v19 = vmul.f32 %v11767_v45, %v11767_v45  ;;  %v1180_v63 = vadd.f32 %v1179_v49, %v1043_v46  ;;  %v11811_v8 = vsub.f32 %v14584_v53, %v11499_v38  ;;  %v14590_v49 = vld [vmem:[#allocation88_spill] sm:$0xff] }
 0x227   : > { %v1045_v30 = vmul.f32 %v11777_v37, %v11777_v37  ;;  %v11817_v43 = vsub.f32 %v14586_v44, %v11499_v38  ;;  %v1051_v11 = vmul.f32 %v11789_v22, %v11789_v22  ;;  %v1187_v33 = vadd.f32 %v1049_v20, %v1048_v27  ;;  %v14592_v44 = vld [vmem:[#allocation89_spill] sm:$0xff]  ;;  %v14594_v27 = vld [vmem:[#allocation92_spill] sm:$0xff] }
 0x228   : > { %14585 = vst [vmem:[#allocation87_spill] sm:$0xff] %v11811_v8  ;;  %v1175_v1 = vadd.f32 %v1174_v29, %v1039_v42  ;;  %v1181_v56 = vadd.f32 %v1180_v63, %v1044_v19  ;;  %v11823_v46 = vsub.f32 %v14588_v57, %v11557_v23  ;;  %v11827_v53 = vsub.f32 %v14590_v49, %v11557_v23  ;;  %v14596_v29 = vld [vmem:[#allocation84_spill] sm:$0xff] }
 0x229   : > { %14587 = vst [vmem:[#allocation64_spill] sm:$0xff] %v11817_v43  ;;  %v1046_v60 = vmul.f32 %v11795_v18, %v11795_v18  ;;  %v1188_v37 = vadd.f32 %v1187_v33, %v1050_v5  ;;  %v11833_v45 = vsub.f32 %v14592_v44, %v11557_v23  ;;  %v11837_v42 = vsub.f32 %v14594_v27, %v11557_v23 }
 0x22a   : > { %14589 = vst [vmem:[#allocation65_spill] sm:$0xff] %v11823_v46  ;;  %14591 = vst [vmem:[#allocation69_spill] sm:$0xff] %v11827_v53  ;;  %1176 = vadd.xlane.f32.xlu1 %v1175_v1  ;;  %v1047_v57 = vmul.f32 %v11799_v25, %v11799_v25  ;;  %v1182_v20 = vadd.f32 %v1181_v56, %v1045_v30  ;;  %v11843_v19 = vsub.f32 %v14596_v29, %v11499_v38  ;;  %v14598_v30 = vld [vmem:[#allocation90_spill] sm:$0xff] }
 0x22b   : > { %14593 = vst [vmem:[#allocation76_spill] sm:$0xff] %v11833_v45  ;;  %14595 = vst [vmem:[#allocation82_spill] sm:$0xff] %v11837_v42  ;;  %v1052_v33 = vmul.f32 %v11811_v8, %v11811_v8  ;;  %v1189_v5 = vadd.f32 %v1188_v37, %v1051_v11  ;;  %v1056_v63 = vmul.f32 %v11823_v46, %v11823_v46  ;;  %v14600_v29 = vld [vmem:[#allocation98_spill] sm:$0xff] }
 0x22c   : > { %14597 = vst [vmem:[#allocation86_spill] sm:$0xff] %v11843_v19  ;;  %v1057_v49 = vmul.f32 %v11827_v53, %v11827_v53  ;;  %v1058_v1 = vmul.f32 %v11833_v45, %v11833_v45  ;;  %v1183_v44 = vadd.f32 %v1182_v20, %v1046_v60  ;;  %v11855_v56 = vsub.f32 %v14598_v30, %v11499_v38  ;;  %v14603_v38 = vld [vmem:[#allocation78_spill] sm:$0xff]  ;;  %v14605_v53 = vld [vmem:[#allocation79_spill] sm:$0xff] }
 0x22d   : > { %v1053_v27 = vmul.f32 %v11817_v43, %v11817_v43  ;;  %v11861_v37 = vsub.f32 %v14600_v29, %v11557_v23  ;;  %v1190_v11 = vadd.f32 %v1189_v5, %v1052_v33  ;;  %v11865_v46 = vsub.f32 %v11217_v7, %v11557_v23  ;;  %v14607_v29 = vld [vmem:[#allocation80_spill] sm:$0xff] }
 0x22e   : > { %14599 = vst [vmem:[#allocation88_spill] sm:$0xff] %v11855_v56  ;;  %v1059_v45 = vmul.f32 %v11837_v42, %v11837_v42  ;;  %v1196_v60 = vadd.f32 %v1057_v49, %v1056_v63  ;;  %v1184_v20 = vadd.f32 %v1183_v44, %v1047_v57  ;;  %v11871_v30 = vsub.f32 %v14603_v38, %v11551_v24  ;;  %v14609_v63 = vld [vmem:[#allocation85_spill] sm:$0xff] }
 0x22f   : > { %14601 = vst [vmem:[#allocation89_spill] sm:$0xff] %v11861_v37  ;;  %14602 = vst [vmem:[#allocation92_spill] sm:$0xff] %v11865_v46  ;;  %v11875_v43 = vsub.f32 %v14605_v53, %v11551_v24  ;;  %v11879_v33 = vsub.f32 %v14607_v29, %v11551_v24  ;;  %v1054_v7 = vmul.f32 %v11843_v19, %v11843_v19 }
 0x230   : > { %14604 = vst [vmem:[#allocation84_spill] sm:$0xff] %v11871_v30  ;;  %v1191_v5 = vadd.f32 %v1190_v11, %v1053_v27  ;;  %v1197_v8 = vadd.f32 %v1196_v60, %v1058_v1  ;;  %v11885_v57 = vsub.f32 %v14609_v63, %v11551_v24  ;;  %1185 = vadd.xlane.f32.xlu0 %v1184_v20  ;;  %v814_v20 = vpop.xlane.xlu1 %813  ;;  %v14613_v63 = vld [vmem:[#allocation91_spill] sm:$0xff] }
 0x231   : > { %14606 = vst [vmem:[#allocation90_spill] sm:$0xff] %v11875_v43  ;;  %14608 = vst [vmem:[#allocation98_spill] sm:$0xff] %v11879_v33  ;;  %v1055_v49 = vmul.f32 %v11855_v56, %v11855_v56  ;;  %v11891_v53 = vsub.f32 %v11235_v47, %v11557_v23  ;;  %v1060_v44 = vmul.f32 %v11861_v37, %v11861_v37  ;;  %v14651_v56 = vld [vmem:[#allocation117_spill] sm:$0xff] }
 0x232   : > { %14610 = vst [vmem:[#allocation78_spill] sm:$0xff] %v11885_v57  ;;  %v1064_v38 = vmul.f32 %v11871_v30, %v11871_v30  ;;  %v1192_v27 = vadd.f32 %v1191_v5, %v1054_v7  ;;  %v1198_v1 = vadd.f32 %v1197_v8, %v1059_v45  ;;  %v1065_v11 = vmul.f32 %v11875_v43, %v11875_v43  ;;  %v14615_v45 = vld [vmem:[#allocation95_spill] sm:$0xff]  ;;  %v14619_v30 = vld [vmem:[#allocation101_spill] sm:$0xff] }
 0x233   : > { %14611 = vst [vmem:[#allocation79_spill] sm:$0xff] %v11891_v53  ;;  %v1066_v60 = vmul.f32 %v11879_v33, %v11879_v33  ;;  %v11903_v29 = vsub.f32 %v11248_v52, %v11557_v23  ;;  %v1061_v47 = vmul.f32 %v11865_v46, %v11865_v46  ;;  %v11909_v37 = vsub.f32 %v14613_v63, %v11551_v24  ;;  %v14617_v52 = vld [vmem:[#allocation100_spill] sm:$0xff]  ;;  %v14621_v63 = vld [vmem:[#allocation102_spill] sm:$0xff] }
 0x234   : > { %v11913_v8 = vsub.f32 %v14615_v45, %v11551_v24  ;;  %v1193_v7 = vadd.f32 %v1192_v27, %v1055_v49  ;;  %v1199_v5 = vadd.f32 %v1198_v1, %v1060_v44  ;;  %v1067_v33 = vmul.f32 %v11885_v57, %v11885_v57 }
 0x235   : > { %14612 = vst [vmem:[#allocation80_spill] sm:$0xff] %v11903_v29  ;;  %14614 = vst [vmem:[#allocation85_spill] sm:$0xff] %v11909_v37  ;;  %v1205_v43 = vadd.f32 %v1065_v11, %v1064_v38  ;;  %v11919_v23 = vsub.f32 %v14617_v52, %v11743_v55  ;;  %v11923_v46 = vsub.f32 %v14619_v30, %v11743_v55  ;;  %v831_v44 = vmul.f32 0.0009765625, %v814_v20  ;;  %v14624_v30 = vld [vmem:[#allocation97_spill] sm:$0xff] }
 0x236   : > { %14616 = vst [vmem:[#allocation91_spill] sm:$0xff] %v11913_v8  ;;  %v11927_v42 = vsub.f32 %v14621_v63, %v11743_v55  ;;  %v11931_v49 = vsub.f32 %v11231_v0, %v11743_v55  ;;  %1194 = vadd.xlane.f32.xlu1 %v1193_v7  ;;  %v1062_v38 = vmul.f32 %v11891_v53, %v11891_v53 }
 0x237   : > { %14618 = vst [vmem:[#allocation95_spill] sm:$0xff] %v11919_v23  ;;  %14620 = vst [vmem:[#allocation100_spill] sm:$0xff] %v11923_v46  ;;  %v1200_v27 = vadd.f32 %v1199_v5, %v1061_v47  ;;  %v1206_v1 = vadd.f32 %v1205_v43, %v1066_v60  ;;  %v1063_v11 = vmul.f32 %v11903_v29, %v11903_v29  ;;  %v14626_v60 = vld [vmem:[#allocation104_spill] sm:$0xff] }
 0x238   : > { %14622 = vst [vmem:[#allocation101_spill] sm:$0xff] %v11927_v42  ;;  %14623 = vst [vmem:[#allocation102_spill] sm:$0xff] %v11931_v49  ;;  %v11939_v45 = vsub.f32 %v14624_v30, %v11551_v24  ;;  %v1072_v52 = vmul.f32 %v11919_v23, %v11919_v23  ;;  %v1073_v0 = vmul.f32 %v11923_v46, %v11923_v46  ;;  %v14628_v30 = vld [vmem:[#allocation106_spill] sm:$0xff] }
 0x239   : > { %v1201_v20 = vadd.f32 %v1200_v27, %v1062_v38  ;;  %v1068_v7 = vmul.f32 %v11909_v37, %v11909_v37  ;;  %v1207_v63 = vadd.f32 %v1206_v1, %v1067_v33  ;;  %v1074_v43 = vmul.f32 %v11927_v42, %v11927_v42  ;;  %v14630_v1 = vld [vmem:[#allocation93_spill] sm:$0xff]  ;;  %v14632_v42 = vld [vmem:[#allocation94_spill] sm:$0xff] }
 0x23a   : > { %14625 = vst [vmem:[#allocation97_spill] sm:$0xff] %v11939_v45  ;;  %v11951_v47 = vsub.f32 %v14626_v60, %v11551_v24  ;;  %v1069_v5 = vmul.f32 %v11913_v8, %v11913_v8  ;;  %v11957_v23 = vsub.f32 %v14628_v30, %v11743_v55  ;;  %v1075_v38 = vmul.f32 %v11931_v49, %v11931_v49  ;;  %v14634_v24 = vld [vmem:[#allocation96_spill] sm:$0xff]  ;;  %v14636_v8 = vld [vmem:[#allocation99_spill] sm:$0xff] }
 0x23b   : > { %v1202_v27 = vadd.f32 %v1201_v20, %v1063_v11  ;;  %v1208_v46 = vadd.f32 %v1207_v63, %v1068_v7  ;;  %v1214_v33 = vadd.f32 %v1073_v0, %v1072_v52  ;;  %v11962_v37 = vsub.f32 %v14630_v1, %v831_v44 }
 0x23c   : > { %14627 = vst [vmem:[#allocation104_spill] sm:$0xff] %v11951_v47  ;;  %14629 = vst [vmem:[#allocation106_spill] sm:$0xff] %v11957_v23  ;;  %v11965_v57 = vsub.f32 %v14632_v42, %v831_v44  ;;  %v11968_v60 = vsub.f32 %v14634_v24, %v831_v44  ;;  %v11971_v29 = vsub.f32 %v14636_v8, %v831_v44 }
 0x23d   : > { %14631 = vst [vmem:[#allocation93_spill] sm:$0xff] %v11962_v37  ;;  %1203 = vadd.xlane.f32.xlu0 %v1202_v27  ;;  %v1070_v30 = vmul.f32 %v11939_v45, %v11939_v45  ;;  %v1209_v49 = vadd.f32 %v1208_v46, %v1069_v5  ;;  %v11977_v11 = vsub.f32 %v11257_v41, %v11743_v55 }
 0x23e   : > { %14633 = vst [vmem:[#allocation94_spill] sm:$0xff] %v11965_v57  ;;  %14635 = vst [vmem:[#allocation96_spill] sm:$0xff] %v11968_v60  ;;  %v1215_v52 = vadd.f32 %v1214_v33, %v1074_v43  ;;  %v1071_v42 = vmul.f32 %v11951_v47, %v11951_v47  ;;  %v1080_v0 = vmul.f32 %v11962_v37, %v11962_v37  ;;  %v14640_v43 = vld [vmem:[#allocation103_spill] sm:$0xff]  ;;  %v14648_v47 = vld [vmem:[#allocation110_spill] sm:$0xff] }
 0x23f   : > { %14637 = vst [vmem:[#allocation99_spill] sm:$0xff] %v11971_v29  ;;  %14638 = vst [vmem:[#allocation128_spill] sm:$0xff] %v11977_v11  ;;  %v1081_v8 = vmul.f32 %v11965_v57, %v11965_v57  ;;  %v1082_v20 = vmul.f32 %v11968_v60, %v11968_v60  ;;  %v1210_v7 = vadd.f32 %v1209_v49, %v1070_v30  ;;  %v14643_v30 = vld [vmem:[#allocation105_spill] sm:$0xff] }
 0x240   : > { %v11989_v46 = vsub.f32 %v11266_v59, %v11743_v55  ;;  %v1076_v41 = vmul.f32 %v11957_v23, %v11957_v23  ;;  %v1216_v63 = vadd.f32 %v1215_v52, %v1075_v38  ;;  %v11994_v5 = vsub.f32 %v14640_v43, %v831_v44  ;;  %v14647_v23 = vld [vmem:[#allocation109_spill] sm:$0xff] }
 0x241   : > { %v1083_v27 = vmul.f32 %v11971_v29, %v11971_v29  ;;  %v1223_v33 = vadd.f32 %v1081_v8, %v1080_v0  ;;  %v1211_v1 = vadd.f32 %v1210_v7, %v1071_v42  ;;  %v12000_v24 = vsub.f32 %v11271_v17, %v11743_v55 }
 0x242   : > { %14639 = vst [vmem:[#allocation129_spill] sm:$0xff] %v11989_v46  ;;  %14641 = vst [vmem:[#allocation103_spill] sm:$0xff] %v11994_v5  ;;  %v1077_v59 = vmul.f32 %v11977_v11, %v11977_v11  ;;  %v1217_v49 = vadd.f32 %v1216_v63, %v1076_v41  ;;  %v12005_v60 = vsub.f32 %v14643_v30, %v831_v44 }
 0x243   : > { %14642 = vst [vmem:[#allocation130_spill] sm:$0xff] %v12000_v24  ;;  %v1224_v38 = vadd.f32 %v1223_v33, %v1082_v20  ;;  %1212 = vadd.xlane.f32.xlu1 %v1211_v1  ;;  %v1078_v52 = vmul.f32 %v11989_v46, %v11989_v46  ;;  %v12010_v0 = vsub.f32 %v11251_v51, %v831_v44 }
 0x244   : > { %14644 = vst [vmem:[#allocation105_spill] sm:$0xff] %v12005_v60  ;;  %v1218_v43 = vadd.f32 %v1217_v49, %v1077_v59  ;;  %v1084_v17 = vmul.f32 %v11994_v5, %v11994_v5  ;;  %v1079_v42 = vmul.f32 %v12000_v24, %v12000_v24  ;;  %v12017_v7 = vsub.f32 %v11260_v21, %v831_v44 }
 0x245   : > { %14645 = vst [vmem:[#allocation131_spill] sm:$0xff] %v12010_v0  ;;  %v1225_v55 = vadd.f32 %v1224_v38, %v1083_v27  ;;  %v1085_v20 = vmul.f32 %v12005_v60, %v12005_v60  ;;  %v1086_v51 = vmul.f32 %v12010_v0, %v12010_v0  ;;  %v1410_v49 = vlaneseq }
 0x246   : > { %v1219_v8 = vadd.f32 %v1218_v43, %v1078_v52  ;;  %14646 = vst [vmem:[#allocation132_spill] sm:$0xff] %v12017_v7  ;;  %v1087_v27 = vmul.f32 %v12017_v7, %v12017_v7 }
 0x247   : > { %v1226_v41 = vadd.f32 %v1225_v55, %v1084_v17  ;;  %v1411_v44 = vshrl.u32 %v1410_v49, 7  ;;  %v1408_v17 = vld [vmem:[#allocation7] sm:$0xff] }
 0x248   : > { %v1220_v63 = vadd.f32 %v1219_v8, %v1079_v42 }
 0x249   : > { %v1227_v33 = vadd.f32 %v1226_v41, %v1085_v20  ;;  %v1412_v52 = vsub.s32 0, %v1411_v44  ;;  %v1416_v43 = vsub.s32 1, %v1411_v44  ;;  %v1420_v55 = vsub.s32 2, %v1411_v44 }
 0x24a   : > { %1221 = vadd.xlane.f32.xlu0 %v1220_v63  ;;  %v1424_v42 = vsub.s32 3, %v1411_v44  ;;  %v1428_v8 = vsub.s32 4, %v1411_v44  ;;  %v1432_v20 = vsub.s32 5, %v1411_v44  ;;  %v1436_v0 = vsub.s32 6, %v1411_v44 }
 0x24b   : > { %v1228_v1 = vadd.f32 %v1227_v33, %v1086_v51  ;;  %v1440_v7 = vsub.s32 7, %v1411_v44  ;;  %v1578_v33 = vld [vmem:[#allocation9] sm:$0xff] }
 0x24c   : > { %v12035_v60 = vrot.slane %v1408_v17, %v1432_v20  ;;  %v12037_v5 = vrot.slane %v1408_v17, %v1436_v0  ;;  %v12041_v44 = vrot.slane %v1578_v33, %v1412_v52  ;;  %v12045_v57 = vrot.slane %v1578_v33, %v1420_v55 }
 0x24d   : > { %v1229_v59 = vadd.f32 %v1228_v1, %v1087_v27  ;;  %v12025_v27 = vrot.slane %v1408_v17, %v1412_v52  ;;  %v12027_v1 = vrot.slane %v1408_v17, %v1416_v43  ;;  %v12039_v29 = vrot.slane %v1408_v17, %v1440_v7 }
 0x24e   : > { %v12051_v24 = vrot.slane %v1578_v33, %v1432_v20  ;;  %v12053_v46 = vrot.slane %v1578_v33, %v1436_v0  ;;  %v12055_v11 = vrot.slane %v1578_v33, %v1440_v7 }
 0x24f   : > { %1230 = vadd.xlane.f32.xlu1 %v1229_v59 }
 0x27f   : > { %v1096_v30 = vpop.xlane.xlu0 %1095 }
 0x280   : > { %v1232_v21 = vmul.f32 0.0009765625, %v1096_v30  ;;  %v12029_v30 = vrot.slane %v1408_v17, %v1420_v55 }
 0x282   : > { %v1248_v38 = vadd.f32 1e-05, %v1232_v21  ;;  %v12031_v21 = vrot.slane %v1408_v17, %v1424_v42 }
 0x283   : > { %v1114_v63 = vpop.xlane.xlu0 %1113 }
 0x284   : > { %9515 = vrsqrt.f32 %v1248_v38  ;;  %v1234_v49 = vmul.f32 0.0009765625, %v1114_v63  ;;  %v12033_v38 = vrot.slane %v1408_v17, %v1428_v8  ;;  %v12047_v63 = vrot.slane %v1578_v33, %v1424_v42 }
 0x286   : > { %v1250_v17 = vadd.f32 1e-05, %v1234_v49 }
 0x288   : > { %v1105_v41 = vpop.xlane.xlu1 %1104 }
 0x289   : > { %v1233_v51 = vmul.f32 0.0009765625, %v1105_v41  ;;  %v12043_v41 = vrot.slane %v1578_v33, %v1416_v43  ;;  %v14649_v43 = vld [vmem:[#allocation111_spill] sm:$0xff] }
 0x28b   : > { %v1249_v59 = vadd.f32 1e-05, %v1233_v51  ;;  %v12049_v51 = vrot.slane %v1578_v33, %v1428_v8  ;;  %v14650_v8 = vld [vmem:[#allocation116_spill] sm:$0xff] }
 0x28d   : > { %9517 = vrsqrt.f32 %v1249_v59 }
 0x28e   : > { %v9516_v37 = vpop.eup %9515  ;;  %9519 = vrsqrt.f32 %v1250_v17  ;;  %v14652_v17 = vld [vmem:[#allocation119_spill] sm:$0xff] }
 0x28f   : > { %v1280_v52 = vmul.f32 %v9516_v37, %v14647_v23  ;;  %v1281_v59 = vmul.f32 %v9516_v37, %v14648_v47  ;;  %v1282_v45 = vmul.f32 %v9516_v37, %v14649_v43  ;;  %v1283_v55 = vmul.f32 %v9516_v37, %v11294_v12 }
 0x290   : > { %v1284_v42 = vmul.f32 %v9516_v37, %v11314_v10  ;;  %v1285_v53 = vmul.f32 %v9516_v37, %v14650_v8  ;;  %v1286_v20 = vmul.f32 %v9516_v37, %v14651_v56  ;;  %v1287_v0 = vmul.f32 %v9516_v37, %v11323_v61 }
 0x291   : > { %v1450_v7 = vmul.f32 %v12025_v27, %v1280_v52  ;;  %v1451_v33 = vmul.f32 %v12027_v1, %v1281_v59  ;;  %v1452_v23 = vmul.f32 %v12029_v30, %v1282_v45  ;;  %v1453_v47 = vmul.f32 %v12031_v21, %v1283_v55 }
 0x292   : > { %v1454_v49 = vmul.f32 %v12033_v38, %v1284_v42  ;;  %v1455_v12 = vmul.f32 %v12035_v60, %v1285_v53  ;;  %v1456_v10 = vmul.f32 %v12037_v5, %v1286_v20  ;;  %v1457_v43 = vmul.f32 %v12039_v29, %v1287_v0 }
 0x293   : > { %v1620_v56 = vadd.f32 %v12041_v44, %v1450_v7  ;;  %v1621_v61 = vadd.f32 %v12043_v41, %v1451_v33  ;;  %v1622_v37 = vadd.f32 %v12045_v57, %v1452_v23  ;;  %v1623_v52 = vadd.f32 %v12047_v63, %v1453_v47 }
 0x294   : > { %v1624_v59 = vadd.f32 %v12049_v51, %v1454_v49  ;;  %v1625_v55 = vadd.f32 %v12051_v24, %v1455_v12  ;;  %v1626_v53 = vadd.f32 %v12053_v46, %v1456_v10  ;;  %v1627_v42 = vadd.f32 %v12055_v11, %v1457_v43 }
 0x296   : > { %v1132_v18 = vpop.xlane.xlu0 %1131 }
 0x297   : > { %v9518_v45 = vpop.eup %9517 }
 0x298   : > { %v1288_v8 = vmul.f32 %v9518_v45, %v11342_v3  ;;  %v1289_v20 = vmul.f32 %v9518_v45, %v14652_v17  ;;  %v1290_v0 = vmul.f32 %v9518_v45, %v11356_v26  ;;  %v1291_v7 = vmul.f32 %v9518_v45, %v11369_v28  ;;  %v1123_v17 = vpop.xlane.xlu1 %1122  ;;  %v12105_v22 = vpop.eup %9519 }
 0x299   : > { %v1292_v33 = vmul.f32 %v9518_v45, %v11374_v9  ;;  %v1293_v23 = vmul.f32 %v9518_v45, %v11377_v6  ;;  %v1294_v47 = vmul.f32 %v9518_v45, %v11380_v2  ;;  %v1295_v49 = vmul.f32 %v9518_v45, %v11385_v31 }
 0x29a   : > { %v1458_v12 = vmul.f32 %v12025_v27, %v1288_v8  ;;  %v1459_v10 = vmul.f32 %v12027_v1, %v1289_v20  ;;  %v1460_v3 = vmul.f32 %v12029_v30, %v1290_v0  ;;  %v1461_v43 = vmul.f32 %v12031_v21, %v1291_v7 }
 0x29b   : > { %v1462_v26 = vmul.f32 %v12033_v38, %v1292_v33  ;;  %v1463_v28 = vmul.f32 %v12035_v60, %v1293_v23  ;;  %v1464_v9 = vmul.f32 %v12037_v5, %v1294_v47  ;;  %v1465_v6 = vmul.f32 %v12039_v29, %v1295_v49 }
 0x29c   : > { %v1628_v2 = vadd.f32 %v12041_v44, %v1458_v12  ;;  %v1629_v31 = vadd.f32 %v12043_v41, %v1459_v10  ;;  %v1630_v45 = vadd.f32 %v12045_v57, %v1460_v3  ;;  %v1631_v8 = vadd.f32 %v12047_v63, %v1461_v43 }
 0x29d   : > { %v1632_v20 = vadd.f32 %v12049_v51, %v1462_v26  ;;  %v1633_v0 = vadd.f32 %v12051_v24, %v1463_v28  ;;  %v1634_v7 = vadd.f32 %v12053_v46, %v1464_v9  ;;  %v1635_v33 = vadd.f32 %v12055_v11, %v1465_v6  ;;  %v12107_v43 = vpop.xlane.xlu1 %1140  ;;  %v14655_v26 = vld [vmem:[#allocation112_spill] sm:$0xff]  ;;  %v14656_v6 = vld [vmem:[#allocation113_spill] sm:$0xff] }
 0x29e   : > { %v1748_v23 = vpack.c.bf16 %v1628_v2, %v1620_v56  ;;  %v1749_v47 = vpack.c.bf16 %v1629_v31, %v1621_v61  ;;  %v1750_v49 = vpack.c.bf16 %v1630_v45, %v1622_v37  ;;  %v1751_v19 = vpack.c.bf16 %v1631_v8, %v1623_v52  ;;  %v14657_v2 = vld [vmem:[#allocation114_spill] sm:$0xff]  ;;  %v14658_v45 = vld [vmem:[#allocation115_spill] sm:$0xff] }
 0x29f   : > { %v1752_v12 = vpack.c.bf16 %v1632_v20, %v1624_v59  ;;  %v1753_v10 = vpack.c.bf16 %v1633_v0, %v1625_v55  ;;  %v1754_v25 = vpack.c.bf16 %v1634_v7, %v1626_v53  ;;  %v1755_v3 = vpack.c.bf16 %v1635_v33, %v1627_v42  ;;  %v14654_v53 = vld [vmem:[#allocation108_spill] sm:$0xff]  ;;  %v14659_v0 = vld [vmem:[#allocation118_spill] sm:$0xff] }
 0x2a0   : > { %1812 = vst [vmem:[#allocation2] sm:$0xff] %v1748_v23  ;;  %1813 = vst [vmem:[#allocation2 + $0x8] sm:$0xff] %v1749_v47  ;;  %v1235_v56 = vmul.f32 0.0009765625, %v1123_v17  ;;  %v12113_v52 = vmul.f32 0.0009765625, %v1132_v18  ;;  %v10289_v59 = vmov 0.0   ;;  %v14653_v18 = vld [vmem:[#allocation107_spill] sm:$0xff]  ;;  %v1297_v42 = vmul.f32 %v12105_v22, %v14654_v53 }
 0x2a1   : > { %1814 = vst [vmem:[#allocation2 + $0x10] sm:$0xff] %v1750_v49  ;;  %1815 = vst [vmem:[#allocation2 + $0x18] sm:$0xff] %v1751_v19  ;;  %v1237_v19 = vmul.f32 0.0009765625, %v12107_v43  ;;  %v1298_v28 = vmul.f32 %v12105_v22, %v14655_v26  ;;  %v1299_v17 = vmul.f32 %v12105_v22, %v14656_v6  ;;  %v1300_v31 = vmul.f32 %v12105_v22, %v14657_v2 }
 0x2a2   : > { %1816 = vst [vmem:[#allocation2 + $0x20] sm:$0xff] %v1752_v12  ;;  %1817 = vst [vmem:[#allocation2 + $0x28] sm:$0xff] %v1753_v10  ;;  %v12111_v37 = vadd.f32 1e-05, %v1235_v56  ;;  %v1301_v8 = vmul.f32 %v12105_v22, %v14658_v45  ;;  %v1302_v7 = vmul.f32 %v12105_v22, %v14659_v0  ;;  %v1303_v33 = vmul.f32 %v12105_v22, %v11337_v34 }
 0x2a3   : > { %1818 = vst [vmem:[#allocation2 + $0x30] sm:$0xff] %v1754_v25  ;;  %1819 = vst [vmem:[#allocation2 + $0x38] sm:$0xff] %v1755_v3  ;;  %v1296_v25 = vmul.f32 %v12105_v22, %v14653_v18  ;;  %v1252_v23 = vadd.f32 1e-05, %v12113_v52  ;;  %v1253_v47 = vadd.f32 1e-05, %v1237_v19  ;;  %v1467_v12 = vmul.f32 %v12027_v1, %v1297_v42 }
 0x2a4   : > { %v12109_v61 = vpop.xlane.xlu0 %1149  ;;  %1876 = vst [vmem:[#allocation3] sm:$0xff] %v10289_v59  ;;  %1877 = vst [vmem:[#allocation3 + $0x8] sm:$0xff] %v10289_v59  ;;  %9521 = vrsqrt.f32 %v12111_v37  ;;  %v1468_v10 = vmul.f32 %v12029_v30, %v1298_v28  ;;  %v1469_v43 = vmul.f32 %v12031_v21, %v1299_v17  ;;  %v1470_v56 = vmul.f32 %v12033_v38, %v1300_v31 }
 0x2a5   : > { %1878 = vst [vmem:[#allocation3 + $0x10] sm:$0xff] %v10289_v59  ;;  %1879 = vst [vmem:[#allocation3 + $0x18] sm:$0xff] %v10289_v59  ;;  %v1238_v9 = vmul.f32 0.0009765625, %v12109_v61  ;;  %v1466_v49 = vmul.f32 %v12025_v27, %v1296_v25  ;;  %v1471_v61 = vmul.f32 %v12035_v60, %v1301_v8  ;;  %v1472_v34 = vmul.f32 %v12037_v5, %v1302_v7 }
 0x2a6   : > { %1880 = vst [vmem:[#allocation3 + $0x20] sm:$0xff] %v10289_v59  ;;  %1881 = vst [vmem:[#allocation3 + $0x28] sm:$0xff] %v10289_v59  ;;  %v1473_v22 = vmul.f32 %v12039_v29, %v1303_v33  ;;  %9523 = vrsqrt.f32 %v1252_v23  ;;  %v1637_v25 = vadd.f32 %v12043_v41, %v1467_v12  ;;  %v1639_v53 = vadd.f32 %v12047_v63, %v1469_v43 }
 0x2a7   : > { %1882 = vst [vmem:[#allocation3 + $0x30] sm:$0xff] %v10289_v59  ;;  %1883 = vst [vmem:[#allocation3 + $0x38] sm:$0xff] %v10289_v59  ;;  %v1254_v3 = vadd.f32 1e-05, %v1238_v9  ;;  %9525 = vrsqrt.f32 %v1253_v47  ;;  %v1636_v18 = vadd.f32 %v12041_v44, %v1466_v49  ;;  %v1640_v42 = vadd.f32 %v12049_v51, %v1470_v56 }
 0x2a8   : > { %1884 = vst [vmem:[#allocation3 + $0x40] sm:$0xff] %v10289_v59  ;;  %1885 = vst [vmem:[#allocation3 + $0x48] sm:$0xff] %v10289_v59  ;;  %v1641_v28 = vadd.f32 %v12051_v24, %v1471_v61  ;;  %v1642_v9 = vadd.f32 %v12053_v46, %v1472_v34  ;;  %v1643_v6 = vadd.f32 %v12055_v11, %v1473_v22 }
 0x2a9   : > { %1886 = vst [vmem:[#allocation3 + $0x50] sm:$0xff] %v10289_v59  ;;  %1887 = vst [vmem:[#allocation3 + $0x58] sm:$0xff] %v10289_v59  ;;  %v1159_v55 = vpop.xlane.xlu1 %1158  ;;  %9527 = vrsqrt.f32 %v1254_v3 }
 0x2aa   : > { %1888 = vst [vmem:[#allocation3 + $0x60] sm:$0xff] %v10289_v59  ;;  %1889 = vst [vmem:[#allocation3 + $0x68] sm:$0xff] %v10289_v59  ;;  %v1239_v20 = vmul.f32 0.0009765625, %v1159_v55  ;;  %v1638_v55 = vadd.f32 %v12045_v57, %v1468_v10 }
 0x2ab   : > { %1890 = vst [vmem:[#allocation3 + $0x70] sm:$0xff] %v10289_v59  ;;  %1891 = vst [vmem:[#allocation3 + $0x78] sm:$0xff] %v10289_v59 }
 0x2ac   : > { %1892 = vst [vmem:[#allocation3 + $0x80] sm:$0xff] %v10289_v59  ;;  %1893 = vst [vmem:[#allocation3 + $0x88] sm:$0xff] %v10289_v59  ;;  %v1255_v37 = vadd.f32 1e-05, %v1239_v20 }
 0x2ad   : > { %1894 = vst [vmem:[#allocation3 + $0x90] sm:$0xff] %v10289_v59  ;;  %1895 = vst [vmem:[#allocation3 + $0x98] sm:$0xff] %v10289_v59 }
 0x2ae   : > { %1896 = vst [vmem:[#allocation3 + $0xa0] sm:$0xff] %v10289_v59  ;;  %1897 = vst [vmem:[#allocation3 + $0xa8] sm:$0xff] %v10289_v59  ;;  %9529 = vrsqrt.f32 %v1255_v37  ;;  %v9522_v26 = vpop.eup %9521 }
 0x2af   : > { %1898 = vst [vmem:[#allocation3 + $0xb0] sm:$0xff] %v10289_v59  ;;  %1899 = vst [vmem:[#allocation3 + $0xb8] sm:$0xff] %v10289_v59  ;;  %v1304_v17 = vmul.f32 %v9522_v26, %v11389_v48  ;;  %v1305_v2 = vmul.f32 %v9522_v26, %v11393_v58  ;;  %v1306_v31 = vmul.f32 %v9522_v26, %v11397_v62 }
 0x2b0   : > { %1900 = vst [vmem:[#allocation3 + $0xc0] sm:$0xff] %v10289_v59  ;;  %1901 = vst [vmem:[#allocation3 + $0xc8] sm:$0xff] %v10289_v59  ;;  %v1307_v45 = vmul.f32 %v9522_v26, %v11407_v14  ;;  %v1308_v8 = vmul.f32 %v9522_v26, %v11425_v39  ;;  %v1309_v20 = vmul.f32 %v9522_v26, %v11429_v16  ;;  %v9524_v12 = vpop.eup %9523 }
 0x2b1   : > { %1902 = vst [vmem:[#allocation3 + $0xd0] sm:$0xff] %v10289_v59  ;;  %1903 = vst [vmem:[#allocation3 + $0xd8] sm:$0xff] %v10289_v59  ;;  %v1310_v0 = vmul.f32 %v9522_v26, %v11446_v40  ;;  %v1311_v7 = vmul.f32 %v9522_v26, %v11455_v54  ;;  %v1474_v33 = vmul.f32 %v12025_v27, %v1304_v17  ;;  %v9526_v61 = vpop.eup %9525 }
 0x2b2   : > { %1904 = vst [vmem:[#allocation3 + $0xe0] sm:$0xff] %v10289_v59  ;;  %1905 = vst [vmem:[#allocation3 + $0xe8] sm:$0xff] %v10289_v59  ;;  %v1475_v23 = vmul.f32 %v12027_v1, %v1305_v2  ;;  %v1476_v48 = vmul.f32 %v12029_v30, %v1306_v31  ;;  %v1477_v58 = vmul.f32 %v12031_v21, %v1307_v45 }
 0x2b3   : > { %1906 = vst [vmem:[#allocation3 + $0xf0] sm:$0xff] %v10289_v59  ;;  %1907 = vst [vmem:[#allocation3 + $0xf8] sm:$0xff] %v10289_v59  ;;  %v1478_v62 = vmul.f32 %v12033_v38, %v1308_v8  ;;  %v1479_v14 = vmul.f32 %v12035_v60, %v1309_v20  ;;  %v1480_v39 = vmul.f32 %v12037_v5, %v1310_v0  ;;  %v14660_v8 = vld [vmem:[#allocation120_spill] sm:$0xff] }
 0x2b4   : > { %1908 = vst [vmem:[#allocation3 + $0x100] sm:$0xff] %v10289_v59  ;;  %1909 = vst [vmem:[#allocation3 + $0x108] sm:$0xff] %v10289_v59  ;;  %v1481_v16 = vmul.f32 %v12039_v29, %v1311_v7  ;;  %v1644_v40 = vadd.f32 %v12041_v44, %v1474_v33  ;;  %v1645_v54 = vadd.f32 %v12043_v41, %v1475_v23  ;;  %v14665_v7 = vld [vmem:[#allocation125_spill] sm:$0xff]  ;;  %v14666_v23 = vld [vmem:[#allocation48_spill] sm:$0xff] }
 0x2b5   : > { %1910 = vst [vmem:[#allocation3 + $0x110] sm:$0xff] %v10289_v59  ;;  %1911 = vst [vmem:[#allocation3 + $0x118] sm:$0xff] %v10289_v59  ;;  %v1646_v47 = vadd.f32 %v12045_v57, %v1476_v48  ;;  %v1647_v49 = vadd.f32 %v12047_v63, %v1477_v58  ;;  %v1648_v10 = vadd.f32 %v12049_v51, %v1478_v62 }
 0x2b6   : > { %1912 = vst [vmem:[#allocation3 + $0x120] sm:$0xff] %v10289_v59  ;;  %1913 = vst [vmem:[#allocation3 + $0x128] sm:$0xff] %v10289_v59  ;;  %v1649_v3 = vadd.f32 %v12051_v24, %v1479_v14  ;;  %v1650_v43 = vadd.f32 %v12053_v46, %v1480_v39  ;;  %v1651_v56 = vadd.f32 %v12055_v11, %v1481_v16 }
 0x2b7   : > { %1914 = vst [vmem:[#allocation3 + $0x130] sm:$0xff] %v10289_v59  ;;  %1915 = vst [vmem:[#allocation3 + $0x138] sm:$0xff] %v10289_v59  ;;  %v1756_v37 = vpack.c.bf16 %v1644_v40, %v1636_v18  ;;  %v1758_v34 = vpack.c.bf16 %v1646_v47, %v1638_v55  ;;  %v1759_v22 = vpack.c.bf16 %v1647_v49, %v1639_v53  ;;  %v14661_v18 = vld [vmem:[#allocation121_spill] sm:$0xff]  ;;  %v14662_v55 = vld [vmem:[#allocation122_spill] sm:$0xff] }
 0x2b8   : > { %1916 = vst [vmem:[#allocation3 + $0x140] sm:$0xff] %v10289_v59  ;;  %1917 = vst [vmem:[#allocation3 + $0x148] sm:$0xff] %v10289_v59  ;;  %v1761_v26 = vpack.c.bf16 %v1649_v3, %v1641_v28  ;;  %v1762_v17 = vpack.c.bf16 %v1650_v43, %v1642_v9  ;;  %v1763_v2 = vpack.c.bf16 %v1651_v56, %v1643_v6  ;;  %v14664_v9 = vld [vmem:[#allocation124_spill] sm:$0xff] }
 0x2b9   : > { %1918 = vst [vmem:[#allocation3 + $0x150] sm:$0xff] %v10289_v59  ;;  %1919 = vst [vmem:[#allocation3 + $0x158] sm:$0xff] %v10289_v59  ;;  %v1312_v45 = vmul.f32 %v9524_v12, %v11434_v15  ;;  %v1313_v20 = vmul.f32 %v9524_v12, %v14660_v8  ;;  %v1315_v53 = vmul.f32 %v9524_v12, %v14662_v55  ;;  %v14671_v8 = vld [vmem:[#allocation33_spill] sm:$0xff]  ;;  %v14673_v55 = vld [vmem:[#allocation38_spill] sm:$0xff] }
 0x2ba   : > { %1920 = vst [vmem:[#allocation3 + $0x160] sm:$0xff] %v10289_v59  ;;  %1921 = vst [vmem:[#allocation3 + $0x168] sm:$0xff] %v10289_v59  ;;  %v1317_v6 = vmul.f32 %v9524_v12, %v14664_v9  ;;  %v1318_v33 = vmul.f32 %v9524_v12, %v14665_v7  ;;  %v1319_v15 = vmul.f32 %v9524_v12, %v14666_v23 }
 0x2bb   : > { %1922 = vst [vmem:[#allocation3 + $0x170] sm:$0xff] %v10289_v59  ;;  %1923 = vst [vmem:[#allocation3 + $0x178] sm:$0xff] %v10289_v59  ;;  %v1482_v48 = vmul.f32 %v12025_v27, %v1312_v45  ;;  %v1483_v58 = vmul.f32 %v12027_v1, %v1313_v20  ;;  %v1485_v14 = vmul.f32 %v12031_v21, %v1315_v53 }
 0x2bc   : > { %1924 = vst [vmem:[#allocation3 + $0x180] sm:$0xff] %v10289_v59  ;;  %1925 = vst [vmem:[#allocation3 + $0x188] sm:$0xff] %v10289_v59  ;;  %v1487_v16 = vmul.f32 %v12035_v60, %v1317_v6  ;;  %v1488_v40 = vmul.f32 %v12037_v5, %v1318_v33  ;;  %v1324_v20 = vmul.f32 %v9526_v61, %v14671_v8 }
 0x2bd   : > { %1926 = vst [vmem:[#allocation3 + $0x190] sm:$0xff] %v10289_v59  ;;  %1927 = vst [vmem:[#allocation3 + $0x198] sm:$0xff] %v10289_v59  ;;  %v1652_v47 = vadd.f32 %v12041_v44, %v1482_v48  ;;  %v1653_v49 = vadd.f32 %v12043_v41, %v1483_v58  ;;  %v1326_v53 = vmul.f32 %v9526_v61, %v14673_v55 }
 0x2be   : > { %1928 = vst [vmem:[#allocation3 + $0x1a0] sm:$0xff] %v10289_v59  ;;  %1929 = vst [vmem:[#allocation3 + $0x1a8] sm:$0xff] %v10289_v59  ;;  %v1657_v43 = vadd.f32 %v12051_v24, %v1487_v16  ;;  %v1658_v56 = vadd.f32 %v12053_v46, %v1488_v40  ;;  %v1494_v23 = vmul.f32 %v12033_v38, %v1324_v20  ;;  %v14675_v20 = vld [vmem:[#allocation40_spill] sm:$0xff] }
 0x2bf   : > { %1930 = vst [vmem:[#allocation3 + $0x1b0] sm:$0xff] %v10289_v59  ;;  %1931 = vst [vmem:[#allocation3 + $0x1b8] sm:$0xff] %v10289_v59  ;;  %v1496_v48 = vmul.f32 %v12037_v5, %v1326_v53  ;;  %v14677_v53 = vld [vmem:[#allocation42_spill] sm:$0xff] }
 0x2c0   : > { %1932 = vst [vmem:[#allocation3 + $0x1c0] sm:$0xff] %v10289_v59  ;;  %1933 = vst [vmem:[#allocation3 + $0x1c8] sm:$0xff] %v10289_v59  ;;  %v1664_v16 = vadd.f32 %v12049_v51, %v1494_v23 }
 0x2c1   : > { %1934 = vst [vmem:[#allocation3 + $0x1d0] sm:$0xff] %v10289_v59  ;;  %1935 = vst [vmem:[#allocation3 + $0x1d8] sm:$0xff] %v10289_v59 }
 0x2c2   : > { %1936 = vst [vmem:[#allocation3 + $0x1e0] sm:$0xff] %v10289_v59  ;;  %1937 = vst [vmem:[#allocation3 + $0x1e8] sm:$0xff] %v10289_v59 }
 0x2c3   : > { %1938 = vst [vmem:[#allocation3 + $0x1f0] sm:$0xff] %v10289_v59  ;;  %1939 = vst [vmem:[#allocation3 + $0x1f8] sm:$0xff] %v10289_v59 }
 0x2c4   : > { %1940 = vst [vmem:[#allocation3 + $0x200] sm:$0xff] %v10289_v59  ;;  %1941 = vst [vmem:[#allocation3 + $0x208] sm:$0xff] %v10289_v59 }
 0x2c5   : > { %1942 = vst [vmem:[#allocation3 + $0x210] sm:$0xff] %v10289_v59  ;;  %1943 = vst [vmem:[#allocation3 + $0x218] sm:$0xff] %v10289_v59 }
 0x2c6   : > { %1944 = vst [vmem:[#allocation3 + $0x220] sm:$0xff] %v10289_v59  ;;  %1945 = vst [vmem:[#allocation3 + $0x228] sm:$0xff] %v10289_v59 }
 0x2c7   : > { %1946 = vst [vmem:[#allocation3 + $0x230] sm:$0xff] %v10289_v59  ;;  %1947 = vst [vmem:[#allocation3 + $0x238] sm:$0xff] %v10289_v59 }
 0x2c8   : > { %1948 = vst [vmem:[#allocation3 + $0x240] sm:$0xff] %v10289_v59  ;;  %1949 = vst [vmem:[#allocation3 + $0x248] sm:$0xff] %v10289_v59 }
 0x2c9   : > { %1950 = vst [vmem:[#allocation3 + $0x250] sm:$0xff] %v10289_v59  ;;  %1951 = vst [vmem:[#allocation3 + $0x258] sm:$0xff] %v10289_v59 }
 0x2ca   : > { %1952 = vst [vmem:[#allocation3 + $0x260] sm:$0xff] %v10289_v59  ;;  %1953 = vst [vmem:[#allocation3 + $0x268] sm:$0xff] %v10289_v59 }
 0x2cb   : > { %1954 = vst [vmem:[#allocation3 + $0x270] sm:$0xff] %v10289_v59  ;;  %1955 = vst [vmem:[#allocation3 + $0x278] sm:$0xff] %v10289_v59 }
 0x2cc   : > { %1956 = vst [vmem:[#allocation3 + $0x280] sm:$0xff] %v10289_v59  ;;  %1957 = vst [vmem:[#allocation3 + $0x288] sm:$0xff] %v10289_v59 }
 0x2cd   : > { %1958 = vst [vmem:[#allocation3 + $0x290] sm:$0xff] %v10289_v59  ;;  %1959 = vst [vmem:[#allocation3 + $0x298] sm:$0xff] %v10289_v59 }
 0x2ce   : > { %1960 = vst [vmem:[#allocation3 + $0x2a0] sm:$0xff] %v10289_v59  ;;  %1961 = vst [vmem:[#allocation3 + $0x2a8] sm:$0xff] %v10289_v59 }
 0x2cf   : > { %1962 = vst [vmem:[#allocation3 + $0x2b0] sm:$0xff] %v10289_v59  ;;  %1963 = vst [vmem:[#allocation3 + $0x2b8] sm:$0xff] %v10289_v59 }
 0x2d0   : > { %1964 = vst [vmem:[#allocation3 + $0x2c0] sm:$0xff] %v10289_v59  ;;  %1965 = vst [vmem:[#allocation3 + $0x2c8] sm:$0xff] %v10289_v59 }
 0x2d1   : > { %1966 = vst [vmem:[#allocation3 + $0x2d0] sm:$0xff] %v10289_v59  ;;  %1967 = vst [vmem:[#allocation3 + $0x2d8] sm:$0xff] %v10289_v59 }
 0x2d2   : > { %1968 = vst [vmem:[#allocation3 + $0x2e0] sm:$0xff] %v10289_v59  ;;  %1969 = vst [vmem:[#allocation3 + $0x2e8] sm:$0xff] %v10289_v59 }
 0x2d3   : > { %1970 = vst [vmem:[#allocation3 + $0x2f0] sm:$0xff] %v10289_v59  ;;  %1971 = vst [vmem:[#allocation3 + $0x2f8] sm:$0xff] %v10289_v59 }
 0x2d4   : > { %1972 = vst [vmem:[#allocation3 + $0x300] sm:$0xff] %v10289_v59  ;;  %1973 = vst [vmem:[#allocation3 + $0x308] sm:$0xff] %v10289_v59 }
 0x2d5   : > { %1974 = vst [vmem:[#allocation3 + $0x310] sm:$0xff] %v10289_v59  ;;  %1975 = vst [vmem:[#allocation3 + $0x318] sm:$0xff] %v10289_v59 }
 0x2d6   : > { %1976 = vst [vmem:[#allocation3 + $0x320] sm:$0xff] %v10289_v59  ;;  %1977 = vst [vmem:[#allocation3 + $0x328] sm:$0xff] %v10289_v59 }
 0x2d7   : > { %1978 = vst [vmem:[#allocation3 + $0x330] sm:$0xff] %v10289_v59  ;;  %1979 = vst [vmem:[#allocation3 + $0x338] sm:$0xff] %v10289_v59 }
 0x2d8   : > { %1980 = vst [vmem:[#allocation3 + $0x340] sm:$0xff] %v10289_v59  ;;  %1981 = vst [vmem:[#allocation3 + $0x348] sm:$0xff] %v10289_v59 }
 0x2d9   : > { %1982 = vst [vmem:[#allocation3 + $0x350] sm:$0xff] %v10289_v59  ;;  %1983 = vst [vmem:[#allocation3 + $0x358] sm:$0xff] %v10289_v59 }
 0x2da   : > { %1984 = vst [vmem:[#allocation3 + $0x360] sm:$0xff] %v10289_v59  ;;  %1985 = vst [vmem:[#allocation3 + $0x368] sm:$0xff] %v10289_v59 }
 0x2db   : > { %1986 = vst [vmem:[#allocation3 + $0x370] sm:$0xff] %v10289_v59  ;;  %1987 = vst [vmem:[#allocation3 + $0x378] sm:$0xff] %v10289_v59 }
 0x2dc   : > { %1988 = vst [vmem:[#allocation3 + $0x380] sm:$0xff] %v10289_v59  ;;  %1989 = vst [vmem:[#allocation3 + $0x388] sm:$0xff] %v10289_v59 }
 0x2dd   : > { %1990 = vst [vmem:[#allocation3 + $0x390] sm:$0xff] %v10289_v59  ;;  %1991 = vst [vmem:[#allocation3 + $0x398] sm:$0xff] %v10289_v59 }
 0x2de   : > { %1992 = vst [vmem:[#allocation3 + $0x3a0] sm:$0xff] %v10289_v59  ;;  %1993 = vst [vmem:[#allocation3 + $0x3a8] sm:$0xff] %v10289_v59 }
 0x2df   : > { %1994 = vst [vmem:[#allocation3 + $0x3b0] sm:$0xff] %v10289_v59  ;;  %1995 = vst [vmem:[#allocation3 + $0x3b8] sm:$0xff] %v10289_v59 }
 0x2e0   : > { %1996 = vst [vmem:[#allocation3 + $0x3c0] sm:$0xff] %v10289_v59  ;;  %1997 = vst [vmem:[#allocation3 + $0x3c8] sm:$0xff] %v10289_v59 }
 0x2e1   : > { %1998 = vst [vmem:[#allocation3 + $0x3d0] sm:$0xff] %v10289_v59  ;;  %1999 = vst [vmem:[#allocation3 + $0x3d8] sm:$0xff] %v10289_v59 }
 0x2e2   : > { %2000 = vst [vmem:[#allocation3 + $0x3e0] sm:$0xff] %v10289_v59  ;;  %2001 = vst [vmem:[#allocation3 + $0x3e8] sm:$0xff] %v10289_v59 }
 0x2e3   : > { %2002 = vst [vmem:[#allocation3 + $0x3f0] sm:$0xff] %v10289_v59  ;;  %2003 = vst [vmem:[#allocation3 + $0x3f8] sm:$0xff] %v10289_v59  ;;  %v1168_v59 = vpop.xlane.xlu0 %1167 }
 0x2e4   : > { %v1240_v52 = vmul.f32 0.0009765625, %v1168_v59  ;;  %v1757_v59 = vpack.c.bf16 %v1645_v54, %v1637_v25  ;;  %1820 = vst [vmem:[#allocation2 + $0x40] sm:$0xff] %v1756_v37  ;;  %1822 = vst [vmem:[#allocation2 + $0x50] sm:$0xff] %v1758_v34  ;;  %v1314_v25 = vmul.f32 %v9524_v12, %v14661_v18  ;;  %v1489_v54 = vmul.f32 %v12039_v29, %v1319_v15  ;;  %v14672_v18 = vld [vmem:[#allocation37_spill] sm:$0xff] }
 0x2e5   : > { %1823 = vst [vmem:[#allocation2 + $0x58] sm:$0xff] %v1759_v22  ;;  %1825 = vst [vmem:[#allocation2 + $0x68] sm:$0xff] %v1761_v26  ;;  %v14668_v22 = vld [vmem:[#allocation127_spill] sm:$0xff] }
 0x2e6   : > { %v1256_v19 = vadd.f32 1e-05, %v1240_v52  ;;  %v12303_v52 = vpop.eup %9527  ;;  %1821 = vst [vmem:[#allocation2 + $0x48] sm:$0xff] %v1757_v59  ;;  %1826 = vst [vmem:[#allocation2 + $0x70] sm:$0xff] %v1762_v17  ;;  %v1484_v62 = vmul.f32 %v12029_v30, %v1314_v25  ;;  %v1659_v37 = vadd.f32 %v12055_v11, %v1489_v54  ;;  %v14667_v59 = vld [vmem:[#allocation126_spill] sm:$0xff]  ;;  %v14669_v26 = vld [vmem:[#allocation31_spill] sm:$0xff]  ;;  %v1325_v25 = vmul.f32 %v9526_v61, %v14672_v18 }
 0x2e7   : > { %v12305_v31 = vpop.eup %9529  ;;  %1827 = vst [vmem:[#allocation2 + $0x78] sm:$0xff] %v1763_v2  ;;  %v1320_v34 = vmul.f32 %v9526_v61, %v14667_v59  ;;  %v1322_v17 = vmul.f32 %v9526_v61, %v14669_v26  ;;  %v14670_v2 = vld [vmem:[#allocation32_spill] sm:$0xff]  ;;  %v1666_v54 = vadd.f32 %v12053_v46, %v1496_v48  ;;  %v1328_v18 = vmul.f32 %v12303_v52, %v14675_v20 }
 0x2e8   : > { %9531 = vrsqrt.f32 %v1256_v19  ;;  %v1760_v19 = vpack.c.bf16 %v1648_v10, %v1640_v42  ;;  %v14663_v42 = vld [vmem:[#allocation123_spill] sm:$0xff]  ;;  %v1655_v10 = vadd.f32 %v12047_v63, %v1485_v14  ;;  %v1323_v45 = vmul.f32 %v9526_v61, %v14670_v2 }
 0x2e9   : > { %v1316_v28 = vmul.f32 %v9524_v12, %v14663_v42  ;;  %v1654_v12 = vadd.f32 %v12045_v57, %v1484_v62  ;;  %v14674_v42 = vld [vmem:[#allocation43_spill] sm:$0xff]  ;;  %v1490_v9 = vmul.f32 %v12025_v27, %v1320_v34  ;;  %v1492_v7 = vmul.f32 %v12029_v30, %v1322_v17 }
 0x2ea   : > { %1824 = vst [vmem:[#allocation2 + $0x60] sm:$0xff] %v1760_v19  ;;  %v1321_v19 = vmul.f32 %v9526_v61, %v14668_v22  ;;  %v1493_v33 = vmul.f32 %v12031_v21, %v1323_v45  ;;  %v1495_v15 = vmul.f32 %v12035_v60, %v1325_v25  ;;  %v1770_v45 = vpack.c.bf16 %v1666_v54, %v1658_v56  ;;  %v14676_v25 = vld [vmem:[#allocation41_spill] sm:$0xff] }
 0x2eb   : > { %v1486_v39 = vmul.f32 %v12033_v38, %v1316_v28  ;;  %v1327_v28 = vmul.f32 %v9526_v61, %v14674_v42  ;;  %v1660_v62 = vadd.f32 %v12041_v44, %v1490_v9  ;;  %v1662_v14 = vadd.f32 %v12045_v57, %v1492_v7 }
 0x2ec   : > { %v1491_v6 = vmul.f32 %v12027_v1, %v1321_v19  ;;  %v1665_v40 = vadd.f32 %v12051_v24, %v1495_v15  ;;  %v1329_v55 = vmul.f32 %v12303_v52, %v14676_v25  ;;  %1834 = vst [vmem:[#allocation2 + $0xb0] sm:$0xff] %v1770_v45  ;;  %v1335_v42 = vmul.f32 %v12303_v52, %v11605_v13 }
 0x2ed   : > { %v1656_v3 = vadd.f32 %v12049_v51, %v1486_v39  ;;  %v1497_v58 = vmul.f32 %v12039_v29, %v1327_v28  ;;  %v1663_v39 = vadd.f32 %v12047_v63, %v1493_v33  ;;  %v1764_v34 = vpack.c.bf16 %v1660_v62, %v1652_v47 }
 0x2ee   : > { %v1661_v61 = vadd.f32 %v12043_v41, %v1491_v6  ;;  %v1766_v19 = vpack.c.bf16 %v1662_v14, %v1654_v12  ;;  %v1769_v2 = vpack.c.bf16 %v1665_v40, %v1657_v43  ;;  %v1330_v47 = vmul.f32 %v12303_v52, %v14677_v53  ;;  %v14680_v43 = vld [vmem:[#allocation58_spill] sm:$0xff] }
 0x2ef   : > { %v1667_v59 = vadd.f32 %v12055_v11, %v1497_v58  ;;  %v1767_v26 = vpack.c.bf16 %v1663_v39, %v1655_v10  ;;  %v1768_v17 = vpack.c.bf16 %v1664_v16, %v1656_v3  ;;  %1828 = vst [vmem:[#allocation2 + $0x80] sm:$0xff] %v1764_v34  ;;  %v14679_v10 = vld [vmem:[#allocation52_spill] sm:$0xff]  ;;  %v1333_v56 = vmul.f32 %v12303_v52, %v14680_v43  ;;  %v1177_v16 = vpop.xlane.xlu1 %1176  ;;  %v14681_v40 = vld [vmem:[#allocation34_spill] sm:$0xff] }
 0x2f0   : > { %v1765_v22 = vpack.c.bf16 %v1661_v61, %v1653_v49  ;;  %1830 = vst [vmem:[#allocation2 + $0x90] sm:$0xff] %v1766_v19  ;;  %v14678_v49 = vld [vmem:[#allocation45_spill] sm:$0xff]  ;;  %1833 = vst [vmem:[#allocation2 + $0xa8] sm:$0xff] %v1769_v2  ;;  %v1332_v3 = vmul.f32 %v12303_v52, %v14679_v10  ;;  %v1498_v28 = vmul.f32 %v12025_v27, %v1328_v18  ;;  %v14685_v2 = vld [vmem:[#allocation60_spill] sm:$0xff] }
 0x2f1   : > { %v1771_v8 = vpack.c.bf16 %v1667_v59, %v1659_v37  ;;  %1831 = vst [vmem:[#allocation2 + $0x98] sm:$0xff] %v1767_v26  ;;  %v1331_v12 = vmul.f32 %v12303_v52, %v14678_v49  ;;  %1832 = vst [vmem:[#allocation2 + $0xa0] sm:$0xff] %v1768_v17  ;;  %v1334_v37 = vmul.f32 %v12303_v52, %v11601_v4  ;;  %v14682_v59 = vld [vmem:[#allocation35_spill] sm:$0xff]  ;;  %v14687_v18 = vld [vmem:[#allocation44_spill] sm:$0xff] }
 0x2f2   : > { %v12311_v0 = vpop.eup %9531  ;;  %1829 = vst [vmem:[#allocation2 + $0x88] sm:$0xff] %v1765_v22  ;;  %v1499_v9 = vmul.f32 %v12027_v1, %v1329_v55  ;;  %v1500_v6 = vmul.f32 %v12029_v30, %v1330_v47  ;;  %v1502_v33 = vmul.f32 %v12033_v38, %v1332_v3  ;;  %v1503_v23 = vmul.f32 %v12035_v60, %v1333_v56  ;;  %v14683_v22 = vld [vmem:[#allocation36_spill] sm:$0xff]  ;;  %v14684_v26 = vld [vmem:[#allocation39_spill] sm:$0xff] }
 0x2f3   : > { %1835 = vst [vmem:[#allocation2 + $0xb8] sm:$0xff] %v1771_v8  ;;  %v1501_v7 = vmul.f32 %v12031_v21, %v1331_v12  ;;  %v1504_v15 = vmul.f32 %v12037_v5, %v1334_v37  ;;  %v1505_v48 = vmul.f32 %v12039_v29, %v1335_v42  ;;  %v1668_v4 = vadd.f32 %v12041_v44, %v1498_v28  ;;  %v14686_v8 = vld [vmem:[#allocation66_spill] sm:$0xff]  ;;  %v14688_v55 = vld [vmem:[#allocation56_spill] sm:$0xff] }
 0x2f4   : > { %v1669_v13 = vadd.f32 %v12043_v41, %v1499_v9  ;;  %v1670_v52 = vadd.f32 %v12045_v57, %v1500_v6  ;;  %v1672_v62 = vadd.f32 %v12049_v51, %v1502_v33  ;;  %v1673_v61 = vadd.f32 %v12051_v24, %v1503_v23  ;;  %v1186_v6 = vpop.xlane.xlu0 %1185 }
 0x2f5   : > { %v1671_v58 = vadd.f32 %v12047_v63, %v1501_v7  ;;  %v1674_v14 = vadd.f32 %v12053_v46, %v1504_v15  ;;  %v1675_v39 = vadd.f32 %v12055_v11, %v1505_v48  ;;  %v1336_v54 = vmul.f32 %v12305_v31, %v14681_v40  ;;  %v1195_v48 = vpop.xlane.xlu1 %1194 }
 0x2f6   : > { %v1337_v34 = vmul.f32 %v12305_v31, %v14682_v59  ;;  %v1338_v19 = vmul.f32 %v12305_v31, %v14683_v22  ;;  %v1339_v17 = vmul.f32 %v12305_v31, %v14684_v26  ;;  %v1340_v45 = vmul.f32 %v12305_v31, %v14685_v2 }
 0x2f7   : > { %v1341_v20 = vmul.f32 %v12305_v31, %v14686_v8  ;;  %v1342_v25 = vmul.f32 %v12305_v31, %v14687_v18  ;;  %v1343_v53 = vmul.f32 %v12305_v31, %v14688_v55  ;;  %v1506_v47 = vmul.f32 %v12025_v27, %v1336_v54 }
 0x2f8   : > { %v1507_v49 = vmul.f32 %v12027_v1, %v1337_v34  ;;  %v1508_v12 = vmul.f32 %v12029_v30, %v1338_v19  ;;  %v1509_v10 = vmul.f32 %v12031_v21, %v1339_v17  ;;  %v1510_v3 = vmul.f32 %v12033_v38, %v1340_v45  ;;  %v1204_v2 = vpop.xlane.xlu0 %1203 }
 0x2f9   : > { %v1511_v43 = vmul.f32 %v12035_v60, %v1341_v20  ;;  %v1512_v56 = vmul.f32 %v12037_v5, %v1342_v25  ;;  %v1513_v37 = vmul.f32 %v12039_v29, %v1343_v53  ;;  %v1676_v42 = vadd.f32 %v12041_v44, %v1506_v47  ;;  %v1213_v45 = vpop.xlane.xlu1 %1212  ;;  %v14691_v25 = vld [vmem:[#allocation54_spill] sm:$0xff]  ;;  %v14692_v53 = vld [vmem:[#allocation55_spill] sm:$0xff] }
 0x2fa   : > { %v1677_v31 = vadd.f32 %v12043_v41, %v1507_v49  ;;  %v1678_v28 = vadd.f32 %v12045_v57, %v1508_v12  ;;  %v1679_v9 = vadd.f32 %v12047_v63, %v1509_v10  ;;  %v1680_v7 = vadd.f32 %v12049_v51, %v1510_v3  ;;  %v14693_v49 = vld [vmem:[#allocation61_spill] sm:$0xff] }
 0x2fb   : > { %v1681_v33 = vadd.f32 %v12051_v24, %v1511_v43  ;;  %v1682_v23 = vadd.f32 %v12053_v46, %v1512_v56  ;;  %v1683_v15 = vadd.f32 %v12055_v11, %v1513_v37  ;;  %v1772_v40 = vpack.c.bf16 %v1676_v42, %v1668_v4  ;;  %v14694_v10 = vld [vmem:[#allocation57_spill] sm:$0xff] }
 0x2fc   : > { %v1773_v54 = vpack.c.bf16 %v1677_v31, %v1669_v13  ;;  %v1774_v59 = vpack.c.bf16 %v1678_v28, %v1670_v52  ;;  %v1775_v34 = vpack.c.bf16 %v1679_v9, %v1671_v58  ;;  %v1776_v22 = vpack.c.bf16 %v1680_v7, %v1672_v62  ;;  %v1222_v52 = vpop.xlane.xlu0 %1221  ;;  %v14689_v58 = vld [vmem:[#allocation49_spill] sm:$0xff] }
 0x2fd   : > { %v1777_v19 = vpack.c.bf16 %v1681_v33, %v1673_v61  ;;  %v1778_v26 = vpack.c.bf16 %v1682_v23, %v1674_v14  ;;  %v1779_v17 = vpack.c.bf16 %v1683_v15, %v1675_v39  ;;  %1836 = vst [vmem:[#allocation2 + $0xc0] sm:$0xff] %v1772_v40  ;;  %v1241_v8 = vmul.f32 0.0009765625, %v1177_v16  ;;  %v14690_v61 = vld [vmem:[#allocation51_spill] sm:$0xff]  ;;  %v1231_v18 = vpop.xlane.xlu1 %1230 }
 0x2fe   : > { %1837 = vst [vmem:[#allocation2 + $0xc8] sm:$0xff] %v1773_v54  ;;  %1838 = vst [vmem:[#allocation2 + $0xd0] sm:$0xff] %v1774_v59  ;;  %v1242_v20 = vmul.f32 0.0009765625, %v1186_v6  ;;  %v1243_v13 = vmul.f32 0.0009765625, %v1195_v48  ;;  %v1344_v62 = vmul.f32 %v12311_v0, %v14689_v58  ;;  %v1345_v14 = vmul.f32 %v12311_v0, %v14690_v61  ;;  %v14697_v58 = vld [vmem:[#allocation46_spill] sm:$0xff]  ;;  %v14698_v61 = vld [vmem:[#allocation47_spill] sm:$0xff] }
 0x2ff   : > { %1839 = vst [vmem:[#allocation2 + $0xd8] sm:$0xff] %v1775_v34  ;;  %1840 = vst [vmem:[#allocation2 + $0xe0] sm:$0xff] %v1776_v22  ;;  %v1257_v4 = vadd.f32 1e-05, %v1241_v8  ;;  %v1244_v39 = vmul.f32 0.0009765625, %v1204_v2  ;;  %v1346_v55 = vmul.f32 %v12311_v0, %v14691_v25  ;;  %v1347_v47 = vmul.f32 %v12311_v0, %v14692_v53  ;;  %v14700_v25 = vld [vmem:[#allocation53_spill] sm:$0xff] }
 0x300   : > { %1841 = vst [vmem:[#allocation2 + $0xe8] sm:$0xff] %v1777_v19  ;;  %1842 = vst [vmem:[#allocation2 + $0xf0] sm:$0xff] %v1778_v26  ;;  %v1245_v16 = vmul.f32 0.0009765625, %v1213_v45  ;;  %v1348_v12 = vmul.f32 %v12311_v0, %v14693_v49  ;;  %v1349_v3 = vmul.f32 %v12311_v0, %v14694_v10  ;;  %v1258_v43 = vadd.f32 1e-05, %v1242_v20  ;;  %v14695_v20 = vld [vmem:[#allocation68_spill] sm:$0xff] }
 0x301   : > { %1843 = vst [vmem:[#allocation2 + $0xf8] sm:$0xff] %v1779_v17  ;;  %9533 = vrsqrt.f32 %v1257_v4  ;;  %v1246_v56 = vmul.f32 0.0009765625, %v1222_v52  ;;  %v1350_v37 = vmul.f32 %v12311_v0, %v11697_v36  ;;  %v1351_v42 = vmul.f32 %v12311_v0, %v11701_v32  ;;  %v14701_v53 = vld [vmem:[#allocation75_spill] sm:$0xff] }
 0x302   : > { %v1259_v31 = vadd.f32 1e-05, %v1243_v13  ;;  %v1247_v28 = vmul.f32 0.0009765625, %v1231_v18  ;;  %v1514_v9 = vmul.f32 %v12025_v27, %v1344_v62  ;;  %v1260_v6 = vadd.f32 1e-05, %v1244_v39  ;;  %v14696_v13 = vld [vmem:[#allocation73_spill] sm:$0xff] }
 0x303   : > { %v1515_v7 = vmul.f32 %v12027_v1, %v1345_v14  ;;  %v1516_v33 = vmul.f32 %v12029_v30, %v1346_v55  ;;  %v1517_v23 = vmul.f32 %v12031_v21, %v1347_v47  ;;  %v1261_v15 = vadd.f32 1e-05, %v1245_v16  ;;  %v14699_v39 = vld [vmem:[#allocation50_spill] sm:$0xff] }
 0x304   : > { %v1518_v48 = vmul.f32 %v12033_v38, %v1348_v12  ;;  %v1519_v40 = vmul.f32 %v12035_v60, %v1349_v3  ;;  %9535 = vrsqrt.f32 %v1258_v43  ;;  %v1262_v36 = vadd.f32 1e-05, %v1246_v56 }
 0x305   : > { %v1520_v32 = vmul.f32 %v12037_v5, %v1350_v37  ;;  %v1521_v0 = vmul.f32 %v12039_v29, %v1351_v42  ;;  %9537 = vrsqrt.f32 %v1259_v31  ;;  %v1263_v54 = vadd.f32 1e-05, %v1247_v28 }
 0x306   : > { %9539 = vrsqrt.f32 %v1260_v6  ;;  %v1684_v59 = vadd.f32 %v12041_v44, %v1514_v9  ;;  %v1685_v34 = vadd.f32 %v12043_v41, %v1515_v7  ;;  %v1686_v22 = vadd.f32 %v12045_v57, %v1516_v33 }
 0x307   : > { %9541 = vrsqrt.f32 %v1261_v15  ;;  %v1687_v19 = vadd.f32 %v12047_v63, %v1517_v23  ;;  %v1688_v26 = vadd.f32 %v12049_v51, %v1518_v48  ;;  %v1689_v2 = vadd.f32 %v12051_v24, %v1519_v40 }
 0x308   : > { %9543 = vrsqrt.f32 %v1262_v36  ;;  %v1690_v45 = vadd.f32 %v12053_v46, %v1520_v32  ;;  %v1691_v8 = vadd.f32 %v12055_v11, %v1521_v0 }
 0x309   : > { %9545 = vrsqrt.f32 %v1263_v54 }
 0x30b   : > { %v9534_v17 = vpop.eup %9533 }
 0x30c   : > { %v1352_v4 = vmul.f32 %v9534_v17, %v14695_v20  ;;  %v1353_v52 = vmul.f32 %v9534_v17, %v14696_v13  ;;  %v1354_v62 = vmul.f32 %v9534_v17, %v14697_v58  ;;  %v1355_v14 = vmul.f32 %v9534_v17, %v14698_v61 }
 0x30d   : > { %v1356_v18 = vmul.f32 %v9534_v17, %v14699_v39  ;;  %v1357_v55 = vmul.f32 %v9534_v17, %v14700_v25  ;;  %v1358_v47 = vmul.f32 %v9534_v17, %v14701_v53  ;;  %v1359_v16 = vmul.f32 %v9534_v17, %v11751_v50 }
 0x30e   : > { %v1522_v49 = vmul.f32 %v12025_v27, %v1352_v4  ;;  %v1523_v12 = vmul.f32 %v12027_v1, %v1353_v52  ;;  %v1524_v10 = vmul.f32 %v12029_v30, %v1354_v62  ;;  %v1525_v3 = vmul.f32 %v12031_v21, %v1355_v14  ;;  %v9536_v31 = vpop.eup %9535  ;;  %v14702_v62 = vld [vmem:[#allocation81_spill] sm:$0xff]  ;;  %v14703_v14 = vld [vmem:[#allocation59_spill] sm:$0xff] }
 0x30f   : > { %v1526_v43 = vmul.f32 %v12033_v38, %v1356_v18  ;;  %v1527_v56 = vmul.f32 %v12035_v60, %v1357_v55  ;;  %v1528_v37 = vmul.f32 %v12037_v5, %v1358_v47  ;;  %v1529_v42 = vmul.f32 %v12039_v29, %v1359_v16  ;;  %v9538_v7 = vpop.eup %9537  ;;  %v14707_v18 = vld [vmem:[#allocation83_spill] sm:$0xff]  ;;  %v14708_v55 = vld [vmem:[#allocation62_spill] sm:$0xff] }
 0x310   : > { %v1692_v28 = vadd.f32 %v12041_v44, %v1522_v49  ;;  %v1693_v50 = vadd.f32 %v12043_v41, %v1523_v12  ;;  %v1694_v9 = vadd.f32 %v12045_v57, %v1524_v10  ;;  %v1695_v6 = vadd.f32 %v12047_v63, %v1525_v3  ;;  %v12477_v40 = vpop.eup %9539 }
 0x311   : > { %v1696_v33 = vadd.f32 %v12049_v51, %v1526_v43  ;;  %v1697_v23 = vadd.f32 %v12051_v24, %v1527_v56  ;;  %v1698_v15 = vadd.f32 %v12053_v46, %v1528_v37  ;;  %v1699_v48 = vadd.f32 %v12055_v11, %v1529_v42  ;;  %v12479_v17 = vpop.eup %9541 }
 0x312   : > { %v1780_v36 = vpack.c.bf16 %v1692_v28, %v1684_v59  ;;  %v1781_v32 = vpack.c.bf16 %v1693_v50, %v1685_v34  ;;  %v1782_v0 = vpack.c.bf16 %v1694_v9, %v1686_v22  ;;  %v1783_v54 = vpack.c.bf16 %v1695_v6, %v1687_v19  ;;  %v12481_v58 = vpop.eup %9543  ;;  %v14704_v59 = vld [vmem:[#allocation63_spill] sm:$0xff] }
 0x313   : > { %v1784_v20 = vpack.c.bf16 %v1696_v33, %v1688_v26  ;;  %v1785_v4 = vpack.c.bf16 %v1697_v23, %v1689_v2  ;;  %v1786_v13 = vpack.c.bf16 %v1698_v15, %v1690_v45  ;;  %v1787_v52 = vpack.c.bf16 %v1699_v48, %v1691_v8  ;;  %v12487_v19 = vpop.eup %9545  ;;  %v14705_v26 = vld [vmem:[#allocation67_spill] sm:$0xff]  ;;  %v14709_v33 = vld [vmem:[#allocation70_spill] sm:$0xff] }
 0x314   : > { %1844 = vst [vmem:[#allocation2 + $0x100] sm:$0xff] %v1780_v36  ;;  %1845 = vst [vmem:[#allocation2 + $0x108] sm:$0xff] %v1781_v32  ;;  %v1360_v61 = vmul.f32 %v9536_v31, %v14702_v62  ;;  %v1361_v39 = vmul.f32 %v9536_v31, %v14703_v14  ;;  %v1362_v34 = vmul.f32 %v9536_v31, %v14704_v59  ;;  %v14706_v45 = vld [vmem:[#allocation71_spill] sm:$0xff]  ;;  %v14710_v15 = vld [vmem:[#allocation74_spill] sm:$0xff] }
 0x315   : > { %1846 = vst [vmem:[#allocation2 + $0x110] sm:$0xff] %v1782_v0  ;;  %1847 = vst [vmem:[#allocation2 + $0x118] sm:$0xff] %v1783_v54  ;;  %v1363_v22 = vmul.f32 %v9536_v31, %v11741_v35  ;;  %v1364_v2 = vmul.f32 %v9536_v31, %v14705_v26  ;;  %v1365_v8 = vmul.f32 %v9536_v31, %v14706_v45  ;;  %v14711_v36 = vld [vmem:[#allocation77_spill] sm:$0xff]  ;;  %v14712_v0 = vld [vmem:[#allocation72_spill] sm:$0xff] }
 0x316   : > { %1848 = vst [vmem:[#allocation2 + $0x120] sm:$0xff] %v1784_v20  ;;  %1849 = vst [vmem:[#allocation2 + $0x128] sm:$0xff] %v1785_v4  ;;  %v1366_v25 = vmul.f32 %v9536_v31, %v14707_v18  ;;  %v1367_v53 = vmul.f32 %v9536_v31, %v14708_v55  ;;  %v1530_v47 = vmul.f32 %v12025_v27, %v1360_v61  ;;  %v14713_v20 = vld [vmem:[#allocation87_spill] sm:$0xff]  ;;  %v14715_v62 = vld [vmem:[#allocation86_spill] sm:$0xff] }
 0x317   : > { %1850 = vst [vmem:[#allocation2 + $0x130] sm:$0xff] %v1786_v13  ;;  %1851 = vst [vmem:[#allocation2 + $0x138] sm:$0xff] %v1787_v52  ;;  %v1531_v16 = vmul.f32 %v12027_v1, %v1361_v39  ;;  %v1532_v35 = vmul.f32 %v12029_v30, %v1362_v34  ;;  %v1533_v49 = vmul.f32 %v12031_v21, %v1363_v22  ;;  %v14714_v13 = vld [vmem:[#allocation64_spill] sm:$0xff] }
 0x318   : > { %v1534_v12 = vmul.f32 %v12033_v38, %v1364_v2  ;;  %v1535_v10 = vmul.f32 %v12035_v60, %v1365_v8  ;;  %v1536_v3 = vmul.f32 %v12037_v5, %v1366_v25  ;;  %v1537_v43 = vmul.f32 %v12039_v29, %v1367_v53  ;;  %v14716_v14 = vld [vmem:[#allocation88_spill] sm:$0xff] }
 0x319   : > { %v1700_v56 = vadd.f32 %v12041_v44, %v1530_v47  ;;  %v1701_v37 = vadd.f32 %v12043_v41, %v1531_v16  ;;  %v1702_v42 = vadd.f32 %v12045_v57, %v1532_v35  ;;  %v1703_v31 = vadd.f32 %v12047_v63, %v1533_v49 }
 0x31a   : > { %v1704_v28 = vadd.f32 %v12049_v51, %v1534_v12  ;;  %v1705_v50 = vadd.f32 %v12051_v24, %v1535_v10  ;;  %v1706_v9 = vadd.f32 %v12053_v46, %v1536_v3  ;;  %v1707_v6 = vadd.f32 %v12055_v11, %v1537_v43 }
 0x31b   : > { %v1368_v23 = vmul.f32 %v9538_v7, %v14709_v33  ;;  %v1369_v48 = vmul.f32 %v9538_v7, %v14710_v15  ;;  %v1370_v32 = vmul.f32 %v9538_v7, %v14711_v36  ;;  %v1371_v54 = vmul.f32 %v9538_v7, %v14712_v0  ;;  %v14717_v36 = vld [vmem:[#allocation65_spill] sm:$0xff] }
 0x31c   : > { %v1372_v4 = vmul.f32 %v9538_v7, %v14713_v20  ;;  %v1373_v52 = vmul.f32 %v9538_v7, %v14714_v13  ;;  %v1374_v61 = vmul.f32 %v9538_v7, %v14715_v62  ;;  %v1375_v39 = vmul.f32 %v9538_v7, %v14716_v14  ;;  %v14718_v0 = vld [vmem:[#allocation69_spill] sm:$0xff]  ;;  %v14719_v20 = vld [vmem:[#allocation76_spill] sm:$0xff] }
 0x31d   : > { %v1538_v59 = vmul.f32 %v12025_v27, %v1368_v23  ;;  %v1539_v34 = vmul.f32 %v12027_v1, %v1369_v48  ;;  %v1540_v22 = vmul.f32 %v12029_v30, %v1370_v32  ;;  %v1541_v26 = vmul.f32 %v12031_v21, %v1371_v54  ;;  %v14724_v13 = vld [vmem:[#allocation80_spill] sm:$0xff] }
 0x31e   : > { %v1542_v2 = vmul.f32 %v12033_v38, %v1372_v4  ;;  %v1543_v45 = vmul.f32 %v12035_v60, %v1373_v52  ;;  %v1544_v8 = vmul.f32 %v12037_v5, %v1374_v61  ;;  %v1545_v18 = vmul.f32 %v12039_v29, %v1375_v39 }
 0x31f   : > { %v1708_v25 = vadd.f32 %v12041_v44, %v1538_v59  ;;  %v1709_v7 = vadd.f32 %v12043_v41, %v1539_v34  ;;  %v1710_v55 = vadd.f32 %v12045_v57, %v1540_v22  ;;  %v1711_v53 = vadd.f32 %v12047_v63, %v1541_v26 }
 0x320   : > { %v1712_v47 = vadd.f32 %v12049_v51, %v1542_v2  ;;  %v1713_v16 = vadd.f32 %v12051_v24, %v1543_v45  ;;  %v1714_v35 = vadd.f32 %v12053_v46, %v1544_v8  ;;  %v1715_v49 = vadd.f32 %v12055_v11, %v1545_v18 }
 0x321   : > { %v1788_v12 = vpack.c.bf16 %v1708_v25, %v1700_v56  ;;  %v1789_v10 = vpack.c.bf16 %v1709_v7, %v1701_v37  ;;  %v1790_v3 = vpack.c.bf16 %v1710_v55, %v1702_v42  ;;  %v1791_v43 = vpack.c.bf16 %v1711_v53, %v1703_v31  ;;  %v14720_v37 = vld [vmem:[#allocation82_spill] sm:$0xff]  ;;  %v14721_v31 = vld [vmem:[#allocation89_spill] sm:$0xff]  ;;  %v14725_v53 = vld [vmem:[#allocation84_spill] sm:$0xff] }
 0x322   : > { %v1792_v33 = vpack.c.bf16 %v1712_v47, %v1704_v28  ;;  %v1793_v23 = vpack.c.bf16 %v1713_v16, %v1705_v50  ;;  %v1794_v15 = vpack.c.bf16 %v1714_v35, %v1706_v9  ;;  %v1795_v48 = vpack.c.bf16 %v1715_v49, %v1707_v6  ;;  %v14722_v50 = vld [vmem:[#allocation92_spill] sm:$0xff]  ;;  %v14723_v6 = vld [vmem:[#allocation79_spill] sm:$0xff]  ;;  %v14726_v16 = vld [vmem:[#allocation90_spill] sm:$0xff] }
 0x323   : > { %1852 = vst [vmem:[#allocation2 + $0x140] sm:$0xff] %v1788_v12  ;;  %1853 = vst [vmem:[#allocation2 + $0x148] sm:$0xff] %v1789_v10  ;;  %v1376_v32 = vmul.f32 %v12477_v40, %v14717_v36  ;;  %v1377_v54 = vmul.f32 %v12477_v40, %v14718_v0  ;;  %v1378_v56 = vmul.f32 %v12477_v40, %v14719_v20  ;;  %v14727_v49 = vld [vmem:[#allocation98_spill] sm:$0xff] }
 0x324   : > { %1854 = vst [vmem:[#allocation2 + $0x150] sm:$0xff] %v1790_v3  ;;  %1855 = vst [vmem:[#allocation2 + $0x158] sm:$0xff] %v1791_v43  ;;  %v1379_v42 = vmul.f32 %v12477_v40, %v14720_v37  ;;  %v1380_v28 = vmul.f32 %v12477_v40, %v14721_v31  ;;  %v1381_v9 = vmul.f32 %v12477_v40, %v14722_v50  ;;  %v14728_v10 = vld [vmem:[#allocation78_spill] sm:$0xff]  ;;  %v14729_v43 = vld [vmem:[#allocation85_spill] sm:$0xff] }
 0x325   : > { %1856 = vst [vmem:[#allocation2 + $0x160] sm:$0xff] %v1792_v33  ;;  %1857 = vst [vmem:[#allocation2 + $0x168] sm:$0xff] %v1793_v23  ;;  %v1382_v4 = vmul.f32 %v12477_v40, %v14723_v6  ;;  %v1383_v52 = vmul.f32 %v12477_v40, %v14724_v13  ;;  %v1546_v62 = vmul.f32 %v12025_v27, %v1376_v32  ;;  %v14730_v23 = vld [vmem:[#allocation91_spill] sm:$0xff]  ;;  %v14732_v32 = vld [vmem:[#allocation104_spill] sm:$0xff] }
 0x326   : > { %1858 = vst [vmem:[#allocation2 + $0x170] sm:$0xff] %v1794_v15  ;;  %1859 = vst [vmem:[#allocation2 + $0x178] sm:$0xff] %v1795_v48  ;;  %v1547_v61 = vmul.f32 %v12027_v1, %v1377_v54  ;;  %v1548_v14 = vmul.f32 %v12029_v30, %v1378_v56  ;;  %v1549_v39 = vmul.f32 %v12031_v21, %v1379_v42  ;;  %v14731_v48 = vld [vmem:[#allocation97_spill] sm:$0xff] }
 0x327   : > { %v1550_v59 = vmul.f32 %v12033_v38, %v1380_v28  ;;  %v1551_v34 = vmul.f32 %v12035_v60, %v1381_v9  ;;  %v1552_v22 = vmul.f32 %v12037_v5, %v1382_v4  ;;  %v1553_v26 = vmul.f32 %v12039_v29, %v1383_v52 }
 0x328   : > { %v1716_v2 = vadd.f32 %v12041_v44, %v1546_v62  ;;  %v1717_v40 = vadd.f32 %v12043_v41, %v1547_v61  ;;  %v1718_v45 = vadd.f32 %v12045_v57, %v1548_v14  ;;  %v1719_v8 = vadd.f32 %v12047_v63, %v1549_v39 }
 0x329   : > { %v1720_v18 = vadd.f32 %v12049_v51, %v1550_v59  ;;  %v1721_v25 = vadd.f32 %v12051_v24, %v1551_v34  ;;  %v1722_v7 = vadd.f32 %v12053_v46, %v1552_v22  ;;  %v1723_v55 = vadd.f32 %v12055_v11, %v1553_v26 }
 0x32a   : > { %v1384_v47 = vmul.f32 %v12479_v17, %v14725_v53  ;;  %v1385_v35 = vmul.f32 %v12479_v17, %v14726_v16  ;;  %v1386_v12 = vmul.f32 %v12479_v17, %v14727_v49  ;;  %v1387_v3 = vmul.f32 %v12479_v17, %v14728_v10  ;;  %v14733_v16 = vld [vmem:[#allocation95_spill] sm:$0xff]  ;;  %v14734_v49 = vld [vmem:[#allocation100_spill] sm:$0xff]  ;;  %v14735_v10 = vld [vmem:[#allocation101_spill] sm:$0xff] }
 0x32b   : > { %v1388_v33 = vmul.f32 %v12479_v17, %v14729_v43  ;;  %v1389_v15 = vmul.f32 %v12479_v17, %v14730_v23  ;;  %v1390_v36 = vmul.f32 %v12479_v17, %v14731_v48  ;;  %v1391_v0 = vmul.f32 %v12479_v17, %v14732_v32  ;;  %v14740_v43 = vld [vmem:[#allocation130_spill] sm:$0xff] }
 0x32c   : > { %v1554_v54 = vmul.f32 %v12025_v27, %v1384_v47  ;;  %v1555_v20 = vmul.f32 %v12027_v1, %v1385_v35  ;;  %v1556_v56 = vmul.f32 %v12029_v30, %v1386_v12  ;;  %v1557_v37 = vmul.f32 %v12031_v21, %v1387_v3 }
 0x32d   : > { %v1558_v42 = vmul.f32 %v12033_v38, %v1388_v33  ;;  %v1559_v31 = vmul.f32 %v12035_v60, %v1389_v15  ;;  %v1560_v28 = vmul.f32 %v12037_v5, %v1390_v36  ;;  %v1561_v50 = vmul.f32 %v12039_v29, %v1391_v0 }
 0x32e   : > { %v1724_v9 = vadd.f32 %v12041_v44, %v1554_v54  ;;  %v1725_v17 = vadd.f32 %v12043_v41, %v1555_v20  ;;  %v1726_v6 = vadd.f32 %v12045_v57, %v1556_v56  ;;  %v1727_v4 = vadd.f32 %v12047_v63, %v1557_v37 }
 0x32f   : > { %v1728_v13 = vadd.f32 %v12049_v51, %v1558_v42  ;;  %v1729_v52 = vadd.f32 %v12051_v24, %v1559_v31  ;;  %v1730_v62 = vadd.f32 %v12053_v46, %v1560_v28  ;;  %v1731_v61 = vadd.f32 %v12055_v11, %v1561_v50 }
 0x330   : > { %v1796_v14 = vpack.c.bf16 %v1724_v9, %v1716_v2  ;;  %v1797_v39 = vpack.c.bf16 %v1725_v17, %v1717_v40  ;;  %v1798_v59 = vpack.c.bf16 %v1726_v6, %v1718_v45  ;;  %v1799_v34 = vpack.c.bf16 %v1727_v4, %v1719_v8  ;;  %v14736_v40 = vld [vmem:[#allocation102_spill] sm:$0xff]  ;;  %v14741_v17 = vld [vmem:[#allocation93_spill] sm:$0xff] }
 0x331   : > { %v1800_v22 = vpack.c.bf16 %v1728_v13, %v1720_v18  ;;  %v1801_v26 = vpack.c.bf16 %v1729_v52, %v1721_v25  ;;  %v1802_v53 = vpack.c.bf16 %v1730_v62, %v1722_v7  ;;  %v1803_v47 = vpack.c.bf16 %v1731_v61, %v1723_v55  ;;  %v14737_v8 = vld [vmem:[#allocation106_spill] sm:$0xff]  ;;  %v14738_v25 = vld [vmem:[#allocation128_spill] sm:$0xff]  ;;  %v14739_v55 = vld [vmem:[#allocation129_spill] sm:$0xff] }
 0x332   : > { %1860 = vst [vmem:[#allocation2 + $0x180] sm:$0xff] %v1796_v14  ;;  %1861 = vst [vmem:[#allocation2 + $0x188] sm:$0xff] %v1797_v39  ;;  %v1392_v35 = vmul.f32 %v12481_v58, %v14733_v16  ;;  %v1393_v12 = vmul.f32 %v12481_v58, %v14734_v49  ;;  %v1394_v2 = vmul.f32 %v12481_v58, %v14735_v10  ;;  %v14742_v4 = vld [vmem:[#allocation94_spill] sm:$0xff]  ;;  %v14743_v52 = vld [vmem:[#allocation96_spill] sm:$0xff] }
 0x333   : > { %1862 = vst [vmem:[#allocation2 + $0x190] sm:$0xff] %v1798_v59  ;;  %1863 = vst [vmem:[#allocation2 + $0x198] sm:$0xff] %v1799_v34  ;;  %v1395_v45 = vmul.f32 %v12481_v58, %v14736_v40  ;;  %v1396_v18 = vmul.f32 %v12481_v58, %v14737_v8  ;;  %v1397_v7 = vmul.f32 %v12481_v58, %v14738_v25  ;;  %v14744_v61 = vld [vmem:[#allocation99_spill] sm:$0xff]  ;;  %v14746_v34 = vld [vmem:[#allocation105_spill] sm:$0xff] }
 0x334   : > { %1864 = vst [vmem:[#allocation2 + $0x1a0] sm:$0xff] %v1800_v22  ;;  %1865 = vst [vmem:[#allocation2 + $0x1a8] sm:$0xff] %v1801_v26  ;;  %v1398_v3 = vmul.f32 %v12481_v58, %v14739_v55  ;;  %v1399_v33 = vmul.f32 %v12481_v58, %v14740_v43  ;;  %v1562_v23 = vmul.f32 %v12025_v27, %v1392_v35  ;;  %v14745_v39 = vld [vmem:[#allocation103_spill] sm:$0xff] }
 0x335   : > { %1866 = vst [vmem:[#allocation2 + $0x1b0] sm:$0xff] %v1802_v53  ;;  %1867 = vst [vmem:[#allocation2 + $0x1b8] sm:$0xff] %v1803_v47  ;;  %v1563_v15 = vmul.f32 %v12027_v1, %v1393_v12  ;;  %v1564_v48 = vmul.f32 %v12029_v30, %v1394_v2  ;;  %v1565_v36 = vmul.f32 %v12031_v21, %v1395_v45  ;;  %v14747_v26 = vld [vmem:[#allocation131_spill] sm:$0xff]  ;;  %v14748_v47 = vld [vmem:[#allocation132_spill] sm:$0xff] }
 0x336   : > { %v1566_v32 = vmul.f32 %v12033_v38, %v1396_v18  ;;  %v1567_v0 = vmul.f32 %v12035_v60, %v1397_v7  ;;  %v1568_v54 = vmul.f32 %v12037_v5, %v1398_v3  ;;  %v1569_v20 = vmul.f32 %v12039_v29, %v1399_v33 }
 0x337   : > { %v1732_v56 = vadd.f32 %v12041_v44, %v1562_v23  ;;  %v1733_v58 = vadd.f32 %v12043_v41, %v1563_v15  ;;  %v1734_v37 = vadd.f32 %v12045_v57, %v1564_v48  ;;  %v1735_v42 = vadd.f32 %v12047_v63, %v1565_v36 }
 0x338   : > { %v1736_v31 = vadd.f32 %v12049_v51, %v1566_v32  ;;  %v1737_v28 = vadd.f32 %v12051_v24, %v1567_v0  ;;  %v1738_v50 = vadd.f32 %v12053_v46, %v1568_v54  ;;  %v1739_v9 = vadd.f32 %v12055_v11, %v1569_v20 }
 0x339   : > { %v1400_v6 = vmul.f32 %v12487_v19, %v14741_v17  ;;  %v1401_v13 = vmul.f32 %v12487_v19, %v14742_v4  ;;  %v1402_v62 = vmul.f32 %v12487_v19, %v14743_v52  ;;  %v1403_v14 = vmul.f32 %v12487_v19, %v14744_v61 }
 0x33a   : > { %v1404_v59 = vmul.f32 %v12487_v19, %v14745_v39  ;;  %v1405_v22 = vmul.f32 %v12487_v19, %v14746_v34  ;;  %v1406_v53 = vmul.f32 %v12487_v19, %v14747_v26  ;;  %v1407_v16 = vmul.f32 %v12487_v19, %v14748_v47 }
 0x33b   : > { %v1570_v35 = vmul.f32 %v12025_v27, %v1400_v6  ;;  %v1571_v49 = vmul.f32 %v12027_v1, %v1401_v13  ;;  %v1572_v12 = vmul.f32 %v12029_v30, %v1402_v62  ;;  %v1573_v10 = vmul.f32 %v12031_v21, %v1403_v14 }
 0x33c   : > { %v1574_v2 = vmul.f32 %v12033_v38, %v1404_v59  ;;  %v1575_v40 = vmul.f32 %v12035_v60, %v1405_v22  ;;  %v1576_v45 = vmul.f32 %v12037_v5, %v1406_v53  ;;  %v1577_v8 = vmul.f32 %v12039_v29, %v1407_v16 }
 0x33d   : > { %v1740_v18 = vadd.f32 %v12041_v44, %v1570_v35  ;;  %v1741_v19 = vadd.f32 %v12043_v41, %v1571_v49  ;;  %v1742_v27 = vadd.f32 %v12045_v57, %v1572_v12  ;;  %v1743_v1 = vadd.f32 %v12047_v63, %v1573_v10 }
 0x33e   : > { %v1744_v30 = vadd.f32 %v12049_v51, %v1574_v2  ;;  %v1745_v21 = vadd.f32 %v12051_v24, %v1575_v40  ;;  %v1746_v38 = vadd.f32 %v12053_v46, %v1576_v45  ;;  %v1747_v60 = vadd.f32 %v12055_v11, %v1577_v8 }
 0x33f   : > { %v1804_v25 = vpack.c.bf16 %v1740_v18, %v1732_v56  ;;  %v1805_v5 = vpack.c.bf16 %v1741_v19, %v1733_v58  ;;  %v1806_v7 = vpack.c.bf16 %v1742_v27, %v1734_v37  ;;  %v1807_v29 = vpack.c.bf16 %v1743_v1, %v1735_v42 }
 0x340   : > { %v1808_v55 = vpack.c.bf16 %v1744_v30, %v1736_v31  ;;  %v1809_v44 = vpack.c.bf16 %v1745_v21, %v1737_v28  ;;  %v1810_v3 = vpack.c.bf16 %v1746_v38, %v1738_v50  ;;  %v1811_v41 = vpack.c.bf16 %v1747_v60, %v1739_v9 }
 0x341   : > { %1868 = vst [vmem:[#allocation2 + $0x1c0] sm:$0xff] %v1804_v25  ;;  %1869 = vst [vmem:[#allocation2 + $0x1c8] sm:$0xff] %v1805_v5 }
 0x342   : > { %1870 = vst [vmem:[#allocation2 + $0x1d0] sm:$0xff] %v1806_v7  ;;  %1871 = vst [vmem:[#allocation2 + $0x1d8] sm:$0xff] %v1807_v29 }
 0x343   : > { %1872 = vst [vmem:[#allocation2 + $0x1e0] sm:$0xff] %v1808_v55  ;;  %1873 = vst [vmem:[#allocation2 + $0x1e8] sm:$0xff] %v1809_v44 }
 0x344   : > { %1874 = vst [vmem:[#allocation2 + $0x1f0] sm:$0xff] %v1810_v3  ;;  %1875 = vst [vmem:[#allocation2 + $0x1f8] sm:$0xff] %v1811_v41 }
 0x345 PF: > { %v9547_v57 = vld [vmem:[%s10733_s17 + $0x4] ss:$16 sps:$4 sm:$0xff]   ;;  %v9549_v11 = vld [vmem:[%s10733_s17 + $0xc] ss:$16 sps:$4 sm:$0xff]   ;;  %v9551_v46 = vld [vmem:[%s10733_s17] ss:$16 sps:$4 sm:$0xff]  }
 0x346   : > { %3626 = vmatprep.subr.bf16.mxu0 %v9547_v57  ;;  %v9552_v24 = vld [vmem:[%s10733_s17 + $0x8] ss:$16 sps:$4 sm:$0xff]   ;;  %4078 = vmatprep.subr.bf16.mxu1 %v9549_v11  ;;  %v9553_v63 = vld [vmem:[%s10733_s17 + $0x24] ss:$16 sps:$4 sm:$0xff]   ;;  %v9555_v51 = vld [vmem:[%s10733_s17 + $0x2c] ss:$16 sps:$4 sm:$0xff]  }
 0x347   : > { %3627 = vmatpush1.bf16.msra.mxu0 %v9551_v46  ;;  %4079 = vmatpush1.bf16.msra.mxu1 %v9552_v24  ;;  %v9557_v43 = vld [vmem:[%s10733_s17 + $0x20] ss:$16 sps:$4 sm:$0xff]   ;;  %v9558_v33 = vld [vmem:[%s10733_s17 + $0x28] ss:$16 sps:$4 sm:$0xff]   ;;  %v9559_v23 = vld [vmem:[%s10733_s17 + $0x44] ss:$16 sps:$4 sm:$0xff]  }
 0x348   : > { %3628 = vmatprep.subr.bf16.mxu0 %v9553_v63  ;;  %4080 = vmatprep.subr.bf16.mxu1 %v9555_v51  ;;  %v9561_v15 = vld [vmem:[%s10733_s17 + $0x4c] ss:$16 sps:$4 sm:$0xff]   ;;  %v9563_v48 = vld [vmem:[%s10733_s17 + $0x40] ss:$16 sps:$4 sm:$0xff]   ;;  %v9564_v36 = vld [vmem:[%s10733_s17 + $0x48] ss:$16 sps:$4 sm:$0xff]  }
 0x349   : > { %v9565_v32 = vld [vmem:[%s10733_s17 + $0x64] ss:$16 sps:$4 sm:$0xff]   ;;  %v9567_v0 = vld [vmem:[%s10733_s17 + $0x6c] ss:$16 sps:$4 sm:$0xff]   ;;  %v9569_v54 = vld [vmem:[%s10733_s17 + $0x60] ss:$16 sps:$4 sm:$0xff]  }
 0x34a   : > { %v9570_v20 = vld [vmem:[%s10733_s17 + $0x68] ss:$16 sps:$4 sm:$0xff]   ;;  %v9571_v56 = vld [vmem:[%s10733_s17 + $0x84] ss:$16 sps:$4 sm:$0xff]   ;;  %v9573_v58 = vld [vmem:[%s10733_s17 + $0x8c] ss:$16 sps:$4 sm:$0xff]  }
 0x34b   : > { %3629 = vmatpush1.bf16.msra.mxu0 %v9557_v43  ;;  %4081 = vmatpush1.bf16.msra.mxu1 %v9558_v33  ;;  %v9575_v37 = vld [vmem:[%s10733_s17 + $0x80] ss:$16 sps:$4 sm:$0xff]   ;;  %v9576_v42 = vld [vmem:[%s10733_s17 + $0x88] ss:$16 sps:$4 sm:$0xff]   ;;  %v9577_v31 = vld [vmem:[%s10733_s17 + $0xa4] ss:$16 sps:$4 sm:$0xff]  }
 0x34c   : > { %3630 = vmatprep.subr.bf16.mxu0 %v9559_v23  ;;  %4082 = vmatprep.subr.bf16.mxu1 %v9561_v15  ;;  %v9579_v28 = vld [vmem:[%s10733_s17 + $0xac] ss:$16 sps:$4 sm:$0xff]   ;;  %v9581_v50 = vld [vmem:[%s10733_s17 + $0xa0] ss:$16 sps:$4 sm:$0xff]   ;;  %v9582_v9 = vld [vmem:[%s10733_s17 + $0xa8] ss:$16 sps:$4 sm:$0xff]  }
 0x34d   : > { %v9583_v17 = vld [vmem:[%s10733_s17 + $0xc4] ss:$16 sps:$4 sm:$0xff]   ;;  %v9585_v6 = vld [vmem:[%s10733_s17 + $0xcc] ss:$16 sps:$4 sm:$0xff]   ;;  %v9587_v4 = vld [vmem:[%s10733_s17 + $0xc0] ss:$16 sps:$4 sm:$0xff]  }
 0x34e   : > { %v9588_v13 = vld [vmem:[%s10733_s17 + $0xc8] ss:$16 sps:$4 sm:$0xff]   ;;  %v9589_v52 = vld [vmem:[%s10733_s17 + $0xe4] ss:$16 sps:$4 sm:$0xff]   ;;  %v9591_v62 = vld [vmem:[%s10733_s17 + $0xec] ss:$16 sps:$4 sm:$0xff]  }
 0x34f   : > { %3631 = vmatpush1.bf16.msra.mxu0 %v9563_v48  ;;  %4083 = vmatpush1.bf16.msra.mxu1 %v9564_v36  ;;  %v9593_v61 = vld [vmem:[%s10733_s17 + $0xe0] ss:$16 sps:$4 sm:$0xff]   ;;  %v9594_v14 = vld [vmem:[%s10733_s17 + $0xe8] ss:$16 sps:$4 sm:$0xff]   ;;  %v9595_v39 = vld [vmem:[%s10733_s17 + $0x104] ss:$16 sps:$4 sm:$0xff]  }
 0x350   : > { %3632 = vmatprep.subr.bf16.mxu0 %v9565_v32  ;;  %4084 = vmatprep.subr.bf16.mxu1 %v9567_v0  ;;  %v9597_v59 = vld [vmem:[%s10733_s17 + $0x10c] ss:$16 sps:$4 sm:$0xff]   ;;  %v9599_v34 = vld [vmem:[%s10733_s17 + $0x100] ss:$16 sps:$4 sm:$0xff]   ;;  %v9600_v22 = vld [vmem:[%s10733_s17 + $0x108] ss:$16 sps:$4 sm:$0xff]  }
 0x351   : > { %v9601_v26 = vld [vmem:[%s10733_s17 + $0x124] ss:$16 sps:$4 sm:$0xff]   ;;  %v9603_v53 = vld [vmem:[%s10733_s17 + $0x12c] ss:$16 sps:$4 sm:$0xff]   ;;  %v9605_v47 = vld [vmem:[%s10733_s17 + $0x120] ss:$16 sps:$4 sm:$0xff]  }
 0x352   : > { %v9606_v16 = vld [vmem:[%s10733_s17 + $0x128] ss:$16 sps:$4 sm:$0xff]   ;;  %v9607_v35 = vld [vmem:[%s10733_s17 + $0x144] ss:$16 sps:$4 sm:$0xff]   ;;  %v9609_v49 = vld [vmem:[%s10733_s17 + $0x14c] ss:$16 sps:$4 sm:$0xff]  }
 0x353   : > { %3633 = vmatpush1.bf16.msra.mxu0 %v9569_v54  ;;  %4085 = vmatpush1.bf16.msra.mxu1 %v9570_v20  ;;  %v9611_v12 = vld [vmem:[%s10733_s17 + $0x140] ss:$16 sps:$4 sm:$0xff]   ;;  %v9612_v10 = vld [vmem:[%s10733_s17 + $0x148] ss:$16 sps:$4 sm:$0xff]   ;;  %v9613_v2 = vld [vmem:[%s10733_s17 + $0x164] ss:$16 sps:$4 sm:$0xff]  }
 0x354   : > { %3634 = vmatprep.subr.bf16.mxu0 %v9571_v56  ;;  %4086 = vmatprep.subr.bf16.mxu1 %v9573_v58  ;;  %v9615_v40 = vld [vmem:[%s10733_s17 + $0x16c] ss:$16 sps:$4 sm:$0xff]   ;;  %v9617_v8 = vld [vmem:[%s10733_s17 + $0x160] ss:$16 sps:$4 sm:$0xff]   ;;  %v9618_v18 = vld [vmem:[%s10733_s17 + $0x168] ss:$16 sps:$4 sm:$0xff]  }
 0x355   : > { %v2005_v45 = vld [vmem:[#allocation2 + $0x8] sm:$0xff]  ;;  %v9623_v1 = vld [vmem:[%s10733_s17 + $0x180] ss:$16 sps:$4 sm:$0xff]   ;;  %s14751_s22 = sld [smem:[#allocation25_spill]] }
 0x356   : > { %3658 = vmatprep.mubr.bf16.mxu0 %v2005_v45  ;;  %4110 = vmatprep.mubr.bf16.mxu1 %v2005_v45  ;;  %v9619_v19 = vld [vmem:[%s10733_s17 + $0x184] ss:$16 sps:$4 sm:$0xff]   ;;  %v9621_v27 = vld [vmem:[%s10733_s17 + $0x18c] ss:$16 sps:$4 sm:$0xff]   ;;  %v9624_v30 = vld [vmem:[%s10733_s17 + $0x188] ss:$16 sps:$4 sm:$0xff]  }
 0x357   : > { %3635 = vmatpush1.bf16.msra.mxu0 %v9575_v37  ;;  %4087 = vmatpush1.bf16.msra.mxu1 %v9576_v42  ;;  %v9625_v21 = vld [vmem:[%s10733_s17 + $0x1a4] ss:$16 sps:$4 sm:$0xff]   ;;  %v9627_v38 = vld [vmem:[%s10733_s17 + $0x1ac] ss:$16 sps:$4 sm:$0xff]   ;;  %v9629_v60 = vld [vmem:[%s10733_s17 + $0x1a0] ss:$16 sps:$4 sm:$0xff]  }
 0x358   : > { %3636 = vmatprep.subr.bf16.mxu0 %v9577_v31  ;;  %4088 = vmatprep.subr.bf16.mxu1 %v9579_v28  ;;  %v9630_v25 = vld [vmem:[%s10733_s17 + $0x1a8] ss:$16 sps:$4 sm:$0xff]   ;;  %v9631_v5 = vld [vmem:[%s10733_s17 + $0x1c4] ss:$16 sps:$4 sm:$0xff]   ;;  %v9633_v7 = vld [vmem:[%s10733_s17 + $0x1cc] ss:$16 sps:$4 sm:$0xff]  }
 0x359   : > { %v9635_v29 = vld [vmem:[%s10733_s17 + $0x1c0] ss:$16 sps:$4 sm:$0xff]   ;;  %v9636_v55 = vld [vmem:[%s10733_s17 + $0x1c8] ss:$16 sps:$4 sm:$0xff]   ;;  %v9637_v44 = vld [vmem:[%s10733_s17 + $0x1e4] ss:$16 sps:$4 sm:$0xff]  }
 0x35a   : > { %v9639_v3 = vld [vmem:[%s10733_s17 + $0x1ec] ss:$16 sps:$4 sm:$0xff]   ;;  %v9641_v41 = vld [vmem:[%s10733_s17 + $0x1e0] ss:$16 sps:$4 sm:$0xff]   ;;  %v9642_v57 = vld [vmem:[%s10733_s17 + $0x1e8] ss:$16 sps:$4 sm:$0xff]  }
 0x35b   : > { %3637 = vmatpush1.bf16.msra.mxu0 %v9581_v50  ;;  %4089 = vmatpush1.bf16.msra.mxu1 %v9582_v9  ;;  %v9645_v11 = vld [vmem:[%s10733_s17 + $0x204] ss:$16 sps:$4 sm:$0xff]   ;;  %v9648_v46 = vld [vmem:[%s10733_s17 + $0x20c] ss:$16 sps:$4 sm:$0xff]   ;;  %v9643_v63 = vld [vmem:[%s10733_s17 + $0x200] ss:$16 sps:$4 sm:$0xff]  }
 0x35c   : > { %3638 = vmatprep.subr.bf16.mxu0 %v9583_v17  ;;  %4090 = vmatprep.subr.bf16.mxu1 %v9585_v6  ;;  %v2004_v24 = vld [vmem:[#allocation2] sm:$0xff]  ;;  %v9646_v51 = vld [vmem:[%s10733_s17 + $0x208] ss:$16 sps:$4 sm:$0xff]   ;;  %p8963_p0 = scmp.ne.s32.totalorder %s14751_s22, 3 }
 0x35d   : > { %v9651_v43 = vld [vmem:[%s10733_s17 + $0x224] ss:$16 sps:$4 sm:$0xff]   ;;  %v9654_v33 = vld [vmem:[%s10733_s17 + $0x22c] ss:$16 sps:$4 sm:$0xff]   ;;  %v9649_v15 = vld [vmem:[%s10733_s17 + $0x220] ss:$16 sps:$4 sm:$0xff]  }
 0x35e   : > { %v2013_v23 = vld [vmem:[#allocation2 + $0x48] sm:$0xff]  ;;  %v2012_v0 = vld [vmem:[#allocation2 + $0x40] sm:$0xff]  ;;  %vm8217_vm0 = vcmask (!%p8963_p0), 7168  }
 0x35f   : > { %3639 = vmatpush1.bf16.msra.mxu0 %v9587_v4  ;;  %4091 = vmatpush1.bf16.msra.mxu1 %v9588_v13  ;;  %v9652_v48 = vld [vmem:[%s10733_s17 + $0x228] ss:$16 sps:$4 sm:$0xff]   ;;  %v9657_v36 = vld [vmem:[%s10733_s17 + $0x244] ss:$16 sps:$4 sm:$0xff]   ;;  %v9660_v32 = vld [vmem:[%s10733_s17 + $0x24c] ss:$16 sps:$4 sm:$0xff]  }
 0x360   : > { %3640 = vmatprep.subr.bf16.mxu0 %v9589_v52  ;;  %4092 = vmatprep.subr.bf16.mxu1 %v9591_v62  ;;  %v9655_v54 = vld [vmem:[%s10733_s17 + $0x240] ss:$16 sps:$4 sm:$0xff]   ;;  %v9658_v20 = vld [vmem:[%s10733_s17 + $0x248] ss:$16 sps:$4 sm:$0xff]   ;;  %v9663_v56 = vld [vmem:[%s10733_s17 + $0x264] ss:$16 sps:$4 sm:$0xff]  }
 0x361   : > { %v9666_v58 = vld [vmem:[%s10733_s17 + $0x26c] ss:$16 sps:$4 sm:$0xff]   ;;  %v9661_v37 = vld [vmem:[%s10733_s17 + $0x260] ss:$16 sps:$4 sm:$0xff]   ;;  %v9664_v42 = vld [vmem:[%s10733_s17 + $0x268] ss:$16 sps:$4 sm:$0xff]  }
 0x362   : > { %v2021_v31 = vld [vmem:[#allocation2 + $0x88] sm:$0xff]  ;;  %v2020_v9 = vld [vmem:[#allocation2 + $0x80] sm:$0xff] }
 0x363   : > { %3641 = vmatpush1.bf16.msra.mxu0 %v9593_v61  ;;  %4093 = vmatpush1.bf16.msra.mxu1 %v9594_v14  ;;  %v9669_v28 = vld [vmem:[%s10733_s17 + $0x284] ss:$16 sps:$4 sm:$0xff]   ;;  %v9672_v50 = vld [vmem:[%s10733_s17 + $0x28c] ss:$16 sps:$4 sm:$0xff]   ;;  %v9667_v17 = vld [vmem:[%s10733_s17 + $0x280] ss:$16 sps:$4 sm:$0xff]  }
 0x364   : > { %3642 = vmatprep.subr.bf16.mxu0 %v9595_v39  ;;  %4094 = vmatprep.subr.bf16.mxu1 %v9597_v59  ;;  %v9670_v6 = vld [vmem:[%s10733_s17 + $0x288] ss:$16 sps:$4 sm:$0xff]   ;;  %v9675_v4 = vld [vmem:[%s10733_s17 + $0x2a4] ss:$16 sps:$4 sm:$0xff]   ;;  %v9678_v13 = vld [vmem:[%s10733_s17 + $0x2ac] ss:$16 sps:$4 sm:$0xff]  }
 0x365   : > { %v2029_v52 = vld [vmem:[#allocation2 + $0xc8] sm:$0xff]  ;;  %v9673_v62 = vld [vmem:[%s10733_s17 + $0x2a0] ss:$16 sps:$4 sm:$0xff]  }
 0x366   : > { %v9676_v61 = vld [vmem:[%s10733_s17 + $0x2a8] ss:$16 sps:$4 sm:$0xff]   ;;  %v9681_v14 = vld [vmem:[%s10733_s17 + $0x2c4] ss:$16 sps:$4 sm:$0xff]   ;;  %v9684_v39 = vld [vmem:[%s10733_s17 + $0x2cc] ss:$16 sps:$4 sm:$0xff]  }
 0x367   : > { %3643 = vmatpush1.bf16.msra.mxu0 %v9599_v34  ;;  %4095 = vmatpush1.bf16.msra.mxu1 %v9600_v22  ;;  %v2028_v59 = vld [vmem:[#allocation2 + $0xc0] sm:$0xff]  ;;  %v9682_v22 = vld [vmem:[%s10733_s17 + $0x2c8] ss:$16 sps:$4 sm:$0xff]  }
 0x368   : > { %3644 = vmatprep.subr.bf16.mxu0 %v9601_v26  ;;  %4096 = vmatprep.subr.bf16.mxu1 %v9603_v53  ;;  %v9679_v34 = vld [vmem:[%s10733_s17 + $0x2c0] ss:$16 sps:$4 sm:$0xff]   ;;  %v9687_v26 = vld [vmem:[%s10733_s17 + $0x2e4] ss:$16 sps:$4 sm:$0xff]   ;;  %v9690_v53 = vld [vmem:[%s10733_s17 + $0x2ec] ss:$16 sps:$4 sm:$0xff]  }
 0x369   : > { %v9699_v45 = vld [vmem:[%s10733_s17 + $0x324] ss:$16 sps:$4 sm:$0xff]  }
 0x36b   : > { %3645 = vmatpush1.bf16.msra.mxu0 %v9605_v47  ;;  %4097 = vmatpush1.bf16.msra.mxu1 %v9606_v16  ;;  %v2037_v47 = vld [vmem:[#allocation2 + $0x108] sm:$0xff]  ;;  %v9685_v16 = vld [vmem:[%s10733_s17 + $0x2e0] ss:$16 sps:$4 sm:$0xff]  }
 0x36c   : > { %3646 = vmatprep.subr.bf16.mxu0 %v9607_v35  ;;  %4098 = vmatprep.subr.bf16.mxu1 %v9609_v49  ;;  %v9688_v35 = vld [vmem:[%s10733_s17 + $0x2e8] ss:$16 sps:$4 sm:$0xff]   ;;  %v9693_v49 = vld [vmem:[%s10733_s17 + $0x304] ss:$16 sps:$4 sm:$0xff]  }
 0x36f   : > { %3647 = vmatpush1.bf16.msra.mxu0 %v9611_v12  ;;  %4099 = vmatpush1.bf16.msra.mxu1 %v9612_v10  ;;  %v9696_v12 = vld [vmem:[%s10733_s17 + $0x30c] ss:$16 sps:$4 sm:$0xff]  }
 0x370   : > { %3648 = vmatprep.subr.bf16.mxu0 %v9613_v2  ;;  %4100 = vmatprep.subr.bf16.mxu1 %v9615_v40  ;;  %v2036_v10 = vld [vmem:[#allocation2 + $0x100] sm:$0xff]  ;;  %v9694_v40 = vld [vmem:[%s10733_s17 + $0x308] ss:$16 sps:$4 sm:$0xff]  }
 0x371   : > { %v9691_v2 = vld [vmem:[%s10733_s17 + $0x300] ss:$16 sps:$4 sm:$0xff]  }
 0x373   : > { %3649 = vmatpush1.bf16.msra.mxu0 %v9617_v8  ;;  %4101 = vmatpush1.bf16.msra.mxu1 %v9618_v18  ;;  %v9702_v8 = vld [vmem:[%s10733_s17 + $0x32c] ss:$16 sps:$4 sm:$0xff]   ;;  %v9697_v18 = vld [vmem:[%s10733_s17 + $0x320] ss:$16 sps:$4 sm:$0xff]  }
 0x374   : > { %3650 = vmatprep.subr.bf16.mxu0 %v9619_v19  ;;  %4102 = vmatprep.subr.bf16.mxu1 %v9621_v27  ;;  %v9700_v19 = vld [vmem:[%s10733_s17 + $0x328] ss:$16 sps:$4 sm:$0xff]  }
 0x375   : > { %v2045_v27 = vld [vmem:[#allocation2 + $0x148] sm:$0xff] }
 0x377   : > { %3651 = vmatpush1.bf16.msra.mxu0 %v9623_v1  ;;  %4103 = vmatpush1.bf16.msra.mxu1 %v9624_v30  ;;  %v9705_v1 = vld [vmem:[%s10733_s17 + $0x344] ss:$16 sps:$4 sm:$0xff]   ;;  %v9708_v30 = vld [vmem:[%s10733_s17 + $0x34c] ss:$16 sps:$4 sm:$0xff]  }
 0x378   : > { %3652 = vmatprep.subr.bf16.mxu0 %v9625_v21  ;;  %4104 = vmatprep.subr.bf16.mxu1 %v9627_v38  ;;  %v2044_v21 = vld [vmem:[#allocation2 + $0x140] sm:$0xff] }
 0x379   : > { %v9703_v38 = vld [vmem:[%s10733_s17 + $0x340] ss:$16 sps:$4 sm:$0xff]  }
 0x37b   : > { %3653 = vmatpush1.bf16.msra.mxu0 %v9629_v60  ;;  %4105 = vmatpush1.bf16.msra.mxu1 %v9630_v25  ;;  %v9706_v60 = vld [vmem:[%s10733_s17 + $0x348] ss:$16 sps:$4 sm:$0xff]   ;;  %v9711_v25 = vld [vmem:[%s10733_s17 + $0x364] ss:$16 sps:$4 sm:$0xff]  }
 0x37c   : > { %3654 = vmatprep.subr.bf16.mxu0 %v9631_v5  ;;  %4106 = vmatprep.subr.bf16.mxu1 %v9633_v7  ;;  %v9714_v5 = vld [vmem:[%s10733_s17 + $0x36c] ss:$16 sps:$4 sm:$0xff]  }
 0x37d   : > { %v2053_v7 = vld [vmem:[#allocation2 + $0x188] sm:$0xff] }
 0x37f   : > { %3655 = vmatpush1.bf16.msra.mxu0 %v9635_v29  ;;  %4107 = vmatpush1.bf16.msra.mxu1 %v9636_v55  ;;  %v9709_v29 = vld [vmem:[%s10733_s17 + $0x360] ss:$16 sps:$4 sm:$0xff]   ;;  %v9712_v55 = vld [vmem:[%s10733_s17 + $0x368] ss:$16 sps:$4 sm:$0xff]  }
 0x380   : > { %3656 = vmatprep.subr.bf16.mxu0 %v9637_v44  ;;  %4108 = vmatprep.subr.bf16.mxu1 %v9639_v3  ;;  %v9717_v44 = vld [vmem:[%s10733_s17 + $0x384] ss:$16 sps:$4 sm:$0xff]   ;;  %v9720_v3 = vld [vmem:[%s10733_s17 + $0x38c] ss:$16 sps:$4 sm:$0xff]  }
 0x383   : > { %3657 = vmatpush1.bf16.msra.mxu0 %v9641_v41  ;;  %4109 = vmatpush1.bf16.msra.mxu1 %v9642_v57  ;;  %v2052_v41 = vld [vmem:[#allocation2 + $0x180] sm:$0xff] }
 0x384   : > { %3739 = vmatprep.subr.bf16.mxu0 %v9645_v11  ;;  %4191 = vmatprep.subr.bf16.mxu1 %v9648_v46  ;;  %v9715_v57 = vld [vmem:[%s10733_s17 + $0x380] ss:$16 sps:$4 sm:$0xff]   ;;  %v9718_v11 = vld [vmem:[%s10733_s17 + $0x388] ss:$16 sps:$4 sm:$0xff]   ;;  %v9723_v46 = vld [vmem:[%s10733_s17 + $0x3a4] ss:$16 sps:$4 sm:$0xff]  }
 0x386   : > { %3659 = vmatmul.mubr.bf16.vlgmr.msra.gmra.mrb[0].mxu0 %v2004_v24  ;;  %4111 = vmatmul.mubr.bf16.vlgmr.msra.gmra.mrb[0].mxu1 %v2004_v24  ;;  %v9726_v24 = vld [vmem:[%s10733_s17 + $0x3ac] ss:$16 sps:$4 sm:$0xff]  }
 0x387   : > { %3740 = vmatpush1.bf16.msra.mxu0 %v9643_v63  ;;  %4192 = vmatpush1.bf16.msra.mxu1 %v9646_v51  ;;  %v2061_v63 = vld [vmem:[#allocation2 + $0x1c8] sm:$0xff]  ;;  %v9721_v51 = vld [vmem:[%s10733_s17 + $0x3a0] ss:$16 sps:$4 sm:$0xff]  }
 0x388   : > { %3741 = vmatprep.subr.bf16.mxu0 %v9651_v43  ;;  %4193 = vmatprep.subr.bf16.mxu1 %v9654_v33  ;;  %v9724_v43 = vld [vmem:[%s10733_s17 + $0x3a8] ss:$16 sps:$4 sm:$0xff]   ;;  %v9729_v33 = vld [vmem:[%s10733_s17 + $0x3c4] ss:$16 sps:$4 sm:$0xff]  }
 0x389   : > { %3668 = vmatprep.mubr.bf16.mxu0 %v2013_v23  ;;  %4120 = vmatprep.mubr.bf16.mxu1 %v2013_v23  ;;  %v9732_v23 = vld [vmem:[%s10733_s17 + $0x3cc] ss:$16 sps:$4 sm:$0xff]  }
 0x38b   : > { %3742 = vmatpush1.bf16.msra.mxu0 %v9649_v15  ;;  %4194 = vmatpush1.bf16.msra.mxu1 %v9652_v48  ;;  %v2060_v15 = vld [vmem:[#allocation2 + $0x1c0] sm:$0xff] }
 0x38c   : > { %3743 = vmatprep.subr.bf16.mxu0 %v9657_v36  ;;  %4195 = vmatprep.subr.bf16.mxu1 %v9660_v32  ;;  %v9727_v48 = vld [vmem:[%s10733_s17 + $0x3c0] ss:$16 sps:$4 sm:$0xff]   ;;  %v9730_v36 = vld [vmem:[%s10733_s17 + $0x3c8] ss:$16 sps:$4 sm:$0xff]   ;;  %v9735_v32 = vld [vmem:[%s10733_s17 + $0x3e4] ss:$16 sps:$4 sm:$0xff]  }
 0x38e   : > { %3669 = vmatmul.mubr.bf16.gmra.mrb[4].mxu0 %v2012_v0  ;;  %4121 = vmatmul.mubr.bf16.gmra.mrb[4].mxu1 %v2012_v0  ;;  %v9738_v0 = vld [vmem:[%s10733_s17 + $0x3ec] ss:$16 sps:$4 sm:$0xff]  }
 0x38f   : > { %3744 = vmatpush1.bf16.msra.mxu0 %v9655_v54  ;;  %4196 = vmatpush1.bf16.msra.mxu1 %v9658_v20  ;;  %v9733_v54 = vld [vmem:[%s10733_s17 + $0x3e0] ss:$16 sps:$4 sm:$0xff]   ;;  %v9736_v20 = vld [vmem:[%s10733_s17 + $0x3e8] ss:$16 sps:$4 sm:$0xff]  }
 0x390   : > { %3745 = vmatprep.subr.bf16.mxu0 %v9663_v56  ;;  %4197 = vmatprep.subr.bf16.mxu1 %v9666_v58  ;;  %v2007_v56 = vld [vmem:[#allocation2 + $0x18] sm:$0xff] }
 0x391   : > { %3678 = vmatprep.mubr.bf16.mxu0 %v2021_v31  ;;  %4130 = vmatprep.mubr.bf16.mxu1 %v2021_v31  ;;  %v9741_v58 = vld [vmem:[%s10733_s17 + $0x404] ss:$16 sps:$4 sm:$0xff]   ;;  %v9739_v31 = vld [vmem:[%s10733_s17 + $0x400] ss:$16 sps:$4 sm:$0xff]  }
 0x393   : > { %3746 = vmatpush1.bf16.msra.mxu0 %v9661_v37  ;;  %4198 = vmatpush1.bf16.msra.mxu1 %v9664_v42  ;;  %v9744_v37 = vld [vmem:[%s10733_s17 + $0x40c] ss:$16 sps:$4 sm:$0xff]  }
 0x394   : > { %3747 = vmatprep.subr.bf16.mxu0 %v9669_v28  ;;  %4199 = vmatprep.subr.bf16.mxu1 %v9672_v50  ;;  %v2006_v42 = vld [vmem:[#allocation2 + $0x10] sm:$0xff]  ;;  %v9742_v28 = vld [vmem:[%s10733_s17 + $0x408] ss:$16 sps:$4 sm:$0xff]  }
 0x395   : > { %v9747_v50 = vld [vmem:[%s10733_s17 + $0x424] ss:$16 sps:$4 sm:$0xff]  }
 0x396   : > { %3679 = vmatmul.mubr.bf16.gmra.mrb[8].mxu0 %v2020_v9  ;;  %4131 = vmatmul.mubr.bf16.gmra.mrb[8].mxu1 %v2020_v9  ;;  %v9750_v9 = vld [vmem:[%s10733_s17 + $0x42c] ss:$16 sps:$4 sm:$0xff]  }
 0x397   : > { %3748 = vmatpush1.bf16.msra.mxu0 %v9667_v17  ;;  %4200 = vmatpush1.bf16.msra.mxu1 %v9670_v6  ;;  %v2015_v17 = vld [vmem:[#allocation2 + $0x58] sm:$0xff]  ;;  %v9745_v6 = vld [vmem:[%s10733_s17 + $0x420] ss:$16 sps:$4 sm:$0xff]  }
 0x398   : > { %3749 = vmatprep.subr.bf16.mxu0 %v9675_v4  ;;  %4201 = vmatprep.subr.bf16.mxu1 %v9678_v13  ;;  %v9748_v4 = vld [vmem:[%s10733_s17 + $0x428] ss:$16 sps:$4 sm:$0xff]   ;;  %v9753_v13 = vld [vmem:[%s10733_s17 + $0x444] ss:$16 sps:$4 sm:$0xff]  }
 0x399   : > { %3688 = vmatprep.mubr.bf16.mxu0 %v2029_v52  ;;  %4140 = vmatprep.mubr.bf16.mxu1 %v2029_v52  ;;  %v9756_v52 = vld [vmem:[%s10733_s17 + $0x44c] ss:$16 sps:$4 sm:$0xff]  }
 0x39b   : > { %3750 = vmatpush1.bf16.msra.mxu0 %v9673_v62  ;;  %4202 = vmatpush1.bf16.msra.mxu1 %v9676_v61  ;;  %v2014_v62 = vld [vmem:[#allocation2 + $0x50] sm:$0xff] }
 0x39c   : > { %3751 = vmatprep.subr.bf16.mxu0 %v9681_v14  ;;  %4203 = vmatprep.subr.bf16.mxu1 %v9684_v39  ;;  %v9751_v61 = vld [vmem:[%s10733_s17 + $0x440] ss:$16 sps:$4 sm:$0xff]   ;;  %v9754_v14 = vld [vmem:[%s10733_s17 + $0x448] ss:$16 sps:$4 sm:$0xff]   ;;  %v9759_v39 = vld [vmem:[%s10733_s17 + $0x464] ss:$16 sps:$4 sm:$0xff]  }
 0x39e   : > { %3689 = vmatmul.mubr.bf16.gmra.mrb[12].mxu0 %v2028_v59  ;;  %4141 = vmatmul.mubr.bf16.gmra.mrb[12].mxu1 %v2028_v59  ;;  %v9762_v59 = vld [vmem:[%s10733_s17 + $0x46c] ss:$16 sps:$4 sm:$0xff]  }
 0x39f   : > { %3752 = vmatpush1.bf16.msra.mxu0 %v9679_v34  ;;  %4204 = vmatpush1.bf16.msra.mxu1 %v9682_v22  ;;  %v2023_v34 = vld [vmem:[#allocation2 + $0x98] sm:$0xff]  ;;  %v9757_v22 = vld [vmem:[%s10733_s17 + $0x460] ss:$16 sps:$4 sm:$0xff]  }
 0x3a0   : > { %3753 = vmatprep.subr.bf16.mxu0 %v9687_v26  ;;  %4205 = vmatprep.subr.bf16.mxu1 %v9690_v53  ;;  %v9760_v26 = vld [vmem:[%s10733_s17 + $0x468] ss:$16 sps:$4 sm:$0xff]   ;;  %v9765_v53 = vld [vmem:[%s10733_s17 + $0x484] ss:$16 sps:$4 sm:$0xff]  }
 0x3a1   : > { %3698 = vmatprep.mubr.bf16.mxu0 %v2037_v47  ;;  %4150 = vmatprep.mubr.bf16.mxu1 %v2037_v47  ;;  %v9768_v47 = vld [vmem:[%s10733_s17 + $0x48c] ss:$16 sps:$4 sm:$0xff]  }
 0x3a3   : > { %3754 = vmatpush1.bf16.msra.mxu0 %v9685_v16  ;;  %4206 = vmatpush1.bf16.msra.mxu1 %v9688_v35  ;;  %v2022_v16 = vld [vmem:[#allocation2 + $0x90] sm:$0xff] }
 0x3a4   : > { %3755 = vmatprep.subr.bf16.mxu0 %v9693_v49  ;;  %4207 = vmatprep.subr.bf16.mxu1 %v9696_v12  ;;  %v9763_v35 = vld [vmem:[%s10733_s17 + $0x480] ss:$16 sps:$4 sm:$0xff]   ;;  %v9766_v49 = vld [vmem:[%s10733_s17 + $0x488] ss:$16 sps:$4 sm:$0xff]   ;;  %v9771_v12 = vld [vmem:[%s10733_s17 + $0x4a4] ss:$16 sps:$4 sm:$0xff]  }
 0x3a6   : > { %3699 = vmatmul.mubr.bf16.gmra.mrb[16].mxu0 %v2036_v10  ;;  %4151 = vmatmul.mubr.bf16.gmra.mrb[16].mxu1 %v2036_v10  ;;  %v9774_v10 = vld [vmem:[%s10733_s17 + $0x4ac] ss:$16 sps:$4 sm:$0xff]  }
 0x3a7   : > { %3756 = vmatpush1.bf16.msra.mxu0 %v9691_v2  ;;  %4208 = vmatpush1.bf16.msra.mxu1 %v9694_v40  ;;  %v9769_v2 = vld [vmem:[%s10733_s17 + $0x4a0] ss:$16 sps:$4 sm:$0xff]   ;;  %v9772_v40 = vld [vmem:[%s10733_s17 + $0x4a8] ss:$16 sps:$4 sm:$0xff]  }
 0x3a8   : > { %3757 = vmatprep.subr.bf16.mxu0 %v9699_v45  ;;  %4209 = vmatprep.subr.bf16.mxu1 %v9702_v8  ;;  %v2031_v45 = vld [vmem:[#allocation2 + $0xd8] sm:$0xff] }
 0x3a9   : > { %3708 = vmatprep.mubr.bf16.mxu0 %v2045_v27  ;;  %4160 = vmatprep.mubr.bf16.mxu1 %v2045_v27  ;;  %v9777_v8 = vld [vmem:[%s10733_s17 + $0x4c4] ss:$16 sps:$4 sm:$0xff]   ;;  %v9775_v27 = vld [vmem:[%s10733_s17 + $0x4c0] ss:$16 sps:$4 sm:$0xff]  }
 0x3ab   : > { %3758 = vmatpush1.bf16.msra.mxu0 %v9697_v18  ;;  %4210 = vmatpush1.bf16.msra.mxu1 %v9700_v19  ;;  %v9780_v18 = vld [vmem:[%s10733_s17 + $0x4cc] ss:$16 sps:$4 sm:$0xff]  }
 0x3ac   : > { %3759 = vmatprep.subr.bf16.mxu0 %v9705_v1  ;;  %4211 = vmatprep.subr.bf16.mxu1 %v9708_v30  ;;  %v2030_v19 = vld [vmem:[#allocation2 + $0xd0] sm:$0xff]  ;;  %v9778_v1 = vld [vmem:[%s10733_s17 + $0x4c8] ss:$16 sps:$4 sm:$0xff]  }
 0x3ad   : > { %v9783_v30 = vld [vmem:[%s10733_s17 + $0x4e4] ss:$16 sps:$4 sm:$0xff]  }
 0x3ae   : > { %3709 = vmatmul.mubr.bf16.gmra.mrb[20].mxu0 %v2044_v21  ;;  %4161 = vmatmul.mubr.bf16.gmra.mrb[20].mxu1 %v2044_v21  ;;  %v9786_v21 = vld [vmem:[%s10733_s17 + $0x4ec] ss:$16 sps:$4 sm:$0xff]  }
 0x3af   : > { %3760 = vmatpush1.bf16.msra.mxu0 %v9703_v38  ;;  %4212 = vmatpush1.bf16.msra.mxu1 %v9706_v60  ;;  %v2039_v38 = vld [vmem:[#allocation2 + $0x118] sm:$0xff]  ;;  %v9781_v60 = vld [vmem:[%s10733_s17 + $0x4e0] ss:$16 sps:$4 sm:$0xff]  }
 0x3b0   : > { %3761 = vmatprep.subr.bf16.mxu0 %v9711_v25  ;;  %4213 = vmatprep.subr.bf16.mxu1 %v9714_v5  ;;  %v9784_v25 = vld [vmem:[%s10733_s17 + $0x4e8] ss:$16 sps:$4 sm:$0xff]   ;;  %v9789_v5 = vld [vmem:[%s10733_s17 + $0x504] ss:$16 sps:$4 sm:$0xff]  }
 0x3b1   : > { %3718 = vmatprep.mubr.bf16.mxu0 %v2053_v7  ;;  %4170 = vmatprep.mubr.bf16.mxu1 %v2053_v7  ;;  %v9792_v7 = vld [vmem:[%s10733_s17 + $0x50c] ss:$16 sps:$4 sm:$0xff]  }
 0x3b3   : > { %3762 = vmatpush1.bf16.msra.mxu0 %v9709_v29  ;;  %4214 = vmatpush1.bf16.msra.mxu1 %v9712_v55  ;;  %v2038_v29 = vld [vmem:[#allocation2 + $0x110] sm:$0xff] }
 0x3b4   : > { %3763 = vmatprep.subr.bf16.mxu0 %v9717_v44  ;;  %4215 = vmatprep.subr.bf16.mxu1 %v9720_v3  ;;  %v9787_v55 = vld [vmem:[%s10733_s17 + $0x500] ss:$16 sps:$4 sm:$0xff]   ;;  %v9790_v44 = vld [vmem:[%s10733_s17 + $0x508] ss:$16 sps:$4 sm:$0xff]   ;;  %v9795_v3 = vld [vmem:[%s10733_s17 + $0x524] ss:$16 sps:$4 sm:$0xff]  }
 0x3b6   : > { %3719 = vmatmul.mubr.bf16.gmra.mrb[24].mxu0 %v2052_v41  ;;  %4171 = vmatmul.mubr.bf16.gmra.mrb[24].mxu1 %v2052_v41  ;;  %v9798_v41 = vld [vmem:[%s10733_s17 + $0x52c] ss:$16 sps:$4 sm:$0xff]  }
 0x3b7   : > { %3764 = vmatpush1.bf16.msra.mxu0 %v9715_v57  ;;  %4216 = vmatpush1.bf16.msra.mxu1 %v9718_v11  ;;  %v2047_v57 = vld [vmem:[#allocation2 + $0x158] sm:$0xff]  ;;  %v9793_v11 = vld [vmem:[%s10733_s17 + $0x520] ss:$16 sps:$4 sm:$0xff]  }
 0x3b8   : > { %3765 = vmatprep.subr.bf16.mxu0 %v9723_v46  ;;  %4217 = vmatprep.subr.bf16.mxu1 %v9726_v24  ;;  %v9796_v46 = vld [vmem:[%s10733_s17 + $0x528] ss:$16 sps:$4 sm:$0xff]   ;;  %v9801_v24 = vld [vmem:[%s10733_s17 + $0x544] ss:$16 sps:$4 sm:$0xff]  }
 0x3b9   : > { %3728 = vmatprep.mubr.bf16.mxu0 %v2061_v63  ;;  %4180 = vmatprep.mubr.bf16.mxu1 %v2061_v63  ;;  %v9804_v63 = vld [vmem:[%s10733_s17 + $0x54c] ss:$16 sps:$4 sm:$0xff]  }
 0x3bb   : > { %3766 = vmatpush1.bf16.msra.mxu0 %v9721_v51  ;;  %4218 = vmatpush1.bf16.msra.mxu1 %v9724_v43  ;;  %v2046_v51 = vld [vmem:[#allocation2 + $0x150] sm:$0xff] }
 0x3bc   : > { %3767 = vmatprep.subr.bf16.mxu0 %v9729_v33  ;;  %4219 = vmatprep.subr.bf16.mxu1 %v9732_v23  ;;  %v9799_v43 = vld [vmem:[%s10733_s17 + $0x540] ss:$16 sps:$4 sm:$0xff]   ;;  %v9802_v33 = vld [vmem:[%s10733_s17 + $0x548] ss:$16 sps:$4 sm:$0xff]   ;;  %v9807_v23 = vld [vmem:[%s10733_s17 + $0x564] ss:$16 sps:$4 sm:$0xff]  }
 0x3be   : > { %3729 = vmatmul.mubr.bf16.gmra.mrb[28].mxu0 %v2060_v15  ;;  %4181 = vmatmul.mubr.bf16.gmra.mrb[28].mxu1 %v2060_v15  ;;  %v9810_v15 = vld [vmem:[%s10733_s17 + $0x56c] ss:$16 sps:$4 sm:$0xff]  }
 0x3bf   : > { %3768 = vmatpush1.bf16.msra.mxu0 %v9727_v48  ;;  %4220 = vmatpush1.bf16.msra.mxu1 %v9730_v36  ;;  %v9805_v48 = vld [vmem:[%s10733_s17 + $0x560] ss:$16 sps:$4 sm:$0xff]   ;;  %v9808_v36 = vld [vmem:[%s10733_s17 + $0x568] ss:$16 sps:$4 sm:$0xff]  }
 0x3c0   : > { %3769 = vmatprep.subr.bf16.mxu0 %v9735_v32  ;;  %4221 = vmatprep.subr.bf16.mxu1 %v9738_v0  ;;  %v2055_v32 = vld [vmem:[#allocation2 + $0x198] sm:$0xff] }
 0x3c1   : > { %3771 = vmatprep.mubr.bf16.mxu0 %v2007_v56  ;;  %4223 = vmatprep.mubr.bf16.mxu1 %v2007_v56  ;;  %v9813_v0 = vld [vmem:[%s10733_s17 + $0x584] ss:$16 sps:$4 sm:$0xff]   ;;  %v9811_v56 = vld [vmem:[%s10733_s17 + $0x580] ss:$16 sps:$4 sm:$0xff]  }
 0x3c3   : > { %3770 = vmatpush1.bf16.msra.mxu0 %v9733_v54  ;;  %4222 = vmatpush1.bf16.msra.mxu1 %v9736_v20  ;;  %v9816_v54 = vld [vmem:[%s10733_s17 + $0x58c] ss:$16 sps:$4 sm:$0xff]  }
 0x3c4   : > { %3852 = vmatprep.subr.bf16.mxu0 %v9741_v58  ;;  %4304 = vmatprep.subr.bf16.mxu1 %v9744_v37  ;;  %v2054_v20 = vld [vmem:[#allocation2 + $0x190] sm:$0xff]  ;;  %v9814_v58 = vld [vmem:[%s10733_s17 + $0x588] ss:$16 sps:$4 sm:$0xff]  }
 0x3c5   : > { %v9819_v37 = vld [vmem:[%s10733_s17 + $0x5a4] ss:$16 sps:$4 sm:$0xff]  }
 0x3c6   : > { %3772 = vmatmul.mubr.bf16.vlgmr.msra.gmra.mrb[0].mxu0 %v2006_v42  ;;  %4224 = vmatmul.mubr.bf16.vlgmr.msra.gmra.mrb[0].mxu1 %v2006_v42  ;;  %v9822_v42 = vld [vmem:[%s10733_s17 + $0x5ac] ss:$16 sps:$4 sm:$0xff]  }
 0x3c7   : > { %3853 = vmatpush1.bf16.msra.mxu0 %v9739_v31  ;;  %4305 = vmatpush1.bf16.msra.mxu1 %v9742_v28  ;;  %v2063_v31 = vld [vmem:[#allocation2 + $0x1d8] sm:$0xff]  ;;  %v9817_v28 = vld [vmem:[%s10733_s17 + $0x5a0] ss:$16 sps:$4 sm:$0xff]  }
 0x3c8   : > { %3854 = vmatprep.subr.bf16.mxu0 %v9747_v50  ;;  %4306 = vmatprep.subr.bf16.mxu1 %v9750_v9  ;;  %v9820_v50 = vld [vmem:[%s10733_s17 + $0x5a8] ss:$16 sps:$4 sm:$0xff]   ;;  %v9825_v9 = vld [vmem:[%s10733_s17 + $0x5c4] ss:$16 sps:$4 sm:$0xff]  }
 0x3c9   : > { %3781 = vmatprep.mubr.bf16.mxu0 %v2015_v17  ;;  %4233 = vmatprep.mubr.bf16.mxu1 %v2015_v17  ;;  %v9828_v17 = vld [vmem:[%s10733_s17 + $0x5cc] ss:$16 sps:$4 sm:$0xff]  }
 0x3cb   : > { %3855 = vmatpush1.bf16.msra.mxu0 %v9745_v6  ;;  %4307 = vmatpush1.bf16.msra.mxu1 %v9748_v4  ;;  %v2062_v6 = vld [vmem:[#allocation2 + $0x1d0] sm:$0xff] }
 0x3cc   : > { %3856 = vmatprep.subr.bf16.mxu0 %v9753_v13  ;;  %4308 = vmatprep.subr.bf16.mxu1 %v9756_v52  ;;  %v9823_v4 = vld [vmem:[%s10733_s17 + $0x5c0] ss:$16 sps:$4 sm:$0xff]   ;;  %v9826_v13 = vld [vmem:[%s10733_s17 + $0x5c8] ss:$16 sps:$4 sm:$0xff]   ;;  %v9831_v52 = vld [vmem:[%s10733_s17 + $0x5e4] ss:$16 sps:$4 sm:$0xff]  }
 0x3ce   : > { %3782 = vmatmul.mubr.bf16.gmra.mrb[4].mxu0 %v2014_v62  ;;  %4234 = vmatmul.mubr.bf16.gmra.mrb[4].mxu1 %v2014_v62  ;;  %v9834_v62 = vld [vmem:[%s10733_s17 + $0x5ec] ss:$16 sps:$4 sm:$0xff]  }
 0x3cf   : > { %3857 = vmatpush1.bf16.msra.mxu0 %v9751_v61  ;;  %4309 = vmatpush1.bf16.msra.mxu1 %v9754_v14  ;;  %v2009_v61 = vld [vmem:[#allocation2 + $0x28] sm:$0xff]  ;;  %v9829_v14 = vld [vmem:[%s10733_s17 + $0x5e0] ss:$16 sps:$4 sm:$0xff]  }
 0x3d0   : > { %3858 = vmatprep.subr.bf16.mxu0 %v9759_v39  ;;  %4310 = vmatprep.subr.bf16.mxu1 %v9762_v59  ;;  %v9832_v39 = vld [vmem:[%s10733_s17 + $0x5e8] ss:$16 sps:$4 sm:$0xff]   ;;  %v9837_v59 = vld [vmem:[%s10733_s17 + $0x604] ss:$16 sps:$4 sm:$0xff]  }
 0x3d1   : > { %3791 = vmatprep.mubr.bf16.mxu0 %v2023_v34  ;;  %4243 = vmatprep.mubr.bf16.mxu1 %v2023_v34  ;;  %v9840_v34 = vld [vmem:[%s10733_s17 + $0x60c] ss:$16 sps:$4 sm:$0xff]  }
 0x3d3   : > { %3859 = vmatpush1.bf16.msra.mxu0 %v9757_v22  ;;  %4311 = vmatpush1.bf16.msra.mxu1 %v9760_v26  ;;  %v2008_v22 = vld [vmem:[#allocation2 + $0x20] sm:$0xff] }
 0x3d4   : > { %3860 = vmatprep.subr.bf16.mxu0 %v9765_v53  ;;  %4312 = vmatprep.subr.bf16.mxu1 %v9768_v47  ;;  %v9835_v26 = vld [vmem:[%s10733_s17 + $0x600] ss:$16 sps:$4 sm:$0xff]   ;;  %v9838_v53 = vld [vmem:[%s10733_s17 + $0x608] ss:$16 sps:$4 sm:$0xff]   ;;  %v9843_v47 = vld [vmem:[%s10733_s17 + $0x624] ss:$16 sps:$4 sm:$0xff]  }
 0x3d6   : > { %3792 = vmatmul.mubr.bf16.gmra.mrb[8].mxu0 %v2022_v16  ;;  %4244 = vmatmul.mubr.bf16.gmra.mrb[8].mxu1 %v2022_v16  ;;  %v9846_v16 = vld [vmem:[%s10733_s17 + $0x62c] ss:$16 sps:$4 sm:$0xff]  }
 0x3d7   : > { %3861 = vmatpush1.bf16.msra.mxu0 %v9763_v35  ;;  %4313 = vmatpush1.bf16.msra.mxu1 %v9766_v49  ;;  %v2017_v35 = vld [vmem:[#allocation2 + $0x68] sm:$0xff]  ;;  %v9841_v49 = vld [vmem:[%s10733_s17 + $0x620] ss:$16 sps:$4 sm:$0xff]  }
 0x3d8   : > { %3862 = vmatprep.subr.bf16.mxu0 %v9771_v12  ;;  %4314 = vmatprep.subr.bf16.mxu1 %v9774_v10  ;;  %v9844_v12 = vld [vmem:[%s10733_s17 + $0x628] ss:$16 sps:$4 sm:$0xff]   ;;  %v9849_v10 = vld [vmem:[%s10733_s17 + $0x644] ss:$16 sps:$4 sm:$0xff]  }
 0x3d9   : > { %3801 = vmatprep.mubr.bf16.mxu0 %v2031_v45  ;;  %4253 = vmatprep.mubr.bf16.mxu1 %v2031_v45  ;;  %v9847_v45 = vld [vmem:[%s10733_s17 + $0x640] ss:$16 sps:$4 sm:$0xff]  }
 0x3db   : > { %3863 = vmatpush1.bf16.msra.mxu0 %v9769_v2  ;;  %4315 = vmatpush1.bf16.msra.mxu1 %v9772_v40  ;;  %v9852_v2 = vld [vmem:[%s10733_s17 + $0x64c] ss:$16 sps:$4 sm:$0xff]  }
 0x3dc   : > { %3864 = vmatprep.subr.bf16.mxu0 %v9777_v8  ;;  %4316 = vmatprep.subr.bf16.mxu1 %v9780_v18  ;;  %v2016_v40 = vld [vmem:[#allocation2 + $0x60] sm:$0xff]  ;;  %v9850_v8 = vld [vmem:[%s10733_s17 + $0x648] ss:$16 sps:$4 sm:$0xff]  }
 0x3dd   : > { %v9855_v18 = vld [vmem:[%s10733_s17 + $0x664] ss:$16 sps:$4 sm:$0xff]  }
 0x3de   : > { %3802 = vmatmul.mubr.bf16.gmra.mrb[12].mxu0 %v2030_v19  ;;  %4254 = vmatmul.mubr.bf16.gmra.mrb[12].mxu1 %v2030_v19  ;;  %v9858_v19 = vld [vmem:[%s10733_s17 + $0x66c] ss:$16 sps:$4 sm:$0xff]  }
 0x3df   : > { %3865 = vmatpush1.bf16.msra.mxu0 %v9775_v27  ;;  %4317 = vmatpush1.bf16.msra.mxu1 %v9778_v1  ;;  %v2025_v27 = vld [vmem:[#allocation2 + $0xa8] sm:$0xff]  ;;  %v9853_v1 = vld [vmem:[%s10733_s17 + $0x660] ss:$16 sps:$4 sm:$0xff]  }
 0x3e0   : > { %3866 = vmatprep.subr.bf16.mxu0 %v9783_v30  ;;  %4318 = vmatprep.subr.bf16.mxu1 %v9786_v21  ;;  %v9856_v30 = vld [vmem:[%s10733_s17 + $0x668] ss:$16 sps:$4 sm:$0xff]   ;;  %v9861_v21 = vld [vmem:[%s10733_s17 + $0x684] ss:$16 sps:$4 sm:$0xff]  }
 0x3e1   : > { %3811 = vmatprep.mubr.bf16.mxu0 %v2039_v38  ;;  %4263 = vmatprep.mubr.bf16.mxu1 %v2039_v38  ;;  %v9864_v38 = vld [vmem:[%s10733_s17 + $0x68c] ss:$16 sps:$4 sm:$0xff]  }
 0x3e3   : > { %3867 = vmatpush1.bf16.msra.mxu0 %v9781_v60  ;;  %4319 = vmatpush1.bf16.msra.mxu1 %v9784_v25  ;;  %v2024_v60 = vld [vmem:[#allocation2 + $0xa0] sm:$0xff] }
 0x3e4   : > { %3868 = vmatprep.subr.bf16.mxu0 %v9789_v5  ;;  %4320 = vmatprep.subr.bf16.mxu1 %v9792_v7  ;;  %v9859_v25 = vld [vmem:[%s10733_s17 + $0x680] ss:$16 sps:$4 sm:$0xff]   ;;  %v9862_v5 = vld [vmem:[%s10733_s17 + $0x688] ss:$16 sps:$4 sm:$0xff]   ;;  %v9867_v7 = vld [vmem:[%s10733_s17 + $0x6a4] ss:$16 sps:$4 sm:$0xff]  }
 0x3e6   : > { %3812 = vmatmul.mubr.bf16.gmra.mrb[16].mxu0 %v2038_v29  ;;  %4264 = vmatmul.mubr.bf16.gmra.mrb[16].mxu1 %v2038_v29  ;;  %v9870_v29 = vld [vmem:[%s10733_s17 + $0x6ac] ss:$16 sps:$4 sm:$0xff]  }
 0x3e7   : > { %3869 = vmatpush1.bf16.msra.mxu0 %v9787_v55  ;;  %4321 = vmatpush1.bf16.msra.mxu1 %v9790_v44  ;;  %v2033_v55 = vld [vmem:[#allocation2 + $0xe8] sm:$0xff]  ;;  %v9865_v44 = vld [vmem:[%s10733_s17 + $0x6a0] ss:$16 sps:$4 sm:$0xff]  }
 0x3e8   : > { %3870 = vmatprep.subr.bf16.mxu0 %v9795_v3  ;;  %4322 = vmatprep.subr.bf16.mxu1 %v9798_v41  ;;  %v9868_v3 = vld [vmem:[%s10733_s17 + $0x6a8] ss:$16 sps:$4 sm:$0xff]   ;;  %v9873_v41 = vld [vmem:[%s10733_s17 + $0x6c4] ss:$16 sps:$4 sm:$0xff]  }
 0x3e9   : > { %3821 = vmatprep.mubr.bf16.mxu0 %v2047_v57  ;;  %4273 = vmatprep.mubr.bf16.mxu1 %v2047_v57  ;;  %v9876_v57 = vld [vmem:[%s10733_s17 + $0x6cc] ss:$16 sps:$4 sm:$0xff]  }
 0x3eb   : > { %3871 = vmatpush1.bf16.msra.mxu0 %v9793_v11  ;;  %4323 = vmatpush1.bf16.msra.mxu1 %v9796_v46  ;;  %v2032_v11 = vld [vmem:[#allocation2 + $0xe0] sm:$0xff] }
 0x3ec   : > { %3872 = vmatprep.subr.bf16.mxu0 %v9801_v24  ;;  %4324 = vmatprep.subr.bf16.mxu1 %v9804_v63  ;;  %v9871_v46 = vld [vmem:[%s10733_s17 + $0x6c0] ss:$16 sps:$4 sm:$0xff]   ;;  %v9874_v24 = vld [vmem:[%s10733_s17 + $0x6c8] ss:$16 sps:$4 sm:$0xff]   ;;  %v9879_v63 = vld [vmem:[%s10733_s17 + $0x6e4] ss:$16 sps:$4 sm:$0xff]  }
 0x3ee   : > { %3822 = vmatmul.mubr.bf16.gmra.mrb[20].mxu0 %v2046_v51  ;;  %4274 = vmatmul.mubr.bf16.gmra.mrb[20].mxu1 %v2046_v51  ;;  %v9882_v51 = vld [vmem:[%s10733_s17 + $0x6ec] ss:$16 sps:$4 sm:$0xff]  }
 0x3ef   : > { %3873 = vmatpush1.bf16.msra.mxu0 %v9799_v43  ;;  %4325 = vmatpush1.bf16.msra.mxu1 %v9802_v33  ;;  %v2041_v43 = vld [vmem:[#allocation2 + $0x128] sm:$0xff]  ;;  %v9877_v33 = vld [vmem:[%s10733_s17 + $0x6e0] ss:$16 sps:$4 sm:$0xff]  }
 0x3f0   : > { %3874 = vmatprep.subr.bf16.mxu0 %v9807_v23  ;;  %4326 = vmatprep.subr.bf16.mxu1 %v9810_v15  ;;  %v9880_v23 = vld [vmem:[%s10733_s17 + $0x6e8] ss:$16 sps:$4 sm:$0xff]   ;;  %v9885_v15 = vld [vmem:[%s10733_s17 + $0x704] ss:$16 sps:$4 sm:$0xff]  }
 0x3f1   : > { %3831 = vmatprep.mubr.bf16.mxu0 %v2055_v32  ;;  %4283 = vmatprep.mubr.bf16.mxu1 %v2055_v32  ;;  %v9883_v32 = vld [vmem:[%s10733_s17 + $0x700] ss:$16 sps:$4 sm:$0xff]  }
 0x3f3   : > { %3875 = vmatpush1.bf16.msra.mxu0 %v9805_v48  ;;  %4327 = vmatpush1.bf16.msra.mxu1 %v9808_v36  ;;  %v9888_v48 = vld [vmem:[%s10733_s17 + $0x70c] ss:$16 sps:$4 sm:$0xff]  }
 0x3f4   : > { %3876 = vmatprep.subr.bf16.mxu0 %v9813_v0  ;;  %4328 = vmatprep.subr.bf16.mxu1 %v9816_v54  ;;  %v2040_v36 = vld [vmem:[#allocation2 + $0x120] sm:$0xff]  ;;  %v9886_v0 = vld [vmem:[%s10733_s17 + $0x708] ss:$16 sps:$4 sm:$0xff]  }
 0x3f5   : > { %v9891_v54 = vld [vmem:[%s10733_s17 + $0x724] ss:$16 sps:$4 sm:$0xff]  }
 0x3f6   : > { %3832 = vmatmul.mubr.bf16.gmra.mrb[24].mxu0 %v2054_v20  ;;  %4284 = vmatmul.mubr.bf16.gmra.mrb[24].mxu1 %v2054_v20  ;;  %v9894_v20 = vld [vmem:[%s10733_s17 + $0x72c] ss:$16 sps:$4 sm:$0xff]  }
 0x3f7   : > { %3877 = vmatpush1.bf16.msra.mxu0 %v9811_v56  ;;  %4329 = vmatpush1.bf16.msra.mxu1 %v9814_v58  ;;  %v2049_v56 = vld [vmem:[#allocation2 + $0x168] sm:$0xff]  ;;  %v9889_v58 = vld [vmem:[%s10733_s17 + $0x720] ss:$16 sps:$4 sm:$0xff]  }
 0x3f8   : > { %3878 = vmatprep.subr.bf16.mxu0 %v9819_v37  ;;  %4330 = vmatprep.subr.bf16.mxu1 %v9822_v42  ;;  %v9892_v37 = vld [vmem:[%s10733_s17 + $0x728] ss:$16 sps:$4 sm:$0xff]   ;;  %v9897_v42 = vld [vmem:[%s10733_s17 + $0x744] ss:$16 sps:$4 sm:$0xff]  }
 0x3f9   : > { %3841 = vmatprep.mubr.bf16.mxu0 %v2063_v31  ;;  %4293 = vmatprep.mubr.bf16.mxu1 %v2063_v31  ;;  %v9900_v31 = vld [vmem:[%s10733_s17 + $0x74c] ss:$16 sps:$4 sm:$0xff]  }
 0x3fb   : > { %3879 = vmatpush1.bf16.msra.mxu0 %v9817_v28  ;;  %4331 = vmatpush1.bf16.msra.mxu1 %v9820_v50  ;;  %v2048_v28 = vld [vmem:[#allocation2 + $0x160] sm:$0xff] }
 0x3fc   : > { %3880 = vmatprep.subr.bf16.mxu0 %v9825_v9  ;;  %4332 = vmatprep.subr.bf16.mxu1 %v9828_v17  ;;  %v9895_v50 = vld [vmem:[%s10733_s17 + $0x740] ss:$16 sps:$4 sm:$0xff]   ;;  %v9898_v9 = vld [vmem:[%s10733_s17 + $0x748] ss:$16 sps:$4 sm:$0xff]   ;;  %v9903_v17 = vld [vmem:[%s10733_s17 + $0x764] ss:$16 sps:$4 sm:$0xff]  }
 0x3fe   : > { %3842 = vmatmul.mubr.bf16.gmra.mrb[28].mxu0 %v2062_v6  ;;  %4294 = vmatmul.mubr.bf16.gmra.mrb[28].mxu1 %v2062_v6  ;;  %v9906_v6 = vld [vmem:[%s10733_s17 + $0x76c] ss:$16 sps:$4 sm:$0xff]  }
 0x3ff   : > { %3881 = vmatpush1.bf16.msra.mxu0 %v9823_v4  ;;  %4333 = vmatpush1.bf16.msra.mxu1 %v9826_v13  ;;  %v2057_v4 = vld [vmem:[#allocation2 + $0x1a8] sm:$0xff]  ;;  %v9901_v13 = vld [vmem:[%s10733_s17 + $0x760] ss:$16 sps:$4 sm:$0xff]  }
 0x400   : > { %3882 = vmatprep.subr.bf16.mxu0 %v9831_v52  ;;  %4334 = vmatprep.subr.bf16.mxu1 %v9834_v62  ;;  %v9904_v52 = vld [vmem:[%s10733_s17 + $0x768] ss:$16 sps:$4 sm:$0xff]   ;;  %v9909_v62 = vld [vmem:[%s10733_s17 + $0x784] ss:$16 sps:$4 sm:$0xff]  }
 0x401   : > { %3884 = vmatprep.mubr.bf16.mxu0 %v2009_v61  ;;  %4336 = vmatprep.mubr.bf16.mxu1 %v2009_v61  ;;  %v9912_v61 = vld [vmem:[%s10733_s17 + $0x78c] ss:$16 sps:$4 sm:$0xff]  }
 0x403   : > { %3883 = vmatpush1.bf16.msra.mxu0 %v9829_v14  ;;  %4335 = vmatpush1.bf16.msra.mxu1 %v9832_v39  ;;  %v2056_v14 = vld [vmem:[#allocation2 + $0x1a0] sm:$0xff] }
 0x404   : > { %3965 = vmatprep.subr.bf16.mxu0 %v9837_v59  ;;  %4417 = vmatprep.subr.bf16.mxu1 %v9840_v34  ;;  %v9907_v39 = vld [vmem:[%s10733_s17 + $0x780] ss:$16 sps:$4 sm:$0xff]   ;;  %v9910_v59 = vld [vmem:[%s10733_s17 + $0x788] ss:$16 sps:$4 sm:$0xff]   ;;  %v9915_v34 = vld [vmem:[%s10733_s17 + $0x7a4] ss:$16 sps:$4 sm:$0xff]  }
 0x406   : > { %3885 = vmatmul.mubr.bf16.vlgmr.msra.gmra.mrb[0].mxu0 %v2008_v22  ;;  %4337 = vmatmul.mubr.bf16.vlgmr.msra.gmra.mrb[0].mxu1 %v2008_v22  ;;  %v9918_v22 = vld [vmem:[%s10733_s17 + $0x7ac] ss:$16 sps:$4 sm:$0xff]  }
 0x407   : > { %3966 = vmatpush1.bf16.msra.mxu0 %v9835_v26  ;;  %4418 = vmatpush1.bf16.msra.mxu1 %v9838_v53  ;;  %v2065_v26 = vld [vmem:[#allocation2 + $0x1e8] sm:$0xff]  ;;  %v9913_v53 = vld [vmem:[%s10733_s17 + $0x7a0] ss:$16 sps:$4 sm:$0xff]  }
 0x408   : > { %3967 = vmatprep.subr.bf16.mxu0 %v9843_v47  ;;  %4419 = vmatprep.subr.bf16.mxu1 %v9846_v16  ;;  %v9916_v47 = vld [vmem:[%s10733_s17 + $0x7a8] ss:$16 sps:$4 sm:$0xff]   ;;  %v9921_v16 = vld [vmem:[%s10733_s17 + $0x7c4] ss:$16 sps:$4 sm:$0xff]  }
 0x409   : > { %3894 = vmatprep.mubr.bf16.mxu0 %v2017_v35  ;;  %4346 = vmatprep.mubr.bf16.mxu1 %v2017_v35  ;;  %v9924_v35 = vld [vmem:[%s10733_s17 + $0x7cc] ss:$16 sps:$4 sm:$0xff]  }
 0x40b   : > { %3968 = vmatpush1.bf16.msra.mxu0 %v9841_v49  ;;  %4420 = vmatpush1.bf16.msra.mxu1 %v9844_v12  ;;  %v2064_v49 = vld [vmem:[#allocation2 + $0x1e0] sm:$0xff] }
 0x40c   : > { %3969 = vmatprep.subr.bf16.mxu0 %v9849_v10  ;;  %4421 = vmatprep.subr.bf16.mxu1 %v9852_v2  ;;  %v9919_v12 = vld [vmem:[%s10733_s17 + $0x7c0] ss:$16 sps:$4 sm:$0xff]   ;;  %v9922_v10 = vld [vmem:[%s10733_s17 + $0x7c8] ss:$16 sps:$4 sm:$0xff]   ;;  %v9927_v2 = vld [vmem:[%s10733_s17 + $0x7e4] ss:$16 sps:$4 sm:$0xff]  }
 0x40e   : > { %3895 = vmatmul.mubr.bf16.gmra.mrb[4].mxu0 %v2016_v40  ;;  %4347 = vmatmul.mubr.bf16.gmra.mrb[4].mxu1 %v2016_v40  ;;  %v9930_v40 = vld [vmem:[%s10733_s17 + $0x7ec] ss:$16 sps:$4 sm:$0xff]  }
 0x40f   : > { %3970 = vmatpush1.bf16.msra.mxu0 %v9847_v45  ;;  %4422 = vmatpush1.bf16.msra.mxu1 %v9850_v8  ;;  %v4754_v45 = vld [vmem:[%s10742_s23] sm:$0xff] }
 0x410   : > { %3971 = vmatprep.subr.bf16.mxu0 %v9855_v18  ;;  %4423 = vmatprep.subr.bf16.mxu1 %v9858_v19  ;;  %v4758_v8 = vld [vmem:[%s10742_s23 + $0x20] sm:$0xff]  ;;  %v4755_v18 = vld [vmem:[%s10742_s23 + $0x8] sm:$0xff] }
 0x411   : > { %3904 = vmatprep.mubr.bf16.mxu0 %v2025_v27  ;;  %4356 = vmatprep.mubr.bf16.mxu1 %v2025_v27  ;;  %v4759_v19 = vld [vmem:[%s10742_s23 + $0x28] sm:$0xff]  ;;  %v2011_v27 = vld [vmem:[#allocation2 + $0x38] sm:$0xff] }
 0x413   : > { %3972 = vmatpush1.bf16.msra.mxu0 %v9853_v1  ;;  %4424 = vmatpush1.bf16.msra.mxu1 %v9856_v30  ;;  %v9925_v1 = vld [vmem:[%s10733_s17 + $0x7e0] ss:$16 sps:$4 sm:$0xff]   ;;  %v9928_v30 = vld [vmem:[%s10733_s17 + $0x7e8] ss:$16 sps:$4 sm:$0xff]  }
 0x414   : > { %3973 = vmatprep.subr.bf16.mxu0 %v9861_v21  ;;  %4425 = vmatprep.subr.bf16.mxu1 %v9864_v38  ;;  %v8708_v21 = vcombine.high %v4754_v45, %v4758_v8  ;;  %v8710_v38 = vcombine.high %v4755_v18, %v4759_v19 }
 0x416   : > { %3905 = vmatmul.mubr.bf16.gmra.mrb[8].mxu0 %v2024_v60  ;;  %4357 = vmatmul.mubr.bf16.gmra.mrb[8].mxu1 %v2024_v60  ;;  %v4762_v60 = vld [vmem:[%s10742_s23 + $0x40] sm:$0xff] }
 0x417   : > { %3974 = vmatpush1.bf16.msra.mxu0 %v9859_v25  ;;  %4426 = vmatpush1.bf16.msra.mxu1 %v9862_v5  ;;  %v4766_v25 = vld [vmem:[%s10742_s23 + $0x60] sm:$0xff]  ;;  %v4763_v5 = vld [vmem:[%s10742_s23 + $0x48] sm:$0xff] }
 0x418   : > { %3975 = vmatprep.subr.bf16.mxu0 %v9867_v7  ;;  %4427 = vmatprep.subr.bf16.mxu1 %v9870_v29  ;;  %v4767_v7 = vld [vmem:[%s10742_s23 + $0x68] sm:$0xff]  ;;  %v2010_v29 = vld [vmem:[#allocation2 + $0x30] sm:$0xff] }
 0x419   : > { %3914 = vmatprep.mubr.bf16.mxu0 %v2033_v55  ;;  %4366 = vmatprep.mubr.bf16.mxu1 %v2033_v55  ;;  %v2019_v55 = vld [vmem:[#allocation2 + $0x78] sm:$0xff] }
 0x41b   : > { %3976 = vmatpush1.bf16.msra.mxu0 %v9865_v44  ;;  %4428 = vmatpush1.bf16.msra.mxu1 %v9868_v3  ;;  %v8707_v44 = vcombine.low %v4754_v45, %v4758_v8  ;;  %v8709_v3 = vcombine.low %v4755_v18, %v4759_v19  ;;  %v4814_v45 = vld [vmem:[%s10742_s23 + $0x1e0] sm:$0xff]  ;;  %v4811_v8 = vld [vmem:[%s10742_s23 + $0x1c8] sm:$0xff]  ;;  %v2034_v19 = vld [vmem:[#allocation2 + $0xf0] sm:$0xff] }
 0x41c   : > { %3977 = vmatprep.subr.bf16.mxu0 %v9873_v41  ;;  %4429 = vmatprep.subr.bf16.mxu1 %v9876_v57  ;;  %v8716_v41 = vcombine.high %v4762_v60, %v4766_v25  ;;  %v8718_v57 = vcombine.high %v4763_v5, %v4767_v7  ;;  %v4815_v18 = vld [vmem:[%s10742_s23 + $0x1e8] sm:$0xff] }
 0x41e   : > { %3915 = vmatmul.mubr.bf16.gmra.mrb[12].mxu0 %v2032_v11  ;;  %4367 = vmatmul.mubr.bf16.gmra.mrb[12].mxu1 %v2032_v11  ;;  %v4770_v11 = vld [vmem:[%s10742_s23 + $0x80] sm:$0xff] }
 0x41f   : > { %3978 = vmatpush1.bf16.msra.mxu0 %v9871_v46  ;;  %4430 = vmatpush1.bf16.msra.mxu1 %v9874_v24  ;;  %v4774_v46 = vld [vmem:[%s10742_s23 + $0xa0] sm:$0xff]  ;;  %v4771_v24 = vld [vmem:[%s10742_s23 + $0x88] sm:$0xff] }
 0x420   : > { %3979 = vmatprep.subr.bf16.mxu0 %v9879_v63  ;;  %4431 = vmatprep.subr.bf16.mxu1 %v9882_v51  ;;  %v4775_v63 = vld [vmem:[%s10742_s23 + $0xa8] sm:$0xff]  ;;  %v8715_v51 = vcombine.low %v4762_v60, %v4766_v25  ;;  %v4818_v60 = vld [vmem:[%s10742_s23 + $0x200] sm:$0xff] }
 0x421   : > { %3924 = vmatprep.mubr.bf16.mxu0 %v2041_v43  ;;  %4376 = vmatprep.mubr.bf16.mxu1 %v2041_v43  ;;  %v8717_v43 = vcombine.low %v4763_v5, %v4767_v7  ;;  %v4822_v25 = vld [vmem:[%s10742_s23 + $0x220] sm:$0xff]  ;;  %v4819_v5 = vld [vmem:[%s10742_s23 + $0x208] sm:$0xff] }
 0x422   : > { %v4823_v7 = vld [vmem:[%s10742_s23 + $0x228] sm:$0xff] }
 0x423   : > { %3980 = vmatpush1.bf16.msra.mxu0 %v9877_v33  ;;  %4432 = vmatpush1.bf16.msra.mxu1 %v9880_v23  ;;  %v8724_v33 = vcombine.high %v4770_v11, %v4774_v46  ;;  %v8726_v23 = vcombine.high %v4771_v24, %v4775_v63 }
 0x424   : > { %3981 = vmatprep.subr.bf16.mxu0 %v9885_v15  ;;  %4433 = vmatprep.subr.bf16.mxu1 %v9888_v48  ;;  %v4778_v15 = vld [vmem:[%s10742_s23 + $0xc0] sm:$0xff] }
 0x425   : > { %v4782_v48 = vld [vmem:[%s10742_s23 + $0xe0] sm:$0xff] }
 0x426   : > { %3925 = vmatmul.mubr.bf16.gmra.mrb[16].mxu0 %v2040_v36  ;;  %4377 = vmatmul.mubr.bf16.gmra.mrb[16].mxu1 %v2040_v36  ;;  %v4779_v36 = vld [vmem:[%s10742_s23 + $0xc8] sm:$0xff] }
 0x427   : > { %3982 = vmatpush1.bf16.msra.mxu0 %v9883_v32  ;;  %4434 = vmatpush1.bf16.msra.mxu1 %v9886_v0  ;;  %v4783_v32 = vld [vmem:[%s10742_s23 + $0xe8] sm:$0xff]  ;;  %v2018_v0 = vld [vmem:[#allocation2 + $0x70] sm:$0xff] }
 0x428   : > { %3983 = vmatprep.subr.bf16.mxu0 %v9891_v54  ;;  %4435 = vmatprep.subr.bf16.mxu1 %v9894_v20  ;;  %v2027_v54 = vld [vmem:[#allocation2 + $0xb8] sm:$0xff]  ;;  %v8723_v20 = vcombine.low %v4770_v11, %v4774_v46  ;;  %v4827_v11 = vld [vmem:[%s10742_s23 + $0x248] sm:$0xff] }
 0x429   : > { %3934 = vmatprep.mubr.bf16.mxu0 %v2049_v56  ;;  %4386 = vmatprep.mubr.bf16.mxu1 %v2049_v56  ;;  %v8725_v56 = vcombine.low %v4771_v24, %v4775_v63  ;;  %v4831_v46 = vld [vmem:[%s10742_s23 + $0x268] sm:$0xff]  ;;  %v2042_v24 = vld [vmem:[#allocation2 + $0x130] sm:$0xff]  ;;  %v2051_v63 = vld [vmem:[#allocation2 + $0x178] sm:$0xff] }
 0x42b   : > { %3984 = vmatpush1.bf16.msra.mxu0 %v9889_v58  ;;  %4436 = vmatpush1.bf16.msra.mxu1 %v9892_v37  ;;  %v8732_v58 = vcombine.high %v4778_v15, %v4782_v48  ;;  %v8734_v37 = vcombine.high %v4779_v36, %v4783_v32 }
 0x42c   : > { %3985 = vmatprep.subr.bf16.mxu0 %v9897_v42  ;;  %4437 = vmatprep.subr.bf16.mxu1 %v9900_v31  ;;  %v4786_v42 = vld [vmem:[%s10742_s23 + $0x100] sm:$0xff] }
 0x42d   : > { %v4790_v31 = vld [vmem:[%s10742_s23 + $0x120] sm:$0xff] }
 0x42e   : > { %3935 = vmatmul.mubr.bf16.gmra.mrb[20].mxu0 %v2048_v28  ;;  %4387 = vmatmul.mubr.bf16.gmra.mrb[20].mxu1 %v2048_v28  ;;  %v4787_v28 = vld [vmem:[%s10742_s23 + $0x108] sm:$0xff] }
 0x42f   : > { %3986 = vmatpush1.bf16.msra.mxu0 %v9895_v50  ;;  %4438 = vmatpush1.bf16.msra.mxu1 %v9898_v9  ;;  %v4791_v50 = vld [vmem:[%s10742_s23 + $0x128] sm:$0xff]  ;;  %v8731_v9 = vcombine.low %v4778_v15, %v4782_v48  ;;  %v4834_v15 = vld [vmem:[%s10742_s23 + $0x280] sm:$0xff] }
 0x430   : > { %3987 = vmatprep.subr.bf16.mxu0 %v9903_v17  ;;  %4439 = vmatprep.subr.bf16.mxu1 %v9906_v6  ;;  %v8733_v17 = vcombine.low %v4779_v36, %v4783_v32  ;;  %v8740_v6 = vcombine.high %v4786_v42, %v4790_v31  ;;  %v4838_v48 = vld [vmem:[%s10742_s23 + $0x2a0] sm:$0xff]  ;;  %v4835_v36 = vld [vmem:[%s10742_s23 + $0x288] sm:$0xff] }
 0x431   : > { %3944 = vmatprep.mubr.bf16.mxu0 %v2057_v4  ;;  %4396 = vmatprep.mubr.bf16.mxu1 %v2057_v4  ;;  %v8742_v4 = vcombine.high %v4787_v28, %v4791_v50  ;;  %v4839_v32 = vld [vmem:[%s10742_s23 + $0x2a8] sm:$0xff] }
 0x433   : > { %3988 = vmatpush1.bf16.msra.mxu0 %v9901_v13  ;;  %4440 = vmatpush1.bf16.msra.mxu1 %v9904_v52  ;;  %v4794_v13 = vld [vmem:[%s10742_s23 + $0x140] sm:$0xff] }
 0x434   : > { %3989 = vmatprep.subr.bf16.mxu0 %v9909_v62  ;;  %4441 = vmatprep.subr.bf16.mxu1 %v9912_v61  ;;  %v4798_v52 = vld [vmem:[%s10742_s23 + $0x160] sm:$0xff]  ;;  %v4795_v62 = vld [vmem:[%s10742_s23 + $0x148] sm:$0xff] }
 0x435   : > { %v4799_v61 = vld [vmem:[%s10742_s23 + $0x168] sm:$0xff] }
 0x436   : > { %3945 = vmatmul.mubr.bf16.gmra.mrb[24].mxu0 %v2056_v14  ;;  %4397 = vmatmul.mubr.bf16.gmra.mrb[24].mxu1 %v2056_v14  ;;  %v2026_v14 = vld [vmem:[#allocation2 + $0xb0] sm:$0xff] }
 0x437   : > { %3990 = vmatpush1.bf16.msra.mxu0 %v9907_v39  ;;  %4442 = vmatpush1.bf16.msra.mxu1 %v9910_v59  ;;  %v2035_v39 = vld [vmem:[#allocation2 + $0xf8] sm:$0xff]  ;;  %v8739_v59 = vcombine.low %v4786_v42, %v4790_v31  ;;  %v4843_v42 = vld [vmem:[%s10742_s23 + $0x2c8] sm:$0xff] }
 0x438   : > { %3991 = vmatprep.subr.bf16.mxu0 %v9915_v34  ;;  %4443 = vmatprep.subr.bf16.mxu1 %v9918_v22  ;;  %v8741_v34 = vcombine.low %v4787_v28, %v4791_v50  ;;  %v8748_v22 = vcombine.high %v4794_v13, %v4798_v52  ;;  %v4847_v31 = vld [vmem:[%s10742_s23 + $0x2e8] sm:$0xff]  ;;  %v2050_v28 = vld [vmem:[#allocation2 + $0x170] sm:$0xff]  ;;  %v2059_v50 = vld [vmem:[#allocation2 + $0x1b8] sm:$0xff] }
 0x439   : > { %3954 = vmatprep.mubr.bf16.mxu0 %v2065_v26  ;;  %4406 = vmatprep.mubr.bf16.mxu1 %v2065_v26  ;;  %v8750_v26 = vcombine.high %v4795_v62, %v4799_v61 }
 0x43b   : > { %3992 = vmatpush1.bf16.msra.mxu0 %v9913_v53  ;;  %4444 = vmatpush1.bf16.msra.mxu1 %v9916_v47  ;;  %v4802_v53 = vld [vmem:[%s10742_s23 + $0x180] sm:$0xff] }
 0x43c   : > { %3993 = vmatprep.subr.bf16.mxu0 %v9921_v16  ;;  %4445 = vmatprep.subr.bf16.mxu1 %v9924_v35  ;;  %v4806_v47 = vld [vmem:[%s10742_s23 + $0x1a0] sm:$0xff]  ;;  %v4803_v16 = vld [vmem:[%s10742_s23 + $0x188] sm:$0xff] }
 0x43d   : > { %v4807_v35 = vld [vmem:[%s10742_s23 + $0x1a8] sm:$0xff] }
 0x43e   : > { %3955 = vmatmul.mubr.bf16.gmra.mrb[28].mxu0 %v2064_v49  ;;  %4407 = vmatmul.mubr.bf16.gmra.mrb[28].mxu1 %v2064_v49  ;;  %v8747_v49 = vcombine.low %v4794_v13, %v4798_v52  ;;  %v4850_v13 = vld [vmem:[%s10742_s23 + $0x300] sm:$0xff] }
 0x43f   : > { %3994 = vmatpush1.bf16.msra.mxu0 %v9919_v12  ;;  %4446 = vmatpush1.bf16.msra.mxu1 %v9922_v10  ;;  %v8749_v12 = vcombine.low %v4795_v62, %v4799_v61  ;;  %v8756_v10 = vcombine.high %v4802_v53, %v4806_v47  ;;  %v4854_v52 = vld [vmem:[%s10742_s23 + $0x320] sm:$0xff]  ;;  %v4851_v62 = vld [vmem:[%s10742_s23 + $0x308] sm:$0xff] }
 0x440   : > { %3995 = vmatprep.subr.bf16.mxu0 %v9927_v2  ;;  %4447 = vmatprep.subr.bf16.mxu1 %v9930_v40  ;;  %v8758_v2 = vcombine.high %v4803_v16, %v4807_v35  ;;  %v4810_v40 = vld [vmem:[%s10742_s23 + $0x1c0] sm:$0xff]  ;;  %v4855_v61 = vld [vmem:[%s10742_s23 + $0x328] sm:$0xff] }
 0x441   : > { %3997 = vmatprep.mubr.bf16.mxu0 %v2011_v27  ;;  %4449 = vmatprep.mubr.bf16.mxu1 %v2011_v27  ;;  %v2043_v27 = vld [vmem:[#allocation2 + $0x138] sm:$0xff] }
 0x443   : > { %3996 = vmatpush1.bf16.msra.mxu0 %v9925_v1  ;;  %4448 = vmatpush1.bf16.msra.mxu1 %v9928_v30  ;;  %v8755_v1 = vcombine.low %v4802_v53, %v4806_v47  ;;  %v8757_v30 = vcombine.low %v4803_v16, %v4807_v35  ;;  %v4859_v53 = vld [vmem:[%s10742_s23 + $0x348] sm:$0xff]  ;;  %v2058_v16 = vld [vmem:[#allocation2 + $0x1b0] sm:$0xff]  ;;  %v2067_v35 = vld [vmem:[#allocation2 + $0x1f8] sm:$0xff] }
 0x444   : > { %6290 = vmatprep.subr.bf16.mxu0 %v8708_v21  ;;  %6516 = vmatprep.subr.bf16.mxu1 %v8710_v38  ;;  %v8764_v21 = vcombine.high %v4810_v40, %v4814_v45  ;;  %v8766_v38 = vcombine.high %v4811_v8, %v4815_v18  ;;  %v4863_v47 = vld [vmem:[%s10742_s23 + $0x368] sm:$0xff] }
 0x446   : > { %3998 = vmatmul.mubr.bf16.vlgmr.msra.gmra.mrb[0].mxu0 %v2010_v29  ;;  %4450 = vmatmul.mubr.bf16.vlgmr.msra.gmra.mrb[0].mxu1 %v2010_v29  ;;  %v8763_v29 = vcombine.low %v4810_v40, %v4814_v45  ;;  %v8813_v45 = vcombine.low %v4859_v53, %v4863_v47 }
 0x447   : > { %4007 = vmatprep.mubr.bf16.mxu0 %v2019_v55  ;;  %4459 = vmatprep.mubr.bf16.mxu1 %v2019_v55  ;;  %v8765_v55 = vcombine.low %v4811_v8, %v4815_v18  ;;  %v2066_v8 = vld [vmem:[#allocation2 + $0x1f0] sm:$0xff]  ;;  %v4866_v18 = vld [vmem:[%s10742_s23 + $0x380] sm:$0xff] }
 0x448   : > { %6291 = vmatpush1.bf16.msra.mxu0 %v8707_v44  ;;  %6517 = vmatpush1.bf16.msra.mxu1 %v8709_v3  ;;  %v8772_v44 = vcombine.high %v4818_v60, %v4822_v25  ;;  %v8774_v3 = vcombine.high %v4819_v5, %v4823_v7 }
 0x449   : > { %6292 = vmatprep.subr.bf16.mxu0 %v8716_v41  ;;  %6518 = vmatprep.subr.bf16.mxu1 %v8718_v57  ;;  %v4826_v41 = vld [vmem:[%s10742_s23 + $0x240] sm:$0xff] }
 0x44a   : > { %v4830_v57 = vld [vmem:[%s10742_s23 + $0x260] sm:$0xff] }
 0x44c   : > { %6293 = vmatpush1.bf16.msra.mxu0 %v8715_v51  ;;  %6519 = vmatpush1.bf16.msra.mxu1 %v8717_v43  ;;  %v8771_v51 = vcombine.low %v4818_v60, %v4822_v25  ;;  %v8773_v43 = vcombine.low %v4819_v5, %v4823_v7  ;;  %v4874_v25 = vld [vmem:[%s10742_s23 + $0x3c0] sm:$0xff]  ;;  %v4875_v7 = vld [vmem:[%s10742_s23 + $0x3c8] sm:$0xff] }
 0x44d   : > { %6294 = vmatprep.subr.bf16.mxu0 %v8724_v33  ;;  %6520 = vmatprep.subr.bf16.mxu1 %v8726_v23  ;;  %v8780_v33 = vcombine.high %v4826_v41, %v4830_v57  ;;  %v8782_v23 = vcombine.high %v4827_v11, %v4831_v46  ;;  %v4878_v5 = vld [vmem:[%s10742_s23 + $0x3e0] sm:$0xff] }
 0x44e   : > { %4008 = vmatmul.mubr.bf16.gmra.mrb[4].mxu0 %v2018_v0  ;;  %4460 = vmatmul.mubr.bf16.gmra.mrb[4].mxu1 %v2018_v0  ;;  %v8779_v0 = vcombine.low %v4826_v41, %v4830_v57  ;;  %v12982_v57 = vld [vmem:[%s10742_s23 + $0x400] sm:$0xff] }
 0x44f   : > { %4017 = vmatprep.mubr.bf16.mxu0 %v2027_v54  ;;  %4469 = vmatprep.mubr.bf16.mxu1 %v2027_v54  ;;  %v8781_v54 = vcombine.low %v4827_v11, %v4831_v46  ;;  %v12985_v11 = vld [vmem:[%s10742_s23 + $0x420] sm:$0xff]  ;;  %v12988_v46 = vld [vmem:[%s10742_s23 + $0x408] sm:$0xff] }
 0x450   : > { %6295 = vmatpush1.bf16.msra.mxu0 %v8723_v20  ;;  %6521 = vmatpush1.bf16.msra.mxu1 %v8725_v56  ;;  %v8788_v20 = vcombine.high %v4834_v15, %v4838_v48  ;;  %v8790_v56 = vcombine.high %v4835_v36, %v4839_v32 }
 0x451   : > { %6296 = vmatprep.subr.bf16.mxu0 %v8732_v58  ;;  %6522 = vmatprep.subr.bf16.mxu1 %v8734_v37  ;;  %v4842_v58 = vld [vmem:[%s10742_s23 + $0x2c0] sm:$0xff] }
 0x452   : > { %v4846_v37 = vld [vmem:[%s10742_s23 + $0x2e0] sm:$0xff] }
 0x454   : > { %6297 = vmatpush1.bf16.msra.mxu0 %v8731_v9  ;;  %6523 = vmatpush1.bf16.msra.mxu1 %v8733_v17  ;;  %v8787_v9 = vcombine.low %v4834_v15, %v4838_v48  ;;  %v8789_v17 = vcombine.low %v4835_v36, %v4839_v32  ;;  %v2324_v32 = vld [vmem:[%s462_s12] sm:$0xf] }
 0x455   : > { %6298 = vmatprep.subr.bf16.mxu0 %v8740_v6  ;;  %6524 = vmatprep.subr.bf16.mxu1 %v8742_v4  ;;  %v8796_v6 = vcombine.high %v4842_v58, %v4846_v37  ;;  %v8798_v4 = vcombine.high %v4843_v42, %v4847_v31 }
 0x456   : > { %4018 = vmatmul.mubr.bf16.gmra.mrb[8].mxu0 %v2026_v14  ;;  %4470 = vmatmul.mubr.bf16.gmra.mrb[8].mxu1 %v2026_v14  ;;  %v8795_v14 = vcombine.low %v4842_v58, %v4846_v37 }
 0x457   : > { %4027 = vmatprep.mubr.bf16.mxu0 %v2035_v39  ;;  %4479 = vmatprep.mubr.bf16.mxu1 %v2035_v39  ;;  %v8797_v39 = vcombine.low %v4843_v42, %v4847_v31 }
 0x458   : > { %6299 = vmatpush1.bf16.msra.mxu0 %v8739_v59  ;;  %6525 = vmatpush1.bf16.msra.mxu1 %v8741_v34  ;;  %v8804_v59 = vcombine.high %v4850_v13, %v4854_v52  ;;  %v8806_v34 = vcombine.high %v4851_v62, %v4855_v61 }
 0x459   : > { %6300 = vmatprep.subr.bf16.mxu0 %v8748_v22  ;;  %6526 = vmatprep.subr.bf16.mxu1 %v8750_v26  ;;  %v4858_v22 = vld [vmem:[%s10742_s23 + $0x340] sm:$0xff] }
 0x45a   : > { %v4862_v26 = vld [vmem:[%s10742_s23 + $0x360] sm:$0xff] }
 0x45b   : > { %v8811_v40 = vcombine.low %v4858_v22, %v4862_v26 }
 0x45c   : > { %6301 = vmatpush1.bf16.msra.mxu0 %v8747_v49  ;;  %6527 = vmatpush1.bf16.msra.mxu1 %v8749_v12  ;;  %v8803_v49 = vcombine.low %v4850_v13, %v4854_v52  ;;  %v8805_v12 = vcombine.low %v4851_v62, %v4855_v61  ;;  %v13038_v13 = vld [vmem:[%s10742_s23 + $0x448] sm:$0xff] }
 0x45d   : > { %6302 = vmatprep.subr.bf16.mxu0 %v8756_v10  ;;  %6528 = vmatprep.subr.bf16.mxu1 %v8758_v2  ;;  %v8812_v10 = vcombine.high %v4858_v22, %v4862_v26  ;;  %v8814_v2 = vcombine.high %v4859_v53, %v4863_v47  ;;  %v13041_v52 = vld [vmem:[%s10742_s23 + $0x468] sm:$0xff] }
 0x45e   : > { %4028 = vmatmul.mubr.bf16.gmra.mrb[12].mxu0 %v2034_v19  ;;  %4480 = vmatmul.mubr.bf16.gmra.mrb[12].mxu1 %v2034_v19  ;;  %v4870_v19 = vld [vmem:[%s10742_s23 + $0x3a0] sm:$0xff] }
 0x45f   : > { %4037 = vmatprep.mubr.bf16.mxu0 %v2043_v27  ;;  %4489 = vmatprep.mubr.bf16.mxu1 %v2043_v27  ;;  %v4867_v27 = vld [vmem:[%s10742_s23 + $0x388] sm:$0xff] }
 0x460   : > { %6303 = vmatpush1.bf16.msra.mxu0 %v8755_v1  ;;  %6529 = vmatpush1.bf16.msra.mxu1 %v8757_v30  ;;  %v8820_v1 = vcombine.high %v4866_v18, %v4870_v19  ;;  %v4871_v30 = vld [vmem:[%s10742_s23 + $0x3a8] sm:$0xff] }
 0x461   : > { %6304 = vmatprep.subr.bf16.mxu0 %v8764_v21  ;;  %6530 = vmatprep.subr.bf16.mxu1 %v8766_v38  ;;  %v8819_v21 = vcombine.low %v4866_v18, %v4870_v19  ;;  %v8821_v38 = vcombine.low %v4867_v27, %v4871_v30  ;;  %v8822_v60 = vcombine.high %v4867_v27, %v4871_v30  ;;  %v13062_v18 = vld [vmem:[%s10742_s23 + $0x488] sm:$0xff] }
 0x462   : > { %v13065_v19 = vld [vmem:[%s10742_s23 + $0x4a8] sm:$0xff] }
 0x464   : > { %6305 = vmatpush1.bf16.msra.mxu0 %v8763_v29  ;;  %6531 = vmatpush1.bf16.msra.mxu1 %v8765_v55  ;;  %v8828_v29 = vcombine.high %v4874_v25, %v4878_v5  ;;  %v4879_v55 = vld [vmem:[%s10742_s23 + $0x3e8] sm:$0xff] }
 0x465   : > { %6306 = vmatprep.subr.bf16.mxu0 %v8772_v44  ;;  %6532 = vmatprep.subr.bf16.mxu1 %v8774_v3  ;;  %v8827_v44 = vcombine.low %v4874_v25, %v4878_v5  ;;  %v8829_v3 = vcombine.low %v4875_v7, %v4879_v55  ;;  %v8830_v41 = vcombine.high %v4875_v7, %v4879_v55 }
 0x466   : > { %4038 = vmatmul.mubr.bf16.gmra.mrb[16].mxu0 %v2042_v24  ;;  %4490 = vmatmul.mubr.bf16.gmra.mrb[16].mxu1 %v2042_v24  ;;  %v8836_v24 = vcombine.high %v12982_v57, %v12985_v11  ;;  %v8846_v7 = vcombine.high %v13038_v13, %v13041_v52 }
 0x467   : > { %4047 = vmatprep.mubr.bf16.mxu0 %v2051_v63  ;;  %4499 = vmatprep.mubr.bf16.mxu1 %v2051_v63  ;;  %v12993_v63 = vld [vmem:[%s10742_s23 + $0x428] sm:$0xff] }
 0x468   : > { %6307 = vmatpush1.bf16.msra.mxu0 %v8771_v51  ;;  %6533 = vmatpush1.bf16.msra.mxu1 %v8773_v43  ;;  %v8835_v51 = vcombine.low %v12982_v57, %v12985_v11  ;;  %v8837_v43 = vcombine.low %v12988_v46, %v12993_v63  ;;  %v13130_v57 = vld [vmem:[%s10742_s23 + $0x508] sm:$0xff] }
 0x469   : > { %6308 = vmatprep.subr.bf16.mxu0 %v8780_v33  ;;  %6534 = vmatprep.subr.bf16.mxu1 %v8782_v23  ;;  %v8838_v33 = vcombine.high %v12988_v46, %v12993_v63  ;;  %v2326_v23 = vlaneseq  ;;  %v13133_v11 = vld [vmem:[%s10742_s23 + $0x528] sm:$0xff] }
 0x46b   : > { %v13001_v15 = vshrl.u32 %v2326_v23, 7  ;;  %v13090_v23 = vld [vmem:[%s10742_s23 + $0x4c8] sm:$0xff] }
 0x46c   : > { %6309 = vmatpush1.bf16.msra.mxu0 %v8779_v0  ;;  %6535 = vmatpush1.bf16.msra.mxu1 %v8781_v54 }
 0x46d   : > { %6310 = vmatprep.subr.bf16.mxu0 %v8788_v20  ;;  %6536 = vmatprep.subr.bf16.mxu1 %v8790_v56  ;;  %v13004_v48 = vsub.s32 0, %v13001_v15  ;;  %v13007_v36 = vsub.s32 2, %v13001_v15  ;;  %v13012_v0 = vsub.s32 1, %v13001_v15  ;;  %v13015_v54 = vsub.s32 3, %v13001_v15 }
 0x46e   : > { %4048 = vmatmul.mubr.bf16.gmra.mrb[20].mxu0 %v2050_v28  ;;  %4500 = vmatmul.mubr.bf16.gmra.mrb[20].mxu1 %v2050_v28  ;;  %v13030_v28 = vld [vmem:[%s10742_s23 + $0x440] sm:$0xff] }
 0x46f   : > { %4057 = vmatprep.mubr.bf16.mxu0 %v2059_v50  ;;  %4509 = vmatprep.mubr.bf16.mxu1 %v2059_v50  ;;  %14749 = vst [vmem:[#allocation133_spill] sm:$0xff] %v13007_v36  ;;  %14750 = vst [vmem:[#allocation134_spill] sm:$0xff] %v13015_v54  ;;  %v13018_v20 = vrot.slane %v2324_v32, %v13004_v48  ;;  %v13021_v56 = vrot.slane %v2324_v32, %v13007_v36  ;;  %v13033_v50 = vld [vmem:[%s10742_s23 + $0x460] sm:$0xff] }
 0x470   : > { %6311 = vmatpush1.bf16.msra.mxu0 %v8787_v9  ;;  %6537 = vmatpush1.bf16.msra.mxu1 %v8789_v17  ;;  %v13024_v58 = vrot.slane %v2324_v32, %v13012_v0  ;;  %v13027_v37 = vrot.slane %v2324_v32, %v13015_v54  ;;  %v8844_v53 = vcombine.high %v13030_v28, %v13033_v50  ;;  %v13093_v32 = vld [vmem:[%s10742_s23 + $0x4e8] sm:$0xff]  ;;  %v5002_v36 = vld [vmem:[%s10742_s23 + $0x7c0] sm:$0xff] }
 0x471   : > { %6312 = vmatprep.subr.bf16.mxu0 %v8796_v6  ;;  %6538 = vmatprep.subr.bf16.mxu1 %v8798_v4 }
 0x474   : > { %6313 = vmatpush1.bf16.msra.mxu0 %v8795_v14  ;;  %6539 = vmatpush1.bf16.msra.mxu1 %v8797_v39 }
 0x475   : > { %6314 = vmatprep.subr.bf16.mxu0 %v8804_v59  ;;  %6540 = vmatprep.subr.bf16.mxu1 %v8806_v34 }
 0x476   : > { %4058 = vmatmul.mubr.bf16.gmra.mrb[24].mxu0 %v2058_v16  ;;  %4510 = vmatmul.mubr.bf16.gmra.mrb[24].mxu1 %v2058_v16 }
 0x477   : > { %4067 = vmatprep.mubr.bf16.mxu0 %v2067_v35  ;;  %4519 = vmatprep.mubr.bf16.mxu1 %v2067_v35  ;;  %v8843_v35 = vcombine.low %v13030_v28, %v13033_v50  ;;  %v8870_v28 = vcombine.high %v13130_v57, %v13133_v11  ;;  %v13169_v50 = vld [vmem:[%s10742_s23 + $0x548] sm:$0xff] }
 0x478   : > { %6315 = vmatpush1.bf16.msra.mxu0 %v8803_v49  ;;  %6541 = vmatpush1.bf16.msra.mxu1 %v8805_v12  ;;  %v8845_v49 = vcombine.low %v13038_v13, %v13041_v52  ;;  %v13056_v12 = vld [vmem:[%s10742_s23 + $0x480] sm:$0xff]  ;;  %v13172_v13 = vld [vmem:[%s10742_s23 + $0x568] sm:$0xff] }
 0x479   : > { %6316 = vmatprep.subr.bf16.mxu0 %v8812_v10  ;;  %6542 = vmatprep.subr.bf16.mxu1 %v8814_v2  ;;  %v13059_v10 = vld [vmem:[%s10742_s23 + $0x4a0] sm:$0xff] }
 0x47c   : > { %6317 = vmatpush1.bf16.msra.mxu0 %v8811_v40  ;;  %6543 = vmatpush1.bf16.msra.mxu1 %v8813_v45 }
 0x47d   : > { %6318 = vmatprep.subr.bf16.mxu0 %v8820_v1  ;;  %6544 = vmatprep.subr.bf16.mxu1 %v8822_v60  ;;  %v13071_v60 = vld [vmem:[%s10742_s23 + $0x4e0] sm:$0xff] }
 0x47e   : > { %4068 = vmatmul.mubr.bf16.gmra.mrb[28].mxu0 %v2066_v8  ;;  %4520 = vmatmul.mubr.bf16.gmra.mrb[28].mxu1 %v2066_v8 }
 0x480   : > { %6319 = vmatpush1.bf16.msra.mxu0 %v8819_v21  ;;  %6545 = vmatpush1.bf16.msra.mxu1 %v8821_v38  ;;  %v13068_v38 = vld [vmem:[%s10742_s23 + $0x4c0] sm:$0xff] }
 0x481   : > { %6320 = vmatprep.subr.bf16.mxu0 %v8828_v29  ;;  %6546 = vmatprep.subr.bf16.mxu1 %v8830_v41  ;;  %v8852_v29 = vcombine.high %v13056_v12, %v13059_v10 }
 0x484   : > { %6321 = vmatpush1.bf16.msra.mxu0 %v8827_v44  ;;  %6547 = vmatpush1.bf16.msra.mxu1 %v8829_v3 }
 0x485   : > { %6403 = vmatprep.subr.bf16.mxu0 %v8836_v24  ;;  %6629 = vmatprep.subr.bf16.mxu1 %v8838_v33  ;;  %v8851_v24 = vcombine.low %v13056_v12, %v13059_v10  ;;  %v8853_v33 = vcombine.low %v13062_v18, %v13065_v19 }
 0x519   : > { %v3999_v42 = vpop.f32.mrb[0].mxu0  ;;  %v4451_v31 = vpop.f32.mrb[0].mxu1 }
 0x51a   : > { %v8973_v9 = vadd.f32 %v3999_v42, %v13018_v20  ;;  %v9005_v17 = vadd.f32 %v4451_v31, %v13021_v56  ;;  %v4001_v6 = vpop.f32.mrb[1].mxu0  ;;  %v4453_v4 = vpop.f32.mrb[1].mxu1 }
 0x51b   : > { %v8974_v62 = vadd.f32 %v4001_v6, %v13024_v58  ;;  %v9006_v61 = vadd.f32 %v4453_v4, %v13027_v37  ;;  %v4003_v14 = vpop.f32.mrb[2].mxu0  ;;  %v4455_v39 = vpop.f32.mrb[2].mxu1  ;;  %v8854_v6 = vcombine.high %v13062_v18, %v13065_v19  ;;  %v8860_v4 = vcombine.high %v13068_v38, %v13071_v60 }
 0x51c   : > { %v8975_v59 = vadd.f32 %v4003_v14, %v13018_v20  ;;  %v9007_v34 = vadd.f32 %v4455_v39, %v13021_v56  ;;  %v4005_v22 = vpop.f32.mrb[3].mxu0  ;;  %v4457_v26 = vpop.f32.mrb[3].mxu1  ;;  %v4530_v2 = vmax.f32 %v8973_v9, 0.0  ;;  %v4532_v40 = vmax.f32 %v9005_v17, 0.0 }
 0x51d   : > { %v8976_v47 = vadd.f32 %v4005_v22, %v13024_v58  ;;  %v9008_v16 = vadd.f32 %v4457_v26, %v13027_v37  ;;  %v4531_v27 = vmax.f32 %v8974_v62, 0.0  ;;  %v4533_v1 = vmax.f32 %v9006_v61, 0.0 }
 0x51e   : > { %v4534_v45 = vmax.f32 %v8975_v59, 0.0  ;;  %v4536_v8 = vmax.f32 %v9007_v34, 0.0  ;;  %v8859_v59 = vcombine.low %v13068_v38, %v13071_v60 }
 0x51f   : > { %v4535_v30 = vmax.f32 %v8976_v47, 0.0  ;;  %v4537_v21 = vmax.f32 %v9008_v16, 0.0  ;;  %v8861_v16 = vcombine.low %v13090_v23, %v13093_v32 }
 0x520   : > { %v13073_v25 = vpack.c.bf16 %v4534_v45, %v4530_v2  ;;  %v13075_v5 = vpack.c.bf16 %v4536_v8, %v4532_v40  ;;  %v8862_v45 = vcombine.high %v13090_v23, %v13093_v32  ;;  %v13124_v8 = vld [vmem:[%s10742_s23 + $0x500] sm:$0xff] }
 0x521   : > { %v13081_v55 = vpack.c.bf16 %v4535_v30, %v4531_v27  ;;  %v13083_v44 = vpack.c.bf16 %v4537_v21, %v4533_v1  ;;  %v4009_v3 = vpop.f32.mrb[4].mxu0  ;;  %v4461_v41 = vpop.f32.mrb[4].mxu1  ;;  %v13127_v27 = vld [vmem:[%s10742_s23 + $0x520] sm:$0xff] }
 0x522   : > { %v8977_v42 = vadd.f32 %v4009_v3, %v13018_v20  ;;  %v9009_v31 = vadd.f32 %v4461_v41, %v13021_v56  ;;  %v4011_v9 = vpop.f32.mrb[5].mxu0  ;;  %v4463_v17 = vpop.f32.mrb[5].mxu1 }
 0x523   : > { %v8978_v62 = vadd.f32 %v4011_v9, %v13024_v58  ;;  %v9010_v61 = vadd.f32 %v4463_v17, %v13027_v37  ;;  %v4013_v14 = vpop.f32.mrb[6].mxu0  ;;  %v4465_v39 = vpop.f32.mrb[6].mxu1  ;;  %6322 = vmatprep.mubr.bf16.mxu0 %v13081_v55  ;;  %6548 = vmatprep.mubr.bf16.mxu1 %v13081_v55 }
 0x524   : > { %v8979_v34 = vadd.f32 %v4013_v14, %v13018_v20  ;;  %v9011_v22 = vadd.f32 %v4465_v39, %v13021_v56  ;;  %v4015_v26 = vpop.f32.mrb[7].mxu0  ;;  %v4467_v47 = vpop.f32.mrb[7].mxu1  ;;  %6323 = vmatmul.mubr.bf16.vlgmr.msra.gmra.mrb[32].mxu0 %v13073_v25  ;;  %6549 = vmatmul.mubr.bf16.vlgmr.msra.gmra.mrb[32].mxu1 %v13073_v25  ;;  %v4538_v1 = vmax.f32 %v8977_v42, 0.0  ;;  %v4540_v30 = vmax.f32 %v9009_v31, 0.0 }
 0x525   : > { %v8980_v2 = vadd.f32 %v4015_v26, %v13024_v58  ;;  %v9012_v40 = vadd.f32 %v4467_v47, %v13027_v37  ;;  %6404 = vmatpush1.bf16.msra.mxu0 %v8835_v51  ;;  %6630 = vmatpush1.bf16.msra.mxu1 %v8837_v43  ;;  %v4539_v46 = vmax.f32 %v8978_v62, 0.0  ;;  %v4541_v63 = vmax.f32 %v9010_v61, 0.0 }
 0x526   : > { %v4542_v21 = vmax.f32 %v8979_v34, 0.0  ;;  %v4544_v3 = vmax.f32 %v9011_v22, 0.0  ;;  %6405 = vmatprep.subr.bf16.mxu0 %v8844_v53  ;;  %6631 = vmatprep.subr.bf16.mxu1 %v8846_v7  ;;  %v8867_v42 = vcombine.low %v13124_v8, %v13127_v27  ;;  %v8868_v31 = vcombine.high %v13124_v8, %v13127_v27  ;;  %v13144_v53 = vld [vmem:[%s10742_s23 + $0x540] sm:$0xff] }
 0x527   : > { %v4543_v51 = vmax.f32 %v8980_v2, 0.0  ;;  %v4545_v43 = vmax.f32 %v9012_v40, 0.0  ;;  %v13147_v7 = vld [vmem:[%s10742_s23 + $0x560] sm:$0xff]  ;;  %v8869_v39 = vcombine.low %v13130_v57, %v13133_v11 }
 0x528   : > { %v13135_v41 = vpack.c.bf16 %v4542_v21, %v4538_v1  ;;  %v13137_v9 = vpack.c.bf16 %v4544_v3, %v4540_v30  ;;  %v8875_v21 = vcombine.low %v13144_v53, %v13147_v7  ;;  %v13276_v8 = vld [vmem:[%s10742_s23 + $0x600] sm:$0xff] }
 0x529   : > { %v13149_v17 = vpack.c.bf16 %v4543_v51, %v4539_v46  ;;  %v13151_v62 = vpack.c.bf16 %v4545_v43, %v4541_v63  ;;  %v4019_v61 = vpop.f32.mrb[8].mxu0  ;;  %v4471_v14 = vpop.f32.mrb[8].mxu1  ;;  %6406 = vmatpush1.bf16.msra.mxu0 %v8843_v35  ;;  %6632 = vmatpush1.bf16.msra.mxu1 %v8845_v49  ;;  %v8877_v63 = vcombine.low %v13169_v50, %v13172_v13  ;;  %v13197_v51 = vld [vmem:[%s10742_s23 + $0x580] sm:$0xff] }
 0x52a   : > { %v8981_v34 = vadd.f32 %v4019_v61, %v13018_v20  ;;  %v9013_v22 = vadd.f32 %v4471_v14, %v13021_v56  ;;  %v4021_v26 = vpop.f32.mrb[9].mxu0  ;;  %v4473_v47 = vpop.f32.mrb[9].mxu1  ;;  %6407 = vmatprep.subr.bf16.mxu0 %v8852_v29  ;;  %6633 = vmatprep.subr.bf16.mxu1 %v8854_v6  ;;  %v8876_v29 = vcombine.high %v13144_v53, %v13147_v7  ;;  %v13200_v43 = vld [vmem:[%s10742_s23 + $0x5a0] sm:$0xff] }
 0x52b   : > { %v8982_v52 = vadd.f32 %v4021_v26, %v13024_v58  ;;  %v9014_v35 = vadd.f32 %v4473_v47, %v13027_v37  ;;  %v4023_v49 = vpop.f32.mrb[10].mxu0  ;;  %v4475_v2 = vpop.f32.mrb[10].mxu1  ;;  %6332 = vmatprep.mubr.bf16.mxu0 %v13149_v17  ;;  %6558 = vmatprep.mubr.bf16.mxu1 %v13149_v17  ;;  %v13279_v27 = vld [vmem:[%s10742_s23 + $0x620] sm:$0xff] }
 0x52c   : > { %v8983_v6 = vadd.f32 %v4023_v49, %v13018_v20  ;;  %v9015_v40 = vadd.f32 %v4475_v2, %v13021_v56  ;;  %v4025_v1 = vpop.f32.mrb[11].mxu0  ;;  %v4477_v30 = vpop.f32.mrb[11].mxu1  ;;  %6333 = vmatmul.mubr.bf16.gmra.mrb[36].mxu0 %v13135_v41  ;;  %6559 = vmatmul.mubr.bf16.gmra.mrb[36].mxu1 %v13135_v41  ;;  %v4546_v61 = vmax.f32 %v8981_v34, 0.0  ;;  %v4548_v14 = vmax.f32 %v9013_v22, 0.0  ;;  %v13315_v7 = vld [vmem:[%s10742_s23 + $0x640] sm:$0xff] }
 0x52d   : > { %v8984_v3 = vadd.f32 %v4025_v1, %v13024_v58  ;;  %v9016_v46 = vadd.f32 %v4477_v30, %v13027_v37  ;;  %6408 = vmatpush1.bf16.msra.mxu0 %v8851_v24  ;;  %6634 = vmatpush1.bf16.msra.mxu1 %v8853_v33  ;;  %v4547_v12 = vmax.f32 %v8982_v52, 0.0  ;;  %v4549_v10 = vmax.f32 %v9014_v35, 0.0  ;;  %v13206_v24 = vld [vmem:[%s10742_s23 + $0x588] sm:$0xff]  ;;  %v13235_v1 = vld [vmem:[%s10742_s23 + $0x5e0] sm:$0xff] }
 0x52e   : > { %v4550_v26 = vmax.f32 %v8983_v6, 0.0  ;;  %v4552_v47 = vmax.f32 %v9015_v40, 0.0  ;;  %6409 = vmatprep.subr.bf16.mxu0 %v8860_v4  ;;  %6635 = vmatprep.subr.bf16.mxu1 %v8862_v45  ;;  %v13209_v33 = vld [vmem:[%s10742_s23 + $0x5a8] sm:$0xff]  ;;  %v8878_v22 = vcombine.high %v13169_v50, %v13172_v13  ;;  %v8884_v4 = vcombine.high %v13197_v51, %v13200_v43  ;;  %v13232_v40 = vld [vmem:[%s10742_s23 + $0x5c0] sm:$0xff] }
 0x52f   : > { %v4551_v18 = vmax.f32 %v8984_v3, 0.0  ;;  %v4553_v19 = vmax.f32 %v9016_v46, 0.0  ;;  %v8883_v6 = vcombine.low %v13197_v51, %v13200_v43  ;;  %v8885_v38 = vcombine.low %v13206_v24, %v13209_v33  ;;  %v13318_v50 = vld [vmem:[%s10742_s23 + $0x660] sm:$0xff] }
 0x530   : > { %v13211_v49 = vpack.c.bf16 %v4550_v26, %v4546_v61  ;;  %v13213_v34 = vpack.c.bf16 %v4552_v47, %v4548_v14  ;;  %v8892_v47 = vcombine.high %v13232_v40, %v13235_v1  ;;  %v8899_v53 = vcombine.low %v13276_v8, %v13279_v27 }
 0x531   : > { %v13219_v45 = vpack.c.bf16 %v4551_v18, %v4547_v12  ;;  %v13221_v52 = vpack.c.bf16 %v4553_v19, %v4549_v10  ;;  %v4029_v35 = vpop.f32.mrb[12].mxu0  ;;  %v4481_v2 = vpop.f32.mrb[12].mxu1  ;;  %6410 = vmatpush1.bf16.msra.mxu0 %v8859_v59  ;;  %6636 = vmatpush1.bf16.msra.mxu1 %v8861_v16  ;;  %v8886_v16 = vcombine.high %v13206_v24, %v13209_v33  ;;  %v13267_v19 = vld [vmem:[%s10742_s23 + $0x5c8] sm:$0xff] }
 0x532   : > { %v8985_v30 = vadd.f32 %v4029_v35, %v13018_v20  ;;  %v9017_v3 = vadd.f32 %v4481_v2, %v13021_v56  ;;  %v4031_v46 = vpop.f32.mrb[13].mxu0  ;;  %v4483_v61 = vpop.f32.mrb[13].mxu1  ;;  %6411 = vmatprep.subr.bf16.mxu0 %v8868_v31  ;;  %6637 = vmatprep.subr.bf16.mxu1 %v8870_v28  ;;  %v8891_v18 = vcombine.low %v13232_v40, %v13235_v1  ;;  %v13270_v35 = vld [vmem:[%s10742_s23 + $0x5e8] sm:$0xff] }
 0x533   : > { %v8986_v60 = vadd.f32 %v4031_v46, %v13024_v58  ;;  %v9018_v23 = vadd.f32 %v4483_v61, %v13027_v37  ;;  %v4033_v32 = vpop.f32.mrb[14].mxu0  ;;  %v4485_v59 = vpop.f32.mrb[14].mxu1  ;;  %6342 = vmatprep.mubr.bf16.mxu0 %v13219_v45  ;;  %6568 = vmatprep.mubr.bf16.mxu1 %v13219_v45 }
 0x534   : > { %v8987_v31 = vadd.f32 %v4033_v32, %v13018_v20  ;;  %v9019_v28 = vadd.f32 %v4485_v59, %v13021_v56  ;;  %v4035_v14 = vpop.f32.mrb[15].mxu0  ;;  %v4487_v26 = vpop.f32.mrb[15].mxu1  ;;  %6343 = vmatmul.mubr.bf16.gmra.mrb[40].mxu0 %v13211_v49  ;;  %6569 = vmatmul.mubr.bf16.gmra.mrb[40].mxu1 %v13211_v49  ;;  %v4554_v2 = vmax.f32 %v8985_v30, 0.0  ;;  %v4556_v46 = vmax.f32 %v9017_v3, 0.0 }
 0x535   : > { %v8988_v12 = vadd.f32 %v4035_v14, %v13024_v58  ;;  %v9020_v10 = vadd.f32 %v4487_v26, %v13027_v37  ;;  %6412 = vmatpush1.bf16.msra.mxu0 %v8867_v42  ;;  %6638 = vmatpush1.bf16.msra.mxu1 %v8869_v39  ;;  %v4555_v57 = vmax.f32 %v8986_v60, 0.0  ;;  %v4557_v11 = vmax.f32 %v9018_v23, 0.0 }
 0x536   : > { %v4558_v61 = vmax.f32 %v8987_v31, 0.0  ;;  %v4560_v32 = vmax.f32 %v9019_v28, 0.0  ;;  %6413 = vmatprep.subr.bf16.mxu0 %v8876_v29  ;;  %6639 = vmatprep.subr.bf16.mxu1 %v8878_v22  ;;  %v8893_v3 = vcombine.low %v13267_v19, %v13270_v35  ;;  %v8894_v31 = vcombine.high %v13267_v19, %v13270_v35  ;;  %v13290_v29 = vld [vmem:[%s10742_s23 + $0x608] sm:$0xff] }
 0x537   : > { %v4559_v42 = vmax.f32 %v8988_v12, 0.0  ;;  %v4561_v39 = vmax.f32 %v9020_v10, 0.0  ;;  %v13293_v22 = vld [vmem:[%s10742_s23 + $0x628] sm:$0xff]  ;;  %v8900_v26 = vcombine.high %v13276_v8, %v13279_v27 }
 0x538   : > { %v13281_v59 = vpack.c.bf16 %v4558_v61, %v4554_v2  ;;  %v13283_v30 = vpack.c.bf16 %v4560_v32, %v4556_v46  ;;  %v13413_v8 = vld [vmem:[%s10742_s23 + $0x6c8] sm:$0xff] }
 0x539   : > { %v13295_v60 = vpack.c.bf16 %v4559_v42, %v4555_v57  ;;  %v13297_v23 = vpack.c.bf16 %v4561_v39, %v4557_v11  ;;  %v4039_v28 = vpop.f32.mrb[16].mxu0  ;;  %v4491_v14 = vpop.f32.mrb[16].mxu1  ;;  %6414 = vmatpush1.bf16.msra.mxu0 %v8875_v21  ;;  %6640 = vmatpush1.bf16.msra.mxu1 %v8877_v63  ;;  %v8902_v57 = vcombine.high %v13290_v29, %v13293_v22  ;;  %v13416_v27 = vld [vmem:[%s10742_s23 + $0x6e8] sm:$0xff] }
 0x53a   : > { %v8989_v12 = vadd.f32 %v4039_v28, %v13018_v20  ;;  %v9021_v10 = vadd.f32 %v4491_v14, %v13021_v56  ;;  %v4041_v19 = vpop.f32.mrb[17].mxu0  ;;  %v4493_v35 = vpop.f32.mrb[17].mxu1  ;;  %6415 = vmatprep.subr.bf16.mxu0 %v8884_v4  ;;  %6641 = vmatprep.subr.bf16.mxu1 %v8886_v16  ;;  %v8901_v4 = vcombine.low %v13290_v29, %v13293_v22  ;;  %v13343_v28 = vld [vmem:[%s10742_s23 + $0x648] sm:$0xff] }
 0x53b   : > { %v8990_v13 = vadd.f32 %v4041_v19, %v13024_v58  ;;  %v9022_v21 = vadd.f32 %v4493_v35, %v13027_v37  ;;  %v4043_v63 = vpop.f32.mrb[18].mxu0  ;;  %v4495_v2 = vpop.f32.mrb[18].mxu1  ;;  %6352 = vmatprep.mubr.bf16.mxu0 %v13295_v60  ;;  %6578 = vmatprep.mubr.bf16.mxu1 %v13295_v60  ;;  %v8908_v39 = vcombine.high %v13315_v7, %v13318_v50  ;;  %v13346_v14 = vld [vmem:[%s10742_s23 + $0x668] sm:$0xff] }
 0x53c   : > { %v8991_v16 = vadd.f32 %v4043_v63, %v13018_v20  ;;  %v9023_v46 = vadd.f32 %v4495_v2, %v13021_v56  ;;  %v4045_v61 = vpop.f32.mrb[19].mxu0  ;;  %v4497_v32 = vpop.f32.mrb[19].mxu1  ;;  %6353 = vmatmul.mubr.bf16.gmra.mrb[44].mxu0 %v13281_v59  ;;  %6579 = vmatmul.mubr.bf16.gmra.mrb[44].mxu1 %v13281_v59  ;;  %v4562_v19 = vmax.f32 %v8989_v12, 0.0  ;;  %v4564_v35 = vmax.f32 %v9021_v10, 0.0 }
 0x53d   : > { %v8992_v11 = vadd.f32 %v4045_v61, %v13024_v58  ;;  %v9024_v42 = vadd.f32 %v4497_v32, %v13027_v37  ;;  %6416 = vmatpush1.bf16.msra.mxu0 %v8883_v6  ;;  %6642 = vmatpush1.bf16.msra.mxu1 %v8885_v38  ;;  %v4563_v51 = vmax.f32 %v8990_v13, 0.0  ;;  %v4565_v43 = vmax.f32 %v9022_v21, 0.0  ;;  %v13352_v6 = vld [vmem:[%s10742_s23 + $0x680] sm:$0xff]  ;;  %v13375_v32 = vld [vmem:[%s10742_s23 + $0x688] sm:$0xff] }
 0x53e   : > { %v4566_v63 = vmax.f32 %v8991_v16, 0.0  ;;  %v4568_v2 = vmax.f32 %v9023_v46, 0.0  ;;  %6417 = vmatprep.subr.bf16.mxu0 %v8892_v47  ;;  %6643 = vmatprep.subr.bf16.mxu1 %v8894_v31  ;;  %v13355_v38 = vld [vmem:[%s10742_s23 + $0x6a0] sm:$0xff]  ;;  %v8907_v10 = vcombine.low %v13315_v7, %v13318_v50  ;;  %v8909_v47 = vcombine.low %v13343_v28, %v13346_v14  ;;  %v13378_v7 = vld [vmem:[%s10742_s23 + $0x6a8] sm:$0xff] }
 0x53f   : > { %v4567_v24 = vmax.f32 %v8992_v11, 0.0  ;;  %v4569_v33 = vmax.f32 %v9024_v42, 0.0  ;;  %v8910_v46 = vcombine.high %v13343_v28, %v13346_v14  ;;  %v8916_v40 = vcombine.high %v13352_v6, %v13355_v38 }
 0x540   : > { %v13357_v61 = vpack.c.bf16 %v4566_v63, %v4562_v19  ;;  %v13359_v12 = vpack.c.bf16 %v4568_v2, %v4564_v35  ;;  %v8915_v14 = vcombine.low %v13352_v6, %v13355_v38  ;;  %v8917_v2 = vcombine.low %v13375_v32, %v13378_v7 }
 0x541   : > { %v13365_v31 = vpack.c.bf16 %v4567_v24, %v4563_v51  ;;  %v13367_v13 = vpack.c.bf16 %v4569_v33, %v4565_v43  ;;  %v4049_v21 = vpop.f32.mrb[20].mxu0  ;;  %v4501_v16 = vpop.f32.mrb[20].mxu1  ;;  %6418 = vmatpush1.bf16.msra.mxu0 %v8891_v18  ;;  %6644 = vmatpush1.bf16.msra.mxu1 %v8893_v3  ;;  %v8918_v24 = vcombine.high %v13375_v32, %v13378_v7  ;;  %v13407_v33 = vld [vmem:[%s10742_s23 + $0x6c0] sm:$0xff] }
 0x542   : > { %v8993_v50 = vadd.f32 %v4049_v21, %v13018_v20  ;;  %v9025_v11 = vadd.f32 %v4501_v16, %v13021_v56  ;;  %v4051_v42 = vpop.f32.mrb[21].mxu0  ;;  %v4503_v19 = vpop.f32.mrb[21].mxu1  ;;  %6419 = vmatprep.subr.bf16.mxu0 %v8900_v26  ;;  %6645 = vmatprep.subr.bf16.mxu1 %v8902_v57  ;;  %v13410_v21 = vld [vmem:[%s10742_s23 + $0x6e0] sm:$0xff] }
 0x543   : > { %v8994_v1 = vadd.f32 %v4051_v42, %v13024_v58  ;;  %v9026_v18 = vadd.f32 %v4503_v19, %v13027_v37  ;;  %v4053_v3 = vpop.f32.mrb[22].mxu0  ;;  %v4505_v28 = vpop.f32.mrb[22].mxu1  ;;  %6362 = vmatprep.mubr.bf16.mxu0 %v13365_v31  ;;  %6588 = vmatprep.mubr.bf16.mxu1 %v13365_v31 }
 0x544   : > { %v8995_v26 = vadd.f32 %v4053_v3, %v13018_v20  ;;  %v9027_v57 = vadd.f32 %v4505_v28, %v13021_v56  ;;  %v4055_v35 = vpop.f32.mrb[23].mxu0  ;;  %v4507_v63 = vpop.f32.mrb[23].mxu1  ;;  %6363 = vmatmul.mubr.bf16.gmra.mrb[48].mxu0 %v13357_v61  ;;  %6589 = vmatmul.mubr.bf16.gmra.mrb[48].mxu1 %v13357_v61  ;;  %v4570_v16 = vmax.f32 %v8993_v50, 0.0  ;;  %v4572_v42 = vmax.f32 %v9025_v11, 0.0 }
 0x545   : > { %v8996_v51 = vadd.f32 %v4055_v35, %v13024_v58  ;;  %v9028_v43 = vadd.f32 %v4507_v63, %v13027_v37  ;;  %6420 = vmatpush1.bf16.msra.mxu0 %v8899_v53  ;;  %6646 = vmatpush1.bf16.msra.mxu1 %v8901_v4  ;;  %v4571_v29 = vmax.f32 %v8994_v1, 0.0  ;;  %v4573_v22 = vmax.f32 %v9026_v18, 0.0 }
 0x546   : > { %v4574_v19 = vmax.f32 %v8995_v26, 0.0  ;;  %v4576_v3 = vmax.f32 %v9027_v57, 0.0  ;;  %6421 = vmatprep.subr.bf16.mxu0 %v8908_v39  ;;  %6647 = vmatprep.subr.bf16.mxu1 %v8910_v46  ;;  %v8923_v50 = vcombine.low %v13407_v33, %v13410_v21  ;;  %v8924_v11 = vcombine.high %v13407_v33, %v13410_v21  ;;  %v13427_v39 = vld [vmem:[%s10742_s23 + $0x700] sm:$0xff]  ;;  %v13443_v21 = vld [vmem:[%s10742_s23 + $0x708] sm:$0xff] }
 0x547   : > { %v4575_v53 = vmax.f32 %v8996_v51, 0.0  ;;  %v4577_v4 = vmax.f32 %v9028_v43, 0.0  ;;  %v13430_v46 = vld [vmem:[%s10742_s23 + $0x720] sm:$0xff]  ;;  %v8925_v57 = vcombine.low %v13413_v8, %v13416_v27  ;;  %v8926_v33 = vcombine.high %v13413_v8, %v13416_v27 }
 0x548   : > { %v13418_v32 = vpack.c.bf16 %v4574_v19, %v4570_v16  ;;  %v13420_v7 = vpack.c.bf16 %v4576_v3, %v4572_v42  ;;  %v13446_v16 = vld [vmem:[%s10742_s23 + $0x728] sm:$0xff] }
 0x549   : > { %v13432_v1 = vpack.c.bf16 %v4575_v53, %v4571_v29  ;;  %v13434_v18 = vpack.c.bf16 %v4577_v4, %v4573_v22  ;;  %v4059_v28 = vpop.f32.mrb[24].mxu0  ;;  %v4511_v26 = vpop.f32.mrb[24].mxu1  ;;  %6422 = vmatpush1.bf16.msra.mxu0 %v8907_v10  ;;  %6648 = vmatpush1.bf16.msra.mxu1 %v8909_v47  ;;  %v8931_v29 = vcombine.low %v13427_v39, %v13430_v46 }
 0x54a   : > { %v8997_v35 = vadd.f32 %v4059_v28, %v13018_v20  ;;  %v9029_v63 = vadd.f32 %v4511_v26, %v13021_v56  ;;  %v4061_v51 = vpop.f32.mrb[25].mxu0  ;;  %v4513_v43 = vpop.f32.mrb[25].mxu1  ;;  %6423 = vmatprep.subr.bf16.mxu0 %v8916_v40  ;;  %6649 = vmatprep.subr.bf16.mxu1 %v8918_v24  ;;  %v8932_v40 = vcombine.high %v13427_v39, %v13430_v46  ;;  %v13468_v28 = vld [vmem:[%s10742_s23 + $0x740] sm:$0xff] }
 0x54b   : > { %v8998_v10 = vadd.f32 %v4061_v51, %v13024_v58  ;;  %v9030_v47 = vadd.f32 %v4513_v43, %v13027_v37  ;;  %v4063_v42 = vpop.f32.mrb[26].mxu0  ;;  %v4515_v19 = vpop.f32.mrb[26].mxu1  ;;  %6372 = vmatprep.mubr.bf16.mxu0 %v13432_v1  ;;  %6598 = vmatprep.mubr.bf16.mxu1 %v13432_v1  ;;  %v8934_v4 = vcombine.high %v13443_v21, %v13446_v16  ;;  %v13471_v26 = vld [vmem:[%s10742_s23 + $0x760] sm:$0xff] }
 0x54c   : > { %v8999_v24 = vadd.f32 %v4063_v42, %v13018_v20  ;;  %v9031_v3 = vadd.f32 %v4515_v19, %v13021_v56  ;;  %v4065_v8 = vpop.f32.mrb[27].mxu0  ;;  %v4517_v27 = vpop.f32.mrb[27].mxu1  ;;  %6373 = vmatmul.mubr.bf16.gmra.mrb[52].mxu0 %v13418_v32  ;;  %6599 = vmatmul.mubr.bf16.gmra.mrb[52].mxu1 %v13418_v32  ;;  %v4578_v51 = vmax.f32 %v8997_v35, 0.0  ;;  %v4580_v39 = vmax.f32 %v9029_v63, 0.0 }
 0x54d   : > { %v9000_v22 = vadd.f32 %v4065_v8, %v13024_v58  ;;  %v9032_v53 = vadd.f32 %v4517_v27, %v13027_v37  ;;  %6424 = vmatpush1.bf16.msra.mxu0 %v8915_v14  ;;  %6650 = vmatpush1.bf16.msra.mxu1 %v8917_v2  ;;  %v4579_v42 = vmax.f32 %v8998_v10, 0.0  ;;  %v4581_v19 = vmax.f32 %v9030_v47, 0.0  ;;  %v4987_v14 = vld [vmem:[%s10742_s23 + $0x748] sm:$0xff] }
 0x54e   : > { %v4582_v46 = vmax.f32 %v8999_v24, 0.0  ;;  %v4584_v43 = vmax.f32 %v9031_v3, 0.0  ;;  %6425 = vmatprep.subr.bf16.mxu0 %v8924_v11  ;;  %6651 = vmatprep.subr.bf16.mxu1 %v8926_v33  ;;  %v4991_v2 = vld [vmem:[%s10742_s23 + $0x768] sm:$0xff]  ;;  %v8933_v35 = vcombine.low %v13443_v21, %v13446_v16  ;;  %v8940_v63 = vcombine.high %v13468_v28, %v13471_v26  ;;  %v13490_v3 = vld [vmem:[%s10742_s23 + $0x780] sm:$0xff] }
 0x54f   : > { %v4583_v6 = vmax.f32 %v9000_v22, 0.0  ;;  %v4585_v38 = vmax.f32 %v9032_v53, 0.0  ;;  %v8939_v24 = vcombine.low %v13468_v28, %v13471_v26  ;;  %v13493_v22 = vld [vmem:[%s10742_s23 + $0x7a0] sm:$0xff] }
 0x550   : > { %v13475_v8 = vpack.c.bf16 %v4582_v46, %v4578_v51  ;;  %v13477_v27 = vpack.c.bf16 %v4584_v43, %v4580_v39  ;;  %v8942_v39 = vcombine.high %v4987_v14, %v4991_v2  ;;  %v4995_v46 = vld [vmem:[%s10742_s23 + $0x788] sm:$0xff] }
 0x551   : > { %v13483_v11 = vpack.c.bf16 %v4583_v6, %v4579_v42  ;;  %v13485_v33 = vpack.c.bf16 %v4585_v38, %v4581_v19  ;;  %v4069_v10 = vpop.f32.mrb[28].mxu0  ;;  %v4521_v47 = vpop.f32.mrb[28].mxu1  ;;  %6426 = vmatpush1.bf16.msra.mxu0 %v8923_v50  ;;  %6652 = vmatpush1.bf16.msra.mxu1 %v8925_v57  ;;  %v4999_v43 = vld [vmem:[%s10742_s23 + $0x7a8] sm:$0xff]  ;;  %v8941_v42 = vcombine.low %v4987_v14, %v4991_v2 }
 0x552   : > { %v9001_v21 = vadd.f32 %v4069_v10, %v13018_v20  ;;  %v9033_v16 = vadd.f32 %v4521_v47, %v13021_v56  ;;  %v4071_v53 = vpop.f32.mrb[29].mxu0  ;;  %v4523_v51 = vpop.f32.mrb[29].mxu1  ;;  %6427 = vmatprep.subr.bf16.mxu0 %v8932_v40  ;;  %6653 = vmatprep.subr.bf16.mxu1 %v8934_v4  ;;  %v8948_v38 = vcombine.high %v13490_v3, %v13493_v22 }
 0x553   : > { %v9002_v50 = vadd.f32 %v4071_v53, %v13024_v58  ;;  %v9034_v57 = vadd.f32 %v4523_v51, %v13027_v37  ;;  %v4073_v28 = vpop.f32.mrb[30].mxu0  ;;  %v4525_v26 = vpop.f32.mrb[30].mxu1  ;;  %6382 = vmatprep.mubr.bf16.mxu0 %v13483_v11  ;;  %6608 = vmatprep.mubr.bf16.mxu1 %v13483_v11 }
 0x554   : > { %v9003_v19 = vadd.f32 %v4073_v28, %v13018_v20  ;;  %v9035_v6 = vadd.f32 %v4525_v26, %v13021_v56  ;;  %v4075_v40 = vpop.f32.mrb[31].mxu0  ;;  %v4527_v4 = vpop.f32.mrb[31].mxu1  ;;  %6383 = vmatmul.mubr.bf16.gmra.mrb[56].mxu0 %v13475_v8  ;;  %6609 = vmatmul.mubr.bf16.gmra.mrb[56].mxu1 %v13475_v8  ;;  %v8950_v20 = vcombine.high %v4995_v46, %v4999_v43  ;;  %v4586_v56 = vmax.f32 %v9001_v21, 0.0 }
 0x555   : > { %v9004_v10 = vadd.f32 %v4075_v40, %v13024_v58  ;;  %v9036_v47 = vadd.f32 %v4527_v4, %v13027_v37  ;;  %6428 = vmatpush1.bf16.msra.mxu0 %v8931_v29  ;;  %6654 = vmatpush1.bf16.msra.mxu1 %v8933_v35  ;;  %v4588_v14 = vmax.f32 %v9033_v16, 0.0  ;;  %v4587_v51 = vmax.f32 %v9002_v50, 0.0  ;;  %v5006_v29 = vld [vmem:[%s10742_s23 + $0x7e0] sm:$0xff]  ;;  %v5003_v35 = vld [vmem:[%s10742_s23 + $0x7c8] sm:$0xff]  ;;  %v4768_v4 = vld [vmem:[%s10742_s23 + $0x70] sm:$0xff] }
 0x556   : > { %v4590_v2 = vmax.f32 %v9003_v19, 0.0  ;;  %v4592_v53 = vmax.f32 %v9035_v6, 0.0  ;;  %6429 = vmatprep.subr.bf16.mxu0 %v8940_v63  ;;  %6655 = vmatprep.subr.bf16.mxu1 %v8942_v39  ;;  %v4589_v28 = vmax.f32 %v9034_v57, 0.0  ;;  %v5007_v40 = vld [vmem:[%s10742_s23 + $0x7e8] sm:$0xff]  ;;  %v8947_v63 = vcombine.low %v13490_v3, %v13493_v22  ;;  %v4756_v19 = vld [vmem:[%s10742_s23 + $0x10] sm:$0xff] }
 0x557   : > { %v4591_v26 = vmax.f32 %v9004_v10, 0.0  ;;  %v4593_v54 = vmax.f32 %v9036_v47, 0.0  ;;  %v8949_v39 = vcombine.low %v4995_v46, %v4999_v43  ;;  %v8956_v50 = vcombine.high %v5002_v36, %v5006_v29  ;;  %v4760_v6 = vld [vmem:[%s10742_s23 + $0x30] sm:$0xff]  ;;  %v4769_v10 = vld [vmem:[%s10742_s23 + $0x78] sm:$0xff] }
 0x558   : > { %v13512_v58 = vpack.c.bf16 %v4590_v2, %v4586_v56  ;;  %v13514_v37 = vpack.c.bf16 %v4592_v53, %v4588_v14  ;;  %v8958_v57 = vcombine.high %v5003_v35, %v5007_v40  ;;  %v8955_v3 = vcombine.low %v5002_v36, %v5006_v29  ;;  %v4772_v14 = vld [vmem:[%s10742_s23 + $0x90] sm:$0xff]  ;;  %v4773_v53 = vld [vmem:[%s10742_s23 + $0x98] sm:$0xff] }
 0x559   : > { %v13519_v21 = vpack.c.bf16 %v4591_v26, %v4587_v51  ;;  %v13521_v16 = vpack.c.bf16 %v4593_v54, %v4589_v28  ;;  %6430 = vmatpush1.bf16.msra.mxu0 %v8939_v24  ;;  %6656 = vmatpush1.bf16.msra.mxu1 %v8941_v42  ;;  %v4757_v54 = vld [vmem:[%s10742_s23 + $0x18] sm:$0xff]  ;;  %v8957_v22 = vcombine.low %v5003_v35, %v5007_v40  ;;  %v4764_v42 = vld [vmem:[%s10742_s23 + $0x50] sm:$0xff] }
 0x55a   : > { %6431 = vmatprep.subr.bf16.mxu0 %v8948_v38  ;;  %6657 = vmatprep.subr.bf16.mxu1 %v8950_v20  ;;  %v4761_v24 = vld [vmem:[%s10742_s23 + $0x38] sm:$0xff]  ;;  %v8712_v46 = vcombine.high %v4756_v19, %v4760_v6  ;;  %v8711_v47 = vcombine.low %v4756_v19, %v4760_v6  ;;  %v8720_v20 = vcombine.high %v4764_v42, %v4768_v4  ;;  %v4776_v2 = vld [vmem:[%s10742_s23 + $0xb0] sm:$0xff] }
 0x55b   : > { %6392 = vmatprep.mubr.bf16.mxu0 %v13519_v21  ;;  %6618 = vmatprep.mubr.bf16.mxu1 %v13519_v21  ;;  %v8714_v43 = vcombine.high %v4757_v54, %v4761_v24  ;;  %v4765_v38 = vld [vmem:[%s10742_s23 + $0x58] sm:$0xff]  ;;  %v8713_v36 = vcombine.low %v4757_v54, %v4761_v24  ;;  %v8719_v28 = vcombine.low %v4764_v42, %v4768_v4  ;;  %v4780_v40 = vld [vmem:[%s10742_s23 + $0xd0] sm:$0xff] }
 0x55c   : > { %6393 = vmatmul.mubr.bf16.gmra.mrb[60].mxu0 %v13512_v58  ;;  %6619 = vmatmul.mubr.bf16.gmra.mrb[60].mxu1 %v13512_v58  ;;  %v8722_v56 = vcombine.high %v4765_v38, %v4769_v10  ;;  %v4777_v51 = vld [vmem:[%s10742_s23 + $0xb8] sm:$0xff]  ;;  %v8721_v26 = vcombine.low %v4765_v38, %v4769_v10  ;;  %v8728_v29 = vcombine.high %v4772_v14, %v4776_v2  ;;  %v4788_v24 = vld [vmem:[%s10742_s23 + $0x110] sm:$0xff] }
 0x55d   : > { %6432 = vmatpush1.bf16.msra.mxu0 %v8947_v63  ;;  %6435 = vmatprep.mubr.bf16.mxu0 %v13083_v44  ;;  %v8730_v35 = vcombine.high %v4773_v53, %v4777_v51  ;;  %v4784_v63 = vld [vmem:[%s10742_s23 + $0xf0] sm:$0xff]  ;;  %v8729_v19 = vcombine.low %v4773_v53, %v4777_v51 }
 0x55e   : > { %6658 = vmatpush1.bf16.msra.mxu1 %v8949_v39  ;;  %6661 = vmatprep.mubr.bf16.mxu1 %v13083_v44  ;;  %v4781_v39 = vld [vmem:[%s10742_s23 + $0xd8] sm:$0xff]  ;;  %v8736_v6 = vcombine.high %v4780_v40, %v4784_v63  ;;  %v4796_v10 = vld [vmem:[%s10742_s23 + $0x150] sm:$0xff] }
 0x55f   : > { %6433 = vmatprep.subr.bf16.mxu0 %v8956_v50  ;;  %6659 = vmatprep.subr.bf16.mxu1 %v8958_v57  ;;  %v4785_v50 = vld [vmem:[%s10742_s23 + $0xf8] sm:$0xff]  ;;  %v8727_v57 = vcombine.low %v4772_v14, %v4776_v2  ;;  %v4804_v51 = vld [vmem:[%s10742_s23 + $0x190] sm:$0xff] }
 0x560   : > { %v8738_v54 = vcombine.high %v4781_v39, %v4785_v50  ;;  %v8737_v42 = vcombine.low %v4781_v39, %v4785_v50  ;;  %v4812_v50 = vld [vmem:[%s10742_s23 + $0x1d0] sm:$0xff] }
 0x561   : > { %6434 = vmatpush1.bf16.msra.mxu0 %v8955_v3  ;;  %v4792_v3 = vld [vmem:[%s10742_s23 + $0x130] sm:$0xff] }
 0x562   : > { %6660 = vmatpush1.bf16.msra.mxu1 %v8957_v22  ;;  %6742 = vmatprep.subr.bf16.mxu0 %v8712_v46  ;;  %v4789_v22 = vld [vmem:[%s10742_s23 + $0x118] sm:$0xff]  ;;  %v8744_v4 = vcombine.high %v4788_v24, %v4792_v3 }
 0x563   : > { %6968 = vmatprep.subr.bf16.mxu1 %v8714_v43  ;;  %v4793_v46 = vld [vmem:[%s10742_s23 + $0x138] sm:$0xff]  ;;  %v8735_v43 = vcombine.low %v4780_v40, %v4784_v63 }
 0x564   : > { %6436 = vmatmul.mubr.bf16.vlgmr.msra.gmra.mrb[32].mxu0 %v13075_v5  ;;  %v8746_v38 = vcombine.high %v4789_v22, %v4793_v46  ;;  %v8745_v14 = vcombine.low %v4789_v22, %v4793_v46  ;;  %v4820_v46 = vld [vmem:[%s10742_s23 + $0x210] sm:$0xff] }
 0x565   : > { %6662 = vmatmul.mubr.bf16.vlgmr.msra.gmra.mrb[32].mxu1 %v13075_v5  ;;  %6445 = vmatprep.mubr.bf16.mxu0 %v13151_v62 }
 0x566   : > { %6671 = vmatprep.mubr.bf16.mxu1 %v13151_v62  ;;  %6743 = vmatpush1.bf16.msra.mxu0 %v8711_v47  ;;  %v4800_v47 = vld [vmem:[%s10742_s23 + $0x170] sm:$0xff] }
 0x567   : > { %6969 = vmatpush1.bf16.msra.mxu1 %v8713_v36  ;;  %6744 = vmatprep.subr.bf16.mxu0 %v8720_v20  ;;  %v4797_v36 = vld [vmem:[%s10742_s23 + $0x158] sm:$0xff]  ;;  %v8752_v2 = vcombine.high %v4796_v10, %v4800_v47 }
 0x568   : > { %6970 = vmatprep.subr.bf16.mxu1 %v8722_v56  ;;  %v4801_v20 = vld [vmem:[%s10742_s23 + $0x178] sm:$0xff]  ;;  %v8743_v56 = vcombine.low %v4788_v24, %v4792_v3 }
 0x569   : > { %v8754_v53 = vcombine.high %v4797_v36, %v4801_v20  ;;  %v8753_v40 = vcombine.low %v4797_v36, %v4801_v20  ;;  %v4828_v20 = vld [vmem:[%s10742_s23 + $0x250] sm:$0xff] }
 0x56a   : > { %6745 = vmatpush1.bf16.msra.mxu0 %v8719_v28  ;;  %v4808_v28 = vld [vmem:[%s10742_s23 + $0x1b0] sm:$0xff] }
 0x56b   : > { %6971 = vmatpush1.bf16.msra.mxu1 %v8721_v26  ;;  %6746 = vmatprep.subr.bf16.mxu0 %v8728_v29  ;;  %v4805_v26 = vld [vmem:[%s10742_s23 + $0x198] sm:$0xff]  ;;  %v8760_v63 = vcombine.high %v4804_v51, %v4808_v28 }
 0x56c   : > { %6446 = vmatmul.mubr.bf16.gmra.mrb[36].mxu0 %v13137_v9  ;;  %6972 = vmatprep.subr.bf16.mxu1 %v8730_v35  ;;  %v4809_v29 = vld [vmem:[%s10742_s23 + $0x1b8] sm:$0xff]  ;;  %v8751_v35 = vcombine.low %v4796_v10, %v4800_v47 }
 0x56d   : > { %6672 = vmatmul.mubr.bf16.gmra.mrb[36].mxu1 %v13137_v9  ;;  %6455 = vmatprep.mubr.bf16.mxu0 %v13221_v52  ;;  %v8762_v39 = vcombine.high %v4805_v26, %v4809_v29  ;;  %v8761_v24 = vcombine.low %v4805_v26, %v4809_v29  ;;  %v4836_v29 = vld [vmem:[%s10742_s23 + $0x290] sm:$0xff] }
 0x56e   : > { %6681 = vmatprep.mubr.bf16.mxu1 %v13221_v52  ;;  %6747 = vmatpush1.bf16.msra.mxu0 %v8727_v57  ;;  %v4816_v57 = vld [vmem:[%s10742_s23 + $0x1f0] sm:$0xff] }
 0x56f   : > { %6973 = vmatpush1.bf16.msra.mxu1 %v8729_v19  ;;  %6748 = vmatprep.subr.bf16.mxu0 %v8736_v6  ;;  %v4813_v19 = vld [vmem:[%s10742_s23 + $0x1d8] sm:$0xff]  ;;  %v8768_v3 = vcombine.high %v4812_v50, %v4816_v57 }
 0x570   : > { %6974 = vmatprep.subr.bf16.mxu1 %v8738_v54  ;;  %v4817_v6 = vld [vmem:[%s10742_s23 + $0x1f8] sm:$0xff]  ;;  %v8759_v54 = vcombine.low %v4804_v51, %v4808_v28 }
 0x571   : > { %v8770_v22 = vcombine.high %v4813_v19, %v4817_v6  ;;  %v8769_v10 = vcombine.low %v4813_v19, %v4817_v6  ;;  %v4844_v6 = vld [vmem:[%s10742_s23 + $0x2d0] sm:$0xff] }
 0x572   : > { %6749 = vmatpush1.bf16.msra.mxu0 %v8735_v43  ;;  %v4824_v43 = vld [vmem:[%s10742_s23 + $0x230] sm:$0xff] }
 0x573   : > { %6975 = vmatpush1.bf16.msra.mxu1 %v8737_v42  ;;  %6750 = vmatprep.subr.bf16.mxu0 %v8744_v4  ;;  %v4821_v42 = vld [vmem:[%s10742_s23 + $0x218] sm:$0xff]  ;;  %v8776_v47 = vcombine.high %v4820_v46, %v4824_v43 }
 0x574   : > { %6456 = vmatmul.mubr.bf16.gmra.mrb[40].mxu0 %v13213_v34  ;;  %6976 = vmatprep.subr.bf16.mxu1 %v8746_v38  ;;  %v4825_v4 = vld [vmem:[%s10742_s23 + $0x238] sm:$0xff]  ;;  %v8767_v38 = vcombine.low %v4812_v50, %v4816_v57 }
 0x575   : > { %6682 = vmatmul.mubr.bf16.gmra.mrb[40].mxu1 %v13213_v34  ;;  %6465 = vmatprep.mubr.bf16.mxu0 %v13297_v23  ;;  %v8778_v36 = vcombine.high %v4821_v42, %v4825_v4  ;;  %v8777_v51 = vcombine.low %v4821_v42, %v4825_v4  ;;  %v4852_v4 = vld [vmem:[%s10742_s23 + $0x310] sm:$0xff] }
 0x576   : > { %6691 = vmatprep.mubr.bf16.mxu1 %v13297_v23  ;;  %6751 = vmatpush1.bf16.msra.mxu0 %v8743_v56  ;;  %v4832_v56 = vld [vmem:[%s10742_s23 + $0x270] sm:$0xff] }
 0x577   : > { %6977 = vmatpush1.bf16.msra.mxu1 %v8745_v14  ;;  %6752 = vmatprep.subr.bf16.mxu0 %v8752_v2  ;;  %v4829_v14 = vld [vmem:[%s10742_s23 + $0x258] sm:$0xff]  ;;  %v8784_v28 = vcombine.high %v4828_v20, %v4832_v56 }
 0x578   : > { %6978 = vmatprep.subr.bf16.mxu1 %v8754_v53  ;;  %v4833_v2 = vld [vmem:[%s10742_s23 + $0x278] sm:$0xff]  ;;  %v8775_v53 = vcombine.low %v4820_v46, %v4824_v43 }
 0x579   : > { %v8786_v26 = vcombine.high %v4829_v14, %v4833_v2  ;;  %v8785_v50 = vcombine.low %v4829_v14, %v4833_v2  ;;  %v4860_v2 = vld [vmem:[%s10742_s23 + $0x350] sm:$0xff] }
 0x57a   : > { %6753 = vmatpush1.bf16.msra.mxu0 %v8751_v35  ;;  %v4840_v35 = vld [vmem:[%s10742_s23 + $0x2b0] sm:$0xff] }
 0x57b   : > { %6979 = vmatpush1.bf16.msra.mxu1 %v8753_v40  ;;  %6754 = vmatprep.subr.bf16.mxu0 %v8760_v63  ;;  %v4837_v40 = vld [vmem:[%s10742_s23 + $0x298] sm:$0xff]  ;;  %v8792_v57 = vcombine.high %v4836_v29, %v4840_v35 }
 0x57c   : > { %6466 = vmatmul.mubr.bf16.gmra.mrb[44].mxu0 %v13283_v30  ;;  %6980 = vmatprep.subr.bf16.mxu1 %v8762_v39  ;;  %v4841_v63 = vld [vmem:[%s10742_s23 + $0x2b8] sm:$0xff]  ;;  %v8783_v39 = vcombine.low %v4828_v20, %v4832_v56 }
 0x57d   : > { %6692 = vmatmul.mubr.bf16.gmra.mrb[44].mxu1 %v13283_v30  ;;  %6475 = vmatprep.mubr.bf16.mxu0 %v13367_v13  ;;  %v8794_v19 = vcombine.high %v4837_v40, %v4841_v63  ;;  %v8793_v46 = vcombine.low %v4837_v40, %v4841_v63  ;;  %v4868_v63 = vld [vmem:[%s10742_s23 + $0x390] sm:$0xff] }
 0x57e   : > { %6701 = vmatprep.mubr.bf16.mxu1 %v13367_v13  ;;  %6755 = vmatpush1.bf16.msra.mxu0 %v8759_v54  ;;  %v4848_v54 = vld [vmem:[%s10742_s23 + $0x2f0] sm:$0xff] }
 0x57f   : > { %6981 = vmatpush1.bf16.msra.mxu1 %v8761_v24  ;;  %6756 = vmatprep.subr.bf16.mxu0 %v8768_v3  ;;  %v4845_v24 = vld [vmem:[%s10742_s23 + $0x2d8] sm:$0xff]  ;;  %v8800_v43 = vcombine.high %v4844_v6, %v4848_v54 }
 0x580   : > { %6982 = vmatprep.subr.bf16.mxu1 %v8770_v22  ;;  %v4849_v3 = vld [vmem:[%s10742_s23 + $0x2f8] sm:$0xff]  ;;  %v8791_v22 = vcombine.low %v4836_v29, %v4840_v35 }
 0x581   : > { %v8802_v42 = vcombine.high %v4845_v24, %v4849_v3  ;;  %v8801_v20 = vcombine.low %v4845_v24, %v4849_v3  ;;  %v4876_v3 = vld [vmem:[%s10742_s23 + $0x3d0] sm:$0xff] }
 0x582   : > { %6757 = vmatpush1.bf16.msra.mxu0 %v8767_v38  ;;  %v4856_v38 = vld [vmem:[%s10742_s23 + $0x330] sm:$0xff] }
 0x583   : > { %6983 = vmatpush1.bf16.msra.mxu1 %v8769_v10  ;;  %6758 = vmatprep.subr.bf16.mxu0 %v8776_v47  ;;  %v4853_v10 = vld [vmem:[%s10742_s23 + $0x318] sm:$0xff]  ;;  %v8808_v56 = vcombine.high %v4852_v4, %v4856_v38 }
 0x584   : > { %6476 = vmatmul.mubr.bf16.gmra.mrb[48].mxu0 %v13359_v12  ;;  %6984 = vmatprep.subr.bf16.mxu1 %v8778_v36  ;;  %v4857_v47 = vld [vmem:[%s10742_s23 + $0x338] sm:$0xff]  ;;  %v8799_v36 = vcombine.low %v4844_v6, %v4848_v54 }
 0x585   : > { %6702 = vmatmul.mubr.bf16.gmra.mrb[48].mxu1 %v13359_v12  ;;  %6485 = vmatprep.mubr.bf16.mxu0 %v13434_v18  ;;  %v8810_v14 = vcombine.high %v4853_v10, %v4857_v47  ;;  %v8809_v29 = vcombine.low %v4853_v10, %v4857_v47  ;;  %v4884_v47 = vld [vmem:[%s10742_s23 + $0x410] sm:$0xff] }
 0x586   : > { %6711 = vmatprep.mubr.bf16.mxu1 %v13434_v18  ;;  %6759 = vmatpush1.bf16.msra.mxu0 %v8775_v53  ;;  %v4864_v53 = vld [vmem:[%s10742_s23 + $0x370] sm:$0xff] }
 0x587   : > { %6985 = vmatpush1.bf16.msra.mxu1 %v8777_v51  ;;  %6760 = vmatprep.subr.bf16.mxu0 %v8784_v28  ;;  %v4861_v51 = vld [vmem:[%s10742_s23 + $0x358] sm:$0xff]  ;;  %v8816_v35 = vcombine.high %v4860_v2, %v4864_v53 }
 0x588   : > { %6986 = vmatprep.subr.bf16.mxu1 %v8786_v26  ;;  %v4865_v28 = vld [vmem:[%s10742_s23 + $0x378] sm:$0xff]  ;;  %v8807_v26 = vcombine.low %v4852_v4, %v4856_v38 }
 0x589   : > { %v8818_v40 = vcombine.high %v4861_v51, %v4865_v28  ;;  %v8817_v6 = vcombine.low %v4861_v51, %v4865_v28  ;;  %v4892_v28 = vld [vmem:[%s10742_s23 + $0x450] sm:$0xff] }
 0x58a   : > { %6761 = vmatpush1.bf16.msra.mxu0 %v8783_v39  ;;  %v4872_v39 = vld [vmem:[%s10742_s23 + $0x3b0] sm:$0xff] }
 0x58b   : > { %6987 = vmatpush1.bf16.msra.mxu1 %v8785_v50  ;;  %6762 = vmatprep.subr.bf16.mxu0 %v8792_v57  ;;  %v4869_v50 = vld [vmem:[%s10742_s23 + $0x398] sm:$0xff]  ;;  %v8824_v54 = vcombine.high %v4868_v63, %v4872_v39 }
 0x58c   : > { %6486 = vmatmul.mubr.bf16.gmra.mrb[52].mxu0 %v13420_v7  ;;  %6988 = vmatprep.subr.bf16.mxu1 %v8794_v19  ;;  %v4873_v57 = vld [vmem:[%s10742_s23 + $0x3b8] sm:$0xff]  ;;  %v8815_v19 = vcombine.low %v4860_v2, %v4864_v53 }
 0x58d   : > { %6712 = vmatmul.mubr.bf16.gmra.mrb[52].mxu1 %v13420_v7  ;;  %6495 = vmatprep.mubr.bf16.mxu0 %v13485_v33  ;;  %v8826_v24 = vcombine.high %v4869_v50, %v4873_v57  ;;  %v8825_v4 = vcombine.low %v4869_v50, %v4873_v57  ;;  %v4900_v50 = vld [vmem:[%s10742_s23 + $0x490] sm:$0xff] }
 0x58e   : > { %6721 = vmatprep.mubr.bf16.mxu1 %v13485_v33  ;;  %6763 = vmatpush1.bf16.msra.mxu0 %v8791_v22  ;;  %v4880_v22 = vld [vmem:[%s10742_s23 + $0x3f0] sm:$0xff] }
 0x58f   : > { %6989 = vmatpush1.bf16.msra.mxu1 %v8793_v46  ;;  %6764 = vmatprep.subr.bf16.mxu0 %v8800_v43  ;;  %v4877_v46 = vld [vmem:[%s10742_s23 + $0x3d8] sm:$0xff]  ;;  %v8832_v38 = vcombine.high %v4876_v3, %v4880_v22  ;;  %v4904_v57 = vld [vmem:[%s10742_s23 + $0x4b0] sm:$0xff] }
 0x590   : > { %6990 = vmatprep.subr.bf16.mxu1 %v8802_v42  ;;  %v4881_v43 = vld [vmem:[%s10742_s23 + $0x3f8] sm:$0xff]  ;;  %v8823_v42 = vcombine.low %v4868_v63, %v4872_v39 }
 0x591   : > { %v8834_v10 = vcombine.high %v4877_v46, %v4881_v43  ;;  %v8833_v2 = vcombine.low %v4877_v46, %v4881_v43  ;;  %v4908_v46 = vld [vmem:[%s10742_s23 + $0x4d0] sm:$0xff] }
 0x592   : > { %6765 = vmatpush1.bf16.msra.mxu0 %v8799_v36  ;;  %v4888_v36 = vld [vmem:[%s10742_s23 + $0x430] sm:$0xff] }
 0x593   : > { %6991 = vmatpush1.bf16.msra.mxu1 %v8801_v20  ;;  %6766 = vmatprep.subr.bf16.mxu0 %v8808_v56  ;;  %v4885_v20 = vld [vmem:[%s10742_s23 + $0x418] sm:$0xff]  ;;  %v8840_v53 = vcombine.high %v4884_v47, %v4888_v36  ;;  %v4912_v43 = vld [vmem:[%s10742_s23 + $0x4f0] sm:$0xff] }
 0x594   : > { %6496 = vmatmul.mubr.bf16.gmra.mrb[56].mxu0 %v13477_v27  ;;  %6992 = vmatprep.subr.bf16.mxu1 %v8810_v14  ;;  %v4889_v56 = vld [vmem:[%s10742_s23 + $0x438] sm:$0xff]  ;;  %v8831_v14 = vcombine.low %v4876_v3, %v4880_v22  ;;  %v8856_v3 = vcombine.high %v4900_v50, %v4904_v57 }
 0x595   : > { %6722 = vmatmul.mubr.bf16.gmra.mrb[56].mxu1 %v13477_v27  ;;  %6505 = vmatprep.mubr.bf16.mxu0 %v13521_v16  ;;  %v8842_v51 = vcombine.high %v4885_v20, %v4889_v56 }
 0x596   : > { %6731 = vmatprep.mubr.bf16.mxu1 %v13521_v16  ;;  %6767 = vmatpush1.bf16.msra.mxu0 %v8807_v26  ;;  %v4896_v26 = vld [vmem:[%s10742_s23 + $0x470] sm:$0xff] }
 0x597   : > { %6993 = vmatpush1.bf16.msra.mxu1 %v8809_v29  ;;  %6768 = vmatprep.subr.bf16.mxu0 %v8816_v35  ;;  %v4893_v29 = vld [vmem:[%s10742_s23 + $0x458] sm:$0xff]  ;;  %v8848_v63 = vcombine.high %v4892_v28, %v4896_v26 }
 0x598   : > { %6994 = vmatprep.subr.bf16.mxu1 %v8818_v40  ;;  %v4897_v35 = vld [vmem:[%s10742_s23 + $0x478] sm:$0xff]  ;;  %v8839_v40 = vcombine.low %v4884_v47, %v4888_v36  ;;  %v4916_v47 = vld [vmem:[%s10742_s23 + $0x510] sm:$0xff] }
 0x599   : > { %v8850_v39 = vcombine.high %v4893_v29, %v4897_v35  ;;  %v4920_v36 = vld [vmem:[%s10742_s23 + $0x530] sm:$0xff] }
 0x59a   : > { %6769 = vmatpush1.bf16.msra.mxu0 %v8815_v19  ;;  %v4901_v19 = vld [vmem:[%s10742_s23 + $0x498] sm:$0xff] }
 0x59b   : > { %6995 = vmatpush1.bf16.msra.mxu1 %v8817_v6  ;;  %6770 = vmatprep.subr.bf16.mxu0 %v8824_v54  ;;  %v4905_v6 = vld [vmem:[%s10742_s23 + $0x4b8] sm:$0xff]  ;;  %v8847_v54 = vcombine.low %v4892_v28, %v4896_v26  ;;  %v4924_v28 = vld [vmem:[%s10742_s23 + $0x550] sm:$0xff] }
 0x59c   : > { %6506 = vmatmul.mubr.bf16.gmra.mrb[60].mxu0 %v13514_v37  ;;  %6996 = vmatprep.subr.bf16.mxu1 %v8826_v24  ;;  %v8849_v24 = vcombine.low %v4893_v29, %v4897_v35  ;;  %v8858_v22 = vcombine.high %v4901_v19, %v4905_v6  ;;  %v4928_v26 = vld [vmem:[%s10742_s23 + $0x570] sm:$0xff]  ;;  %v4929_v29 = vld [vmem:[%s10742_s23 + $0x578] sm:$0xff]  ;;  %v8871_v35 = vcombine.low %v4916_v47, %v4920_v36 }
 0x59d   : > { %6732 = vmatmul.mubr.bf16.gmra.mrb[60].mxu1 %v13514_v37  ;;  %6774 = vmatprep.mubr.bf16.mxu0 %v13081_v55 }
 0x59e   : > { %6771 = vmatpush1.bf16.msra.mxu0 %v8823_v42  ;;  %7000 = vmatprep.mubr.bf16.mxu1 %v13081_v55  ;;  %v8841_v55 = vcombine.low %v4885_v20, %v4889_v56  ;;  %v4913_v42 = vld [vmem:[%s10742_s23 + $0x4f8] sm:$0xff] }
 0x59f   : > { %6997 = vmatpush1.bf16.msra.mxu1 %v8825_v4  ;;  %6772 = vmatprep.subr.bf16.mxu0 %v8832_v38  ;;  %v8855_v4 = vcombine.low %v4900_v50, %v4904_v57  ;;  %v8864_v38 = vcombine.high %v4908_v46, %v4912_v43  ;;  %v4917_v20 = vld [vmem:[%s10742_s23 + $0x518] sm:$0xff] }
 0x5a0   : > { %6998 = vmatprep.subr.bf16.mxu1 %v8834_v10  ;;  %v4921_v56 = vld [vmem:[%s10742_s23 + $0x538] sm:$0xff] }
 0x5a1   : > { %v4933_v50 = vld [vmem:[%s10742_s23 + $0x598] sm:$0xff] }
 0x5a2   : > { %6773 = vmatpush1.bf16.msra.mxu0 %v8831_v14  ;;  %v8863_v14 = vcombine.low %v4908_v46, %v4912_v43  ;;  %v4937_v57 = vld [vmem:[%s10742_s23 + $0x5b8] sm:$0xff] }
 0x5a3   : > { %6999 = vmatpush1.bf16.msra.mxu1 %v8833_v2  ;;  %6855 = vmatprep.subr.bf16.mxu0 %v8840_v53  ;;  %v8872_v53 = vcombine.high %v4916_v47, %v4920_v36  ;;  %v4945_v46 = vld [vmem:[%s10742_s23 + $0x5f8] sm:$0xff] }
 0x5a4   : > { %7081 = vmatprep.subr.bf16.mxu1 %v8842_v51  ;;  %v8874_v51 = vcombine.high %v4917_v20, %v4921_v56 }
 0x5a5   : > { %6775 = vmatmul.mubr.bf16.vlgmr.msra.gmra.mrb[64].mxu0 %v13073_v25 }
 0x5a6   : > { %7001 = vmatmul.mubr.bf16.vlgmr.msra.gmra.mrb[64].mxu1 %v13073_v25  ;;  %6784 = vmatprep.mubr.bf16.mxu0 %v13149_v17  ;;  %v4909_v25 = vld [vmem:[%s10742_s23 + $0x4d8] sm:$0xff] }
 0x5a7   : > { %6856 = vmatpush1.bf16.msra.mxu0 %v8839_v40  ;;  %7010 = vmatprep.mubr.bf16.mxu1 %v13149_v17  ;;  %v8857_v17 = vcombine.low %v4901_v19, %v4905_v6  ;;  %v8866_v10 = vcombine.high %v4909_v25, %v4913_v42  ;;  %v8865_v2 = vcombine.low %v4909_v25, %v4913_v42 }
 0x5a8   : > { %7082 = vmatpush1.bf16.msra.mxu1 %v8841_v55  ;;  %6857 = vmatprep.subr.bf16.mxu0 %v8848_v63  ;;  %v8880_v40 = vcombine.high %v4924_v28, %v4928_v26  ;;  %v4932_v63 = vld [vmem:[%s10742_s23 + $0x590] sm:$0xff]  ;;  %v8879_v19 = vcombine.low %v4924_v28, %v4928_v26 }
 0x5a9   : > { %7083 = vmatprep.subr.bf16.mxu1 %v8850_v39  ;;  %v4936_v39 = vld [vmem:[%s10742_s23 + $0x5b0] sm:$0xff] }
 0x5aa   : > { %v8887_v43 = vcombine.low %v4932_v63, %v4936_v39 }
 0x5ab   : > { %6858 = vmatpush1.bf16.msra.mxu0 %v8847_v54  ;;  %v8888_v54 = vcombine.high %v4932_v63, %v4936_v39 }
 0x5ac   : > { %7084 = vmatpush1.bf16.msra.mxu1 %v8849_v24  ;;  %6859 = vmatprep.subr.bf16.mxu0 %v8856_v3  ;;  %v8890_v24 = vcombine.high %v4933_v50, %v4937_v57  ;;  %v4940_v3 = vld [vmem:[%s10742_s23 + $0x5d0] sm:$0xff] }
 0x5ad   : > { %6785 = vmatmul.mubr.bf16.gmra.mrb[68].mxu0 %v13135_v41  ;;  %7085 = vmatprep.subr.bf16.mxu1 %v8858_v22  ;;  %v4944_v22 = vld [vmem:[%s10742_s23 + $0x5f0] sm:$0xff] }
 0x5ae   : > { %7011 = vmatmul.mubr.bf16.gmra.mrb[68].mxu1 %v13135_v41  ;;  %6794 = vmatprep.mubr.bf16.mxu0 %v13219_v45  ;;  %v4925_v41 = vld [vmem:[%s10742_s23 + $0x558] sm:$0xff]  ;;  %v8896_v25 = vcombine.high %v4940_v3, %v4944_v22  ;;  %v8895_v47 = vcombine.low %v4940_v3, %v4944_v22  ;;  %v4980_v3 = vld [vmem:[%s10742_s23 + $0x710] sm:$0xff] }
 0x5af   : > { %6860 = vmatpush1.bf16.msra.mxu0 %v8855_v4  ;;  %7020 = vmatprep.mubr.bf16.mxu1 %v13219_v45  ;;  %v8873_v45 = vcombine.low %v4917_v20, %v4921_v56  ;;  %v8882_v55 = vcombine.high %v4925_v41, %v4929_v29  ;;  %v8881_v6 = vcombine.low %v4925_v41, %v4929_v29  ;;  %v4948_v4 = vld [vmem:[%s10742_s23 + $0x610] sm:$0xff] }
 0x5b0   : > { %7086 = vmatpush1.bf16.msra.mxu1 %v8857_v17  ;;  %6861 = vmatprep.subr.bf16.mxu0 %v8864_v38  ;;  %v4952_v17 = vld [vmem:[%s10742_s23 + $0x630] sm:$0xff]  ;;  %v4949_v38 = vld [vmem:[%s10742_s23 + $0x618] sm:$0xff] }
 0x5b1   : > { %7087 = vmatprep.subr.bf16.mxu1 %v8866_v10  ;;  %v4953_v10 = vld [vmem:[%s10742_s23 + $0x638] sm:$0xff]  ;;  %v8904_v20 = vcombine.high %v4948_v4, %v4952_v17  ;;  %v4964_v41 = vld [vmem:[%s10742_s23 + $0x690] sm:$0xff] }
 0x5b2   : > { %v8906_v56 = vcombine.high %v4949_v38, %v4953_v10  ;;  %v4968_v29 = vld [vmem:[%s10742_s23 + $0x6b0] sm:$0xff] }
 0x5b3   : > { %6862 = vmatpush1.bf16.msra.mxu0 %v8863_v14  ;;  %v4956_v14 = vld [vmem:[%s10742_s23 + $0x650] sm:$0xff]  ;;  %v8920_v63 = vcombine.high %v4964_v41, %v4968_v29 }
 0x5b4   : > { %7088 = vmatpush1.bf16.msra.mxu1 %v8865_v2  ;;  %6863 = vmatprep.subr.bf16.mxu0 %v8872_v53  ;;  %v4960_v2 = vld [vmem:[%s10742_s23 + $0x670] sm:$0xff]  ;;  %v4961_v53 = vld [vmem:[%s10742_s23 + $0x678] sm:$0xff] }
 0x5b5   : > { %6795 = vmatmul.mubr.bf16.gmra.mrb[72].mxu0 %v13211_v49  ;;  %7089 = vmatprep.subr.bf16.mxu1 %v8874_v51  ;;  %v8903_v51 = vcombine.low %v4948_v4, %v4952_v17  ;;  %v8912_v28 = vcombine.high %v4956_v14, %v4960_v2  ;;  %v4984_v22 = vld [vmem:[%s10742_s23 + $0x730] sm:$0xff] }
 0x5b6   : > { %7021 = vmatmul.mubr.bf16.gmra.mrb[72].mxu1 %v13211_v49  ;;  %6804 = vmatprep.mubr.bf16.mxu0 %v13295_v60  ;;  %v4941_v49 = vld [vmem:[%s10742_s23 + $0x5d8] sm:$0xff]  ;;  %v4988_v4 = vld [vmem:[%s10742_s23 + $0x750] sm:$0xff] }
 0x5b7   : > { %6864 = vmatpush1.bf16.msra.mxu0 %v8871_v35  ;;  %7030 = vmatprep.mubr.bf16.mxu1 %v13295_v60  ;;  %v8889_v60 = vcombine.low %v4933_v50, %v4937_v57  ;;  %v8898_v42 = vcombine.high %v4941_v49, %v4945_v46  ;;  %v8897_v36 = vcombine.low %v4941_v49, %v4945_v46  ;;  %v4965_v35 = vld [vmem:[%s10742_s23 + $0x698] sm:$0xff]  ;;  %v4972_v50 = vld [vmem:[%s10742_s23 + $0x6d0] sm:$0xff] }
 0x5b8   : > { %7090 = vmatpush1.bf16.msra.mxu1 %v8873_v45  ;;  %6865 = vmatprep.subr.bf16.mxu0 %v8880_v40  ;;  %v4969_v45 = vld [vmem:[%s10742_s23 + $0x6b8] sm:$0xff]  ;;  %v8911_v40 = vcombine.low %v4956_v14, %v4960_v2  ;;  %v4976_v57 = vld [vmem:[%s10742_s23 + $0x6f0] sm:$0xff] }
 0x5b9   : > { %7091 = vmatprep.subr.bf16.mxu1 %v8882_v55  ;;  %v8922_v39 = vcombine.high %v4965_v35, %v4969_v45  ;;  %v4981_v49 = vld [vmem:[%s10742_s23 + $0x718] sm:$0xff]  ;;  %v4992_v17 = vld [vmem:[%s10742_s23 + $0x770] sm:$0xff] }
 0x5ba   : > { %v4985_v46 = vld [vmem:[%s10742_s23 + $0x738] sm:$0xff] }
 0x5bb   : > { %6866 = vmatpush1.bf16.msra.mxu0 %v8879_v19  ;;  %v4977_v19 = vld [vmem:[%s10742_s23 + $0x6f8] sm:$0xff] }
 0x5bc   : > { %7092 = vmatpush1.bf16.msra.mxu1 %v8881_v6  ;;  %6867 = vmatprep.subr.bf16.mxu0 %v8888_v54  ;;  %v8919_v6 = vcombine.low %v4964_v41, %v4968_v29  ;;  %v8928_v54 = vcombine.high %v4972_v50, %v4976_v57  ;;  %v4997_v14 = vld [vmem:[%s10742_s23 + $0x798] sm:$0xff] }
 0x5bd   : > { %6805 = vmatmul.mubr.bf16.gmra.mrb[76].mxu0 %v13281_v59  ;;  %7093 = vmatprep.subr.bf16.mxu1 %v8890_v24  ;;  %v5001_v2 = vld [vmem:[%s10742_s23 + $0x7b8] sm:$0xff] }
 0x5be   : > { %7031 = vmatmul.mubr.bf16.gmra.mrb[76].mxu1 %v13281_v59  ;;  %6814 = vmatprep.mubr.bf16.mxu0 %v13365_v31  ;;  %v4957_v59 = vld [vmem:[%s10742_s23 + $0x658] sm:$0xff] }
 0x5bf   : > { %6868 = vmatpush1.bf16.msra.mxu0 %v8887_v43  ;;  %7040 = vmatprep.mubr.bf16.mxu1 %v13365_v31  ;;  %v8905_v31 = vcombine.low %v4949_v38, %v4953_v10  ;;  %v8914_v26 = vcombine.high %v4957_v59, %v4961_v53  ;;  %v8913_v55 = vcombine.low %v4957_v59, %v4961_v53  ;;  %v4993_v38 = vld [vmem:[%s10742_s23 + $0x778] sm:$0xff] }
 0x5c0   : > { %7094 = vmatpush1.bf16.msra.mxu1 %v8889_v60  ;;  %6869 = vmatprep.subr.bf16.mxu0 %v8896_v25  ;;  %v8927_v43 = vcombine.low %v4972_v50, %v4976_v57  ;;  %v8936_v25 = vcombine.high %v4980_v3, %v4984_v22  ;;  %v8935_v10 = vcombine.low %v4980_v3, %v4984_v22  ;;  %v5005_v41 = vld [vmem:[%s10742_s23 + $0x7d8] sm:$0xff] }
 0x5c1   : > { %7095 = vmatprep.subr.bf16.mxu1 %v8898_v42  ;;  %v8938_v42 = vcombine.high %v4981_v49, %v4985_v46  ;;  %v8943_v59 = vcombine.low %v4988_v4, %v4992_v17  ;;  %v5009_v29 = vld [vmem:[%s10742_s23 + $0x7f8] sm:$0xff] }
 0x5c2   : > { %v4613_v22 = vld [vmem:[#allocation3 + $0x98] sm:$0xff] }
 0x5c3   : > { %6870 = vmatpush1.bf16.msra.mxu0 %v8895_v47  ;;  %v8944_v47 = vcombine.high %v4988_v4, %v4992_v17 }
 0x5c4   : > { %7096 = vmatpush1.bf16.msra.mxu1 %v8897_v36  ;;  %6871 = vmatprep.subr.bf16.mxu0 %v8904_v20  ;;  %v4996_v20 = vld [vmem:[%s10742_s23 + $0x790] sm:$0xff] }
 0x5c5   : > { %6815 = vmatmul.mubr.bf16.gmra.mrb[80].mxu0 %v13357_v61  ;;  %7097 = vmatprep.subr.bf16.mxu1 %v8906_v56  ;;  %v5000_v56 = vld [vmem:[%s10742_s23 + $0x7b0] sm:$0xff] }
 0x5c6   : > { %7041 = vmatmul.mubr.bf16.gmra.mrb[80].mxu1 %v13357_v61  ;;  %6824 = vmatprep.mubr.bf16.mxu0 %v13432_v1  ;;  %v4973_v61 = vld [vmem:[%s10742_s23 + $0x6d8] sm:$0xff] }
 0x5c7   : > { %6872 = vmatpush1.bf16.msra.mxu0 %v8903_v51  ;;  %7050 = vmatprep.mubr.bf16.mxu1 %v13432_v1  ;;  %v8921_v1 = vcombine.low %v4965_v35, %v4969_v45  ;;  %v8930_v24 = vcombine.high %v4973_v61, %v4977_v19  ;;  %v8929_v60 = vcombine.low %v4973_v61, %v4977_v19 }
 0x5c8   : > { %7098 = vmatpush1.bf16.msra.mxu1 %v8905_v31  ;;  %6873 = vmatprep.subr.bf16.mxu0 %v8912_v28  ;;  %v8952_v51 = vcombine.high %v4996_v20, %v5000_v56  ;;  %v8954_v31 = vcombine.high %v4997_v14, %v5001_v2  ;;  %v5004_v28 = vld [vmem:[%s10742_s23 + $0x7d0] sm:$0xff]  ;;  %v8953_v35 = vcombine.low %v4997_v14, %v5001_v2 }
 0x5c9   : > { %7099 = vmatprep.subr.bf16.mxu1 %v8914_v26  ;;  %v5008_v26 = vld [vmem:[%s10742_s23 + $0x7f0] sm:$0xff] }
 0x5ca   : > { %v8960_v45 = vcombine.high %v5004_v28, %v5008_v26 }
 0x5cb   : > { %6874 = vmatpush1.bf16.msra.mxu0 %v8911_v40  ;;  %v8959_v40 = vcombine.low %v5004_v28, %v5008_v26  ;;  %v4629_v26 = vld [vmem:[#allocation3 + $0x118] sm:$0xff] }
 0x5cc   : > { %7100 = vmatpush1.bf16.msra.mxu1 %v8913_v55  ;;  %6875 = vmatprep.subr.bf16.mxu0 %v8920_v63  ;;  %v8961_v55 = vcombine.low %v5005_v41, %v5009_v29 }
 0x5cd   : > { %6825 = vmatmul.mubr.bf16.gmra.mrb[84].mxu0 %v13418_v32  ;;  %7101 = vmatprep.subr.bf16.mxu1 %v8922_v39 }
 0x5ce   : > { %7051 = vmatmul.mubr.bf16.gmra.mrb[84].mxu1 %v13418_v32  ;;  %6834 = vmatprep.mubr.bf16.mxu0 %v13483_v11  ;;  %v4989_v32 = vld [vmem:[%s10742_s23 + $0x758] sm:$0xff] }
 0x5cf   : > { %6876 = vmatpush1.bf16.msra.mxu0 %v8919_v6  ;;  %7060 = vmatprep.mubr.bf16.mxu1 %v13483_v11  ;;  %v8937_v11 = vcombine.low %v4981_v49, %v4985_v46  ;;  %v8946_v36 = vcombine.high %v4989_v32, %v4993_v38  ;;  %v8945_v53 = vcombine.low %v4989_v32, %v4993_v38  ;;  %v4618_v49 = vld [vmem:[#allocation3 + $0xc0] sm:$0xff] }
 0x5d0   : > { %7102 = vmatpush1.bf16.msra.mxu1 %v8921_v1  ;;  %6877 = vmatprep.subr.bf16.mxu0 %v8928_v54  ;;  %v4610_v1 = vld [vmem:[#allocation3 + $0x80] sm:$0xff]  ;;  %v4612_v54 = vld [vmem:[#allocation3 + $0x90] sm:$0xff] }
 0x5d1   : > { %7103 = vmatprep.subr.bf16.mxu1 %v8930_v24  ;;  %v4611_v24 = vld [vmem:[#allocation3 + $0x88] sm:$0xff] }
 0x5d3   : > { %6878 = vmatpush1.bf16.msra.mxu0 %v8927_v43 }
 0x5d4   : > { %7104 = vmatpush1.bf16.msra.mxu1 %v8929_v60  ;;  %6879 = vmatprep.subr.bf16.mxu0 %v8936_v25  ;;  %v4620_v25 = vld [vmem:[#allocation3 + $0xd0] sm:$0xff] }
 0x5d5   : > { %6835 = vmatmul.mubr.bf16.gmra.mrb[88].mxu0 %v13475_v8  ;;  %7105 = vmatprep.subr.bf16.mxu1 %v8938_v42  ;;  %v4619_v42 = vld [vmem:[#allocation3 + $0xc8] sm:$0xff] }
 0x5d6   : > { %7061 = vmatmul.mubr.bf16.gmra.mrb[88].mxu1 %v13475_v8  ;;  %6844 = vmatprep.mubr.bf16.mxu0 %v13519_v21  ;;  %v8951_v8 = vcombine.low %v4996_v20, %v5000_v56 }
 0x5d7   : > { %6880 = vmatpush1.bf16.msra.mxu0 %v8935_v10  ;;  %7070 = vmatprep.mubr.bf16.mxu1 %v13519_v21  ;;  %v8962_v21 = vcombine.high %v5005_v41, %v5009_v29  ;;  %v4621_v10 = vld [vmem:[#allocation3 + $0xd8] sm:$0xff]  ;;  %v4634_v41 = vld [vmem:[#allocation3 + $0x140] sm:$0xff] }
 0x5d8   : > { %7106 = vmatpush1.bf16.msra.mxu1 %v8937_v11  ;;  %6881 = vmatprep.subr.bf16.mxu0 %v8944_v47 }
 0x5d9   : > { %7107 = vmatprep.subr.bf16.mxu1 %v8946_v36 }
 0x5db   : > { %6882 = vmatpush1.bf16.msra.mxu0 %v8943_v59 }
 0x5dc   : > { %7108 = vmatpush1.bf16.msra.mxu1 %v8945_v53  ;;  %6883 = vmatprep.subr.bf16.mxu0 %v8952_v51  ;;  %v4626_v53 = vld [vmem:[#allocation3 + $0x100] sm:$0xff]  ;;  %v4628_v51 = vld [vmem:[#allocation3 + $0x110] sm:$0xff] }
 0x5dd   : > { %6845 = vmatmul.mubr.bf16.gmra.mrb[92].mxu0 %v13512_v58  ;;  %7109 = vmatprep.subr.bf16.mxu1 %v8954_v31  ;;  %v4627_v31 = vld [vmem:[#allocation3 + $0x108] sm:$0xff] }
 0x5de   : > { %7071 = vmatmul.mubr.bf16.gmra.mrb[92].mxu1 %v13512_v58  ;;  %6887 = vmatprep.mubr.bf16.mxu0 %v13083_v44 }
 0x5df   : > { %6884 = vmatpush1.bf16.msra.mxu0 %v8951_v8  ;;  %7113 = vmatprep.mubr.bf16.mxu1 %v13083_v44  ;;  %v4596_v44 = vld [vmem:[#allocation3 + $0x10] sm:$0xff] }
 0x5e0   : > { %7110 = vmatpush1.bf16.msra.mxu1 %v8953_v35  ;;  %6885 = vmatprep.subr.bf16.mxu0 %v8960_v45  ;;  %v4636_v45 = vld [vmem:[#allocation3 + $0x150] sm:$0xff] }
 0x5e1   : > { %7111 = vmatprep.subr.bf16.mxu1 %v8962_v21  ;;  %v4635_v21 = vld [vmem:[#allocation3 + $0x148] sm:$0xff] }
 0x5e3   : > { %6886 = vmatpush1.bf16.msra.mxu0 %v8959_v40 }
 0x5e4   : > { %7112 = vmatpush1.bf16.msra.mxu1 %v8961_v55 }
 0x5e6   : > { %6888 = vmatmul.mubr.bf16.vlgmr.msra.gmra.mrb[64].mxu0 %v13075_v5 }
 0x5e7   : > { %7114 = vmatmul.mubr.bf16.vlgmr.msra.gmra.mrb[64].mxu1 %v13075_v5  ;;  %6897 = vmatprep.mubr.bf16.mxu0 %v13151_v62  ;;  %v4594_v5 = vld [vmem:[#allocation3] sm:$0xff] }
 0x5e8   : > { %7123 = vmatprep.mubr.bf16.mxu1 %v13151_v62 }
 0x5ee   : > { %6898 = vmatmul.mubr.bf16.gmra.mrb[68].mxu0 %v13137_v9 }
 0x5ef   : > { %7124 = vmatmul.mubr.bf16.gmra.mrb[68].mxu1 %v13137_v9  ;;  %6907 = vmatprep.mubr.bf16.mxu0 %v13221_v52  ;;  %v4595_v9 = vld [vmem:[#allocation3 + $0x8] sm:$0xff] }
 0x5f0   : > { %7133 = vmatprep.mubr.bf16.mxu1 %v13221_v52  ;;  %v4602_v52 = vld [vmem:[#allocation3 + $0x40] sm:$0xff] }
 0x5f6   : > { %6908 = vmatmul.mubr.bf16.gmra.mrb[72].mxu0 %v13213_v34 }
 0x5f7   : > { %7134 = vmatmul.mubr.bf16.gmra.mrb[72].mxu1 %v13213_v34  ;;  %6917 = vmatprep.mubr.bf16.mxu0 %v13297_v23  ;;  %v4597_v34 = vld [vmem:[#allocation3 + $0x18] sm:$0xff] }
 0x5f8   : > { %7143 = vmatprep.mubr.bf16.mxu1 %v13297_v23 }
 0x5fe   : > { %6918 = vmatmul.mubr.bf16.gmra.mrb[76].mxu0 %v13283_v30 }
 0x5ff   : > { %7144 = vmatmul.mubr.bf16.gmra.mrb[76].mxu1 %v13283_v30  ;;  %6927 = vmatprep.mubr.bf16.mxu0 %v13367_v13 }
 0x600   : > { %7153 = vmatprep.mubr.bf16.mxu1 %v13367_v13  ;;  %v4604_v13 = vld [vmem:[#allocation3 + $0x50] sm:$0xff] }
 0x606   : > { %6928 = vmatmul.mubr.bf16.gmra.mrb[80].mxu0 %v13359_v12 }
 0x607   : > { %7154 = vmatmul.mubr.bf16.gmra.mrb[80].mxu1 %v13359_v12  ;;  %6937 = vmatprep.mubr.bf16.mxu0 %v13434_v18 }
 0x608   : > { %7163 = vmatprep.mubr.bf16.mxu1 %v13434_v18 }
 0x60e   : > { %6938 = vmatmul.mubr.bf16.gmra.mrb[84].mxu0 %v13420_v7 }
 0x60f   : > { %7164 = vmatmul.mubr.bf16.gmra.mrb[84].mxu1 %v13420_v7  ;;  %6947 = vmatprep.mubr.bf16.mxu0 %v13485_v33  ;;  %v4603_v7 = vld [vmem:[#allocation3 + $0x48] sm:$0xff] }
 0x610   : > { %7173 = vmatprep.mubr.bf16.mxu1 %v13485_v33 }
 0x616   : > { %6948 = vmatmul.mubr.bf16.gmra.mrb[88].mxu0 %v13477_v27 }
 0x617   : > { %7174 = vmatmul.mubr.bf16.gmra.mrb[88].mxu1 %v13477_v27  ;;  %6957 = vmatprep.mubr.bf16.mxu0 %v13521_v16 }
 0x618   : > { %7183 = vmatprep.mubr.bf16.mxu1 %v13521_v16  ;;  %v4605_v16 = vld [vmem:[#allocation3 + $0x58] sm:$0xff] }
 0x61e   : > { %6958 = vmatmul.mubr.bf16.gmra.mrb[92].mxu0 %v13514_v37 }
 0x61f   : > { %7184 = vmatmul.mubr.bf16.gmra.mrb[92].mxu1 %v13514_v37 }
 0x637   : > { %v6437_v62 = vpop.f32.mrb[32].mxu0 }
 0x638   : > { %v7194_v30 = vadd.f32 %v6437_v62, %v4594_v5  ;;  %v6663_v23 = vpop.f32.mrb[32].mxu1  ;;  %v6439_v12 = vpop.f32.mrb[33].mxu0 }
 0x639   : > { %v7196_v18 = vadd.f32 %v6663_v23, %v4596_v44  ;;  %v7195_v27 = vadd.f32 %v6439_v12, %v4595_v9  ;;  %v6665_v33 = vpop.f32.mrb[33].mxu1  ;;  %v6441_v58 = vpop.f32.mrb[34].mxu0  ;;  %v4637_v9 = vld [vmem:[#allocation3 + $0x158] sm:$0xff] }
 0x63a   : > { %7322 = vst [vmem:[#allocation3] sm:$0xff] %v7194_v30  ;;  %v7197_v63 = vadd.f32 %v6665_v33, %v4597_v34  ;;  %v7202_v39 = vadd.f32 %v6441_v58, %v4602_v52  ;;  %v6667_v37 = vpop.f32.mrb[34].mxu1  ;;  %v6443_v50 = vpop.f32.mrb[35].mxu0  ;;  %v4643_v33 = vld [vmem:[#allocation3 + $0x188] sm:$0xff] }
 0x63b   : > { %7324 = vst [vmem:[#allocation3 + $0x10] sm:$0xff] %v7196_v18  ;;  %7323 = vst [vmem:[#allocation3 + $0x8] sm:$0xff] %v7195_v27  ;;  %v7204_v57 = vadd.f32 %v6667_v37, %v4604_v13  ;;  %v7203_v61 = vadd.f32 %v6443_v50, %v4603_v7  ;;  %v6669_v19 = vpop.f32.mrb[35].mxu1  ;;  %v4642_v18 = vld [vmem:[#allocation3 + $0x180] sm:$0xff]  ;;  %v4644_v27 = vld [vmem:[#allocation3 + $0x190] sm:$0xff] }
 0x63c   : > { %7325 = vst [vmem:[#allocation3 + $0x18] sm:$0xff] %v7197_v63  ;;  %7330 = vst [vmem:[#allocation3 + $0x40] sm:$0xff] %v7202_v39  ;;  %v7205_v6 = vadd.f32 %v6669_v19, %v4605_v16  ;;  %v4645_v16 = vld [vmem:[#allocation3 + $0x198] sm:$0xff]  ;;  %v4650_v63 = vld [vmem:[#allocation3 + $0x1c0] sm:$0xff] }
 0x63d   : > { %7332 = vst [vmem:[#allocation3 + $0x50] sm:$0xff] %v7204_v57  ;;  %7331 = vst [vmem:[#allocation3 + $0x48] sm:$0xff] %v7203_v61  ;;  %v4652_v57 = vld [vmem:[#allocation3 + $0x1d0] sm:$0xff]  ;;  %v4651_v61 = vld [vmem:[#allocation3 + $0x1c8] sm:$0xff] }
 0x63e   : > { %7333 = vst [vmem:[#allocation3 + $0x58] sm:$0xff] %v7205_v6 }
 0x63f   : > { %v6447_v3 = vpop.f32.mrb[36].mxu0 }
 0x640   : > { %v7210_v46 = vadd.f32 %v6447_v3, %v4610_v1  ;;  %v6673_v43 = vpop.f32.mrb[36].mxu1  ;;  %v6449_v60 = vpop.f32.mrb[37].mxu0 }
 0x641   : > { %v7212_v4 = vadd.f32 %v6673_v43, %v4612_v54  ;;  %v7211_v17 = vadd.f32 %v6449_v60, %v4611_v24  ;;  %v6675_v32 = vpop.f32.mrb[37].mxu1  ;;  %v6451_v38 = vpop.f32.mrb[38].mxu0  ;;  %v4653_v24 = vld [vmem:[#allocation3 + $0x1d8] sm:$0xff] }
 0x642   : > { %7338 = vst [vmem:[#allocation3 + $0x80] sm:$0xff] %v7210_v46  ;;  %v7213_v11 = vadd.f32 %v6675_v32, %v4613_v22  ;;  %v7218_v47 = vadd.f32 %v6451_v38, %v4618_v49  ;;  %v6677_v36 = vpop.f32.mrb[38].mxu1  ;;  %v6453_v20 = vpop.f32.mrb[39].mxu0  ;;  %v4659_v32 = vld [vmem:[#allocation3 + $0x208] sm:$0xff] }
 0x643   : > { %7340 = vst [vmem:[#allocation3 + $0x90] sm:$0xff] %v7212_v4  ;;  %7339 = vst [vmem:[#allocation3 + $0x88] sm:$0xff] %v7211_v17  ;;  %v7220_v56 = vadd.f32 %v6677_v36, %v4620_v25  ;;  %v7219_v14 = vadd.f32 %v6453_v20, %v4619_v42  ;;  %v6679_v2 = vpop.f32.mrb[39].mxu1  ;;  %v4658_v4 = vld [vmem:[#allocation3 + $0x200] sm:$0xff]  ;;  %v4660_v17 = vld [vmem:[#allocation3 + $0x210] sm:$0xff] }
 0x644   : > { %7341 = vst [vmem:[#allocation3 + $0x98] sm:$0xff] %v7213_v11  ;;  %7346 = vst [vmem:[#allocation3 + $0xc0] sm:$0xff] %v7218_v47  ;;  %v7221_v59 = vadd.f32 %v6679_v2, %v4621_v10  ;;  %v4661_v10 = vld [vmem:[#allocation3 + $0x218] sm:$0xff]  ;;  %v4666_v11 = vld [vmem:[#allocation3 + $0x240] sm:$0xff] }
 0x645   : > { %7348 = vst [vmem:[#allocation3 + $0xd0] sm:$0xff] %v7220_v56  ;;  %7347 = vst [vmem:[#allocation3 + $0xc8] sm:$0xff] %v7219_v14  ;;  %v4668_v56 = vld [vmem:[#allocation3 + $0x250] sm:$0xff]  ;;  %v4667_v14 = vld [vmem:[#allocation3 + $0x248] sm:$0xff] }
 0x646   : > { %7349 = vst [vmem:[#allocation3 + $0xd8] sm:$0xff] %v7221_v59 }
 0x647   : > { %v6457_v28 = vpop.f32.mrb[40].mxu0 }
 0x648   : > { %v7226_v29 = vadd.f32 %v6457_v28, %v4626_v53  ;;  %v6683_v8 = vpop.f32.mrb[40].mxu1  ;;  %v6459_v35 = vpop.f32.mrb[41].mxu0 }
 0x649   : > { %v7228_v40 = vadd.f32 %v6683_v8, %v4628_v51  ;;  %v7227_v55 = vadd.f32 %v6459_v35, %v4627_v31  ;;  %v6685_v5 = vpop.f32.mrb[41].mxu1  ;;  %v6461_v44 = vpop.f32.mrb[42].mxu0  ;;  %v4669_v31 = vld [vmem:[#allocation3 + $0x258] sm:$0xff] }
 0x64a   : > { %7354 = vst [vmem:[#allocation3 + $0x100] sm:$0xff] %v7226_v29  ;;  %v7229_v62 = vadd.f32 %v6685_v5, %v4629_v26  ;;  %v7234_v34 = vadd.f32 %v6461_v44, %v4634_v41  ;;  %v6687_v52 = vpop.f32.mrb[42].mxu1  ;;  %v6463_v30 = vpop.f32.mrb[43].mxu0  ;;  %v4675_v5 = vld [vmem:[#allocation3 + $0x288] sm:$0xff] }
 0x64b   : > { %7356 = vst [vmem:[#allocation3 + $0x110] sm:$0xff] %v7228_v40  ;;  %7355 = vst [vmem:[#allocation3 + $0x108] sm:$0xff] %v7227_v55  ;;  %v7236_v23 = vadd.f32 %v6687_v52, %v4636_v45  ;;  %v7235_v12 = vadd.f32 %v6463_v30, %v4635_v21  ;;  %v6689_v13 = vpop.f32.mrb[43].mxu1  ;;  %v4674_v40 = vld [vmem:[#allocation3 + $0x280] sm:$0xff]  ;;  %v4676_v55 = vld [vmem:[#allocation3 + $0x290] sm:$0xff] }
 0x64c   : > { %7357 = vst [vmem:[#allocation3 + $0x118] sm:$0xff] %v7229_v62  ;;  %7362 = vst [vmem:[#allocation3 + $0x140] sm:$0xff] %v7234_v34  ;;  %v7237_v7 = vadd.f32 %v6689_v13, %v4637_v9  ;;  %v4677_v9 = vld [vmem:[#allocation3 + $0x298] sm:$0xff]  ;;  %v4682_v62 = vld [vmem:[#allocation3 + $0x2c0] sm:$0xff] }
 0x64d   : > { %7364 = vst [vmem:[#allocation3 + $0x150] sm:$0xff] %v7236_v23  ;;  %7363 = vst [vmem:[#allocation3 + $0x148] sm:$0xff] %v7235_v12  ;;  %v4684_v23 = vld [vmem:[#allocation3 + $0x2d0] sm:$0xff]  ;;  %v4683_v12 = vld [vmem:[#allocation3 + $0x2c8] sm:$0xff] }
 0x64e   : > { %7365 = vst [vmem:[#allocation3 + $0x158] sm:$0xff] %v7237_v7 }
 0x64f   : > { %v6467_v58 = vpop.f32.mrb[44].mxu0 }
 0x650   : > { %v7242_v39 = vadd.f32 %v6467_v58, %v4642_v18  ;;  %v6693_v37 = vpop.f32.mrb[44].mxu1  ;;  %v6469_v50 = vpop.f32.mrb[45].mxu0 }
 0x651   : > { %v7244_v19 = vadd.f32 %v6693_v37, %v4644_v27  ;;  %v7243_v6 = vadd.f32 %v6469_v50, %v4643_v33  ;;  %v6695_v1 = vpop.f32.mrb[45].mxu1  ;;  %v6471_v54 = vpop.f32.mrb[46].mxu0  ;;  %v4685_v33 = vld [vmem:[#allocation3 + $0x2d8] sm:$0xff] }
 0x652   : > { %7370 = vst [vmem:[#allocation3 + $0x180] sm:$0xff] %v7242_v39  ;;  %v7245_v3 = vadd.f32 %v6695_v1, %v4645_v16  ;;  %v7250_v22 = vadd.f32 %v6471_v54, %v4650_v63  ;;  %v6697_v49 = vpop.f32.mrb[46].mxu1  ;;  %v6473_v46 = vpop.f32.mrb[47].mxu0  ;;  %v4691_v1 = vld [vmem:[#allocation3 + $0x308] sm:$0xff] }
 0x653   : > { %7372 = vst [vmem:[#allocation3 + $0x190] sm:$0xff] %v7244_v19  ;;  %7371 = vst [vmem:[#allocation3 + $0x188] sm:$0xff] %v7243_v6  ;;  %v7252_v43 = vadd.f32 %v6697_v49, %v4652_v57  ;;  %v7251_v60 = vadd.f32 %v6473_v46, %v4651_v61  ;;  %v6699_v25 = vpop.f32.mrb[47].mxu1  ;;  %v4690_v19 = vld [vmem:[#allocation3 + $0x300] sm:$0xff]  ;;  %v4692_v6 = vld [vmem:[#allocation3 + $0x310] sm:$0xff] }
 0x654   : > { %7373 = vst [vmem:[#allocation3 + $0x198] sm:$0xff] %v7245_v3  ;;  %7378 = vst [vmem:[#allocation3 + $0x1c0] sm:$0xff] %v7250_v22  ;;  %v7253_v42 = vadd.f32 %v6699_v25, %v4653_v24  ;;  %v4693_v24 = vld [vmem:[#allocation3 + $0x318] sm:$0xff]  ;;  %v4698_v3 = vld [vmem:[#allocation3 + $0x340] sm:$0xff] }
 0x655   : > { %7380 = vst [vmem:[#allocation3 + $0x1d0] sm:$0xff] %v7252_v43  ;;  %7379 = vst [vmem:[#allocation3 + $0x1c8] sm:$0xff] %v7251_v60  ;;  %v4700_v43 = vld [vmem:[#allocation3 + $0x350] sm:$0xff]  ;;  %v4699_v60 = vld [vmem:[#allocation3 + $0x348] sm:$0xff] }
 0x656   : > { %7381 = vst [vmem:[#allocation3 + $0x1d8] sm:$0xff] %v7253_v42 }
 0x657   : > { %v6477_v38 = vpop.f32.mrb[48].mxu0 }
 0x658   : > { %v7258_v47 = vadd.f32 %v6477_v38, %v4658_v4  ;;  %v6703_v36 = vpop.f32.mrb[48].mxu1  ;;  %v6479_v20 = vpop.f32.mrb[49].mxu0 }
 0x659   : > { %v7260_v2 = vadd.f32 %v6703_v36, %v4660_v17  ;;  %v7259_v59 = vadd.f32 %v6479_v20, %v4659_v32  ;;  %v6705_v53 = vpop.f32.mrb[49].mxu1  ;;  %v6481_v51 = vpop.f32.mrb[50].mxu0  ;;  %v4701_v32 = vld [vmem:[#allocation3 + $0x358] sm:$0xff] }
 0x65a   : > { %7386 = vst [vmem:[#allocation3 + $0x200] sm:$0xff] %v7258_v47  ;;  %v7261_v28 = vadd.f32 %v6705_v53, %v4661_v10  ;;  %v7266_v26 = vadd.f32 %v6481_v51, %v4666_v11  ;;  %v6707_v41 = vpop.f32.mrb[50].mxu1  ;;  %v6483_v29 = vpop.f32.mrb[51].mxu0  ;;  %v4707_v53 = vld [vmem:[#allocation3 + $0x388] sm:$0xff] }
 0x65b   : > { %7388 = vst [vmem:[#allocation3 + $0x210] sm:$0xff] %v7260_v2  ;;  %7387 = vst [vmem:[#allocation3 + $0x208] sm:$0xff] %v7259_v59  ;;  %v7268_v8 = vadd.f32 %v6707_v41, %v4668_v56  ;;  %v7267_v35 = vadd.f32 %v6483_v29, %v4667_v14  ;;  %v6709_v45 = vpop.f32.mrb[51].mxu1  ;;  %v4706_v2 = vld [vmem:[#allocation3 + $0x380] sm:$0xff]  ;;  %v4708_v59 = vld [vmem:[#allocation3 + $0x390] sm:$0xff] }
 0x65c   : > { %7389 = vst [vmem:[#allocation3 + $0x218] sm:$0xff] %v7261_v28  ;;  %7394 = vst [vmem:[#allocation3 + $0x240] sm:$0xff] %v7266_v26  ;;  %v7269_v21 = vadd.f32 %v6709_v45, %v4669_v31  ;;  %v4709_v31 = vld [vmem:[#allocation3 + $0x398] sm:$0xff]  ;;  %v4714_v28 = vld [vmem:[#allocation3 + $0x3c0] sm:$0xff] }
 0x65d   : > { %7396 = vst [vmem:[#allocation3 + $0x250] sm:$0xff] %v7268_v8  ;;  %7395 = vst [vmem:[#allocation3 + $0x248] sm:$0xff] %v7267_v35  ;;  %v4716_v8 = vld [vmem:[#allocation3 + $0x3d0] sm:$0xff]  ;;  %v4715_v35 = vld [vmem:[#allocation3 + $0x3c8] sm:$0xff] }
 0x65e   : > { %7397 = vst [vmem:[#allocation3 + $0x258] sm:$0xff] %v7269_v21 }
 0x65f   : > { %v6487_v44 = vpop.f32.mrb[52].mxu0 }
 0x660   : > { %v7274_v34 = vadd.f32 %v6487_v44, %v4674_v40  ;;  %v6713_v52 = vpop.f32.mrb[52].mxu1  ;;  %v6489_v30 = vpop.f32.mrb[53].mxu0 }
 0x661   : > { %v7276_v13 = vadd.f32 %v6713_v52, %v4676_v55  ;;  %v7275_v7 = vadd.f32 %v6489_v30, %v4675_v5  ;;  %v6715_v18 = vpop.f32.mrb[53].mxu1  ;;  %v6491_v27 = vpop.f32.mrb[54].mxu0  ;;  %v4717_v5 = vld [vmem:[#allocation3 + $0x3d8] sm:$0xff] }
 0x662   : > { %7402 = vst [vmem:[#allocation3 + $0x280] sm:$0xff] %v7274_v34  ;;  %v7277_v58 = vadd.f32 %v6715_v18, %v4677_v9  ;;  %v7282_v16 = vadd.f32 %v6491_v27, %v4682_v62  ;;  %v6717_v63 = vpop.f32.mrb[54].mxu1  ;;  %v6493_v39 = vpop.f32.mrb[55].mxu0  ;;  %v4599_v18 = vld [vmem:[#allocation3 + $0x28] sm:$0xff] }
 0x663   : > { %7404 = vst [vmem:[#allocation3 + $0x290] sm:$0xff] %v7276_v13  ;;  %7403 = vst [vmem:[#allocation3 + $0x288] sm:$0xff] %v7275_v7  ;;  %v7284_v37 = vadd.f32 %v6717_v63, %v4684_v23  ;;  %v7283_v50 = vadd.f32 %v6493_v39, %v4683_v12  ;;  %v6719_v57 = vpop.f32.mrb[55].mxu1  ;;  %v4598_v13 = vld [vmem:[#allocation3 + $0x20] sm:$0xff]  ;;  %v4600_v7 = vld [vmem:[#allocation3 + $0x30] sm:$0xff] }
 0x664   : > { %7405 = vst [vmem:[#allocation3 + $0x298] sm:$0xff] %v7277_v58  ;;  %7410 = vst [vmem:[#allocation3 + $0x2c0] sm:$0xff] %v7282_v16  ;;  %v7285_v61 = vadd.f32 %v6719_v57, %v4685_v33  ;;  %v4601_v33 = vld [vmem:[#allocation3 + $0x38] sm:$0xff]  ;;  %v4606_v58 = vld [vmem:[#allocation3 + $0x60] sm:$0xff] }
 0x665   : > { %7412 = vst [vmem:[#allocation3 + $0x2d0] sm:$0xff] %v7284_v37  ;;  %7411 = vst [vmem:[#allocation3 + $0x2c8] sm:$0xff] %v7283_v50  ;;  %v4608_v37 = vld [vmem:[#allocation3 + $0x70] sm:$0xff]  ;;  %v4607_v50 = vld [vmem:[#allocation3 + $0x68] sm:$0xff] }
 0x666   : > { %7413 = vst [vmem:[#allocation3 + $0x2d8] sm:$0xff] %v7285_v61 }
 0x667   : > { %v6497_v54 = vpop.f32.mrb[56].mxu0 }
 0x668   : > { %v7290_v22 = vadd.f32 %v6497_v54, %v4690_v19  ;;  %v6723_v49 = vpop.f32.mrb[56].mxu1  ;;  %v6499_v46 = vpop.f32.mrb[57].mxu0 }
 0x669   : > { %v7292_v25 = vadd.f32 %v6723_v49, %v4692_v6  ;;  %v7291_v42 = vadd.f32 %v6499_v46, %v4691_v1  ;;  %v6725_v4 = vpop.f32.mrb[57].mxu1  ;;  %v6501_v17 = vpop.f32.mrb[58].mxu0  ;;  %v4609_v1 = vld [vmem:[#allocation3 + $0x78] sm:$0xff] }
 0x66a   : > { %7418 = vst [vmem:[#allocation3 + $0x300] sm:$0xff] %v7290_v22  ;;  %v7293_v38 = vadd.f32 %v6725_v4, %v4693_v24  ;;  %v7298_v10 = vadd.f32 %v6501_v17, %v4698_v3  ;;  %v6727_v11 = vpop.f32.mrb[58].mxu1  ;;  %v6503_v47 = vpop.f32.mrb[59].mxu0  ;;  %v4615_v4 = vld [vmem:[#allocation3 + $0xa8] sm:$0xff] }
 0x66b   : > { %7420 = vst [vmem:[#allocation3 + $0x310] sm:$0xff] %v7292_v25  ;;  %7419 = vst [vmem:[#allocation3 + $0x308] sm:$0xff] %v7291_v42  ;;  %v7300_v36 = vadd.f32 %v6727_v11, %v4700_v43  ;;  %v7299_v20 = vadd.f32 %v6503_v47, %v4699_v60  ;;  %v6729_v56 = vpop.f32.mrb[59].mxu1  ;;  %v4614_v25 = vld [vmem:[#allocation3 + $0xa0] sm:$0xff]  ;;  %v4616_v42 = vld [vmem:[#allocation3 + $0xb0] sm:$0xff] }
 0x66c   : > { %7421 = vst [vmem:[#allocation3 + $0x318] sm:$0xff] %v7293_v38  ;;  %7426 = vst [vmem:[#allocation3 + $0x340] sm:$0xff] %v7298_v10  ;;  %v7301_v14 = vadd.f32 %v6729_v56, %v4701_v32  ;;  %v4617_v32 = vld [vmem:[#allocation3 + $0xb8] sm:$0xff]  ;;  %v4622_v38 = vld [vmem:[#allocation3 + $0xe0] sm:$0xff] }
 0x66d   : > { %7428 = vst [vmem:[#allocation3 + $0x350] sm:$0xff] %v7300_v36  ;;  %7427 = vst [vmem:[#allocation3 + $0x348] sm:$0xff] %v7299_v20  ;;  %v4624_v36 = vld [vmem:[#allocation3 + $0xf0] sm:$0xff]  ;;  %v4623_v20 = vld [vmem:[#allocation3 + $0xe8] sm:$0xff] }
 0x66e   : > { %7429 = vst [vmem:[#allocation3 + $0x358] sm:$0xff] %v7301_v14 }
 0x66f   : > { %v6507_v51 = vpop.f32.mrb[60].mxu0 }
 0x670   : > { %v7306_v26 = vadd.f32 %v6507_v51, %v4706_v2  ;;  %v6733_v41 = vpop.f32.mrb[60].mxu1  ;;  %v6509_v29 = vpop.f32.mrb[61].mxu0 }
 0x671   : > { %v7308_v45 = vadd.f32 %v6733_v41, %v4708_v59  ;;  %v7307_v21 = vadd.f32 %v6509_v29, %v4707_v53  ;;  %v6735_v40 = vpop.f32.mrb[61].mxu1  ;;  %v6511_v55 = vpop.f32.mrb[62].mxu0  ;;  %v4625_v53 = vld [vmem:[#allocation3 + $0xf8] sm:$0xff] }
 0x672   : > { %7434 = vst [vmem:[#allocation3 + $0x380] sm:$0xff] %v7306_v26  ;;  %v7309_v44 = vadd.f32 %v6735_v40, %v4709_v31  ;;  %v7314_v9 = vadd.f32 %v6511_v55, %v4714_v28  ;;  %v6737_v62 = vpop.f32.mrb[62].mxu1  ;;  %v6513_v34 = vpop.f32.mrb[63].mxu0  ;;  %v4631_v40 = vld [vmem:[#allocation3 + $0x128] sm:$0xff] }
 0x673   : > { %7436 = vst [vmem:[#allocation3 + $0x390] sm:$0xff] %v7308_v45  ;;  %7435 = vst [vmem:[#allocation3 + $0x388] sm:$0xff] %v7307_v21  ;;  %v7316_v52 = vadd.f32 %v6737_v62, %v4716_v8  ;;  %v7315_v30 = vadd.f32 %v6513_v34, %v4715_v35  ;;  %v6739_v23 = vpop.f32.mrb[63].mxu1  ;;  %v4630_v45 = vld [vmem:[#allocation3 + $0x120] sm:$0xff]  ;;  %v4632_v21 = vld [vmem:[#allocation3 + $0x130] sm:$0xff] }
 0x674   : > { %7437 = vst [vmem:[#allocation3 + $0x398] sm:$0xff] %v7309_v44  ;;  %7442 = vst [vmem:[#allocation3 + $0x3c0] sm:$0xff] %v7314_v9  ;;  %v7317_v12 = vadd.f32 %v6739_v23, %v4717_v5  ;;  %v4633_v5 = vld [vmem:[#allocation3 + $0x138] sm:$0xff]  ;;  %v4638_v44 = vld [vmem:[#allocation3 + $0x160] sm:$0xff] }
 0x675   : > { %7444 = vst [vmem:[#allocation3 + $0x3d0] sm:$0xff] %v7316_v52  ;;  %7443 = vst [vmem:[#allocation3 + $0x3c8] sm:$0xff] %v7315_v30  ;;  %v4640_v52 = vld [vmem:[#allocation3 + $0x170] sm:$0xff]  ;;  %v4639_v30 = vld [vmem:[#allocation3 + $0x168] sm:$0xff] }
 0x676   : > { %7445 = vst [vmem:[#allocation3 + $0x3d8] sm:$0xff] %v7317_v12 }
 0x6b9   : > { %v6889_v27 = vpop.f32.mrb[64].mxu0 }
 0x6ba   : > { %v7198_v16 = vadd.f32 %v6889_v27, %v4598_v13  ;;  %v7115_v63 = vpop.f32.mrb[64].mxu1  ;;  %v6891_v39 = vpop.f32.mrb[65].mxu0 }
 0x6bb   : > { %v7200_v57 = vadd.f32 %v7115_v63, %v4600_v7  ;;  %v7199_v61 = vadd.f32 %v6891_v39, %v4599_v18  ;;  %v7117_v19 = vpop.f32.mrb[65].mxu1  ;;  %v6893_v6 = vpop.f32.mrb[66].mxu0  ;;  %v4641_v18 = vld [vmem:[#allocation3 + $0x178] sm:$0xff] }
 0x6bc   : > { %7326 = vst [vmem:[#allocation3 + $0x20] sm:$0xff] %v7198_v16  ;;  %v7201_v54 = vadd.f32 %v7117_v19, %v4601_v33  ;;  %v7206_v24 = vadd.f32 %v6893_v6, %v4606_v58  ;;  %v7119_v3 = vpop.f32.mrb[66].mxu1  ;;  %v6895_v22 = vpop.f32.mrb[67].mxu0  ;;  %v4647_v19 = vld [vmem:[#allocation3 + $0x1a8] sm:$0xff] }
 0x6bd   : > { %7328 = vst [vmem:[#allocation3 + $0x30] sm:$0xff] %v7200_v57  ;;  %7327 = vst [vmem:[#allocation3 + $0x28] sm:$0xff] %v7199_v61  ;;  %v7208_v49 = vadd.f32 %v7119_v3, %v4608_v37  ;;  %v7207_v46 = vadd.f32 %v6895_v22, %v4607_v50  ;;  %v7121_v43 = vpop.f32.mrb[67].mxu1  ;;  %v4646_v57 = vld [vmem:[#allocation3 + $0x1a0] sm:$0xff]  ;;  %v4648_v61 = vld [vmem:[#allocation3 + $0x1b0] sm:$0xff] }
 0x6be   : > { %7329 = vst [vmem:[#allocation3 + $0x38] sm:$0xff] %v7201_v54  ;;  %7334 = vst [vmem:[#allocation3 + $0x60] sm:$0xff] %v7206_v24  ;;  %v7209_v60 = vadd.f32 %v7121_v43, %v4609_v1  ;;  %v4649_v1 = vld [vmem:[#allocation3 + $0x1b8] sm:$0xff]  ;;  %v4654_v54 = vld [vmem:[#allocation3 + $0x1e0] sm:$0xff] }
 0x6bf   : > { %7336 = vst [vmem:[#allocation3 + $0x70] sm:$0xff] %v7208_v49  ;;  %7335 = vst [vmem:[#allocation3 + $0x68] sm:$0xff] %v7207_v46  ;;  %v4656_v49 = vld [vmem:[#allocation3 + $0x1f0] sm:$0xff]  ;;  %v4655_v46 = vld [vmem:[#allocation3 + $0x1e8] sm:$0xff] }
 0x6c0   : > { %7337 = vst [vmem:[#allocation3 + $0x78] sm:$0xff] %v7209_v60 }
 0x6c1   : > { %v6899_v17 = vpop.f32.mrb[68].mxu0 }
 0x6c2   : > { %v7214_v10 = vadd.f32 %v6899_v17, %v4614_v25  ;;  %v7125_v11 = vpop.f32.mrb[68].mxu1  ;;  %v6901_v47 = vpop.f32.mrb[69].mxu0 }
 0x6c3   : > { %v7216_v56 = vadd.f32 %v7125_v11, %v4616_v42  ;;  %v7215_v14 = vadd.f32 %v6901_v47, %v4615_v4  ;;  %v7127_v2 = vpop.f32.mrb[69].mxu1  ;;  %v6903_v59 = vpop.f32.mrb[70].mxu0  ;;  %v4657_v4 = vld [vmem:[#allocation3 + $0x1f8] sm:$0xff] }
 0x6c4   : > { %7342 = vst [vmem:[#allocation3 + $0xa0] sm:$0xff] %v7214_v10  ;;  %v7217_v51 = vadd.f32 %v7127_v2, %v4617_v32  ;;  %v7222_v31 = vadd.f32 %v6903_v59, %v4622_v38  ;;  %v7129_v28 = vpop.f32.mrb[70].mxu1  ;;  %v6905_v26 = vpop.f32.mrb[71].mxu0  ;;  %v4663_v2 = vld [vmem:[#allocation3 + $0x228] sm:$0xff] }
 0x6c5   : > { %7344 = vst [vmem:[#allocation3 + $0xb0] sm:$0xff] %v7216_v56  ;;  %7343 = vst [vmem:[#allocation3 + $0xa8] sm:$0xff] %v7215_v14  ;;  %v7224_v41 = vadd.f32 %v7129_v28, %v4624_v36  ;;  %v7223_v29 = vadd.f32 %v6905_v26, %v4623_v20  ;;  %v7131_v8 = vpop.f32.mrb[71].mxu1  ;;  %v4662_v56 = vld [vmem:[#allocation3 + $0x220] sm:$0xff]  ;;  %v4664_v14 = vld [vmem:[#allocation3 + $0x230] sm:$0xff] }
 0x6c6   : > { %7345 = vst [vmem:[#allocation3 + $0xb8] sm:$0xff] %v7217_v51  ;;  %7350 = vst [vmem:[#allocation3 + $0xe0] sm:$0xff] %v7222_v31  ;;  %v7225_v35 = vadd.f32 %v7131_v8, %v4625_v53  ;;  %v4665_v53 = vld [vmem:[#allocation3 + $0x238] sm:$0xff]  ;;  %v4670_v51 = vld [vmem:[#allocation3 + $0x260] sm:$0xff] }
 0x6c7   : > { %7352 = vst [vmem:[#allocation3 + $0xf0] sm:$0xff] %v7224_v41  ;;  %7351 = vst [vmem:[#allocation3 + $0xe8] sm:$0xff] %v7223_v29  ;;  %v4672_v41 = vld [vmem:[#allocation3 + $0x270] sm:$0xff]  ;;  %v4671_v29 = vld [vmem:[#allocation3 + $0x268] sm:$0xff] }
 0x6c8   : > { %7353 = vst [vmem:[#allocation3 + $0xf8] sm:$0xff] %v7225_v35 }
 0x6c9   : > { %v6909_v55 = vpop.f32.mrb[72].mxu0 }
 0x6ca   : > { %v7230_v9 = vadd.f32 %v6909_v55, %v4630_v45  ;;  %v7135_v62 = vpop.f32.mrb[72].mxu1  ;;  %v6911_v34 = vpop.f32.mrb[73].mxu0 }
 0x6cb   : > { %v7232_v23 = vadd.f32 %v7135_v62, %v4632_v21  ;;  %v7231_v12 = vadd.f32 %v6911_v34, %v4631_v40  ;;  %v7137_v13 = vpop.f32.mrb[73].mxu1  ;;  %v6913_v7 = vpop.f32.mrb[74].mxu0  ;;  %v4673_v40 = vld [vmem:[#allocation3 + $0x278] sm:$0xff] }
 0x6cc   : > { %7358 = vst [vmem:[#allocation3 + $0x120] sm:$0xff] %v7230_v9  ;;  %v7233_v27 = vadd.f32 %v7137_v13, %v4633_v5  ;;  %v7238_v33 = vadd.f32 %v6913_v7, %v4638_v44  ;;  %v7139_v58 = vpop.f32.mrb[74].mxu1  ;;  %v6915_v16 = vpop.f32.mrb[75].mxu0  ;;  %v4679_v13 = vld [vmem:[#allocation3 + $0x2a8] sm:$0xff] }
 0x6cd   : > { %7360 = vst [vmem:[#allocation3 + $0x130] sm:$0xff] %v7232_v23  ;;  %7359 = vst [vmem:[#allocation3 + $0x128] sm:$0xff] %v7231_v12  ;;  %v7240_v63 = vadd.f32 %v7139_v58, %v4640_v52  ;;  %v7239_v39 = vadd.f32 %v6915_v16, %v4639_v30  ;;  %v7141_v37 = vpop.f32.mrb[75].mxu1  ;;  %v4678_v23 = vld [vmem:[#allocation3 + $0x2a0] sm:$0xff]  ;;  %v4680_v12 = vld [vmem:[#allocation3 + $0x2b0] sm:$0xff] }
 0x6ce   : > { %7361 = vst [vmem:[#allocation3 + $0x138] sm:$0xff] %v7233_v27  ;;  %7366 = vst [vmem:[#allocation3 + $0x160] sm:$0xff] %v7238_v33  ;;  %v7241_v50 = vadd.f32 %v7141_v37, %v4641_v18  ;;  %v4681_v18 = vld [vmem:[#allocation3 + $0x2b8] sm:$0xff]  ;;  %v4686_v27 = vld [vmem:[#allocation3 + $0x2e0] sm:$0xff] }
 0x6cf   : > { %7368 = vst [vmem:[#allocation3 + $0x170] sm:$0xff] %v7240_v63  ;;  %7367 = vst [vmem:[#allocation3 + $0x168] sm:$0xff] %v7239_v39  ;;  %v4688_v63 = vld [vmem:[#allocation3 + $0x2f0] sm:$0xff]  ;;  %v4687_v39 = vld [vmem:[#allocation3 + $0x2e8] sm:$0xff] }
 0x6d0   : > { %7369 = vst [vmem:[#allocation3 + $0x178] sm:$0xff] %v7241_v50 }
 0x6d1   : > { %v6919_v6 = vpop.f32.mrb[76].mxu0 }
 0x6d2   : > { %v7246_v24 = vadd.f32 %v6919_v6, %v4646_v57  ;;  %v7145_v3 = vpop.f32.mrb[76].mxu1  ;;  %v6921_v22 = vpop.f32.mrb[77].mxu0 }
 0x6d3   : > { %v7248_v43 = vadd.f32 %v7145_v3, %v4648_v61  ;;  %v7247_v60 = vadd.f32 %v6921_v22, %v4647_v19  ;;  %v7147_v25 = vpop.f32.mrb[77].mxu1  ;;  %v6923_v42 = vpop.f32.mrb[78].mxu0  ;;  %v4689_v19 = vld [vmem:[#allocation3 + $0x2f8] sm:$0xff] }
 0x6d4   : > { %7374 = vst [vmem:[#allocation3 + $0x1a0] sm:$0xff] %v7246_v24  ;;  %v7249_v17 = vadd.f32 %v7147_v25, %v4649_v1  ;;  %v7254_v32 = vadd.f32 %v6923_v42, %v4654_v54  ;;  %v7149_v38 = vpop.f32.mrb[78].mxu1  ;;  %v6925_v10 = vpop.f32.mrb[79].mxu0  ;;  %v4695_v25 = vld [vmem:[#allocation3 + $0x328] sm:$0xff] }
 0x6d5   : > { %7376 = vst [vmem:[#allocation3 + $0x1b0] sm:$0xff] %v7248_v43  ;;  %7375 = vst [vmem:[#allocation3 + $0x1a8] sm:$0xff] %v7247_v60  ;;  %v7256_v11 = vadd.f32 %v7149_v38, %v4656_v49  ;;  %v7255_v47 = vadd.f32 %v6925_v10, %v4655_v46  ;;  %v7151_v36 = vpop.f32.mrb[79].mxu1  ;;  %v4694_v43 = vld [vmem:[#allocation3 + $0x320] sm:$0xff]  ;;  %v4696_v60 = vld [vmem:[#allocation3 + $0x330] sm:$0xff] }
 0x6d6   : > { %7377 = vst [vmem:[#allocation3 + $0x1b8] sm:$0xff] %v7249_v17  ;;  %7382 = vst [vmem:[#allocation3 + $0x1e0] sm:$0xff] %v7254_v32  ;;  %v7257_v20 = vadd.f32 %v7151_v36, %v4657_v4  ;;  %v4697_v4 = vld [vmem:[#allocation3 + $0x338] sm:$0xff]  ;;  %v4702_v17 = vld [vmem:[#allocation3 + $0x360] sm:$0xff] }
 0x6d7   : > { %7384 = vst [vmem:[#allocation3 + $0x1f0] sm:$0xff] %v7256_v11  ;;  %7383 = vst [vmem:[#allocation3 + $0x1e8] sm:$0xff] %v7255_v47  ;;  %v4704_v11 = vld [vmem:[#allocation3 + $0x370] sm:$0xff]  ;;  %v4703_v47 = vld [vmem:[#allocation3 + $0x368] sm:$0xff] }
 0x6d8   : > { %7385 = vst [vmem:[#allocation3 + $0x1f8] sm:$0xff] %v7257_v20 }
 0x6d9   : > { %v6929_v59 = vpop.f32.mrb[80].mxu0 }
 0x6da   : > { %v7262_v31 = vadd.f32 %v6929_v59, %v4662_v56  ;;  %v7155_v28 = vpop.f32.mrb[80].mxu1  ;;  %v6931_v26 = vpop.f32.mrb[81].mxu0 }
 0x6db   : > { %v7264_v8 = vadd.f32 %v7155_v28, %v4664_v14  ;;  %v7263_v35 = vadd.f32 %v6931_v26, %v4663_v2  ;;  %v7157_v45 = vpop.f32.mrb[81].mxu1  ;;  %v6933_v21 = vpop.f32.mrb[82].mxu0  ;;  %v4705_v2 = vld [vmem:[#allocation3 + $0x378] sm:$0xff] }
 0x6dc   : > { %7390 = vst [vmem:[#allocation3 + $0x220] sm:$0xff] %v7262_v31  ;;  %v7265_v55 = vadd.f32 %v7157_v45, %v4665_v53  ;;  %v7270_v5 = vadd.f32 %v6933_v21, %v4670_v51  ;;  %v7159_v44 = vpop.f32.mrb[82].mxu1  ;;  %v6935_v9 = vpop.f32.mrb[83].mxu0  ;;  %v4711_v45 = vld [vmem:[#allocation3 + $0x3a8] sm:$0xff] }
 0x6dd   : > { %7392 = vst [vmem:[#allocation3 + $0x230] sm:$0xff] %v7264_v8  ;;  %7391 = vst [vmem:[#allocation3 + $0x228] sm:$0xff] %v7263_v35  ;;  %v7272_v62 = vadd.f32 %v7159_v44, %v4672_v41  ;;  %v7271_v34 = vadd.f32 %v6935_v9, %v4671_v29  ;;  %v7161_v52 = vpop.f32.mrb[83].mxu1  ;;  %v4710_v8 = vld [vmem:[#allocation3 + $0x3a0] sm:$0xff]  ;;  %v4712_v35 = vld [vmem:[#allocation3 + $0x3b0] sm:$0xff] }
 0x6de   : > { %7393 = vst [vmem:[#allocation3 + $0x238] sm:$0xff] %v7265_v55  ;;  %7398 = vst [vmem:[#allocation3 + $0x260] sm:$0xff] %v7270_v5  ;;  %v7273_v30 = vadd.f32 %v7161_v52, %v4673_v40  ;;  %v4713_v40 = vld [vmem:[#allocation3 + $0x3b8] sm:$0xff]  ;;  %v4718_v55 = vld [vmem:[#allocation3 + $0x3e0] sm:$0xff] }
 0x6df   : > { %7400 = vst [vmem:[#allocation3 + $0x270] sm:$0xff] %v7272_v62  ;;  %7399 = vst [vmem:[#allocation3 + $0x268] sm:$0xff] %v7271_v34  ;;  %v4720_v62 = vld [vmem:[#allocation3 + $0x3f0] sm:$0xff]  ;;  %v4719_v34 = vld [vmem:[#allocation3 + $0x3e8] sm:$0xff] }
 0x6e0   : > { %7401 = vst [vmem:[#allocation3 + $0x278] sm:$0xff] %v7273_v30 }
 0x6e1   : > { %v6939_v7 = vpop.f32.mrb[84].mxu0 }
 0x6e2   : > { %v7278_v33 = vadd.f32 %v6939_v7, %v4678_v23  ;;  %v7165_v58 = vpop.f32.mrb[84].mxu1  ;;  %v6941_v16 = vpop.f32.mrb[85].mxu0 }
 0x6e3   : > { %v7280_v37 = vadd.f32 %v7165_v58, %v4680_v12  ;;  %v7279_v50 = vadd.f32 %v6941_v16, %v4679_v13  ;;  %v7167_v57 = vpop.f32.mrb[85].mxu1  ;;  %v6943_v61 = vpop.f32.mrb[86].mxu0  ;;  %v4721_v13 = vld [vmem:[#allocation3 + $0x3f8] sm:$0xff] }
 0x6e4   : > { %7406 = vst [vmem:[#allocation3 + $0x2a0] sm:$0xff] %v7278_v33  ;;  %v7281_v6 = vadd.f32 %v7167_v57, %v4681_v18  ;;  %v7286_v1 = vadd.f32 %v6943_v61, %v4686_v27  ;;  %v7169_v54 = vpop.f32.mrb[86].mxu1  ;;  %v6945_v24 = vpop.f32.mrb[87].mxu0  ;;  %v7610_v57 = vsub.s32 (!%p8963_p0), 6, %v13001_v15  ;;  %v7470_v61 = vld [vmem:[#allocation3 + $0x80] sm:$0xff] (!%p8963_p0) }
 0x6e5   : > { %7408 = vst [vmem:[#allocation3 + $0x2b0] sm:$0xff] %v7280_v37  ;;  %7407 = vst [vmem:[#allocation3 + $0x2a8] sm:$0xff] %v7279_v50  ;;  %v7288_v3 = vadd.f32 %v7169_v54, %v4688_v63  ;;  %v7287_v22 = vadd.f32 %v6945_v24, %v4687_v39  ;;  %v7171_v49 = vpop.f32.mrb[87].mxu1  ;;  %v7602_v37 = vsub.s32 (!%p8963_p0), 4, %v13001_v15  ;;  %v7606_v50 = vsub.s32 (!%p8963_p0), 5, %v13001_v15  ;;  %v7473_v54 = vld [vmem:[#allocation3 + $0x98] sm:$0xff] (!%p8963_p0) }
 0x6e6   : > { %7409 = vst [vmem:[#allocation3 + $0x2b8] sm:$0xff] %v7281_v6  ;;  %7414 = vst [vmem:[#allocation3 + $0x2e0] sm:$0xff] %v7286_v1  ;;  %v7289_v46 = vadd.f32 %v7171_v49, %v4689_v19  ;;  %v7471_v19 = vld [vmem:[#allocation3 + $0x88] sm:$0xff] (!%p8963_p0)  ;;  %v7472_v6 = vld [vmem:[#allocation3 + $0x90] sm:$0xff] (!%p8963_p0)  ;;  %v7614_v1 = vsub.s32 (!%p8963_p0), 7, %v13001_v15 }
 0x6e7   : > { %7416 = vst [vmem:[#allocation3 + $0x2f0] sm:$0xff] %v7288_v3  ;;  %7415 = vst [vmem:[#allocation3 + $0x2e8] sm:$0xff] %v7287_v22  ;;  %v7474_v24 = vld [vmem:[#allocation3 + $0xa0] sm:$0xff] (!%p8963_p0)  ;;  %v7475_v22 = vld [vmem:[#allocation3 + $0xa8] sm:$0xff] (!%p8963_p0) }
 0x6e8   : > { %7417 = vst [vmem:[#allocation3 + $0x2f8] sm:$0xff] %v7289_v46  ;;  %v7582_v3 = vld [vmem:[#allocation15] sm:$0xff] (!%p8963_p0)  ;;  %v7476_v49 = vld [vmem:[#allocation3 + $0xb0] sm:$0xff] (!%p8963_p0) }
 0x6e9   : > { %v6949_v42 = vpop.f32.mrb[88].mxu0  ;;  %v7477_v46 = vld [vmem:[#allocation3 + $0xb8] sm:$0xff] (!%p8963_p0)  ;;  %v13772_v15 = vrot.slane (!%p8963_p0), %v7582_v3, %v7606_v50 }
 0x6ea   : > { %v7294_v32 = vadd.f32 %v6949_v42, %v4694_v43  ;;  %v7175_v38 = vpop.f32.mrb[88].mxu1  ;;  %v6951_v10 = vpop.f32.mrb[89].mxu0  ;;  %v13759_v43 = vrot.slane (!%p8963_p0), %v7582_v3, %v13004_v48 }
 0x6eb   : > { %v7296_v36 = vadd.f32 %v7175_v38, %v4696_v60  ;;  %v7295_v20 = vadd.f32 %v6951_v10, %v4695_v25  ;;  %v7177_v56 = vpop.f32.mrb[89].mxu1  ;;  %v6953_v14 = vpop.f32.mrb[90].mxu0  ;;  %v13762_v60 = vrot.slane (!%p8963_p0), %v7582_v3, %v13012_v0  ;;  %v14752_v25 = vld [vmem:[#allocation133_spill] sm:$0xff] (!%p8963_p0)  ;;  %v13774_v38 = vrot.slane (!%p8963_p0), %v7582_v3, %v7610_v57 }
 0x6ec   : > { %7422 = vst [vmem:[#allocation3 + $0x320] sm:$0xff] %v7294_v32  ;;  %v7297_v59 = vadd.f32 %v7177_v56, %v4697_v4  ;;  %v7302_v53 = vadd.f32 %v6953_v14, %v4702_v17  ;;  %v7179_v51 = vpop.f32.mrb[90].mxu1  ;;  %v6955_v31 = vpop.f32.mrb[91].mxu0  ;;  %v13765_v42 = vrot.slane (!%p8963_p0), %v7582_v3, %v14752_v25  ;;  %v14753_v4 = vld [vmem:[#allocation134_spill] sm:$0xff] (!%p8963_p0)  ;;  %v13770_v32 = vrot.slane (!%p8963_p0), %v7582_v3, %v7602_v37 }
 0x6ed   : > { %7424 = vst [vmem:[#allocation3 + $0x330] sm:$0xff] %v7296_v36  ;;  %7423 = vst [vmem:[#allocation3 + $0x328] sm:$0xff] %v7295_v20  ;;  %v7304_v28 = vadd.f32 %v7179_v51, %v4704_v11  ;;  %v7303_v26 = vadd.f32 %v6955_v31, %v4703_v47  ;;  %v7181_v41 = vpop.f32.mrb[91].mxu1  ;;  %v13768_v17 = vrot.slane (!%p8963_p0), %v7582_v3, %v14753_v4 }
 0x6ee   : > { %7425 = vst [vmem:[#allocation3 + $0x338] sm:$0xff] %v7297_v59  ;;  %7430 = vst [vmem:[#allocation3 + $0x360] sm:$0xff] %v7302_v53  ;;  %v7305_v29 = vadd.f32 %v7181_v41, %v4705_v2  ;;  %v13776_v10 = vrot.slane (!%p8963_p0), %v7582_v3, %v7614_v1  ;;  %v7640_v11 = vadd.f32 (!%p8963_p0), %v13759_v43, %v7470_v61  ;;  %v7880_v53 = vld [vmem:[#allocation16] sm:$0xff] (!%p8963_p0) }
 0x6ef   : > { %7432 = vst [vmem:[#allocation3 + $0x370] sm:$0xff] %v7304_v28  ;;  %7431 = vst [vmem:[#allocation3 + $0x368] sm:$0xff] %v7303_v26  ;;  %v7641_v47 = vadd.f32 (!%p8963_p0), %v13762_v60, %v7471_v19  ;;  %v7642_v36 = vadd.f32 (!%p8963_p0), %v13765_v42, %v7472_v6  ;;  %v7643_v20 = vadd.f32 (!%p8963_p0), %v13768_v17, %v7473_v54 }
 0x6f0   : > { %7433 = vst [vmem:[#allocation3 + $0x378] sm:$0xff] %v7305_v29  ;;  %v7644_v56 = vadd.f32 (!%p8963_p0), %v13770_v32, %v7474_v24  ;;  %v7645_v14 = vadd.f32 (!%p8963_p0), %v13772_v15, %v7475_v22  ;;  %v7646_v2 = vadd.f32 (!%p8963_p0), %v13774_v38, %v7476_v49  ;;  %v7647_v59 = vadd.f32 (!%p8963_p0), %v13776_v10, %v7477_v46 }
 0x6f1   : > { %v6959_v21 = vpop.f32.mrb[92].mxu0  ;;  %v7768_v51 = vmax.f32 (!%p8963_p0), %v7640_v11, 0.0  ;;  %v7769_v31 = vmax.f32 (!%p8963_p0), %v7641_v47, 0.0  ;;  %v7770_v28 = vmax.f32 (!%p8963_p0), %v7642_v36, 0.0  ;;  %v7771_v26 = vmax.f32 (!%p8963_p0), %v7643_v20, 0.0  ;;  %v7478_v20 = vld [vmem:[#allocation3 + $0xc0] sm:$0xff] (!%p8963_p0) }
 0x6f2   : > { %v7310_v5 = vadd.f32 %v6959_v21, %v4710_v8  ;;  %v7185_v44 = vpop.f32.mrb[92].mxu1  ;;  %v6961_v9 = vpop.f32.mrb[93].mxu0  ;;  %7453 = sbr.rel (%p8963_p0) target bundleno = 2058 (0x80a), region = 96  ;;  %v7772_v41 = vmax.f32 (!%p8963_p0), %v7644_v56, 0.0  ;;  %v7773_v29 = vmax.f32 (!%p8963_p0), %v7645_v14, 0.0  ;;  %v13787_v8 = vrot.slane (!%p8963_p0), %v7880_v53, %v13004_v48  ;;  %v7457_v48 = vld [vmem:[#allocation3 + $0x18] sm:$0xff] (!%p8963_p0) }
 0x6f3   : > { %v7312_v52 = vadd.f32 %v7185_v44, %v4712_v35  ;;  %v7311_v30 = vadd.f32 %v6961_v9, %v4711_v45  ;;  %v7187_v23 = vpop.f32.mrb[93].mxu1  ;;  %v6963_v12 = vpop.f32.mrb[94].mxu0  ;;  %v13790_v35 = vrot.slane (!%p8963_p0), %v7880_v53, %v13012_v0  ;;  %v13793_v45 = vrot.slane (!%p8963_p0), %v7880_v53, %v14752_v25  ;;  %v7479_v56 = vld [vmem:[#allocation3 + $0xc8] sm:$0xff] (!%p8963_p0)  ;;  %v7480_v14 = vld [vmem:[#allocation3 + $0xd0] sm:$0xff] (!%p8963_p0) }
 0x6f4   : > { %7438 = vst [vmem:[#allocation3 + $0x3a0] sm:$0xff] %v7310_v5  ;;  %v7313_v7 = vadd.f32 %v7187_v23, %v4713_v40  ;;  %v7318_v18 = vadd.f32 %v6963_v12, %v4718_v55  ;;  %v7189_v27 = vpop.f32.mrb[94].mxu1  ;;  %v6965_v33 = vpop.f32.mrb[95].mxu0  ;;  %v13796_v21 = vrot.slane (!%p8963_p0), %v7880_v53, %v14753_v4  ;;  %v7454_v40 = vld [vmem:[#allocation3] sm:$0xff] (!%p8963_p0)  ;;  %v7774_v55 = vmax.f32 (!%p8963_p0), %v7646_v2, 0.0 }
 0x6f5   : > { %7440 = vst [vmem:[#allocation3 + $0x3b0] sm:$0xff] %v7312_v52  ;;  %7439 = vst [vmem:[#allocation3 + $0x3a8] sm:$0xff] %v7311_v30  ;;  %v7320_v58 = vadd.f32 %v7189_v27, %v4720_v62  ;;  %v7319_v16 = vadd.f32 %v6965_v33, %v4719_v34  ;;  %v7191_v63 = vpop.f32.mrb[95].mxu1  ;;  %v7775_v5 = vmax.f32 (!%p8963_p0), %v7647_v59, 0.0  ;;  %v13798_v44 = vrot.slane (!%p8963_p0), %v7880_v53, %v7602_v37  ;;  %v7455_v62 = vld [vmem:[#allocation3 + $0x8] sm:$0xff] (!%p8963_p0)  ;;  %v7456_v34 = vld [vmem:[#allocation3 + $0x10] sm:$0xff] (!%p8963_p0) }
 0x6f6   : > { %7441 = vst [vmem:[#allocation3 + $0x3b8] sm:$0xff] %v7313_v7  ;;  %7446 = vst [vmem:[#allocation3 + $0x3e0] sm:$0xff] %v7318_v18  ;;  %v7321_v39 = vadd.f32 %v7191_v63, %v4721_v13  ;;  %v13800_v9 = vrot.slane (!%p8963_p0), %v7880_v53, %v7606_v50  ;;  %v13802_v52 = vrot.slane (!%p8963_p0), %v7880_v53, %v7610_v57  ;;  %v7458_v12 = vld [vmem:[#allocation3 + $0x20] sm:$0xff] (!%p8963_p0)  ;;  %v7459_v13 = vld [vmem:[#allocation3 + $0x28] sm:$0xff] (!%p8963_p0) }
 0x6f7   : > { %7448 = vst [vmem:[#allocation3 + $0x3f0] sm:$0xff] %v7320_v58  ;;  %7447 = vst [vmem:[#allocation3 + $0x3e8] sm:$0xff] %v7319_v16  ;;  %v7938_v0 = vmul.f32 (!%p8963_p0), %v13787_v8, %v7768_v51  ;;  %v7939_v30 = vmul.f32 (!%p8963_p0), %v13790_v35, %v7769_v31  ;;  %v7940_v23 = vmul.f32 (!%p8963_p0), %v13793_v45, %v7770_v28  ;;  %v7460_v7 = vld [vmem:[#allocation3 + $0x30] sm:$0xff] (!%p8963_p0)  ;;  %v7461_v16 = vld [vmem:[#allocation3 + $0x38] sm:$0xff] (!%p8963_p0) }
 0x6f8   : > { %7449 = vst [vmem:[#allocation3 + $0x3f8] sm:$0xff] %v7321_v39  ;;  %v13807_v18 = vrot.slane (!%p8963_p0), %v7880_v53, %v7614_v1  ;;  %v7941_v27 = vmul.f32 (!%p8963_p0), %v13796_v21, %v7771_v26  ;;  %v7942_v33 = vmul.f32 (!%p8963_p0), %v13798_v44, %v7772_v41  ;;  %v7943_v58 = vmul.f32 (!%p8963_p0), %v13800_v9, %v7773_v29  ;;  %v7481_v31 = vld [vmem:[#allocation3 + $0xd8] sm:$0xff] (!%p8963_p0)  ;;  %v7482_v28 = vld [vmem:[#allocation3 + $0xe0] sm:$0xff] (!%p8963_p0)  ;;  %v7483_v26 = vld [vmem:[#allocation3 + $0xe8] sm:$0xff] (!%p8963_p0) }
 0x6f9   : > { %v8068_v63 = vadd.f32 %v7939_v30, %v7938_v0  ;;  %v7624_v39 = vadd.f32 %v13759_v43, %v7454_v40  ;;  %v7625_v37 = vadd.f32 %v13762_v60, %v7455_v62  ;;  %v7626_v50 = vadd.f32 %v13765_v42, %v7456_v34  ;;  %v7485_v62 = vld [vmem:[#allocation3 + $0xf8] sm:$0xff] }
 0x6fa   : > { %v7627_v57 = vadd.f32 %v13768_v17, %v7457_v48  ;;  %v7628_v61 = vadd.f32 %v13770_v32, %v7458_v12  ;;  %v7629_v19 = vadd.f32 %v13772_v15, %v7459_v13  ;;  %v7630_v6 = vadd.f32 %v13774_v38, %v7460_v7 }
 0x6fb   : > { %v8069_v1 = vadd.f32 %v8068_v63, %v7940_v23  ;;  %v7631_v54 = vadd.f32 %v13776_v10, %v7461_v16  ;;  %v7752_v24 = vmax.f32 %v7624_v39, 0.0  ;;  %v7753_v3 = vmax.f32 %v7625_v37, 0.0 }
 0x6fc   : > { %v7754_v22 = vmax.f32 %v7626_v50, 0.0  ;;  %v7755_v49 = vmax.f32 %v7627_v57, 0.0  ;;  %v7756_v46 = vmax.f32 %v7628_v61, 0.0  ;;  %v7757_v25 = vmax.f32 %v7629_v19, 0.0 }
 0x6fd   : > { %v7944_v4 = vmul.f32 %v13802_v52, %v7774_v55  ;;  %v7945_v11 = vmul.f32 %v13807_v18, %v7775_v5  ;;  %v8070_v47 = vadd.f32 %v8069_v1, %v7941_v27  ;;  %v7922_v36 = vmul.f32 %v13787_v8, %v7752_v24  ;;  %v7484_v5 = vld [vmem:[#allocation3 + $0xf0] sm:$0xff] }
 0x6fe   : > { %v7758_v2 = vmax.f32 %v7630_v6, 0.0  ;;  %v7759_v59 = vmax.f32 %v7631_v54, 0.0  ;;  %v7923_v53 = vmul.f32 %v13790_v35, %v7753_v3  ;;  %v7924_v51 = vmul.f32 %v13793_v45, %v7754_v22  ;;  %v7462_v22 = vld [vmem:[#allocation3 + $0x40] sm:$0xff] }
 0x6ff   : > { %v8071_v41 = vadd.f32 %v8070_v47, %v7942_v33  ;;  %v7925_v29 = vmul.f32 %v13796_v21, %v7755_v49  ;;  %v7926_v40 = vmul.f32 %v13798_v44, %v7756_v46  ;;  %v7927_v55 = vmul.f32 %v13800_v9, %v7757_v25  ;;  %v7463_v49 = vld [vmem:[#allocation3 + $0x48] sm:$0xff]  ;;  %v7464_v46 = vld [vmem:[#allocation3 + $0x50] sm:$0xff] }
 0x700   : > { %v8050_v34 = vadd.f32 %v7923_v53, %v7922_v36  ;;  %v7648_v48 = vadd.f32 %v13759_v43, %v7478_v20  ;;  %v7649_v0 = vadd.f32 %v13762_v60, %v7479_v56  ;;  %v7650_v30 = vadd.f32 %v13765_v42, %v7480_v14  ;;  %v7465_v20 = vld [vmem:[#allocation3 + $0x58] sm:$0xff]  ;;  %v7466_v56 = vld [vmem:[#allocation3 + $0x60] sm:$0xff]  ;;  %v7467_v14 = vld [vmem:[#allocation3 + $0x68] sm:$0xff] }
 0x701   : > { %v8072_v23 = vadd.f32 %v8071_v41, %v7943_v58  ;;  %v7651_v12 = vadd.f32 %v13768_v17, %v7481_v31  ;;  %v7652_v13 = vadd.f32 %v13770_v32, %v7482_v28  ;;  %v7653_v7 = vadd.f32 %v13772_v15, %v7483_v26  ;;  %v7469_v31 = vld [vmem:[#allocation3 + $0x78] sm:$0xff] }
 0x702   : > { %v8051_v27 = vadd.f32 %v8050_v34, %v7924_v51  ;;  %v7654_v33 = vadd.f32 %v13774_v38, %v7484_v5  ;;  %v7655_v16 = vadd.f32 %v13776_v10, %v7485_v62  ;;  %v7776_v63 = vmax.f32 %v7648_v48, 0.0  ;;  %v7468_v51 = vld [vmem:[#allocation3 + $0x70] sm:$0xff] }
 0x703   : > { %v8073_v39 = vadd.f32 %v8072_v23, %v7944_v4  ;;  %v7777_v37 = vmax.f32 %v7649_v0, 0.0  ;;  %v7778_v50 = vmax.f32 %v7650_v30, 0.0  ;;  %v7779_v57 = vmax.f32 %v7651_v12, 0.0 }
 0x704   : > { %v7928_v61 = vmul.f32 %v13802_v52, %v7758_v2  ;;  %v8052_v19 = vadd.f32 %v8051_v27, %v7925_v29  ;;  %v7780_v58 = vmax.f32 %v7652_v13, 0.0  ;;  %v7781_v6 = vmax.f32 %v7653_v7, 0.0 }
 0x705   : > { %v8074_v1 = vadd.f32 %v8073_v39, %v7945_v11  ;;  %v7929_v54 = vmul.f32 %v13807_v18, %v7759_v59  ;;  %v7946_v24 = vmul.f32 %v13787_v8, %v7776_v63  ;;  %v7947_v3 = vmul.f32 %v13790_v35, %v7777_v37  ;;  %v7494_v39 = vld [vmem:[#allocation3 + $0x140] sm:$0xff] }
 0x706   : > { %v8053_v25 = vadd.f32 %v8052_v19, %v7926_v40  ;;  %v7782_v4 = vmax.f32 %v7654_v33, 0.0  ;;  %v7783_v47 = vmax.f32 %v7655_v16, 0.0  ;;  %v7948_v36 = vmul.f32 %v13793_v45, %v7778_v50  ;;  %v7495_v19 = vld [vmem:[#allocation3 + $0x148] sm:$0xff] }
 0x707   : > { %8075 = vadd.xlane.f32.xlu1 %v8074_v1  ;;  %v7949_v11 = vmul.f32 %v13796_v21, %v7779_v57  ;;  %v7950_v2 = vmul.f32 %v13798_v44, %v7780_v58  ;;  %v7951_v59 = vmul.f32 %v13800_v9, %v7781_v6  ;;  %v8077_v53 = vadd.f32 %v7947_v3, %v7946_v24  ;;  %v7496_v58 = vld [vmem:[#allocation3 + $0x150] sm:$0xff]  ;;  %v7497_v6 = vld [vmem:[#allocation3 + $0x158] sm:$0xff] }
 0x708   : > { %v8054_v28 = vadd.f32 %v8053_v25, %v7927_v55  ;;  %v7632_v26 = vadd.f32 %v13759_v43, %v7462_v22  ;;  %v7633_v41 = vadd.f32 %v13762_v60, %v7463_v49  ;;  %v7634_v29 = vadd.f32 %v13765_v42, %v7464_v46  ;;  %v7498_v22 = vld [vmem:[#allocation3 + $0x160] sm:$0xff]  ;;  %v7499_v49 = vld [vmem:[#allocation3 + $0x168] sm:$0xff] }
 0x709   : > { %v8078_v40 = vadd.f32 %v8077_v53, %v7948_v36  ;;  %v7635_v5 = vadd.f32 %v13768_v17, %v7465_v20  ;;  %v7636_v62 = vadd.f32 %v13770_v32, %v7466_v56  ;;  %v7637_v34 = vadd.f32 %v13772_v15, %v7467_v14  ;;  %v7500_v36 = vld [vmem:[#allocation3 + $0x170] sm:$0xff]  ;;  %v7501_v20 = vld [vmem:[#allocation3 + $0x178] sm:$0xff] }
 0x70a   : > { %v8055_v48 = vadd.f32 %v8054_v28, %v7928_v61  ;;  %v7638_v0 = vadd.f32 %v13774_v38, %v7468_v51  ;;  %v7639_v30 = vadd.f32 %v13776_v10, %v7469_v31  ;;  %v7760_v23 = vmax.f32 %v7632_v26, 0.0 }
 0x70b   : > { %v8079_v55 = vadd.f32 %v8078_v40, %v7949_v11  ;;  %v7761_v12 = vmax.f32 %v7633_v41, 0.0  ;;  %v7762_v13 = vmax.f32 %v7634_v29, 0.0  ;;  %v7763_v7 = vmax.f32 %v7635_v5, 0.0 }
 0x70c   : > { %v8056_v27 = vadd.f32 %v8055_v48, %v7929_v54  ;;  %v7952_v33 = vmul.f32 %v13802_v52, %v7782_v4  ;;  %v7764_v16 = vmax.f32 %v7636_v62, 0.0  ;;  %v7765_v63 = vmax.f32 %v7637_v34, 0.0 }
 0x70d   : > { %v7953_v37 = vmul.f32 %v13807_v18, %v7783_v47  ;;  %v8080_v50 = vadd.f32 %v8079_v55, %v7950_v2  ;;  %v7930_v57 = vmul.f32 %v13787_v8, %v7760_v23  ;;  %v7931_v61 = vmul.f32 %v13790_v35, %v7761_v12  ;;  %v7486_v55 = vld [vmem:[#allocation3 + $0x100] sm:$0xff]  ;;  %v7487_v12 = vld [vmem:[#allocation3 + $0x108] sm:$0xff] }
 0x70e   : > { %8057 = vadd.xlane.f32.xlu0 %v8056_v27  ;;  %v7766_v1 = vmax.f32 %v7638_v0, 0.0  ;;  %v7767_v24 = vmax.f32 %v7639_v30, 0.0  ;;  %v7932_v54 = vmul.f32 %v13793_v45, %v7762_v13  ;;  %v7933_v3 = vmul.f32 %v13796_v21, %v7763_v7 }
 0x70f   : > { %v8081_v46 = vadd.f32 %v8080_v50, %v7951_v59  ;;  %v7934_v25 = vmul.f32 %v13798_v44, %v7764_v16  ;;  %v7935_v4 = vmul.f32 %v13800_v9, %v7765_v63  ;;  %v8059_v47 = vadd.f32 %v7931_v61, %v7930_v57  ;;  %v7488_v16 = vld [vmem:[#allocation3 + $0x110] sm:$0xff]  ;;  %v7489_v63 = vld [vmem:[#allocation3 + $0x118] sm:$0xff] }
 0x710   : > { %v7664_v56 = vadd.f32 %v13759_v43, %v7494_v39  ;;  %v7665_v14 = vadd.f32 %v13762_v60, %v7495_v19  ;;  %v7666_v11 = vadd.f32 %v13765_v42, %v7496_v58  ;;  %v7667_v2 = vadd.f32 %v13768_v17, %v7497_v6  ;;  %v7490_v39 = vld [vmem:[#allocation3 + $0x120] sm:$0xff]  ;;  %v7491_v19 = vld [vmem:[#allocation3 + $0x128] sm:$0xff]  ;;  %v7492_v58 = vld [vmem:[#allocation3 + $0x130] sm:$0xff] }
 0x711   : > { %v8082_v53 = vadd.f32 %v8081_v46, %v7952_v33  ;;  %v8060_v51 = vadd.f32 %v8059_v47, %v7932_v54  ;;  %v7668_v31 = vadd.f32 %v13770_v32, %v7498_v22  ;;  %v7669_v59 = vadd.f32 %v13772_v15, %v7499_v49  ;;  %v7493_v54 = vld [vmem:[#allocation3 + $0x138] sm:$0xff] }
 0x712   : > { %v7670_v28 = vadd.f32 %v13774_v38, %v7500_v36  ;;  %v7671_v26 = vadd.f32 %v13776_v10, %v7501_v20  ;;  %v7792_v41 = vmax.f32 %v7664_v56, 0.0  ;;  %v7793_v29 = vmax.f32 %v7665_v14, 0.0 }
 0x713   : > { %v8083_v40 = vadd.f32 %v8082_v53, %v7953_v37  ;;  %v8061_v5 = vadd.f32 %v8060_v51, %v7933_v3  ;;  %v7794_v62 = vmax.f32 %v7666_v11, 0.0  ;;  %v7795_v34 = vmax.f32 %v7667_v2, 0.0 }
 0x714   : > { %v7936_v48 = vmul.f32 %v13802_v52, %v7766_v1  ;;  %v7937_v0 = vmul.f32 %v13807_v18, %v7767_v24  ;;  %v7796_v30 = vmax.f32 %v7668_v31, 0.0  ;;  %v7797_v23 = vmax.f32 %v7669_v59, 0.0 }
 0x715   : > { %8084 = vadd.xlane.f32.xlu1 %v8083_v40  ;;  %v8062_v13 = vadd.f32 %v8061_v5, %v7934_v25  ;;  %v7962_v7 = vmul.f32 %v13787_v8, %v7792_v41  ;;  %v7963_v27 = vmul.f32 %v13790_v35, %v7793_v29  ;;  %v7964_v33 = vmul.f32 %v13793_v45, %v7794_v62  ;;  %v7510_v40 = vld [vmem:[#allocation3 + $0x1c0] sm:$0xff]  ;;  %v7511_v5 = vld [vmem:[#allocation3 + $0x1c8] sm:$0xff]  ;;  %v7512_v62 = vld [vmem:[#allocation3 + $0x1d0] sm:$0xff] }
 0x716   : > { %v7798_v37 = vmax.f32 %v7670_v28, 0.0  ;;  %v7799_v50 = vmax.f32 %v7671_v26, 0.0  ;;  %v7965_v57 = vmul.f32 %v13796_v21, %v7795_v34  ;;  %v7966_v61 = vmul.f32 %v13798_v44, %v7796_v30 }
 0x717   : > { %v8063_v6 = vadd.f32 %v8062_v13, %v7935_v4  ;;  %v7967_v1 = vmul.f32 %v13800_v9, %v7797_v23  ;;  %v8095_v24 = vadd.f32 %v7963_v27, %v7962_v7  ;;  %v7656_v3 = vadd.f32 %v13759_v43, %v7486_v55  ;;  %v7513_v23 = vld [vmem:[#allocation3 + $0x1d8] sm:$0xff]  ;;  %v7514_v55 = vld [vmem:[#allocation3 + $0x1e0] sm:$0xff] }
 0x718   : > { %v7657_v22 = vadd.f32 %v13762_v60, %v7487_v12  ;;  %v7658_v49 = vadd.f32 %v13765_v42, %v7488_v16  ;;  %v7659_v46 = vadd.f32 %v13768_v17, %v7489_v63  ;;  %v7660_v25 = vadd.f32 %v13770_v32, %v7490_v39  ;;  %v7515_v12 = vld [vmem:[#allocation3 + $0x1e8] sm:$0xff]  ;;  %v7516_v16 = vld [vmem:[#allocation3 + $0x1f0] sm:$0xff]  ;;  %v7517_v63 = vld [vmem:[#allocation3 + $0x1f8] sm:$0xff] }
 0x719   : > { %v8064_v47 = vadd.f32 %v8063_v6, %v7936_v48  ;;  %v8096_v36 = vadd.f32 %v8095_v24, %v7964_v33  ;;  %v7661_v20 = vadd.f32 %v13772_v15, %v7491_v19  ;;  %v7662_v4 = vadd.f32 %v13774_v38, %v7492_v58 }
 0x71a   : > { %v7663_v56 = vadd.f32 %v13776_v10, %v7493_v54  ;;  %v7784_v14 = vmax.f32 %v7656_v3, 0.0  ;;  %v7785_v11 = vmax.f32 %v7657_v22, 0.0  ;;  %v7786_v2 = vmax.f32 %v7658_v49, 0.0 }
 0x71b   : > { %v8065_v53 = vadd.f32 %v8064_v47, %v7937_v0  ;;  %v8097_v51 = vadd.f32 %v8096_v36, %v7965_v57  ;;  %v7787_v31 = vmax.f32 %v7659_v46, 0.0  ;;  %v7788_v59 = vmax.f32 %v7660_v25, 0.0 }
 0x71c   : > { %v7968_v28 = vmul.f32 %v13802_v52, %v7798_v37  ;;  %v7969_v26 = vmul.f32 %v13807_v18, %v7799_v50  ;;  %v7789_v41 = vmax.f32 %v7661_v20, 0.0  ;;  %v7954_v29 = vmul.f32 %v13787_v8, %v7784_v14 }
 0x71d   : > { %8066 = vadd.xlane.f32.xlu0 %v8065_v53  ;;  %v8098_v34 = vadd.f32 %v8097_v51, %v7966_v61  ;;  %v7790_v48 = vmax.f32 %v7662_v4, 0.0  ;;  %v7955_v30 = vmul.f32 %v13790_v35, %v7785_v11  ;;  %v7956_v0 = vmul.f32 %v13793_v45, %v7786_v2  ;;  %v7502_v53 = vld [vmem:[#allocation3 + $0x180] sm:$0xff]  ;;  %v7503_v51 = vld [vmem:[#allocation3 + $0x188] sm:$0xff] }
 0x71e   : > { %v7791_v13 = vmax.f32 %v7663_v56, 0.0  ;;  %v7957_v7 = vmul.f32 %v13796_v21, %v7787_v31  ;;  %v7958_v27 = vmul.f32 %v13798_v44, %v7788_v59  ;;  %v7959_v33 = vmul.f32 %v13800_v9, %v7789_v41  ;;  %v7504_v31 = vld [vmem:[#allocation3 + $0x190] sm:$0xff] }
 0x71f   : > { %v8099_v39 = vadd.f32 %v8098_v34, %v7967_v1  ;;  %v8086_v37 = vadd.f32 %v7955_v30, %v7954_v29  ;;  %v7680_v50 = vadd.f32 %v13759_v43, %v7510_v40  ;;  %v7681_v57 = vadd.f32 %v13762_v60, %v7511_v5  ;;  %v7505_v29 = vld [vmem:[#allocation3 + $0x198] sm:$0xff]  ;;  %v7506_v40 = vld [vmem:[#allocation3 + $0x1a0] sm:$0xff]  ;;  %v7507_v5 = vld [vmem:[#allocation3 + $0x1a8] sm:$0xff] }
 0x720   : > { %v7682_v61 = vadd.f32 %v13765_v42, %v7512_v62  ;;  %v7683_v19 = vadd.f32 %v13768_v17, %v7513_v23  ;;  %v7684_v58 = vadd.f32 %v13770_v32, %v7514_v55  ;;  %v7685_v6 = vadd.f32 %v13772_v15, %v7515_v12  ;;  %v7509_v23 = vld [vmem:[#allocation3 + $0x1b8] sm:$0xff] }
 0x721   : > { %v8100_v24 = vadd.f32 %v8099_v39, %v7968_v28  ;;  %v8087_v54 = vadd.f32 %v8086_v37, %v7956_v0  ;;  %v7686_v3 = vadd.f32 %v13774_v38, %v7516_v16  ;;  %v7687_v22 = vadd.f32 %v13776_v10, %v7517_v63  ;;  %v7508_v0 = vld [vmem:[#allocation3 + $0x1b0] sm:$0xff] }
 0x722   : > { %v7808_v1 = vmax.f32 %v7680_v50, 0.0  ;;  %v7809_v49 = vmax.f32 %v7681_v57, 0.0  ;;  %v7810_v46 = vmax.f32 %v7682_v61, 0.0  ;;  %v7811_v25 = vmax.f32 %v7683_v19, 0.0 }
 0x723   : > { %v8101_v47 = vadd.f32 %v8100_v24, %v7969_v26  ;;  %v8088_v36 = vadd.f32 %v8087_v54, %v7957_v7  ;;  %v7812_v20 = vmax.f32 %v7684_v58, 0.0  ;;  %v7813_v4 = vmax.f32 %v7685_v6, 0.0 }
 0x724   : > { %v7960_v56 = vmul.f32 %v13802_v52, %v7790_v48  ;;  %v7961_v14 = vmul.f32 %v13807_v18, %v7791_v13  ;;  %v7978_v11 = vmul.f32 %v13787_v8, %v7808_v1  ;;  %v7979_v2 = vmul.f32 %v13790_v35, %v7809_v49  ;;  %v7526_v1 = vld [vmem:[#allocation3 + $0x240] sm:$0xff] }
 0x725   : > { %8102 = vadd.xlane.f32.xlu1 %v8101_v47  ;;  %v8089_v59 = vadd.f32 %v8088_v36, %v7958_v27  ;;  %v7814_v28 = vmax.f32 %v7686_v3, 0.0  ;;  %v7815_v41 = vmax.f32 %v7687_v22, 0.0  ;;  %v7980_v26 = vmul.f32 %v13793_v45, %v7810_v46  ;;  %v7527_v36 = vld [vmem:[#allocation3 + $0x248] sm:$0xff] }
 0x726   : > { %v7981_v62 = vmul.f32 %v13796_v21, %v7811_v25  ;;  %v7982_v34 = vmul.f32 %v13798_v44, %v7812_v20  ;;  %v7983_v48 = vmul.f32 %v13800_v9, %v7813_v4  ;;  %v8113_v30 = vadd.f32 %v7979_v2, %v7978_v11  ;;  %v7528_v20 = vld [vmem:[#allocation3 + $0x250] sm:$0xff]  ;;  %v7529_v4 = vld [vmem:[#allocation3 + $0x258] sm:$0xff] }
 0x727   : > { %v8090_v55 = vadd.f32 %v8089_v59, %v7959_v33  ;;  %v7672_v12 = vadd.f32 %v13759_v43, %v7502_v53  ;;  %v7673_v13 = vadd.f32 %v13762_v60, %v7503_v51  ;;  %v7674_v7 = vadd.f32 %v13765_v42, %v7504_v31  ;;  %v7530_v53 = vld [vmem:[#allocation3 + $0x260] sm:$0xff]  ;;  %v7531_v51 = vld [vmem:[#allocation3 + $0x268] sm:$0xff] }
 0x728   : > { %v8114_v27 = vadd.f32 %v8113_v30, %v7980_v26  ;;  %v7675_v16 = vadd.f32 %v13768_v17, %v7505_v29  ;;  %v7676_v63 = vadd.f32 %v13770_v32, %v7506_v40  ;;  %v7677_v39 = vadd.f32 %v13772_v15, %v7507_v5  ;;  %v7532_v26 = vld [vmem:[#allocation3 + $0x270] sm:$0xff]  ;;  %v7533_v29 = vld [vmem:[#allocation3 + $0x278] sm:$0xff] }
 0x729   : > { %v8091_v37 = vadd.f32 %v8090_v55, %v7960_v56  ;;  %v7678_v50 = vadd.f32 %v13774_v38, %v7508_v0  ;;  %v7679_v57 = vadd.f32 %v13776_v10, %v7509_v23  ;;  %v7800_v61 = vmax.f32 %v7672_v12, 0.0 }
 0x72a   : > { %v8115_v33 = vadd.f32 %v8114_v27, %v7981_v62  ;;  %v7801_v19 = vmax.f32 %v7673_v13, 0.0  ;;  %v7802_v58 = vmax.f32 %v7674_v7, 0.0  ;;  %v7803_v6 = vmax.f32 %v7675_v16, 0.0 }
 0x72b   : > { %v8092_v24 = vadd.f32 %v8091_v37, %v7961_v14  ;;  %v7984_v54 = vmul.f32 %v13802_v52, %v7814_v28  ;;  %v7804_v3 = vmax.f32 %v7676_v63, 0.0  ;;  %v7805_v22 = vmax.f32 %v7677_v39, 0.0 }
 0x72c   : > { %v7985_v49 = vmul.f32 %v13807_v18, %v7815_v41  ;;  %v8116_v46 = vadd.f32 %v8115_v33, %v7982_v34  ;;  %v7970_v25 = vmul.f32 %v13787_v8, %v7800_v61  ;;  %v7971_v47 = vmul.f32 %v13790_v35, %v7801_v19  ;;  %v7518_v33 = vld [vmem:[#allocation3 + $0x200] sm:$0xff]  ;;  %v7519_v19 = vld [vmem:[#allocation3 + $0x208] sm:$0xff] }
 0x72d   : > { %8093 = vadd.xlane.f32.xlu0 %v8092_v24  ;;  %v7806_v56 = vmax.f32 %v7678_v50, 0.0  ;;  %v7807_v11 = vmax.f32 %v7679_v57, 0.0  ;;  %v7972_v14 = vmul.f32 %v13793_v45, %v7802_v58  ;;  %v7973_v2 = vmul.f32 %v13796_v21, %v7803_v6 }
 0x72e   : > { %v8117_v31 = vadd.f32 %v8116_v46, %v7983_v48  ;;  %v7974_v59 = vmul.f32 %v13798_v44, %v7804_v3  ;;  %v7975_v28 = vmul.f32 %v13800_v9, %v7805_v22  ;;  %v8104_v41 = vadd.f32 %v7971_v47, %v7970_v25  ;;  %v7520_v3 = vld [vmem:[#allocation3 + $0x210] sm:$0xff]  ;;  %v7521_v22 = vld [vmem:[#allocation3 + $0x218] sm:$0xff] }
 0x72f   : > { %v7696_v40 = vadd.f32 %v13759_v43, %v7526_v1  ;;  %v7697_v5 = vadd.f32 %v13762_v60, %v7527_v36  ;;  %v7698_v62 = vadd.f32 %v13765_v42, %v7528_v20  ;;  %v7699_v34 = vadd.f32 %v13768_v17, %v7529_v4  ;;  %v7522_v1 = vld [vmem:[#allocation3 + $0x220] sm:$0xff]  ;;  %v7523_v36 = vld [vmem:[#allocation3 + $0x228] sm:$0xff]  ;;  %v7524_v20 = vld [vmem:[#allocation3 + $0x230] sm:$0xff] }
 0x730   : > { %v8118_v30 = vadd.f32 %v8117_v31, %v7984_v54  ;;  %v8105_v0 = vadd.f32 %v8104_v41, %v7972_v14  ;;  %v7700_v23 = vadd.f32 %v13770_v32, %v7530_v53  ;;  %v7701_v48 = vadd.f32 %v13772_v15, %v7531_v51  ;;  %v7525_v14 = vld [vmem:[#allocation3 + $0x238] sm:$0xff] }
 0x731   : > { %v7702_v55 = vadd.f32 %v13774_v38, %v7532_v26  ;;  %v7703_v12 = vadd.f32 %v13776_v10, %v7533_v29  ;;  %v7824_v13 = vmax.f32 %v7696_v40, 0.0  ;;  %v7825_v7 = vmax.f32 %v7697_v5, 0.0 }
 0x732   : > { %v8119_v27 = vadd.f32 %v8118_v30, %v7985_v49  ;;  %v8106_v16 = vadd.f32 %v8105_v0, %v7973_v2  ;;  %v7826_v63 = vmax.f32 %v7698_v62, 0.0  ;;  %v7827_v39 = vmax.f32 %v7699_v34, 0.0 }
 0x733   : > { %v7976_v37 = vmul.f32 %v13802_v52, %v7806_v56  ;;  %v7977_v50 = vmul.f32 %v13807_v18, %v7807_v11  ;;  %v7828_v57 = vmax.f32 %v7700_v23, 0.0  ;;  %v7829_v61 = vmax.f32 %v7701_v48, 0.0 }
 0x734   : > { %8120 = vadd.xlane.f32.xlu1 %v8119_v27  ;;  %v8107_v58 = vadd.f32 %v8106_v16, %v7974_v59  ;;  %v7994_v6 = vmul.f32 %v13787_v8, %v7824_v13  ;;  %v7995_v24 = vmul.f32 %v13790_v35, %v7825_v7  ;;  %v7996_v54 = vmul.f32 %v13793_v45, %v7826_v63  ;;  %v7542_v27 = vld [vmem:[#allocation3 + $0x2c0] sm:$0xff]  ;;  %v7543_v16 = vld [vmem:[#allocation3 + $0x2c8] sm:$0xff]  ;;  %v7544_v63 = vld [vmem:[#allocation3 + $0x2d0] sm:$0xff] }
 0x735   : > { %v7830_v49 = vmax.f32 %v7702_v55, 0.0  ;;  %v7831_v46 = vmax.f32 %v7703_v12, 0.0  ;;  %v7997_v25 = vmul.f32 %v13796_v21, %v7827_v39  ;;  %v7998_v47 = vmul.f32 %v13798_v44, %v7828_v57 }
 0x736   : > { %v8108_v4 = vadd.f32 %v8107_v58, %v7975_v28  ;;  %v7999_v56 = vmul.f32 %v13800_v9, %v7829_v61  ;;  %v8131_v11 = vadd.f32 %v7995_v24, %v7994_v6  ;;  %v7688_v2 = vadd.f32 %v13759_v43, %v7518_v33  ;;  %v7545_v61 = vld [vmem:[#allocation3 + $0x2d8] sm:$0xff]  ;;  %v7546_v33 = vld [vmem:[#allocation3 + $0x2e0] sm:$0xff] }
 0x737   : > { %v7689_v53 = vadd.f32 %v13762_v60, %v7519_v19  ;;  %v7690_v51 = vadd.f32 %v13765_v42, %v7520_v3  ;;  %v7691_v31 = vadd.f32 %v13768_v17, %v7521_v22  ;;  %v7692_v59 = vadd.f32 %v13770_v32, %v7522_v1  ;;  %v7547_v19 = vld [vmem:[#allocation3 + $0x2e8] sm:$0xff]  ;;  %v7548_v3 = vld [vmem:[#allocation3 + $0x2f0] sm:$0xff]  ;;  %v7549_v22 = vld [vmem:[#allocation3 + $0x2f8] sm:$0xff] }
 0x738   : > { %v8109_v41 = vadd.f32 %v8108_v4, %v7976_v37  ;;  %v8132_v26 = vadd.f32 %v8131_v11, %v7996_v54  ;;  %v7693_v29 = vadd.f32 %v13772_v15, %v7523_v36  ;;  %v7694_v28 = vadd.f32 %v13774_v38, %v7524_v20 }
 0x739   : > { %v7695_v40 = vadd.f32 %v13776_v10, %v7525_v14  ;;  %v7816_v5 = vmax.f32 %v7688_v2, 0.0  ;;  %v7817_v62 = vmax.f32 %v7689_v53, 0.0  ;;  %v7818_v34 = vmax.f32 %v7690_v51, 0.0 }
 0x73a   : > { %v8110_v30 = vadd.f32 %v8109_v41, %v7977_v50  ;;  %v8133_v0 = vadd.f32 %v8132_v26, %v7997_v25  ;;  %v7819_v23 = vmax.f32 %v7691_v31, 0.0  ;;  %v7820_v48 = vmax.f32 %v7692_v59, 0.0 }
 0x73b   : > { %v8000_v55 = vmul.f32 %v13802_v52, %v7830_v49  ;;  %v8001_v12 = vmul.f32 %v13807_v18, %v7831_v46  ;;  %v7821_v13 = vmax.f32 %v7693_v29, 0.0  ;;  %v7986_v7 = vmul.f32 %v13787_v8, %v7816_v5 }
 0x73c   : > { %8111 = vadd.xlane.f32.xlu0 %v8110_v30  ;;  %v8134_v39 = vadd.f32 %v8133_v0, %v7998_v47  ;;  %v7822_v37 = vmax.f32 %v7694_v28, 0.0  ;;  %v7987_v57 = vmul.f32 %v13790_v35, %v7817_v62  ;;  %v7988_v50 = vmul.f32 %v13793_v45, %v7818_v34  ;;  %v7534_v30 = vld [vmem:[#allocation3 + $0x280] sm:$0xff]  ;;  %v7535_v0 = vld [vmem:[#allocation3 + $0x288] sm:$0xff] }
 0x73d   : > { %v7823_v58 = vmax.f32 %v7695_v40, 0.0  ;;  %v7989_v6 = vmul.f32 %v13796_v21, %v7819_v23  ;;  %v7990_v24 = vmul.f32 %v13798_v44, %v7820_v48  ;;  %v7991_v54 = vmul.f32 %v13800_v9, %v7821_v13  ;;  %v7536_v23 = vld [vmem:[#allocation3 + $0x290] sm:$0xff] }
 0x73e   : > { %v8135_v1 = vadd.f32 %v8134_v39, %v7999_v56  ;;  %v8122_v49 = vadd.f32 %v7987_v57, %v7986_v7  ;;  %v7712_v46 = vadd.f32 %v13759_v43, %v7542_v27  ;;  %v7713_v25 = vadd.f32 %v13762_v60, %v7543_v16  ;;  %v7537_v7 = vld [vmem:[#allocation3 + $0x298] sm:$0xff]  ;;  %v7538_v27 = vld [vmem:[#allocation3 + $0x2a0] sm:$0xff]  ;;  %v7539_v16 = vld [vmem:[#allocation3 + $0x2a8] sm:$0xff] }
 0x73f   : > { %v7714_v47 = vadd.f32 %v13765_v42, %v7544_v63  ;;  %v7715_v36 = vadd.f32 %v13768_v17, %v7545_v61  ;;  %v7716_v20 = vadd.f32 %v13770_v32, %v7546_v33  ;;  %v7717_v4 = vadd.f32 %v13772_v15, %v7547_v19  ;;  %v7541_v61 = vld [vmem:[#allocation3 + $0x2b8] sm:$0xff] }
 0x740   : > { %v8136_v11 = vadd.f32 %v8135_v1, %v8000_v55  ;;  %v8123_v14 = vadd.f32 %v8122_v49, %v7988_v50  ;;  %v7718_v2 = vadd.f32 %v13774_v38, %v7548_v3  ;;  %v7719_v53 = vadd.f32 %v13776_v10, %v7549_v22  ;;  %v7540_v50 = vld [vmem:[#allocation3 + $0x2b0] sm:$0xff] }
 0x741   : > { %v7840_v56 = vmax.f32 %v7712_v46, 0.0  ;;  %v7841_v51 = vmax.f32 %v7713_v25, 0.0  ;;  %v7842_v31 = vmax.f32 %v7714_v47, 0.0  ;;  %v7843_v59 = vmax.f32 %v7715_v36, 0.0 }
 0x742   : > { %v8137_v41 = vadd.f32 %v8136_v11, %v8001_v12  ;;  %v8124_v26 = vadd.f32 %v8123_v14, %v7989_v6  ;;  %v7844_v29 = vmax.f32 %v7716_v20, 0.0  ;;  %v7845_v28 = vmax.f32 %v7717_v4, 0.0 }
 0x743   : > { %v7992_v40 = vmul.f32 %v13802_v52, %v7822_v37  ;;  %v7993_v5 = vmul.f32 %v13807_v18, %v7823_v58  ;;  %v8010_v62 = vmul.f32 %v13787_v8, %v7840_v56  ;;  %v8011_v34 = vmul.f32 %v13790_v35, %v7841_v51  ;;  %v7558_v56 = vld [vmem:[#allocation3 + $0x340] sm:$0xff] }
 0x744   : > { %8138 = vadd.xlane.f32.xlu1 %v8137_v41  ;;  %v8125_v48 = vadd.f32 %v8124_v26, %v7990_v24  ;;  %v7846_v55 = vmax.f32 %v7718_v2, 0.0  ;;  %v7847_v13 = vmax.f32 %v7719_v53, 0.0  ;;  %v8012_v12 = vmul.f32 %v13793_v45, %v7842_v31  ;;  %v7559_v26 = vld [vmem:[#allocation3 + $0x348] sm:$0xff] }
 0x745   : > { %v8013_v63 = vmul.f32 %v13796_v21, %v7843_v59  ;;  %v8014_v39 = vmul.f32 %v13798_v44, %v7844_v29  ;;  %v8015_v37 = vmul.f32 %v13800_v9, %v7845_v28  ;;  %v8149_v57 = vadd.f32 %v8011_v34, %v8010_v62  ;;  %v7560_v29 = vld [vmem:[#allocation3 + $0x350] sm:$0xff]  ;;  %v7561_v28 = vld [vmem:[#allocation3 + $0x358] sm:$0xff] }
 0x746   : > { %v8126_v33 = vadd.f32 %v8125_v48, %v7991_v54  ;;  %v7704_v19 = vadd.f32 %v13759_v43, %v7534_v30  ;;  %v7705_v58 = vadd.f32 %v13762_v60, %v7535_v0  ;;  %v7706_v6 = vadd.f32 %v13765_v42, %v7536_v23  ;;  %v7562_v30 = vld [vmem:[#allocation3 + $0x360] sm:$0xff]  ;;  %v7563_v0 = vld [vmem:[#allocation3 + $0x368] sm:$0xff] }
 0x747   : > { %v8150_v24 = vadd.f32 %v8149_v57, %v8012_v12  ;;  %v7707_v3 = vadd.f32 %v13768_v17, %v7537_v7  ;;  %v7708_v22 = vadd.f32 %v13770_v32, %v7538_v27  ;;  %v7709_v1 = vadd.f32 %v13772_v15, %v7539_v16  ;;  %v7564_v12 = vld [vmem:[#allocation3 + $0x370] sm:$0xff]  ;;  %v7565_v7 = vld [vmem:[#allocation3 + $0x378] sm:$0xff] }
 0x748   : > { %v8127_v49 = vadd.f32 %v8126_v33, %v7992_v40  ;;  %v7710_v46 = vadd.f32 %v13774_v38, %v7540_v50  ;;  %v7711_v25 = vadd.f32 %v13776_v10, %v7541_v61  ;;  %v7832_v47 = vmax.f32 %v7704_v19, 0.0 }
 0x749   : > { %v8151_v54 = vadd.f32 %v8150_v24, %v8013_v63  ;;  %v7833_v36 = vmax.f32 %v7705_v58, 0.0  ;;  %v7834_v20 = vmax.f32 %v7706_v6, 0.0  ;;  %v7835_v4 = vmax.f32 %v7707_v3, 0.0 }
 0x74a   : > { %v8128_v11 = vadd.f32 %v8127_v49, %v7993_v5  ;;  %v8016_v14 = vmul.f32 %v13802_v52, %v7846_v55  ;;  %v7836_v2 = vmax.f32 %v7708_v22, 0.0  ;;  %v7837_v53 = vmax.f32 %v7709_v1, 0.0 }
 0x74b   : > { %v8017_v51 = vmul.f32 %v13807_v18, %v7847_v13  ;;  %v8152_v31 = vadd.f32 %v8151_v54, %v8014_v39  ;;  %v8002_v59 = vmul.f32 %v13787_v8, %v7832_v47  ;;  %v8003_v41 = vmul.f32 %v13790_v35, %v7833_v36  ;;  %v7550_v54 = vld [vmem:[#allocation3 + $0x300] sm:$0xff]  ;;  %v7551_v36 = vld [vmem:[#allocation3 + $0x308] sm:$0xff] }
 0x74c   : > { %8129 = vadd.xlane.f32.xlu0 %v8128_v11  ;;  %v7838_v40 = vmax.f32 %v7710_v46, 0.0  ;;  %v7839_v62 = vmax.f32 %v7711_v25, 0.0  ;;  %v8004_v5 = vmul.f32 %v13793_v45, %v7834_v20  ;;  %v8005_v34 = vmul.f32 %v13796_v21, %v7835_v4 }
 0x74d   : > { %v8153_v23 = vadd.f32 %v8152_v31, %v8015_v37  ;;  %v8006_v48 = vmul.f32 %v13798_v44, %v7836_v2  ;;  %v8007_v55 = vmul.f32 %v13800_v9, %v7837_v53  ;;  %v8140_v13 = vadd.f32 %v8003_v41, %v8002_v59  ;;  %v7552_v2 = vld [vmem:[#allocation3 + $0x310] sm:$0xff]  ;;  %v7553_v53 = vld [vmem:[#allocation3 + $0x318] sm:$0xff] }
 0x74e   : > { %v7728_v27 = vadd.f32 %v13759_v43, %v7558_v56  ;;  %v7729_v16 = vadd.f32 %v13762_v60, %v7559_v26  ;;  %v7730_v63 = vadd.f32 %v13765_v42, %v7560_v29  ;;  %v7731_v39 = vadd.f32 %v13768_v17, %v7561_v28  ;;  %v7554_v56 = vld [vmem:[#allocation3 + $0x320] sm:$0xff]  ;;  %v7555_v26 = vld [vmem:[#allocation3 + $0x328] sm:$0xff]  ;;  %v7556_v29 = vld [vmem:[#allocation3 + $0x330] sm:$0xff] }
 0x74f   : > { %v8154_v57 = vadd.f32 %v8153_v23, %v8016_v14  ;;  %v8141_v50 = vadd.f32 %v8140_v13, %v8004_v5  ;;  %v7732_v61 = vadd.f32 %v13770_v32, %v7562_v30  ;;  %v7733_v37 = vadd.f32 %v13772_v15, %v7563_v0  ;;  %v7557_v5 = vld [vmem:[#allocation3 + $0x338] sm:$0xff] }
 0x750   : > { %v7734_v33 = vadd.f32 %v13774_v38, %v7564_v12  ;;  %v7735_v19 = vadd.f32 %v13776_v10, %v7565_v7  ;;  %v7856_v58 = vmax.f32 %v7728_v27, 0.0  ;;  %v7857_v6 = vmax.f32 %v7729_v16, 0.0 }
 0x751   : > { %v8155_v24 = vadd.f32 %v8154_v57, %v8017_v51  ;;  %v8142_v3 = vadd.f32 %v8141_v50, %v8005_v34  ;;  %v7858_v22 = vmax.f32 %v7730_v63, 0.0  ;;  %v7859_v1 = vmax.f32 %v7731_v39, 0.0 }
 0x752   : > { %v8008_v49 = vmul.f32 %v13802_v52, %v7838_v40  ;;  %v8009_v46 = vmul.f32 %v13807_v18, %v7839_v62  ;;  %v7860_v25 = vmax.f32 %v7732_v61, 0.0  ;;  %v7861_v47 = vmax.f32 %v7733_v37, 0.0 }
 0x753   : > { %8156 = vadd.xlane.f32.xlu1 %v8155_v24  ;;  %v8143_v20 = vadd.f32 %v8142_v3, %v8006_v48  ;;  %v8026_v4 = vmul.f32 %v13787_v8, %v7856_v58  ;;  %v8027_v11 = vmul.f32 %v13790_v35, %v7857_v6  ;;  %v8028_v14 = vmul.f32 %v13793_v45, %v7858_v22  ;;  %v7574_v6 = vld [vmem:[#allocation3 + $0x3c0] sm:$0xff]  ;;  %v7575_v24 = vld [vmem:[#allocation3 + $0x3c8] sm:$0xff]  ;;  %v7576_v3 = vld [vmem:[#allocation3 + $0x3d0] sm:$0xff] }
 0x754   : > { %v7862_v51 = vmax.f32 %v7734_v33, 0.0  ;;  %v7863_v31 = vmax.f32 %v7735_v19, 0.0  ;;  %v8029_v59 = vmul.f32 %v13796_v21, %v7859_v1  ;;  %v8030_v41 = vmul.f32 %v13798_v44, %v7860_v25 }
 0x755   : > { %v8144_v28 = vadd.f32 %v8143_v20, %v8007_v55  ;;  %v8031_v40 = vmul.f32 %v13800_v9, %v7861_v47  ;;  %v8167_v62 = vadd.f32 %v8027_v11, %v8026_v4  ;;  %v7720_v34 = vadd.f32 %v13759_v43, %v7550_v54  ;;  %v7578_v47 = vld [vmem:[#allocation3 + $0x3e0] sm:$0xff]  ;;  %v7579_v54 = vld [vmem:[#allocation3 + $0x3e8] sm:$0xff] }
 0x756   : > { %v7721_v30 = vadd.f32 %v13762_v60, %v7551_v36  ;;  %v7722_v0 = vadd.f32 %v13765_v42, %v7552_v2  ;;  %v7723_v23 = vadd.f32 %v13768_v17, %v7553_v53  ;;  %v7724_v48 = vadd.f32 %v13770_v32, %v7554_v56  ;;  %v7581_v2 = vld [vmem:[#allocation3 + $0x3f8] sm:$0xff] }
 0x757   : > { %v8145_v13 = vadd.f32 %v8144_v28, %v8008_v49  ;;  %v8168_v12 = vadd.f32 %v8167_v62, %v8028_v14  ;;  %v7725_v7 = vadd.f32 %v13772_v15, %v7555_v26  ;;  %v7726_v55 = vadd.f32 %v13774_v38, %v7556_v29  ;;  %v7580_v14 = vld [vmem:[#allocation3 + $0x3f0] sm:$0xff] }
 0x758   : > { %v7727_v27 = vadd.f32 %v13776_v10, %v7557_v5  ;;  %v7848_v16 = vmax.f32 %v7720_v34, 0.0  ;;  %v7849_v63 = vmax.f32 %v7721_v30, 0.0  ;;  %v7850_v39 = vmax.f32 %v7722_v0, 0.0 }
 0x759   : > { %v8146_v57 = vadd.f32 %v8145_v13, %v8009_v46  ;;  %v8169_v50 = vadd.f32 %v8168_v12, %v8029_v59  ;;  %v7851_v61 = vmax.f32 %v7723_v23, 0.0  ;;  %v7852_v37 = vmax.f32 %v7724_v48, 0.0  ;;  %v7577_v46 = vld [vmem:[#allocation3 + $0x3d8] sm:$0xff] }
 0x75a   : > { %v8032_v33 = vmul.f32 %v13802_v52, %v7862_v51  ;;  %v8033_v19 = vmul.f32 %v13807_v18, %v7863_v31  ;;  %v8018_v58 = vmul.f32 %v13787_v8, %v7848_v16  ;;  %v7853_v1 = vmax.f32 %v7725_v7, 0.0 }
 0x75b   : > { %8147 = vadd.xlane.f32.xlu0 %v8146_v57  ;;  %v8170_v22 = vadd.f32 %v8169_v50, %v8030_v41  ;;  %v8019_v49 = vmul.f32 %v13790_v35, %v7849_v63  ;;  %v8020_v25 = vmul.f32 %v13793_v45, %v7850_v39  ;;  %v7854_v36 = vmax.f32 %v7726_v55, 0.0  ;;  %v7566_v63 = vld [vmem:[#allocation3 + $0x380] sm:$0xff]  ;;  %v7567_v39 = vld [vmem:[#allocation3 + $0x388] sm:$0xff]  ;;  %v7568_v57 = vld [vmem:[#allocation3 + $0x390] sm:$0xff] }
 0x75c   : > { %v7855_v20 = vmax.f32 %v7727_v27, 0.0  ;;  %v8021_v4 = vmul.f32 %v13796_v21, %v7851_v61  ;;  %v8022_v11 = vmul.f32 %v13798_v44, %v7852_v37  ;;  %v7744_v51 = vadd.f32 %v13759_v43, %v7574_v6 }
 0x75d   : > { %v8171_v53 = vadd.f32 %v8170_v22, %v8031_v40  ;;  %v8158_v56 = vadd.f32 %v8019_v49, %v8018_v58  ;;  %v7745_v31 = vadd.f32 %v13762_v60, %v7575_v24  ;;  %v7746_v59 = vadd.f32 %v13765_v42, %v7576_v3  ;;  %v7570_v58 = vld [vmem:[#allocation3 + $0x3a0] sm:$0xff] }
 0x75e   : > { %v7747_v41 = vadd.f32 %v13768_v17, %v7577_v46  ;;  %v7748_v26 = vadd.f32 %v13770_v32, %v7578_v47  ;;  %v7749_v29 = vadd.f32 %v13772_v15, %v7579_v54  ;;  %v7750_v5 = vadd.f32 %v13774_v38, %v7580_v14 }
 0x75f   : > { %v8172_v28 = vadd.f32 %v8171_v53, %v8032_v33  ;;  %v8159_v62 = vadd.f32 %v8158_v56, %v8020_v25  ;;  %v7751_v34 = vadd.f32 %v13776_v10, %v7581_v2  ;;  %v7872_v40 = vmax.f32 %v7744_v51, 0.0 }
 0x760   : > { %v7873_v30 = vmax.f32 %v7745_v31, 0.0  ;;  %v7874_v0 = vmax.f32 %v7746_v59, 0.0  ;;  %v7875_v23 = vmax.f32 %v7747_v41, 0.0  ;;  %v8023_v13 = vmul.f32 %v13800_v9, %v7853_v1  ;;  %v7571_v1 = vld [vmem:[#allocation3 + $0x3a8] sm:$0xff] }
 0x761   : > { %v8173_v48 = vadd.f32 %v8172_v28, %v8033_v19  ;;  %v8160_v12 = vadd.f32 %v8159_v62, %v8021_v4  ;;  %v8024_v7 = vmul.f32 %v13802_v52, %v7854_v36  ;;  %v7876_v55 = vmax.f32 %v7748_v26, 0.0  ;;  %v7569_v19 = vld [vmem:[#allocation3 + $0x398] sm:$0xff] }
 0x762   : > { %v8042_v27 = vmul.f32 %v13787_v8, %v7872_v40  ;;  %v8043_v16 = vmul.f32 %v13790_v35, %v7873_v30  ;;  %v8025_v50 = vmul.f32 %v13807_v18, %v7855_v20  ;;  %v7877_v37 = vmax.f32 %v7749_v29, 0.0  ;;  %v7572_v20 = vld [vmem:[#allocation3 + $0x3b0] sm:$0xff] }
 0x763   : > { %8174 = vadd.xlane.f32.xlu1 %v8173_v48  ;;  %v8161_v61 = vadd.f32 %v8160_v12, %v8022_v11  ;;  %v8044_v33 = vmul.f32 %v13793_v45, %v7874_v0  ;;  %v7878_v6 = vmax.f32 %v7750_v5, 0.0  ;;  %v7879_v24 = vmax.f32 %v7751_v34, 0.0 }
 0x764   : > { %v8045_v3 = vmul.f32 %v13796_v21, %v7875_v23  ;;  %v8185_v22 = vadd.f32 %v8043_v16, %v8042_v27  ;;  %v7736_v25 = vadd.f32 %v13759_v43, %v7566_v63  ;;  %v7737_v46 = vadd.f32 %v13762_v60, %v7567_v39  ;;  %v7573_v43 = vld [vmem:[#allocation3 + $0x3b8] sm:$0xff] }
 0x765   : > { %v8162_v49 = vadd.f32 %v8161_v61, %v8023_v13  ;;  %v7738_v47 = vadd.f32 %v13765_v42, %v7568_v57  ;;  %v8046_v54 = vmul.f32 %v13798_v44, %v7876_v55  ;;  %v7739_v4 = vadd.f32 %v13768_v17, %v7569_v19 }
 0x766   : > { %v8186_v36 = vadd.f32 %v8185_v22, %v8044_v33  ;;  %v7740_v11 = vadd.f32 %v13770_v32, %v7570_v58  ;;  %v8047_v2 = vmul.f32 %v13800_v9, %v7877_v37  ;;  %v7741_v53 = vadd.f32 %v13772_v15, %v7571_v1 }
 0x767   : > { %v8163_v14 = vadd.f32 %v8162_v49, %v8024_v7  ;;  %v7864_v56 = vmax.f32 %v7736_v25, 0.0  ;;  %v7865_v31 = vmax.f32 %v7737_v46, 0.0  ;;  %v7866_v60 = vmax.f32 %v7738_v47, 0.0 }
 0x768   : > { %v8187_v51 = vadd.f32 %v8186_v36, %v8045_v3  ;;  %v7867_v59 = vmax.f32 %v7739_v4, 0.0  ;;  %v8048_v41 = vmul.f32 %v13802_v52, %v7878_v6  ;;  %v7742_v26 = vadd.f32 %v13774_v38, %v7572_v20 }
 0x769   : > { %v8164_v42 = vadd.f32 %v8163_v14, %v8025_v50  ;;  %v7868_v17 = vmax.f32 %v7740_v11, 0.0  ;;  %v8034_v32 = vmul.f32 %v13787_v8, %v7864_v56  ;;  %v8035_v28 = vmul.f32 %v13790_v35, %v7865_v31 }
 0x76a   : > { %v8188_v29 = vadd.f32 %v8187_v51, %v8046_v54  ;;  %v8049_v15 = vmul.f32 %v13807_v18, %v7879_v24  ;;  %v7743_v62 = vadd.f32 %v13776_v10, %v7573_v43  ;;  %v8036_v5 = vmul.f32 %v13793_v45, %v7866_v60 }
 0x76b   : > { %8165 = vadd.xlane.f32.xlu0 %v8164_v42  ;;  %v7869_v40 = vmax.f32 %v7741_v53, 0.0  ;;  %v8037_v30 = vmul.f32 %v13796_v21, %v7867_v59  ;;  %v8176_v0 = vadd.f32 %v8035_v28, %v8034_v32  ;;  %v7870_v38 = vmax.f32 %v7742_v26, 0.0 }
 0x76c   : > { %v8189_v34 = vadd.f32 %v8188_v29, %v8047_v2  ;;  %v8038_v48 = vmul.f32 %v13798_v44, %v7868_v17  ;;  %v7871_v35 = vmax.f32 %v7743_v62, 0.0  ;;  %v8964_v44 = vld [vmem:[#allocation4] ss:$0 sm:$0xff] }
 0x76d   : > { %v8177_v13 = vadd.f32 %v8176_v0, %v8036_v5  ;;  %v8039_v12 = vmul.f32 %v13800_v9, %v7869_v40  ;;  %v8040_v10 = vmul.f32 %v13802_v52, %v7870_v38 }
 0x76e   : > { %v8190_v23 = vadd.f32 %v8189_v34, %v8048_v41  ;;  %v8041_v21 = vmul.f32 %v13807_v18, %v7871_v35 }
 0x76f   : > { %v8178_v7 = vadd.f32 %v8177_v13, %v8037_v30 }
 0x770   : > { %v8191_v8 = vadd.f32 %v8190_v23, %v8049_v15 }
 0x771   : > { %v8179_v45 = vadd.f32 %v8178_v7, %v8038_v48 }
 0x772   : > { %8192 = vadd.xlane.f32.xlu1 %v8191_v8 }
 0x773   : > { %v8180_v55 = vadd.f32 %v8179_v45, %v8039_v12 }
 0x775   : > { %v8181_v27 = vadd.f32 %v8180_v55, %v8040_v10 }
 0x777   : > { %v8182_v16 = vadd.f32 %v8181_v27, %v8041_v21 }
 0x779   : > { %8183 = vadd.xlane.f32.xlu0 %v8182_v16 }
 0x794   : > { %v8076_v63 = vpop.xlane.xlu1 %8075 }
 0x795   : > { %v8203_v39 = vadd.f32 %v8964_v44, %v8076_v63 }
 0x797   : > { %8220 = vst.msk [vmem:[%s10760_s26 + $0x10] sm:$0xff] %vm8217_vm0, %v8203_v39 }
 0x79b   : > { %v8058_v9 = vpop.xlane.xlu0 %8057 }
 0x79c   : > { %v8201_v57 = vadd.f32 %v8964_v44, %v8058_v9 }
 0x79e   : > { %8218 = vst.msk [vmem:[%s10760_s26] sm:$0xff] %vm8217_vm0, %v8201_v57 }
 0x7a2   : > { %v8085_v52 = vpop.xlane.xlu1 %8084 }
 0x7a3   : > { %v8204_v18 = vadd.f32 %v8964_v44, %v8085_v52 }
 0x7a5   : > { %8221 = vst.msk [vmem:[%s10760_s26 + $0x18] sm:$0xff] %vm8217_vm0, %v8204_v18 }
 0x7aa   : > { %v8067_v50 = vpop.xlane.xlu0 %8066 }
 0x7ab   : > { %v8202_v61 = vadd.f32 %v8964_v44, %v8067_v50 }
 0x7ad   : > { %8219 = vst.msk [vmem:[%s10760_s26 + $0x8] sm:$0xff] %vm8217_vm0, %v8202_v61 }
 0x7b2   : > { %v8103_v37 = vpop.xlane.xlu1 %8102 }
 0x7b3   : > { %v8206_v33 = vadd.f32 %v8964_v44, %v8103_v37 }
 0x7b5   : > { %8223 = vst.msk [vmem:[%s10760_s26 + $0x28] sm:$0xff] %vm8217_vm0, %v8206_v33 }
 0x7ba   : > { %v8094_v19 = vpop.xlane.xlu0 %8093 }
 0x7bb   : > { %v8205_v58 = vadd.f32 %v8964_v44, %v8094_v19 }
 0x7bd   : > { %8222 = vst.msk [vmem:[%s10760_s26 + $0x20] sm:$0xff] %vm8217_vm0, %v8205_v58 }
 0x7c1   : > { %v8121_v6 = vpop.xlane.xlu1 %8120 }
 0x7c2   : > { %v8208_v24 = vadd.f32 %v8964_v44, %v8121_v6 }
 0x7c4   : > { %8225 = vst.msk [vmem:[%s10760_s26 + $0x38] sm:$0xff] %vm8217_vm0, %v8208_v24 }
 0x7c9   : > { %v8112_v3 = vpop.xlane.xlu0 %8111 }
 0x7ca   : > { %v8207_v22 = vadd.f32 %v8964_v44, %v8112_v3 }
 0x7cc   : > { %8224 = vst.msk [vmem:[%s10760_s26 + $0x30] sm:$0xff] %vm8217_vm0, %v8207_v22 }
 0x7d1   : > { %v8139_v1 = vpop.xlane.xlu1 %8138 }
 0x7d2   : > { %v8210_v49 = vadd.f32 %v8964_v44, %v8139_v1 }
 0x7d4   : > { %8227 = vst.msk [vmem:[%s10760_s26 + $0x48] sm:$0xff] %vm8217_vm0, %v8210_v49 }
 0x7d9   : > { %v8130_v25 = vpop.xlane.xlu0 %8129 }
 0x7da   : > { %v8209_v46 = vadd.f32 %v8964_v44, %v8130_v25 }
 0x7dc   : > { %8226 = vst.msk [vmem:[%s10760_s26 + $0x40] sm:$0xff] %vm8217_vm0, %v8209_v46 }
 0x7e0   : > { %v8157_v47 = vpop.xlane.xlu1 %8156 }
 0x7e1   : > { %v8212_v54 = vadd.f32 %v8964_v44, %v8157_v47 }
 0x7e3   : > { %8229 = vst.msk [vmem:[%s10760_s26 + $0x58] sm:$0xff] %vm8217_vm0, %v8212_v54 }
 0x7e8   : > { %v8148_v36 = vpop.xlane.xlu0 %8147 }
 0x7e9   : > { %v8211_v20 = vadd.f32 %v8964_v44, %v8148_v36 }
 0x7eb   : > { %8228 = vst.msk [vmem:[%s10760_s26 + $0x50] sm:$0xff] %vm8217_vm0, %v8211_v20 }
 0x7f0   : > { %v8175_v4 = vpop.xlane.xlu1 %8174 }
 0x7f1   : > { %v8214_v11 = vadd.f32 %v8964_v44, %v8175_v4 }
 0x7f3   : > { %8231 = vst.msk [vmem:[%s10760_s26 + $0x68] sm:$0xff] %vm8217_vm0, %v8214_v11 }
 0x7f8   : > { %v8166_v14 = vpop.xlane.xlu0 %8165 }
 0x7f9   : > { %v8213_v2 = vadd.f32 %v8964_v44, %v8166_v14 }
 0x7fb   : > { %8230 = vst.msk [vmem:[%s10760_s26 + $0x60] sm:$0xff] %vm8217_vm0, %v8213_v2 }
 0x7ff   : > { %v8193_v53 = vpop.xlane.xlu1 %8192 }
 0x800   : > { %v8216_v56 = vadd.f32 %v8964_v44, %v8193_v53 }
 0x802   : > { %8233 = vst.msk [vmem:[%s10760_s26 + $0x78] sm:$0xff] %vm8217_vm0, %v8216_v56 }
 0x806   : > { %v8184_v51 = vpop.xlane.xlu0 %8183 }
 0x807   : > { %v8215_v43 = vadd.f32 %v8964_v44, %v8184_v51 }
 0x809   : > { %8232 = vst.msk [vmem:[%s10760_s26 + $0x70] sm:$0xff] %vm8217_vm0, %v8215_v43 }
 0x80a PF: > { %s32_s20 = sadd.s32 1, %s10273_s20   ;;  %s14754_s11 = sld [smem:[#allocation24_spill]] }
 0x80b   : > { %p29_p3 = scmp.ge.s32.totalorder %s32_s20, 10   ;;  %s14755_s12 = smov %s10241_s13 }
 0x80c   : > { %s14756_s13 = smov %s10599_s4  ;;  %s14757_s14 = smov %s10249_s15 }
 0x80d   : > { %s14758_s15 = smov %s10253_s8  ;;  %s14759_s8 = smov %s10606_s28 }
 0x80e   : > { %s14760_s16 = smov %s10265_s18  ;;  %s14761_s17 = smov %s10269_s19 }
 0x80f   : > { %s14762_s18 = smov %s14765_s25  ;;  %s14763_s19 = smov %s14769_s29 }
 0x810   :  { %31 = sbr.rel (!%p29_p3) target bundleno = 21 (0x15), region = 157 }
 0x817   :  { %8256 = vsyncpa [#allocation6], 1 }
 0x818   :  { %8258 = vsyncpa [#allocation6 + $0x1], 1 }
 0x819   :  { %8259 = vsyncpa [#allocation8], 1 }
 0x81a   :  { %8260 = vsyncpa [#allocation11], 1 }
 0x81b   :  { %8262 = vsyncpa [#allocation11 + $0x1], 1 }
 0x81c   :  { %8263 = vsyncpa [#allocation14], 1 }
 0x81d   :  { %8265 = vsyncpa [#allocation14 + $0x1], 1 }
 0x81e   :  { %8266 = vsyncpa [#allocation17], 1 }

</bundles_post_ra>
